<compile_context>
chip_gen: v6e
topology: v6e:2x2x1
jax: 0.10.0
libtpu: 0.0.40
codegen_flags: <defaults>
</compile_context>

<pallas_src>
import jax
import jax.numpy as jnp
from jax.experimental import pallas as pl
from jax.experimental.pallas import tpu as pltpu


IN_DIM = 256      # ProductionAutoencoder.TARGET_SIZE
HIDDEN = 2048


def _round_up(x, m):
    return ((x + m - 1) // m) * m


def _evaluator_fused_kernel(x_ref, w1_ref, b1_ref, w2_ref, b2_ref,
                            w3_ref, b3_ref, w4_ref, b4_ref,
                            o_ref, h1_ref, acc_ref):
    """Fused forward over a (nb batch-tiles) x (nt feature-tiles) grid.

    For each batch tile b (outer, "parallel"), feature step j (inner):
      j == 0    : layer 1 (256 -> 2048) into VMEM scratch h1
      every j   : layer-2 tile j   h2_j = relu(h1 @ W2[:, jT] + b2[jT])
                  layer-3 partial  acc (=/+=) h2_j @ W3[jT, :]
      j == last : layer-3 bias + ReLU, then the 2048 -> 1 head as a VPU
                  multiply + lane reduction; write the (tb, 1) output block.
    """
    j = pl.program_id(1)
    nt = pl.num_programs(1)

    @pl.when(j == 0)
    def _():
        y1 = jnp.dot(x_ref[...], w1_ref[...],
                     preferred_element_type=jnp.float32)
        h1_ref[...] = jnp.maximum(y1 + b1_ref[...], 0.0).astype(h1_ref.dtype)

    # Layer 2, output tile j (full-K dot, no reduction grid axis).
    y2 = jnp.dot(h1_ref[...], w2_ref[0],
                 preferred_element_type=jnp.float32)
    h2_j = jnp.maximum(y2 + b2_ref[...], 0.0).astype(jnp.bfloat16)

    # Layer 3, contribution of K-block j (no zero-fill: assign on j==0).
    y3_j = jnp.dot(h2_j, w3_ref[...], preferred_element_type=jnp.float32)

    @pl.when(j == 0)
    def _():
        acc_ref[...] = y3_j

    @pl.when(j > 0)
    def _():
        acc_ref[...] += y3_j

    @pl.when(j == nt - 1)
    def _():
        h3 = jnp.maximum(acc_ref[...] + b3_ref[...], 0.0)   # (tb, HIDDEN) f32
        w4 = w4_ref[...].astype(jnp.float32)                 # (1, HIDDEN)
        out = jnp.sum(h3 * w4, axis=-1, keepdims=True) + b4_ref[...]
        o_ref[...] = out.astype(o_ref.dtype)


def evaluator_forward_pallas(boards_tensor, prepared, *, tb=256):
    """Fused Evaluator forward: (B, 256) f32 -> (B, 1) f32."""
    w1, b1, w2t, b2, w3, b3, w4, b4 = prepared
    nt, k2, tn = w2t.shape
    B, k0 = boards_tensor.shape
    assert k0 == IN_DIM and k2 == HIDDEN and nt * tn == HIDDEN
    assert tn % 128 == 0

    # Batch tiling: pad B to a multiple of the (8-aligned) batch tile.
    tb_eff = min(tb, _round_up(B, 8))
    Bp = _round_up(B, tb_eff)
    nb = Bp // tb_eff

    xb = boards_tensor.astype(jnp.bfloat16)     # tiny (B, 256) cast
    if Bp != B:
        xb = jnp.pad(xb, ((0, Bp - B), (0, 0)))

    out = pl.pallas_call(
        _evaluator_fused_kernel,
        out_shape=jax.ShapeDtypeStruct((Bp, 1), jnp.float32),
        grid_spec=pltpu.PrefetchScalarGridSpec(
            num_scalar_prefetch=0,
            grid=(nb, nt),                                     # feature axis innermost
            in_specs=[
                pl.BlockSpec((tb_eff, IN_DIM), lambda b, j: (b, 0)),   # x batch tile
                pl.BlockSpec((IN_DIM, HIDDEN), lambda b, j: (0, 0)),   # W1 (resident)
                pl.BlockSpec((1, HIDDEN), lambda b, j: (0, 0)),        # b1
                pl.BlockSpec((1, HIDDEN, tn), lambda b, j: (j, 0, 0)),  # W2 tile (contig.)
                pl.BlockSpec((1, tn), lambda b, j: (0, j)),            # b2 tile
                pl.BlockSpec((tn, HIDDEN), lambda b, j: (j, 0)),       # W3 K-tile
                pl.BlockSpec((1, HIDDEN), lambda b, j: (0, 0)),        # b3
                pl.BlockSpec((1, HIDDEN), lambda b, j: (0, 0)),        # w4 row
                pl.BlockSpec((1, 1), lambda b, j: (0, 0)),             # b4
            ],
            out_specs=pl.BlockSpec((tb_eff, 1), lambda b, j: (b, 0)),
            scratch_shapes=[
                pltpu.VMEM((tb_eff, HIDDEN), jnp.bfloat16),   # h1 (layer-1 output)
                pltpu.VMEM((tb_eff, HIDDEN), jnp.float32),    # layer-3 accumulator
            ],
        ),
        compiler_params=pltpu.CompilerParams(
            dimension_semantics=("parallel", "arbitrary"),
            vmem_limit_bytes=48 * 1024 * 1024,
        ),
    )(xb, w1, b1, w2t, b2, w3, b3, w4, b4)

    return out[:B] if Bp != B else out


evaluator_forward = jax.jit(evaluator_forward_pallas, static_argnames=("tb",))


def init_evaluator_params(key):
    """Deterministic synthetic parameters matching Evaluator's layer shapes."""
    dims = [(IN_DIM, HIDDEN), (HIDDEN, HIDDEN), (HIDDEN, HIDDEN), (HIDDEN, 1)]
    params = []
    for i, (fan_in, fan_out) in enumerate(dims):
        kw, kb = jax.random.split(jax.random.fold_in(key, i))
        bound = 1.0 / jnp.sqrt(jnp.float32(fan_in))
        # stored as (in, out): transpose of PyTorch's (out, in) Linear weight
        w = jax.random.uniform(kw, (fan_in, fan_out), jnp.float32, -bound, bound)
        b = jax.random.uniform(kb, (fan_out,), jnp.float32, -bound, bound)
        params.append((w, b))
    return params


def prepare_evaluator_params(params, *, tn=512):
    """One-time prep: bf16 weights, W2 pre-tiled into contiguous (HIDDEN, tn)
    slabs, (1, N) f32 biases.  Use tn=1024 on v7x for fewer grid steps."""
    assert HIDDEN % tn == 0 and tn % 128 == 0
    nt = HIDDEN // tn
    (w1, b1), (w2, b2), (w3, b3), (w4, b4) = params
    # (HIDDEN, HIDDEN) -> (nt, HIDDEN, tn): tile j == W2[:, j*tn:(j+1)*tn],
    # stored contiguously so each weight-tile DMA is one dense slab.
    w2t = jnp.transpose(w2.astype(jnp.bfloat16).reshape(HIDDEN, nt, tn),
                        (1, 0, 2))
    return (
        w1.astype(jnp.bfloat16), b1.reshape(1, -1),
        w2t, b2.reshape(1, -1),
        w3.astype(jnp.bfloat16), b3.reshape(1, -1),
        w4.reshape(1, -1).astype(jnp.bfloat16),   # head weights as a row vector
        b4.reshape(1, 1),
    )


def evaluator_forward_ref(boards_tensor, params):
    """Pure-JAX reference mirroring the kernel's bf16-weight numerics.
    (Accuracy vs. the true f32 PyTorch model should be validated separately.)"""
    (w1, b1), (w2, b2), (w3, b3), (w4, b4) = params
    bf16, f32 = jnp.bfloat16, jnp.float32
    h = jnp.dot(boards_tensor.astype(bf16), w1.astype(bf16),
                preferred_element_type=f32) + b1
    h = jnp.maximum(h, 0.0)
    h = jnp.dot(h.astype(bf16), w2.astype(bf16),
                preferred_element_type=f32) + b2
    h = jnp.maximum(h, 0.0)
    h = jnp.dot(h.astype(bf16), w3.astype(bf16),
                preferred_element_type=f32) + b3
    h = jnp.maximum(h, 0.0)
    w4r = w4.astype(bf16).astype(f32).reshape(1, -1)
    return jnp.sum(h * w4r, axis=-1, keepdims=True) + b4


if __name__ == "__main__":
    key = jax.random.PRNGKey(0)
    k_in, k_params, k_in2 = jax.random.split(key, 3)

    params = init_evaluator_params(k_params)
    prepared = prepare_evaluator_params(params, tn=512)   # bf16 cast + W2 pre-tiling, ONCE

    # Small batch (single-position-style use); exercises tb collapsing to 8.
    B_small = 8
    x_small = jax.random.normal(k_in, (B_small, IN_DIM), jnp.float32)
    out_small = jax.block_until_ready(evaluator_forward(x_small, prepared))
    assert out_small.shape == (B_small, 1), out_small.shape
    ref_small = evaluator_forward_ref(x_small, params)
    assert jnp.allclose(out_small, ref_small, rtol=2e-3, atol=2e-3), (
        float(jnp.max(jnp.abs(out_small - ref_small))))

    # Larger non-multiple-of-tile batch: exercises the batch-tiled "parallel"
    # grid axis plus padding/slicing (the review's main amortization lever).
    B_big = 300
    x_big = jax.random.normal(k_in2, (B_big, IN_DIM), jnp.float32)
    out_big = jax.block_until_ready(evaluator_forward(x_big, prepared))
    assert out_big.shape == (B_big, 1), out_big.shape
    ref_big = evaluator_forward_ref(x_big, params)
    assert jnp.allclose(out_big, ref_big, rtol=5e-3, atol=5e-3), (
        float(jnp.max(jnp.abs(out_big - ref_big))))

    print("KERNEL_OK")
</pallas_src>

<mosaic_0001>
module attributes {stable_mosaic.version = 11 : i64} {
  func.func @_evaluator_fused_kernel(%arg0: i32, %arg1: i32, %arg2: memref<8x256xbf16, #tpu.memory_space<vmem>>, %arg3: memref<256x2048xbf16, #tpu.memory_space<vmem>>, %arg4: memref<1x2048xf32, #tpu.memory_space<vmem>>, %arg5: memref<1x2048x512xbf16, #tpu.memory_space<vmem>>, %arg6: memref<1x512xf32, #tpu.memory_space<vmem>>, %arg7: memref<512x2048xbf16, #tpu.memory_space<vmem>>, %arg8: memref<1x2048xf32, #tpu.memory_space<vmem>>, %arg9: memref<1x2048xbf16, #tpu.memory_space<vmem>>, %arg10: memref<1x1xf32, #tpu.memory_space<vmem>>, %arg11: memref<8x1xf32, #tpu.memory_space<vmem>>, %arg12: memref<8x2048xbf16, #tpu.memory_space<vmem>>, %arg13: memref<8x2048xf32, #tpu.memory_space<vmem>>) attributes {dimension_semantics = [#tpu.dimension_semantics<parallel>, #tpu.dimension_semantics<arbitrary>], iteration_bounds = array<i64: 1, 4>, scalar_prefetch = 0 : i64, scratch_operands = 2 : i64, tpu.core_type = #tpu.core_type<tc>, window_params = [{transform_indices = @transform_0, window_bounds = array<i64: 8, 256>}, {pipeline_mode = #tpu.pipeline_mode<synchronous>, transform_indices = @transform_1, window_bounds = array<i64: 256, 2048>}, {pipeline_mode = #tpu.pipeline_mode<synchronous>, transform_indices = @transform_2, window_bounds = array<i64: 1, 2048>}, {transform_indices = @transform_3, window_bounds = array<i64: 1, 2048, 512>}, {transform_indices = @transform_4, window_bounds = array<i64: 1, 512>}, {transform_indices = @transform_5, window_bounds = array<i64: 512, 2048>}, {pipeline_mode = #tpu.pipeline_mode<synchronous>, transform_indices = @transform_6, window_bounds = array<i64: 1, 2048>}, {pipeline_mode = #tpu.pipeline_mode<synchronous>, transform_indices = @transform_7, window_bounds = array<i64: 1, 2048>}, {pipeline_mode = #tpu.pipeline_mode<synchronous>, transform_indices = @transform_8, window_bounds = array<i64: 1, 1>}, {transform_indices = @transform_9, window_bounds = array<i64: 8, 1>}]} {
    %c0_i32 = arith.constant 0 : i32
    %0 = arith.cmpi eq, %arg1, %c0_i32 : i32
    %1 = arith.extui %0 : i1 to i32
    %c0_i32_0 = arith.constant 0 : i32
    %2 = arith.cmpi ne, %1, %c0_i32_0 : i32
    scf.if %2 {
      %c0_16 = arith.constant 0 : index
      %c0_17 = arith.constant 0 : index
      %24 = vector.load %arg2[%c0_16, %c0_17] : memref<8x256xbf16, #tpu.memory_space<vmem>>, vector<8x256xbf16>
      %c0_18 = arith.constant 0 : index
      %c0_19 = arith.constant 0 : index
      %25 = vector.load %arg3[%c0_18, %c0_19] : memref<256x2048xbf16, #tpu.memory_space<vmem>>, vector<256x2048xbf16>
      %cst_20 = arith.constant dense<0.000000e+00> : vector<8x2048xf32>
      %26 = tpu.matmul %24, %25, %cst_20 {dimension_numbers = #tpu.dot_dimension_numbers<[1], [0], [0], [1], [0, 0, 1, 1], [], []>} : vector<8x256xbf16>, vector<256x2048xbf16>, vector<8x2048xf32> -> vector<8x2048xf32>
      %c0_21 = arith.constant 0 : index
      %c0_22 = arith.constant 0 : index
      %27 = vector.load %arg4[%c0_21, %c0_22] : memref<1x2048xf32, #tpu.memory_space<vmem>>, vector<1x2048xf32>
      %28 = vector.broadcast %27 : vector<1x2048xf32> to vector<8x2048xf32>
      %29 = arith.addf %26, %28 : vector<8x2048xf32>
      %cst_23 = arith.constant 0.000000e+00 : f32
      %30 = vector.broadcast %cst_23 : f32 to vector<8x2048xf32>
      %31 = arith.maximumf %29, %30 : vector<8x2048xf32>
      %32 = arith.truncf %31 : vector<8x2048xf32> to vector<8x2048xbf16>
      %c0_24 = arith.constant 0 : index
      %c0_25 = arith.constant 0 : index
      %33 = vector.load %arg12[%c0_24, %c0_25] : memref<8x2048xbf16, #tpu.memory_space<vmem>>, vector<8x2048xbf16>
      tpu.vector_store %arg12[%c0_24, %c0_25], %32 {strides = array<i32>} : memref<8x2048xbf16, #tpu.memory_space<vmem>>, vector<8x2048xbf16>,
    } else {
    }
    %c0 = arith.constant 0 : index
    %c0_1 = arith.constant 0 : index
    %3 = vector.load %arg12[%c0, %c0_1] : memref<8x2048xbf16, #tpu.memory_space<vmem>>, vector<8x2048xbf16>
    %c0_2 = arith.constant 0 : index
    %c0_3 = arith.constant 0 : index
    %c0_4 = arith.constant 0 : index
    %4 = vector.load %arg5[%c0_2, %c0_3, %c0_4] : memref<1x2048x512xbf16, #tpu.memory_space<vmem>>, vector<1x2048x512xbf16>
    %5 = vector.shape_cast %4 : vector<1x2048x512xbf16> to vector<2048x512xbf16>
    %cst = arith.constant dense<0.000000e+00> : vector<8x512xf32>
    %6 = tpu.matmul %3, %5, %cst {dimension_numbers = #tpu.dot_dimension_numbers<[1], [0], [0], [1], [0, 0, 1, 1], [], []>} : vector<8x2048xbf16>, vector<2048x512xbf16>, vector<8x512xf32> -> vector<8x512xf32>
    %c0_5 = arith.constant 0 : index
    %c0_6 = arith.constant 0 : index
    %7 = vector.load %arg6[%c0_5, %c0_6] : memref<1x512xf32, #tpu.memory_space<vmem>>, vector<1x512xf32>
    %8 = vector.broadcast %7 : vector<1x512xf32> to vector<8x512xf32>
    %9 = arith.addf %6, %8 : vector<8x512xf32>
    %cst_7 = arith.constant 0.000000e+00 : f32
    %10 = vector.broadcast %cst_7 : f32 to vector<8x512xf32>
    %11 = arith.maximumf %9, %10 : vector<8x512xf32>
    %12 = arith.truncf %11 : vector<8x512xf32> to vector<8x512xbf16>
    %c0_8 = arith.constant 0 : index
    %c0_9 = arith.constant 0 : index
    %13 = vector.load %arg7[%c0_8, %c0_9] : memref<512x2048xbf16, #tpu.memory_space<vmem>>, vector<512x2048xbf16>
    %cst_10 = arith.constant dense<0.000000e+00> : vector<8x2048xf32>
    %14 = tpu.matmul %12, %13, %cst_10 {dimension_numbers = #tpu.dot_dimension_numbers<[1], [0], [0], [1], [0, 0, 1, 1], [], []>} : vector<8x512xbf16>, vector<512x2048xbf16>, vector<8x2048xf32> -> vector<8x2048xf32>
    %c0_i32_11 = arith.constant 0 : i32
    %15 = arith.cmpi eq, %arg1, %c0_i32_11 : i32
    %16 = arith.extui %15 : i1 to i32
    %c0_i32_12 = arith.constant 0 : i32
    %17 = arith.cmpi ne, %16, %c0_i32_12 : i32
    scf.if %17 {
      %c0_16 = arith.constant 0 : index
      %c0_17 = arith.constant 0 : index
      %24 = vector.load %arg13[%c0_16, %c0_17] : memref<8x2048xf32, #tpu.memory_space<vmem>>, vector<8x2048xf32>
      tpu.vector_store %arg13[%c0_16, %c0_17], %14 {strides = array<i32>} : memref<8x2048xf32, #tpu.memory_space<vmem>>, vector<8x2048xf32>,
    } else {
    }
    %c0_i32_13 = arith.constant 0 : i32
    %18 = arith.cmpi sgt, %arg1, %c0_i32_13 : i32
    %19 = arith.extui %18 : i1 to i32
    %c0_i32_14 = arith.constant 0 : i32
    %20 = arith.cmpi ne, %19, %c0_i32_14 : i32
    scf.if %20 {
      %c0_16 = arith.constant 0 : index
      %c0_17 = arith.constant 0 : index
      %24 = vector.load %arg13[%c0_16, %c0_17] : memref<8x2048xf32, #tpu.memory_space<vmem>>, vector<8x2048xf32>
      %25 = arith.addf %24, %14 : vector<8x2048xf32>
      %c0_18 = arith.constant 0 : index
      %c0_19 = arith.constant 0 : index
      %26 = vector.load %arg13[%c0_18, %c0_19] : memref<8x2048xf32, #tpu.memory_space<vmem>>, vector<8x2048xf32>
      tpu.vector_store %arg13[%c0_18, %c0_19], %25 {strides = array<i32>} : memref<8x2048xf32, #tpu.memory_space<vmem>>, vector<8x2048xf32>,
    } else {
    }
    %c3_i32 = arith.constant 3 : i32
    %21 = arith.cmpi eq, %arg1, %c3_i32 : i32
    %22 = arith.extui %21 : i1 to i32
    %c0_i32_15 = arith.constant 0 : i32
    %23 = arith.cmpi ne, %22, %c0_i32_15 : i32
    scf.if %23 {
      %c0_16 = arith.constant 0 : index
      %c0_17 = arith.constant 0 : index
      %24 = vector.load %arg13[%c0_16, %c0_17] : memref<8x2048xf32, #tpu.memory_space<vmem>>, vector<8x2048xf32>
      %c0_18 = arith.constant 0 : index
      %c0_19 = arith.constant 0 : index
      %25 = vector.load %arg8[%c0_18, %c0_19] : memref<1x2048xf32, #tpu.memory_space<vmem>>, vector<1x2048xf32>
      %26 = vector.broadcast %25 : vector<1x2048xf32> to vector<8x2048xf32>
      %27 = arith.addf %24, %26 : vector<8x2048xf32>
      %cst_20 = arith.constant 0.000000e+00 : f32
      %28 = vector.broadcast %cst_20 : f32 to vector<8x2048xf32>
      %29 = arith.maximumf %27, %28 : vector<8x2048xf32>
      %c0_21 = arith.constant 0 : index
      %c0_22 = arith.constant 0 : index
      %30 = vector.load %arg9[%c0_21, %c0_22] : memref<1x2048xbf16, #tpu.memory_space<vmem>>, vector<1x2048xbf16>
      %31 = arith.extf %30 : vector<1x2048xbf16> to vector<1x2048xf32>
      %32 = vector.broadcast %31 : vector<1x2048xf32> to vector<8x2048xf32>
      %33 = arith.mulf %29, %32 : vector<8x2048xf32>
      %cst_23 = arith.constant dense<0.000000e+00> : vector<8xf32>
      %34 = vector.multi_reduction <add>, %33, %cst_23 [1] : vector<8x2048xf32> to vector<8xf32>
      %35 = vector.shape_cast %34 : vector<8xf32> to vector<8x1xf32>
      %c0_24 = arith.constant 0 : index
      %c0_25 = arith.constant 0 : index
      %36 = vector.load %arg10[%c0_24, %c0_25] : memref<1x1xf32, #tpu.memory_space<vmem>>, vector<1x1xf32>
      %37 = vector.broadcast %36 : vector<1x1xf32> to vector<8x1xf32>
      %38 = arith.addf %35, %37 : vector<8x1xf32>
      %c0_26 = arith.constant 0 : index
      %c0_27 = arith.constant 0 : index
      %39 = vector.load %arg11[%c0_26, %c0_27] : memref<8x1xf32, #tpu.memory_space<vmem>>, vector<8x1xf32>
      tpu.vector_store %arg11[%c0_26, %c0_27], %38 {strides = array<i32>} : memref<8x1xf32, #tpu.memory_space<vmem>>, vector<8x1xf32>,
    } else {
    }
    return
  }
  func.func @transform_0(%arg0: i32, %arg1: i32) -> (i32, i32) {
    %c0_i32 = arith.constant 0 : i32
    %c0_i32_0 = arith.constant 0 : i32
    return %arg0, %c0_i32 : i32, i32
  }
  func.func @transform_1(%arg0: i32, %arg1: i32) -> (i32, i32) {
    %c0_i32 = arith.constant 0 : i32
    %c0_i32_0 = arith.constant 0 : i32
    %c0_i32_1 = arith.constant 0 : i32
    return %c0_i32, %c0_i32_0 : i32, i32
  }
  func.func @transform_2(%arg0: i32, %arg1: i32) -> (i32, i32) {
    %c0_i32 = arith.constant 0 : i32
    %c0_i32_0 = arith.constant 0 : i32
    %c0_i32_1 = arith.constant 0 : i32
    return %c0_i32, %c0_i32_0 : i32, i32
  }
  func.func @transform_3(%arg0: i32, %arg1: i32) -> (i32, i32, i32) {
    %c0_i32 = arith.constant 0 : i32
    %c0_i32_0 = arith.constant 0 : i32
    %c0_i32_1 = arith.constant 0 : i32
    return %arg1, %c0_i32, %c0_i32_0 : i32, i32, i32
  }
  func.func @transform_4(%arg0: i32, %arg1: i32) -> (i32, i32) {
    %c0_i32 = arith.constant 0 : i32
    %c0_i32_0 = arith.constant 0 : i32
    return %c0_i32, %arg1 : i32, i32
  }
  func.func @transform_5(%arg0: i32, %arg1: i32) -> (i32, i32) {
    %c0_i32 = arith.constant 0 : i32
    %c0_i32_0 = arith.constant 0 : i32
    return %arg1, %c0_i32 : i32, i32
  }
  func.func @transform_6(%arg0: i32, %arg1: i32) -> (i32, i32) {
    %c0_i32 = arith.constant 0 : i32
    %c0_i32_0 = arith.constant 0 : i32
    %c0_i32_1 = arith.constant 0 : i32
    return %c0_i32, %c0_i32_0 : i32, i32
  }
  func.func @transform_7(%arg0: i32, %arg1: i32) -> (i32, i32) {
    %c0_i32 = arith.constant 0 : i32
    %c0_i32_0 = arith.constant 0 : i32
    %c0_i32_1 = arith.constant 0 : i32
    return %c0_i32, %c0_i32_0 : i32, i32
  }
  func.func @transform_8(%arg0: i32, %arg1: i32) -> (i32, i32) {
    %c0_i32 = arith.constant 0 : i32
    %c0_i32_0 = arith.constant 0 : i32
    %c0_i32_1 = arith.constant 0 : i32
    return %c0_i32, %c0_i32_0 : i32, i32
  }
  func.func @transform_9(%arg0: i32, %arg1: i32) -> (i32, i32) {
    %c0_i32 = arith.constant 0 : i32
    %c0_i32_0 = arith.constant 0 : i32
    return %arg0, %c0_i32 : i32, i32
  }
}

</mosaic_0001>

<bundles_post_ra>
// kernel: evaluator_forward_pallas.1
= control target key start
LH: loop header
LB: loop body
LE: loop exit
PB: predicated region body
PF: predicated region fallthrough
CT: control target
= control target key end

     0   :  { %s14922_s0 = inlined_call_operand.vmem [shape: bf16[8,256], index: 0, kind: input, shape index: {}]   ;;  %s14923_s1 = inlined_call_operand.hbm [shape: bf16[256,2048], index: 1, kind: input, shape index: {}]   ;;  %s14924_s2 = inlined_call_operand.hbm [shape: f32[1,2048], index: 2, kind: input, shape index: {}]   ;;  %s14925_s3 = inlined_call_operand.hbm [shape: bf16[4,2048,512], index: 3, kind: input, shape index: {}]   ;;  %s14926_s4 = inlined_call_operand.hbm [shape: f32[1,2048], index: 4, kind: input, shape index: {}]   ;;  %s14927_s5 = inlined_call_operand.hbm [shape: bf16[2048,2048], index: 5, kind: input, shape index: {}]   ;;  %s14928_s6 = inlined_call_operand.hbm [shape: f32[1,2048], index: 6, kind: input, shape index: {}]   ;;  %s14929_s7 = inlined_call_operand.hbm [shape: bf16[1,2048], index: 7, kind: input, shape index: {}]   ;;  %s14930_s8 = inlined_call_operand.<no memory space> [shape: f32[1,1], index: 8, kind: input, shape index: {}]   ;;  %s14931_s9 = inlined_call_operand.vmem [shape: f32[8,1], index: 9, kind: output, shape index: {}]  }
   0x1   :  { %14946 = sst [smem:[#allocation23_spill]] %s14923_s1  ;;  %v14_v0 = vstv %s14930_s8 }
   0x2   :  { %14947 = sst [smem:[#allocation24_spill]] %s14925_s3  ;;  %15 = vst [vmem:[#allocation4] sm:$0x1] %v14_v0 }
   0x3   :  { %16 = vsyncpa [#allocation6], 0 }
   0x4   :  { %17 = vsyncpa [#allocation8], 0 }
   0x5   :  { %18 = vsyncpa [#allocation14], 0  ;;  %s13244_s11 = smov 0   ;;  %s13246_s12 = smov 0  }
   0x6   :  { %s13248_s13 = smov 0   ;;  %s13250_s14 = smov 0  }
   0x7   :  { %s13252_s15 = smov 0   ;;  %s13254_s16 = smov 0  }
   0x8 LB: > { %14948 = sst [smem:[#allocation20_spill]] %s13166_s13  ;;  %s14932_s8 = sadd.s32 4294967295, %s13178_s16   ;;  %s13178_s16 = sphi %s13254_s16, %s24_s16   ;;  %s13174_s15 = sphi %s13252_s15, %s14974_s15   ;;  %s13170_s14 = sphi %s13250_s14, %s14973_s14   ;;  %s13166_s13 = sphi %s13248_s13, %s14969_s13   ;;  %s13162_s12 = sphi %s13246_s12, %s14972_s12   ;;  %s13158_s11 = sphi %s13244_s11, %s14971_s11  }
   0x9   : > { %p124_p0 = scmp.ne.s32.totalorder %s13162_s12, %s13158_s11  ;;  %p13276_p1 = scmp.eq.s32.totalorder %s14932_s8, 0 }
   0xa   : > { %p10676_p2 = scmp.ge.s32.totalorder %s13178_s16, 1  ;;  %p276_p3 = scmp.lt.s32.totalorder %s13178_s16, 5 }
   0xb   : > { %s14949_s17 = scalar_select %p13276_p1, 1, 0 }
   0xc   : > { %p13284_p4 = por %p13276_p1, %p124_p0  ;;  %p13288_p5 = pnand %p10676_p2, %p276_p3 }
   0xd   : > { %s13180_s20 = smov [#allocation5]   ;;  %s33_s23 = sadd.s32 1, %s13174_s15 }
   0xe   : > { %s14950_s18 = scalar_select %p13284_p4, 1, 0 }
   0xf   : > { %s14951_s19 = scalar_select %p13288_p5, 1, 0 }
  0x10   : > { %s296_s21 = sshll.u32 %s13180_s20, 4  ;;  %p12049_p6 = pneg %p13288_p5  ;;  %s297_s21 = int_to_ptr.vmem [resolvable:$true] %s296_s21 }
  0x11   : > { %s12935_s24 = scalar_lea.vmem %s297_s21, 32768  ;;  %p12943_p12 = scmp.lt.s32.totalorder %s297_s21, %s297_s21 }
  0x12   : > { %p13296_p7 = pnand %p12049_p6, %p13276_p1  ;;  %p12936_p9 = scmp.ne.s32.totalorder %s297_s21, %s12935_s24 }
  0x13   : > { %p12944_p13 = scmp.lt.s32.totalorder %s12935_s24, %s12935_s24 }
  0x14   : > { %p12926_p8 = pneg %p13296_p7 }
  0x15   : > { %p12945_p0 = por %p12944_p13, %p12943_p12 }
  0x16   : > { %p12938_p10 = pnand %p12936_p9, %p12926_p8 }
  0x18   : > { %p12939_p11 = pneg %p12938_p10 }
  0x1a   : > { %p12946_p2 = pnand %p12945_p0, %p12939_p11 }
  0x1c   : > { %12949 = shalt.err (!%p12946_p2)
}
  0x1d   : > { %s14933_s25 = smov 1024   ;;  %s14934_s26 = smov 64  }
  0x1e   : > { %s14953_s1 = sld [smem:[#allocation23_spill]]  ;;  %p34_p3 = scmp.ge.s32.totalorder %s33_s23, 4 }
  0x1f   : > { %s111_s29 = sadd.s32 1, %s13166_s13  ;;  %p118_p6 = scmp.ne.s32.totalorder %s13166_s13, %s13162_s12 }
  0x20   : > { %p119_p9 = scmp.eq.s32.totalorder %s13178_s16, 0  ;;  %s14976_s23 = smov (%p34_p3, %s33_s23), 0 }
  0x21   : > { %14954 = sst [smem:[#allocation21_spill]] %s14976_s23  ;;  %p12076_p11 = scmp.lt.s32.totalorder %s13178_s16, 4 }
  0x22   : > { %p120_p10 = por %p119_p9, %p118_p6  ;;  %s108_s30 = ssub.s32 %s13174_s15, %s14976_s23 }
  0x23   : > { %s346_s10 = sand.u32 1, %s13178_s16   ;;  %p109_p12 = scmp.eq.s32.totalorder %s108_s30, 0 }
  0x24   : > { %12052 = dma.hbm_to_vmem [thread:$0]  (!%p13296_p7), %s14953_s1, 32768, %s297_s21, [#allocation6], %s14933_s25, %s14933_s25, %s14934_s26  }
  0x25   : > { %s14935_s11 = sand.u32 1, %s13166_s13   ;;  %s14936_s20 = sshll.u32 %s13174_s15, 16 }
  0x26   : > { %s13327_s24 = scalar_select %p109_p12, %s13166_s13, %s111_s29  }
  0x27   : > { %s13331_s27 = sshll.u32 %s14935_s11, 12  ;;  %s14956_s3 = sld [smem:[#allocation24_spill]] }
  0x28   : > { %14955 = sst [smem:[#allocation22_spill]] %s13327_s24  ;;  %p13338_p13 = pnand %p12076_p11, %p120_p10 }
  0x29   : > { %s350_s30 = scalar_lea.vmem [#allocation9], %s13331_s27  ;;  %s13343_s29 = scalar_lea.sflag [#allocation6], %s346_s10 }
  0x2a   : > { %s14957_s25 = scalar_select %p13338_p13, 1, 0 }
  0x2b   : > { %s357_s26 = sshll.u32 %s350_s30, 4  ;;  %p14939_p0 = pneg %p13338_p13  ;;  %s358_s26 = int_to_ptr.vmem [resolvable:$true] %s357_s26 }
  0x2c   : > { %s12963_s11 = scalar_lea.vmem %s358_s26, 65536  ;;  %s13183_s21 = smov [#allocation9]  }
  0x2d   : > { %s356_s8 = scalar_lea.hbm %s14956_s3, %s14936_s20  ;;  %p12964_p2 = scmp.ne.s32.totalorder %s358_s26, %s12963_s11 }
  0x2e   : > { %s12968_s28 = sshll.u32 %s13183_s21, 4  ;;  %s12969_s28 = int_to_ptr.vmem [resolvable:$false] %s12968_s28 }
  0x2f   : > { %p12966_p3 = pnand %p12964_p2, %p14939_p0  ;;  %s12970_s20 = scalar_lea.vmem %s12969_s28, 131072 }
  0x30   : > { %p12971_p9 = scmp.lt.s32.totalorder %s358_s26, %s12969_s28  ;;  %p12972_p10 = scmp.lt.s32.totalorder %s12970_s20, %s12963_s11 }
  0x31   : > { %p12967_p6 = pneg %p12966_p3 }
  0x32   : > { %p12973_p11 = por %p12972_p10, %p12971_p9 }
  0x34   : > { %p12974_p12 = pnand %p12973_p11, %p12967_p6 }
  0x36   : > { %12977 = shalt.err (!%p12974_p12)
}
  0x37   : > { %s13184_s30 = smov 256   ;;  %s13185_s10 = smov 16  }
  0x38   : > { %12065 = dma.hbm_to_vmem [thread:$0]  (!%p13338_p13), %s356_s8, 65536, %s358_s26, %s13343_s29, %s13184_s30, %s13184_s30, %s13185_s10  }
  0x39   : > { %s13186_s1 = smov [#allocation7]   ;;  %s14958_s23 = sand.u32 1, %s13166_s13  }
  0x3a   : > { %s310_s3 = sshll.u32 %s13186_s1, 4  ;;  %s10686_s24 = sshll.u32 %s14958_s23, 2  ;;  %s311_s3 = int_to_ptr.vmem [resolvable:$true] %s310_s3 }
  0x3b   : > { %s12989_s21 = scalar_lea.vmem %s311_s3, 256  ;;  %p12997_p9 = scmp.lt.s32.totalorder %s311_s3, %s311_s3 }
  0x3c   : > { %p12990_p2 = scmp.ne.s32.totalorder %s311_s3, %s12989_s21  ;;  %p12998_p10 = scmp.lt.s32.totalorder %s12989_s21, %s12989_s21 }
  0x3e   : > { %p12992_p3 = pnand %p12990_p2, %p12926_p8  ;;  %p12999_p11 = por %p12998_p10, %p12997_p9 }
  0x40   : > { %p12993_p6 = pneg %p12992_p3 }
  0x42   : > { %p13000_p12 = pnand %p12999_p11, %p12993_p6 }
  0x44   : > { %13003 = shalt.err (!%p13000_p12)
}
  0x45   : > { %12055 = dma.hbm_to_vmem [thread:$0]  (!%p13296_p7), %s14924_s2, 256, %s311_s3, [#allocation8]  }
  0x46   : > { %s12016_s1 = sshll.u32 %s13174_s15, 6  ;;  %s371_s23 = scalar_lea.vmem [#allocation10], %s10686_s24 }
  0x47   : > { %s379_s26 = sshll.u32 %s371_s23, 4  ;;  %s377_s30 = scalar_lea.hbm %s14926_s4, %s12016_s1  ;;  %s380_s26 = int_to_ptr.vmem [resolvable:$true] %s379_s26 }
  0x48   : > { %s13017_s10 = scalar_lea.vmem %s380_s26, 64  ;;  %s13187_s21 = smov [#allocation10]  }
  0x49   : > { %p13018_p2 = scmp.ne.s32.totalorder %s380_s26, %s13017_s10  ;;  %s13022_s13 = sshll.u32 %s13187_s21, 4  ;;  %s13023_s13 = int_to_ptr.vmem [resolvable:$false] %s13022_s13 }
  0x4a   : > { %s13024_s11 = scalar_lea.vmem %s13023_s13, 128  ;;  %p13025_p9 = scmp.lt.s32.totalorder %s380_s26, %s13023_s13 }
  0x4b   : > { %p13020_p3 = pnand %p13018_p2, %p14939_p0  ;;  %p13026_p10 = scmp.lt.s32.totalorder %s13024_s11, %s13017_s10 }
  0x4d   : > { %p13021_p6 = pneg %p13020_p3  ;;  %p13027_p11 = por %p13026_p10, %p13025_p9 }
  0x4f   : > { %p13028_p12 = pnand %p13027_p11, %p13021_p6 }
  0x51   : > { %13031 = shalt.err (!%p13028_p12)
}
  0x52   : > { %12068 = dma.hbm_to_vmem [thread:$0]  (!%p13338_p13), %s377_s30, 64, %s380_s26, %s13343_s29  }
  0x53   : > { %s13188_s3 = smov [#allocation12]   ;;  %s13189_s8 = smov [#allocation13]  }
  0x54   : > { %s321_s24 = sshll.u32 %s13188_s3, 4  ;;  %s332_s1 = sshll.u32 %s13189_s8, 4  ;;  %s322_s24 = int_to_ptr.vmem [resolvable:$true] %s321_s24  ;;  %s333_s1 = int_to_ptr.vmem [resolvable:$true] %s332_s1 }
  0x55   : > { %s13043_s23 = scalar_lea.vmem %s322_s24, 256  ;;  %p13051_p9 = scmp.lt.s32.totalorder %s322_s24, %s322_s24 }
  0x56   : > { %p13044_p2 = scmp.ne.s32.totalorder %s322_s24, %s13043_s23  ;;  %p13052_p6 = scmp.lt.s32.totalorder %s13043_s23, %s13043_s23 }
  0x58   : > { %p13046_p3 = pnand %p13044_p2, %p12926_p8  ;;  %p13053_p10 = por %p13052_p6, %p13051_p9 }
  0x5a   : > { %p13047_p0 = pneg %p13046_p3 }
  0x5c   : > { %p13054_p11 = pnand %p13053_p10, %p13047_p0 }
  0x5e   : > { %13057 = shalt.err (!%p13054_p11)
}
  0x5f   : > { %12058 = dma.hbm_to_vmem [thread:$0]  (!%p13296_p7), %s14928_s6, 256, %s322_s24, [#allocation8]  }
  0x60   : > { %s13069_s20 = scalar_lea.vmem %s333_s1, 256  ;;  %p13077_p2 = scmp.lt.s32.totalorder %s333_s1, %s333_s1 }
  0x61   : > { %p13070_p12 = scmp.ne.s32.totalorder %s333_s1, %s13069_s20  ;;  %p13078_p3 = scmp.lt.s32.totalorder %s13069_s20, %s13069_s20 }
  0x63   : > { %p13072_p4 = pnand %p13070_p12, %p12926_p8  ;;  %p13079_p5 = por %p13078_p3, %p13077_p2 }
  0x65   : > { %p13073_p1 = pneg %p13072_p4 }
  0x67   : > { %p13080_p13 = pnand %p13079_p5, %p13073_p1 }
  0x69   : > { %13083 = shalt.err (!%p13080_p13)
}
  0x6a   : > { %12061 = dma.hbm_to_vmem [thread:$0]  (!%p13296_p7), %s14929_s7, 256, %s333_s1, [#allocation14]  }
  0x6b   : > { %s14959_s10 = sshll.u32 %s13174_s15, 16  ;;  %s390_s24 = scalar_lea.vmem [#allocation11], %s13331_s27 }
  0x6c   : > { %s397_s3 = scalar_lea.hbm %s14927_s5, %s14959_s10  ;;  %s398_s8 = sshll.u32 %s390_s24, 4  ;;  %s399_s8 = int_to_ptr.vmem [resolvable:$true] %s398_s8 }
  0x6d   : > { %s13097_s23 = scalar_lea.vmem %s399_s8, 65536  ;;  %p14960_p4 = scmp.ne.s32.totalorder %s14957_s25, 0 }
  0x6e   : > { %p13098_p1 = scmp.ne.s32.totalorder %s399_s8, %s13097_s23  ;;  %s13190_s22 = smov [#allocation11]  }
  0x6f   : > { %p14961_p5 = pneg %p14960_p4  ;;  %s13102_s13 = sshll.u32 %s13190_s22, 4  ;;  %s13103_s13 = int_to_ptr.vmem [resolvable:$false] %s13102_s13 }
  0x70   : > { %s13104_s26 = scalar_lea.vmem %s13103_s13, 131072  ;;  %p13105_p0 = scmp.lt.s32.totalorder %s399_s8, %s13103_s13 }
  0x71   : > { %p13100_p8 = pnand %p13098_p1, %p14961_p5  ;;  %p13106_p7 = scmp.lt.s32.totalorder %s13104_s26, %s13097_s23 }
  0x73   : > { %p13101_p13 = pneg %p13100_p8  ;;  %p13107_p9 = por %p13106_p7, %p13105_p0 }
  0x75   : > { %p13108_p6 = pnand %p13107_p9, %p13101_p13 }
  0x77   : > { %13111 = shalt.err (!%p13108_p6)
}
  0x78   : > { %s14962_s27 = smov 64   ;;  %s14963_s1 = smov 1024  }
  0x79   : > { %12071 = dma.hbm_to_vmem [thread:$0]  (!%p14960_p4), %s397_s3, 65536, %s399_s8, %s13343_s29, %s14963_s1, %s14963_s1, %s14962_s27  }
  0x7a   : > { %p14964_p10 = scmp.ne.s32.totalorder %s14951_s19, 0 }
  0x7b   : > { %p14965_p11 = scmp.ne.s32.totalorder (!%p14964_p10), %s14949_s17, 0 }
  0x7c   : > { %410 = sbr.rel (%p14964_p10) target bundleno = 2192 (0x890), region = 56 }
  0x81   : > { %13137 = dma.done.wait (%p14965_p11), [#allocation6], 32768  }
  0x82   : > { %13139 = vsyncadd (%p14965_p11), [#allocation6], 4294934528 }
  0x83   : > { %13141 = dma.done.wait (%p14965_p11), [#allocation8], 256  }
  0x84   : > { %13143 = vsyncadd (%p14965_p11), [#allocation8], 4294967040  ;;  %s14966_s25 = sadd.s32 4294967295, %s13178_s16   ;;  %s422_s20 = sand.u32 1, %s13162_s12  }
  0x85   : > { %s420_s29 = sand.u32 1, %s14966_s25   ;;  %s10696_s19 = sshll.u32 %s422_s20, 12 }
  0x86   : > { %s421_s28 = scalar_lea.sflag [#allocation6], %s420_s29  ;;  %s13417_s30 = scalar_lea.vmem [#allocation9], %s10696_s19 }
  0x87   : > { %p14967_p12 = scmp.ne.s32.totalorder %s14950_s18, 0 }
  0x89   : > { %13145 = dma.done.wait (%p14967_p12), %s421_s28, 131136  }
  0x8a   : > { %13147 = vsyncadd (%p14967_p12), %s421_s28, 4294836160  ;;  %s13423_s10 = sshll.u32 %s422_s20, 2  ;;  %s13426_s11 = scalar_lea.vmem [#allocation11], %s10696_s19 }
  0x8b   : > { %s433_s21 = scalar_lea.vmem [#allocation10], %s13423_s10 }
  0x8c   : > { %13149 = dma.done.wait (%p14965_p11), [#allocation8], 256  }
  0x8d   : > { %13151 = vsyncadd (%p14965_p11), [#allocation8], 4294967040 }
  0x8e   : > { %13153 = dma.done.wait (%p14965_p11), [#allocation14], 256  }
  0x8f   : > { %13155 = vsyncadd (%p14965_p11), [#allocation14], 4294967040  ;;  %p10701_p2 = scmp.ne.s32.totalorder %s13170_s14, 0 }
  0x91   : > { %513 = sbr.rel (%p10701_p2) target bundleno = 612 (0x264), region = 88 }
  0x96   : > { %v627_v1 = vld [vmem:[#allocation5 + $0x380] sm:$0xff]  ;;  %v628_v3 = vld [vmem:[#allocation5 + $0x388] sm:$0xff] }
  0x97   : > { %v635_v2 = vld [vmem:[#allocation5 + $0x3c0] sm:$0xff]  ;;  %v636_v5 = vld [vmem:[#allocation5 + $0x3c8] sm:$0xff] }
  0x98   : > { %v10817_v4 = vcombine.high %v627_v1, %v635_v2  ;;  %v10816_v6 = vcombine.low %v627_v1, %v635_v2  ;;  %v611_v7 = vld [vmem:[#allocation5 + $0x300] sm:$0xff]  ;;  %v10819_v9 = vcombine.high %v628_v3, %v636_v5  ;;  %v10818_v10 = vcombine.low %v628_v3, %v636_v5  ;;  %v612_v12 = vld [vmem:[#allocation5 + $0x308] sm:$0xff] }
  0x99   : > { %v619_v8 = vld [vmem:[#allocation5 + $0x340] sm:$0xff]  ;;  %v620_v13 = vld [vmem:[#allocation5 + $0x348] sm:$0xff] }
  0x9a   : > { %v10801_v11 = vcombine.high %v611_v7, %v619_v8  ;;  %v595_v14 = vld [vmem:[#allocation5 + $0x280] sm:$0xff]  ;;  %2142 = vmatprep.subr.bf16.mxu0 %v10817_v4  ;;  %v10803_v15 = vcombine.high %v612_v12, %v620_v13  ;;  %v596_v17 = vld [vmem:[#allocation5 + $0x288] sm:$0xff]  ;;  %2183 = vmatprep.subr.bf16.mxu1 %v10819_v9  ;;  %v10800_v19 = vcombine.low %v611_v7, %v619_v8 }
  0x9b   : > { %v603_v16 = vld [vmem:[#allocation5 + $0x2c0] sm:$0xff]  ;;  %v604_v18 = vld [vmem:[#allocation5 + $0x2c8] sm:$0xff]  ;;  %2143 = vmatpush1.bf16.msra.mxu0 %v10816_v6  ;;  %2184 = vmatpush1.bf16.msra.mxu1 %v10818_v10  ;;  %v10802_v20 = vcombine.low %v612_v12, %v620_v13 }
  0x9c   : > { %2144 = vmatprep.subr.bf16.mxu0 %v10801_v11  ;;  %v10785_v21 = vcombine.high %v595_v14, %v603_v16  ;;  %2185 = vmatprep.subr.bf16.mxu1 %v10803_v15  ;;  %v10787_v22 = vcombine.high %v596_v17, %v604_v18  ;;  %v579_v23 = vld [vmem:[#allocation5 + $0x200] sm:$0xff]  ;;  %v580_v25 = vld [vmem:[#allocation5 + $0x208] sm:$0xff]  ;;  %v10784_v27 = vcombine.low %v595_v14, %v603_v16 }
  0x9d   : > { %v587_v24 = vld [vmem:[#allocation5 + $0x240] sm:$0xff]  ;;  %v588_v26 = vld [vmem:[#allocation5 + $0x248] sm:$0xff]  ;;  %v10786_v28 = vcombine.low %v596_v17, %v604_v18 }
  0x9e   : > { %v10769_v29 = vcombine.high %v579_v23, %v587_v24  ;;  %v10771_v30 = vcombine.high %v580_v25, %v588_v26  ;;  %v563_v31 = vld [vmem:[#allocation5 + $0x180] sm:$0xff]  ;;  %v564_v33 = vld [vmem:[#allocation5 + $0x188] sm:$0xff]  ;;  %v10768_v35 = vcombine.low %v579_v23, %v587_v24  ;;  %v10770_v36 = vcombine.low %v580_v25, %v588_v26 }
  0x9f   : > { %2145 = vmatpush1.bf16.msra.mxu0 %v10800_v19  ;;  %2186 = vmatpush1.bf16.msra.mxu1 %v10802_v20  ;;  %v571_v32 = vld [vmem:[#allocation5 + $0x1c0] sm:$0xff]  ;;  %v572_v34 = vld [vmem:[#allocation5 + $0x1c8] sm:$0xff] }
  0xa0   : > { %2146 = vmatprep.subr.bf16.mxu0 %v10785_v21  ;;  %2187 = vmatprep.subr.bf16.mxu1 %v10787_v22  ;;  %v10753_v37 = vcombine.high %v563_v31, %v571_v32  ;;  %v10755_v38 = vcombine.high %v564_v33, %v572_v34  ;;  %v547_v39 = vld [vmem:[#allocation5 + $0x100] sm:$0xff]  ;;  %v548_v41 = vld [vmem:[#allocation5 + $0x108] sm:$0xff]  ;;  %v10752_v43 = vcombine.low %v563_v31, %v571_v32 }
  0xa1   : > { %v555_v40 = vld [vmem:[#allocation5 + $0x140] sm:$0xff]  ;;  %v556_v42 = vld [vmem:[#allocation5 + $0x148] sm:$0xff]  ;;  %v10754_v44 = vcombine.low %v564_v33, %v572_v34 }
  0xa2   : > { %v10737_v45 = vcombine.high %v547_v39, %v555_v40  ;;  %v10739_v46 = vcombine.high %v548_v41, %v556_v42  ;;  %v531_v47 = vld [vmem:[#allocation5 + $0x80] sm:$0xff]  ;;  %v532_v49 = vld [vmem:[#allocation5 + $0x88] sm:$0xff]  ;;  %v10736_v51 = vcombine.low %v547_v39, %v555_v40  ;;  %v10738_v52 = vcombine.low %v548_v41, %v556_v42 }
  0xa3   : > { %2147 = vmatpush1.bf16.msra.mxu0 %v10784_v27  ;;  %2188 = vmatpush1.bf16.msra.mxu1 %v10786_v28  ;;  %v539_v48 = vld [vmem:[#allocation5 + $0xc0] sm:$0xff]  ;;  %v540_v50 = vld [vmem:[#allocation5 + $0xc8] sm:$0xff] }
  0xa4   : > { %2148 = vmatprep.subr.bf16.mxu0 %v10769_v29  ;;  %2189 = vmatprep.subr.bf16.mxu1 %v10771_v30  ;;  %v10721_v53 = vcombine.high %v531_v47, %v539_v48  ;;  %v13442_v54 = vld [vmem:[%s14922_s0] sm:$0xff]  ;;  %v10723_v55 = vcombine.high %v532_v49, %v540_v50  ;;  %v516_v59 = vld [vmem:[#allocation5 + $0x8] sm:$0xff]  ;;  %v10720_v61 = vcombine.low %v531_v47, %v539_v48 }
  0xa5   : > { %v515_v56 = vld [vmem:[#allocation5] sm:$0xff]  ;;  %v13446_v58 = vcombine.high %v13442_v54, %v13442_v54  ;;  %v524_v60 = vld [vmem:[#allocation5 + $0x48] sm:$0xff]  ;;  %v10722_v62 = vcombine.low %v532_v49, %v540_v50 }
  0xa6   : > { %v523_v57 = vld [vmem:[#allocation5 + $0x40] sm:$0xff]  ;;  %v10707_v0 = vcombine.high %v516_v59, %v524_v60  ;;  %v756_v3 = vld [vmem:[#allocation5 + $0x788] sm:$0xff]  ;;  %v10706_v6 = vcombine.low %v516_v59, %v524_v60 }
  0xa7   : > { %2149 = vmatpush1.bf16.msra.mxu0 %v10768_v35  ;;  %2190 = vmatpush1.bf16.msra.mxu1 %v10770_v36  ;;  %v10705_v63 = vcombine.high %v515_v56, %v523_v57  ;;  %v755_v1 = vld [vmem:[#allocation5 + $0x780] sm:$0xff]  ;;  %v764_v4 = vld [vmem:[#allocation5 + $0x7c8] sm:$0xff]  ;;  %v10704_v5 = vcombine.low %v515_v56, %v523_v57 }
  0xa8   : > { %2150 = vmatprep.subr.bf16.mxu0 %v10753_v37  ;;  %2191 = vmatprep.subr.bf16.mxu1 %v10755_v38  ;;  %v763_v2 = vld [vmem:[#allocation5 + $0x7c0] sm:$0xff]  ;;  %v10947_v8 = vcombine.high %v756_v3, %v764_v4  ;;  %v740_v11 = vld [vmem:[#allocation5 + $0x708] sm:$0xff]  ;;  %v10946_v14 = vcombine.low %v756_v3, %v764_v4  ;;  %v629_v3 = vld [vmem:[#allocation5 + $0x390] sm:$0xff] }
  0xa9   : > { %2174 = vmatprep.mubr.bf16.mxu0 %v13446_v58  ;;  %2215 = vmatprep.mubr.bf16.mxu1 %v13446_v58  ;;  %v10945_v7 = vcombine.high %v755_v1, %v763_v2  ;;  %v739_v9 = vld [vmem:[#allocation5 + $0x700] sm:$0xff]  ;;  %v748_v12 = vld [vmem:[#allocation5 + $0x748] sm:$0xff]  ;;  %v10944_v13 = vcombine.low %v755_v1, %v763_v2  ;;  %v637_v4 = vld [vmem:[#allocation5 + $0x3d0] sm:$0xff] }
  0xaa   : > { %v747_v10 = vld [vmem:[#allocation5 + $0x740] sm:$0xff]  ;;  %v10931_v16 = vcombine.high %v740_v11, %v748_v12  ;;  %v724_v19 = vld [vmem:[#allocation5 + $0x688] sm:$0xff]  ;;  %v10930_v22 = vcombine.low %v740_v11, %v748_v12  ;;  %v613_v11 = vld [vmem:[#allocation5 + $0x310] sm:$0xff] }
  0xab   : > { %2151 = vmatpush1.bf16.msra.mxu0 %v10752_v43  ;;  %2192 = vmatpush1.bf16.msra.mxu1 %v10754_v44  ;;  %v10929_v15 = vcombine.high %v739_v9, %v747_v10  ;;  %v723_v17 = vld [vmem:[#allocation5 + $0x680] sm:$0xff]  ;;  %v732_v20 = vld [vmem:[#allocation5 + $0x6c8] sm:$0xff]  ;;  %v10928_v21 = vcombine.low %v739_v9, %v747_v10  ;;  %v10821_v9 = vcombine.high %v629_v3, %v637_v4  ;;  %v621_v12 = vld [vmem:[#allocation5 + $0x350] sm:$0xff] }
  0xac   : > { %2152 = vmatprep.subr.bf16.mxu0 %v10737_v45  ;;  %2193 = vmatprep.subr.bf16.mxu1 %v10739_v46  ;;  %v731_v18 = vld [vmem:[#allocation5 + $0x6c0] sm:$0xff]  ;;  %v10915_v24 = vcombine.high %v724_v19, %v732_v20  ;;  %v708_v27 = vld [vmem:[#allocation5 + $0x608] sm:$0xff]  ;;  %v10914_v30 = vcombine.low %v724_v19, %v732_v20  ;;  %v597_v20 = vld [vmem:[#allocation5 + $0x290] sm:$0xff] }
  0xad   : > { %v10913_v23 = vcombine.high %v723_v17, %v731_v18  ;;  %v707_v25 = vld [vmem:[#allocation5 + $0x600] sm:$0xff]  ;;  %v716_v28 = vld [vmem:[#allocation5 + $0x648] sm:$0xff]  ;;  %v10912_v29 = vcombine.low %v723_v17, %v731_v18  ;;  %v10805_v18 = vcombine.high %v613_v11, %v621_v12 }
  0xae   : > { %v715_v26 = vld [vmem:[#allocation5 + $0x640] sm:$0xff]  ;;  %v10899_v32 = vcombine.high %v708_v27, %v716_v28  ;;  %v692_v35 = vld [vmem:[#allocation5 + $0x588] sm:$0xff]  ;;  %v10898_v38 = vcombine.low %v708_v27, %v716_v28  ;;  %v581_v27 = vld [vmem:[#allocation5 + $0x210] sm:$0xff] }
  0xaf   : > { %2153 = vmatpush1.bf16.msra.mxu0 %v10736_v51  ;;  %2194 = vmatpush1.bf16.msra.mxu1 %v10738_v52  ;;  %v10897_v31 = vcombine.high %v707_v25, %v715_v26  ;;  %v691_v33 = vld [vmem:[#allocation5 + $0x580] sm:$0xff]  ;;  %v700_v36 = vld [vmem:[#allocation5 + $0x5c8] sm:$0xff]  ;;  %v10896_v37 = vcombine.low %v707_v25, %v715_v26  ;;  %v589_v28 = vld [vmem:[#allocation5 + $0x250] sm:$0xff] }
  0xb0   : > { %2154 = vmatprep.subr.bf16.mxu0 %v10721_v53  ;;  %2195 = vmatprep.subr.bf16.mxu1 %v10723_v55  ;;  %v699_v34 = vld [vmem:[#allocation5 + $0x5c0] sm:$0xff]  ;;  %v10883_v40 = vcombine.high %v692_v35, %v700_v36  ;;  %v676_v43 = vld [vmem:[#allocation5 + $0x508] sm:$0xff]  ;;  %v10882_v46 = vcombine.low %v692_v35, %v700_v36  ;;  %v565_v35 = vld [vmem:[#allocation5 + $0x190] sm:$0xff] }
  0xb1   : > { %v10881_v39 = vcombine.high %v691_v33, %v699_v34  ;;  %v675_v41 = vld [vmem:[#allocation5 + $0x500] sm:$0xff]  ;;  %v684_v44 = vld [vmem:[#allocation5 + $0x548] sm:$0xff]  ;;  %v10880_v45 = vcombine.low %v691_v33, %v699_v34  ;;  %v10773_v33 = vcombine.high %v581_v27, %v589_v28  ;;  %v573_v36 = vld [vmem:[#allocation5 + $0x1d0] sm:$0xff] }
  0xb2   : > { %v683_v42 = vld [vmem:[#allocation5 + $0x540] sm:$0xff]  ;;  %v10867_v48 = vcombine.high %v676_v43, %v684_v44  ;;  %v660_v51 = vld [vmem:[#allocation5 + $0x488] sm:$0xff]  ;;  %v10866_v55 = vcombine.low %v676_v43, %v684_v44  ;;  %v549_v43 = vld [vmem:[#allocation5 + $0x110] sm:$0xff] }
  0xb3   : > { %2155 = vmatpush1.bf16.msra.mxu0 %v10720_v61  ;;  %2196 = vmatpush1.bf16.msra.mxu1 %v10722_v62  ;;  %v10865_v47 = vcombine.high %v675_v41, %v683_v42  ;;  %v659_v49 = vld [vmem:[#allocation5 + $0x480] sm:$0xff]  ;;  %v668_v52 = vld [vmem:[#allocation5 + $0x4c8] sm:$0xff]  ;;  %v10864_v53 = vcombine.low %v675_v41, %v683_v42  ;;  %v10757_v41 = vcombine.high %v565_v35, %v573_v36  ;;  %v557_v44 = vld [vmem:[#allocation5 + $0x150] sm:$0xff] }
  0xb4   : > { %2156 = vmatprep.subr.bf16.mxu0 %v10705_v63  ;;  %2197 = vmatprep.subr.bf16.mxu1 %v10707_v0  ;;  %v667_v50 = vld [vmem:[#allocation5 + $0x4c0] sm:$0xff]  ;;  %v10851_v57 = vcombine.high %v660_v51, %v668_v52  ;;  %v644_v61 = vld [vmem:[#allocation5 + $0x408] sm:$0xff]  ;;  %v10850_v0 = vcombine.low %v660_v51, %v668_v52  ;;  %v533_v51 = vld [vmem:[#allocation5 + $0x90] sm:$0xff] }
  0xb5   : > { %v10849_v56 = vcombine.high %v659_v49, %v667_v50  ;;  %v643_v59 = vld [vmem:[#allocation5 + $0x400] sm:$0xff]  ;;  %v652_v62 = vld [vmem:[#allocation5 + $0x448] sm:$0xff]  ;;  %v10848_v63 = vcombine.low %v659_v49, %v667_v50  ;;  %v10741_v49 = vcombine.high %v549_v43, %v557_v44  ;;  %v541_v52 = vld [vmem:[#allocation5 + $0xd0] sm:$0xff] }
  0xb6   : > { %v651_v60 = vld [vmem:[#allocation5 + $0x440] sm:$0xff]  ;;  %v10835_v2 = vcombine.high %v644_v61, %v652_v62 }
  0xb7   : > { %2157 = vmatpush1.bf16.msra.mxu0 %v10704_v5  ;;  %2198 = vmatpush1.bf16.msra.mxu1 %v10706_v6  ;;  %v10833_v1 = vcombine.high %v643_v59, %v651_v60  ;;  %v630_v5 = vld [vmem:[#allocation5 + $0x398] sm:$0xff] }
  0xb8   : > { %2158 = vmatprep.subr.bf16.mxu0 %v10945_v7  ;;  %2199 = vmatprep.subr.bf16.mxu1 %v10947_v8  ;;  %v638_v6 = vld [vmem:[#allocation5 + $0x3d8] sm:$0xff]  ;;  %v10832_v7 = vcombine.low %v643_v59, %v651_v60  ;;  %v10834_v8 = vcombine.low %v644_v61, %v652_v62  ;;  %v10725_v59 = vcombine.high %v533_v51, %v541_v52  ;;  %v517_v61 = vld [vmem:[#allocation5 + $0x10] sm:$0xff] }
  0xb9   : > { %v10823_v10 = vcombine.high %v630_v5, %v638_v6  ;;  %v10822_v17 = vcombine.low %v630_v5, %v638_v6  ;;  %v525_v62 = vld [vmem:[#allocation5 + $0x50] sm:$0xff] }
  0xba   : > { %v757_v5 = vld [vmem:[#allocation5 + $0x790] sm:$0xff] }
  0xbb   : > { %2159 = vmatpush2.bf16.msra.mxu0 %v10944_v13  ;;  %2200 = vmatpush2.bf16.msra.mxu1 %v10946_v14  ;;  %v13452_v13 = vcombine.low %v13442_v54, %v13442_v54  ;;  %v614_v14 = vld [vmem:[#allocation5 + $0x318] sm:$0xff]  ;;  %v10804_v54 = vcombine.low %v613_v11, %v621_v12  ;;  %v765_v6 = vld [vmem:[#allocation5 + $0x7d0] sm:$0xff] }
  0xbc   : > { %2160 = vmatprep.subr.bf16.mxu0 %v10929_v15  ;;  %2201 = vmatprep.subr.bf16.mxu1 %v10931_v16  ;;  %v622_v15 = vld [vmem:[#allocation5 + $0x358] sm:$0xff]  ;;  %v10820_v16 = vcombine.low %v629_v3, %v637_v4  ;;  %v10709_v3 = vcombine.high %v517_v61, %v525_v62  ;;  %v10949_v11 = vcombine.high %v757_v5, %v765_v6 }
  0xbd   : > { %v10807_v19 = vcombine.high %v614_v14, %v622_v15 }
  0xbf   : > { %2161 = vmatpush2.bf16.msra.mxu0 %v10928_v21  ;;  %2202 = vmatpush2.bf16.msra.mxu1 %v10930_v22  ;;  %v605_v21 = vld [vmem:[#allocation5 + $0x2d0] sm:$0xff]  ;;  %v598_v22 = vld [vmem:[#allocation5 + $0x298] sm:$0xff] }
  0xc0   : > { %2162 = vmatprep.subr.bf16.mxu0 %v10913_v23  ;;  %2203 = vmatprep.subr.bf16.mxu1 %v10915_v24  ;;  %v606_v23 = vld [vmem:[#allocation5 + $0x2d8] sm:$0xff]  ;;  %v10806_v24 = vcombine.low %v614_v14, %v622_v15  ;;  %v10789_v25 = vcombine.high %v597_v20, %v605_v21  ;;  %v741_v14 = vld [vmem:[#allocation5 + $0x710] sm:$0xff] }
  0xc1   : > { %v10791_v26 = vcombine.high %v598_v22, %v606_v23  ;;  %v749_v15 = vld [vmem:[#allocation5 + $0x750] sm:$0xff] }
  0xc3   : > { %2163 = vmatpush2.bf16.msra.mxu0 %v10912_v29  ;;  %2204 = vmatpush2.bf16.msra.mxu1 %v10914_v30  ;;  %v582_v29 = vld [vmem:[#allocation5 + $0x218] sm:$0xff] }
  0xc4   : > { %2164 = vmatprep.subr.bf16.mxu0 %v10897_v31  ;;  %2205 = vmatprep.subr.bf16.mxu1 %v10899_v32  ;;  %v590_v30 = vld [vmem:[#allocation5 + $0x258] sm:$0xff]  ;;  %v10788_v31 = vcombine.low %v597_v20, %v605_v21  ;;  %v10790_v32 = vcombine.low %v598_v22, %v606_v23  ;;  %v10933_v20 = vcombine.high %v741_v14, %v749_v15  ;;  %v725_v22 = vld [vmem:[#allocation5 + $0x690] sm:$0xff] }
  0xc5   : > { %v10775_v34 = vcombine.high %v582_v29, %v590_v30  ;;  %v733_v23 = vld [vmem:[#allocation5 + $0x6d0] sm:$0xff] }
  0xc7   : > { %2165 = vmatpush2.bf16.msra.mxu0 %v10896_v37  ;;  %2206 = vmatpush2.bf16.msra.mxu1 %v10898_v38  ;;  %v566_v37 = vld [vmem:[#allocation5 + $0x198] sm:$0xff] }
  0xc8   : > { %2166 = vmatprep.subr.bf16.mxu0 %v10881_v39  ;;  %2207 = vmatprep.subr.bf16.mxu1 %v10883_v40  ;;  %v574_v38 = vld [vmem:[#allocation5 + $0x1d8] sm:$0xff]  ;;  %v10772_v39 = vcombine.low %v581_v27, %v589_v28  ;;  %v10774_v40 = vcombine.low %v582_v29, %v590_v30  ;;  %v10917_v27 = vcombine.high %v725_v22, %v733_v23  ;;  %v709_v29 = vld [vmem:[#allocation5 + $0x610] sm:$0xff] }
  0xc9   : > { %v10759_v42 = vcombine.high %v566_v37, %v574_v38  ;;  %v717_v30 = vld [vmem:[#allocation5 + $0x650] sm:$0xff] }
  0xcb   : > { %2167 = vmatpush2.bf16.msra.mxu0 %v10880_v45  ;;  %2208 = vmatpush2.bf16.msra.mxu1 %v10882_v46  ;;  %v550_v45 = vld [vmem:[#allocation5 + $0x118] sm:$0xff] }
  0xcc   : > { %2168 = vmatprep.subr.bf16.mxu0 %v10865_v47  ;;  %2209 = vmatprep.subr.bf16.mxu1 %v10867_v48  ;;  %v558_v46 = vld [vmem:[#allocation5 + $0x158] sm:$0xff]  ;;  %v10756_v47 = vcombine.low %v565_v35, %v573_v36  ;;  %v10758_v48 = vcombine.low %v566_v37, %v574_v38  ;;  %v10901_v35 = vcombine.high %v709_v29, %v717_v30  ;;  %v693_v37 = vld [vmem:[#allocation5 + $0x590] sm:$0xff] }
  0xcd   : > { %v10743_v50 = vcombine.high %v550_v45, %v558_v46  ;;  %v701_v38 = vld [vmem:[#allocation5 + $0x5d0] sm:$0xff] }
  0xcf   : > { %2169 = vmatpush2.bf16.msra.mxu0 %v10864_v53  ;;  %2210 = vmatpush2.bf16.msra.mxu1 %v10866_v55  ;;  %v534_v53 = vld [vmem:[#allocation5 + $0x98] sm:$0xff] }
  0xd0   : > { %2170 = vmatprep.subr.bf16.mxu0 %v10849_v56  ;;  %2211 = vmatprep.subr.bf16.mxu1 %v10851_v57  ;;  %v542_v55 = vld [vmem:[#allocation5 + $0xd8] sm:$0xff]  ;;  %v10740_v56 = vcombine.low %v549_v43, %v557_v44  ;;  %v10742_v57 = vcombine.low %v550_v45, %v558_v46  ;;  %v10885_v43 = vcombine.high %v693_v37, %v701_v38  ;;  %v677_v45 = vld [vmem:[#allocation5 + $0x510] sm:$0xff] }
  0xd1   : > { %v10727_v60 = vcombine.high %v534_v53, %v542_v55  ;;  %v685_v46 = vld [vmem:[#allocation5 + $0x550] sm:$0xff] }
  0xd3   : > { %2171 = vmatpush2.bf16.msra.mxu0 %v10848_v63  ;;  %2212 = vmatpush2.bf16.msra.mxu1 %v10850_v0  ;;  %v518_v63 = vld [vmem:[#allocation5 + $0x18] sm:$0xff] }
  0xd4   : > { %2172 = vmatprep.subr.bf16.mxu0 %v10833_v1  ;;  %2213 = vmatprep.subr.bf16.mxu1 %v10835_v2  ;;  %v526_v0 = vld [vmem:[#allocation5 + $0x58] sm:$0xff]  ;;  %v10724_v1 = vcombine.low %v533_v51, %v541_v52  ;;  %v10726_v2 = vcombine.low %v534_v53, %v542_v55  ;;  %v10869_v51 = vcombine.high %v677_v45, %v685_v46  ;;  %v661_v53 = vld [vmem:[#allocation5 + $0x490] sm:$0xff] }
  0xd5   : > { %v10711_v4 = vcombine.high %v518_v63, %v526_v0  ;;  %v669_v55 = vld [vmem:[#allocation5 + $0x4d0] sm:$0xff] }
  0xd7   : > { %2173 = vmatpush2.bf16.msra.mxu0 %v10832_v7  ;;  %2214 = vmatpush2.bf16.msra.mxu1 %v10834_v8  ;;  %v758_v7 = vld [vmem:[#allocation5 + $0x798] sm:$0xff] }
  0xd8   : > { %2224 = vmatprep.subr.bf16.mxu0 %v10821_v9  ;;  %2265 = vmatprep.subr.bf16.mxu1 %v10823_v10  ;;  %v766_v8 = vld [vmem:[#allocation5 + $0x7d8] sm:$0xff]  ;;  %v10708_v9 = vcombine.low %v517_v61, %v525_v62  ;;  %v10710_v10 = vcombine.low %v518_v63, %v526_v0  ;;  %v10853_v61 = vcombine.high %v661_v53, %v669_v55  ;;  %v645_v63 = vld [vmem:[#allocation5 + $0x410] sm:$0xff] }
  0xd9   : > { %v10951_v12 = vcombine.high %v758_v7, %v766_v8  ;;  %v653_v0 = vld [vmem:[#allocation5 + $0x450] sm:$0xff] }
  0xda   : > { %2175 = vmatmul.mubr.bf16.vlgmr.msra.gmra.mxu0 %v13452_v13  ;;  %2216 = vmatmul.mubr.bf16.vlgmr.msra.gmra.mxu1 %v13452_v13 }
  0xdb   : > { %2225 = vmatpush1.bf16.msra.mxu0 %v10820_v16  ;;  %2266 = vmatpush1.bf16.msra.mxu1 %v10822_v17  ;;  %v742_v16 = vld [vmem:[#allocation5 + $0x718] sm:$0xff] }
  0xdc   : > { %2226 = vmatprep.subr.bf16.mxu0 %v10805_v18  ;;  %2267 = vmatprep.subr.bf16.mxu1 %v10807_v19  ;;  %v750_v17 = vld [vmem:[#allocation5 + $0x758] sm:$0xff]  ;;  %v10948_v18 = vcombine.low %v757_v5, %v765_v6  ;;  %v10950_v19 = vcombine.low %v758_v7, %v766_v8  ;;  %v10837_v5 = vcombine.high %v645_v63, %v653_v0  ;;  %v631_v7 = vld [vmem:[#allocation5 + $0x3a0] sm:$0xff] }
  0xdd   : > { %2256 = vmatprep.mubr.bf16.mxu0 %v13446_v58  ;;  %2297 = vmatprep.mubr.bf16.mxu1 %v13446_v58  ;;  %v10935_v21 = vcombine.high %v742_v16, %v750_v17  ;;  %v639_v8 = vld [vmem:[#allocation5 + $0x3e0] sm:$0xff] }
  0xdf   : > { %2227 = vmatpush1.bf16.msra.mxu0 %v10804_v54  ;;  %2268 = vmatpush1.bf16.msra.mxu1 %v10806_v24  ;;  %v726_v54 = vld [vmem:[#allocation5 + $0x698] sm:$0xff] }
  0xe0   : > { %2228 = vmatprep.subr.bf16.mxu0 %v10789_v25  ;;  %2269 = vmatprep.subr.bf16.mxu1 %v10791_v26  ;;  %v734_v24 = vld [vmem:[#allocation5 + $0x6d8] sm:$0xff]  ;;  %v10932_v25 = vcombine.low %v741_v14, %v749_v15  ;;  %v10934_v26 = vcombine.low %v742_v16, %v750_v17  ;;  %v10825_v14 = vcombine.high %v631_v7, %v639_v8  ;;  %v615_v16 = vld [vmem:[#allocation5 + $0x320] sm:$0xff] }
  0xe1   : > { %v10919_v28 = vcombine.high %v726_v54, %v734_v24  ;;  %v623_v17 = vld [vmem:[#allocation5 + $0x360] sm:$0xff] }
  0xe3   : > { %2229 = vmatpush1.bf16.msra.mxu0 %v10788_v31  ;;  %2270 = vmatpush1.bf16.msra.mxu1 %v10790_v32  ;;  %v710_v31 = vld [vmem:[#allocation5 + $0x618] sm:$0xff] }
  0xe4   : > { %2230 = vmatprep.subr.bf16.mxu0 %v10773_v33  ;;  %2271 = vmatprep.subr.bf16.mxu1 %v10775_v34  ;;  %v718_v32 = vld [vmem:[#allocation5 + $0x658] sm:$0xff]  ;;  %v10916_v33 = vcombine.low %v725_v22, %v733_v23  ;;  %v10918_v34 = vcombine.low %v726_v54, %v734_v24  ;;  %v10809_v22 = vcombine.high %v615_v16, %v623_v17  ;;  %v599_v54 = vld [vmem:[#allocation5 + $0x2a0] sm:$0xff] }
  0xe5   : > { %v10903_v36 = vcombine.high %v710_v31, %v718_v32  ;;  %v607_v24 = vld [vmem:[#allocation5 + $0x2e0] sm:$0xff] }
  0xe7   : > { %2231 = vmatpush1.bf16.msra.mxu0 %v10772_v39  ;;  %2272 = vmatpush1.bf16.msra.mxu1 %v10774_v40  ;;  %v694_v39 = vld [vmem:[#allocation5 + $0x598] sm:$0xff] }
  0xe8   : > { %2232 = vmatprep.subr.bf16.mxu0 %v10757_v41  ;;  %2273 = vmatprep.subr.bf16.mxu1 %v10759_v42  ;;  %v702_v40 = vld [vmem:[#allocation5 + $0x5d8] sm:$0xff]  ;;  %v10900_v41 = vcombine.low %v709_v29, %v717_v30  ;;  %v10902_v42 = vcombine.low %v710_v31, %v718_v32  ;;  %v10793_v29 = vcombine.high %v599_v54, %v607_v24  ;;  %v583_v31 = vld [vmem:[#allocation5 + $0x220] sm:$0xff] }
  0xe9   : > { %v10887_v44 = vcombine.high %v694_v39, %v702_v40  ;;  %v591_v32 = vld [vmem:[#allocation5 + $0x260] sm:$0xff] }
  0xeb   : > { %2233 = vmatpush1.bf16.msra.mxu0 %v10756_v47  ;;  %2274 = vmatpush1.bf16.msra.mxu1 %v10758_v48  ;;  %v678_v47 = vld [vmem:[#allocation5 + $0x518] sm:$0xff] }
  0xec   : > { %2234 = vmatprep.subr.bf16.mxu0 %v10741_v49  ;;  %2275 = vmatprep.subr.bf16.mxu1 %v10743_v50  ;;  %v686_v48 = vld [vmem:[#allocation5 + $0x558] sm:$0xff]  ;;  %v10884_v49 = vcombine.low %v693_v37, %v701_v38  ;;  %v10886_v50 = vcombine.low %v694_v39, %v702_v40  ;;  %v10777_v37 = vcombine.high %v583_v31, %v591_v32  ;;  %v567_v39 = vld [vmem:[#allocation5 + $0x1a0] sm:$0xff] }
  0xed   : > { %v10871_v52 = vcombine.high %v678_v47, %v686_v48  ;;  %v575_v40 = vld [vmem:[#allocation5 + $0x1e0] sm:$0xff] }
  0xef   : > { %2235 = vmatpush1.bf16.msra.mxu0 %v10740_v56  ;;  %2276 = vmatpush1.bf16.msra.mxu1 %v10742_v57  ;;  %v662_v56 = vld [vmem:[#allocation5 + $0x498] sm:$0xff] }
  0xf0   : > { %2236 = vmatprep.subr.bf16.mxu0 %v10725_v59  ;;  %2277 = vmatprep.subr.bf16.mxu1 %v10727_v60  ;;  %v670_v57 = vld [vmem:[#allocation5 + $0x4d8] sm:$0xff]  ;;  %v10868_v59 = vcombine.low %v677_v45, %v685_v46  ;;  %v10870_v60 = vcombine.low %v678_v47, %v686_v48  ;;  %v10761_v45 = vcombine.high %v567_v39, %v575_v40  ;;  %v551_v47 = vld [vmem:[#allocation5 + $0x120] sm:$0xff] }
  0xf1   : > { %v10855_v62 = vcombine.high %v662_v56, %v670_v57  ;;  %v559_v48 = vld [vmem:[#allocation5 + $0x160] sm:$0xff] }
  0xf3   : > { %2237 = vmatpush1.bf16.msra.mxu0 %v10724_v1  ;;  %2278 = vmatpush1.bf16.msra.mxu1 %v10726_v2  ;;  %v646_v1 = vld [vmem:[#allocation5 + $0x418] sm:$0xff] }
  0xf4   : > { %2238 = vmatprep.subr.bf16.mxu0 %v10709_v3  ;;  %2279 = vmatprep.subr.bf16.mxu1 %v10711_v4  ;;  %v654_v2 = vld [vmem:[#allocation5 + $0x458] sm:$0xff]  ;;  %v10852_v3 = vcombine.low %v661_v53, %v669_v55  ;;  %v10854_v4 = vcombine.low %v662_v56, %v670_v57  ;;  %v10745_v53 = vcombine.high %v551_v47, %v559_v48  ;;  %v535_v56 = vld [vmem:[#allocation5 + $0xa0] sm:$0xff] }
  0xf5   : > { %v10839_v6 = vcombine.high %v646_v1, %v654_v2  ;;  %v543_v57 = vld [vmem:[#allocation5 + $0xe0] sm:$0xff] }
  0xf7   : > { %2239 = vmatpush1.bf16.msra.mxu0 %v10708_v9  ;;  %2280 = vmatpush1.bf16.msra.mxu1 %v10710_v10  ;;  %v632_v9 = vld [vmem:[#allocation5 + $0x3a8] sm:$0xff] }
  0xf8   : > { %2240 = vmatprep.subr.bf16.mxu0 %v10949_v11  ;;  %2281 = vmatprep.subr.bf16.mxu1 %v10951_v12  ;;  %v640_v10 = vld [vmem:[#allocation5 + $0x3e8] sm:$0xff]  ;;  %v10836_v11 = vcombine.low %v645_v63, %v653_v0  ;;  %v10838_v12 = vcombine.low %v646_v1, %v654_v2  ;;  %v10729_v63 = vcombine.high %v535_v56, %v543_v57  ;;  %v519_v1 = vld [vmem:[#allocation5 + $0x20] sm:$0xff] }
  0xf9   : > { %v10827_v15 = vcombine.high %v632_v9, %v640_v10  ;;  %v527_v2 = vld [vmem:[#allocation5 + $0x60] sm:$0xff] }
  0xfb   : > { %2241 = vmatpush2.bf16.msra.mxu0 %v10948_v18  ;;  %2282 = vmatpush2.bf16.msra.mxu1 %v10950_v19  ;;  %v616_v18 = vld [vmem:[#allocation5 + $0x328] sm:$0xff] }
  0xfc   : > { %2242 = vmatprep.subr.bf16.mxu0 %v10933_v20  ;;  %2283 = vmatprep.subr.bf16.mxu1 %v10935_v21  ;;  %v624_v19 = vld [vmem:[#allocation5 + $0x368] sm:$0xff]  ;;  %v10824_v20 = vcombine.low %v631_v7, %v639_v8  ;;  %v10826_v21 = vcombine.low %v632_v9, %v640_v10  ;;  %v10713_v7 = vcombine.high %v519_v1, %v527_v2  ;;  %v759_v9 = vld [vmem:[#allocation5 + $0x7a0] sm:$0xff] }
  0xfd   : > { %v10811_v23 = vcombine.high %v616_v18, %v624_v19  ;;  %v767_v10 = vld [vmem:[#allocation5 + $0x7e0] sm:$0xff] }
  0xff   : > { %2243 = vmatpush2.bf16.msra.mxu0 %v10932_v25  ;;  %2284 = vmatpush2.bf16.msra.mxu1 %v10934_v26  ;;  %v600_v25 = vld [vmem:[#allocation5 + $0x2a8] sm:$0xff] }
 0x100   : > { %2244 = vmatprep.subr.bf16.mxu0 %v10917_v27  ;;  %2285 = vmatprep.subr.bf16.mxu1 %v10919_v28  ;;  %v608_v26 = vld [vmem:[#allocation5 + $0x2e8] sm:$0xff]  ;;  %v10808_v27 = vcombine.low %v615_v16, %v623_v17  ;;  %v10810_v28 = vcombine.low %v616_v18, %v624_v19  ;;  %v10953_v16 = vcombine.high %v759_v9, %v767_v10  ;;  %v743_v18 = vld [vmem:[#allocation5 + $0x720] sm:$0xff] }
 0x101   : > { %v10795_v30 = vcombine.high %v600_v25, %v608_v26  ;;  %v751_v19 = vld [vmem:[#allocation5 + $0x760] sm:$0xff] }
 0x103   : > { %2245 = vmatpush2.bf16.msra.mxu0 %v10916_v33  ;;  %2286 = vmatpush2.bf16.msra.mxu1 %v10918_v34  ;;  %v584_v33 = vld [vmem:[#allocation5 + $0x228] sm:$0xff] }
 0x104   : > { %2246 = vmatprep.subr.bf16.mxu0 %v10901_v35  ;;  %2287 = vmatprep.subr.bf16.mxu1 %v10903_v36  ;;  %v592_v34 = vld [vmem:[#allocation5 + $0x268] sm:$0xff]  ;;  %v10792_v35 = vcombine.low %v599_v54, %v607_v24  ;;  %v10794_v36 = vcombine.low %v600_v25, %v608_v26  ;;  %v10937_v54 = vcombine.high %v743_v18, %v751_v19  ;;  %v727_v25 = vld [vmem:[#allocation5 + $0x6a0] sm:$0xff] }
 0x105   : > { %v10779_v38 = vcombine.high %v584_v33, %v592_v34  ;;  %v735_v26 = vld [vmem:[#allocation5 + $0x6e0] sm:$0xff] }
 0x107   : > { %2247 = vmatpush2.bf16.msra.mxu0 %v10900_v41  ;;  %2288 = vmatpush2.bf16.msra.mxu1 %v10902_v42  ;;  %v568_v41 = vld [vmem:[#allocation5 + $0x1a8] sm:$0xff] }
 0x108   : > { %2248 = vmatprep.subr.bf16.mxu0 %v10885_v43  ;;  %2289 = vmatprep.subr.bf16.mxu1 %v10887_v44  ;;  %v576_v42 = vld [vmem:[#allocation5 + $0x1e8] sm:$0xff]  ;;  %v10776_v43 = vcombine.low %v583_v31, %v591_v32  ;;  %v10778_v44 = vcombine.low %v584_v33, %v592_v34  ;;  %v10921_v31 = vcombine.high %v727_v25, %v735_v26  ;;  %v711_v33 = vld [vmem:[#allocation5 + $0x620] sm:$0xff] }
 0x109   : > { %v10763_v46 = vcombine.high %v568_v41, %v576_v42  ;;  %v719_v34 = vld [vmem:[#allocation5 + $0x660] sm:$0xff] }
 0x10b   : > { %2249 = vmatpush2.bf16.msra.mxu0 %v10884_v49  ;;  %2290 = vmatpush2.bf16.msra.mxu1 %v10886_v50  ;;  %v552_v49 = vld [vmem:[#allocation5 + $0x128] sm:$0xff] }
 0x10c   : > { %2250 = vmatprep.subr.bf16.mxu0 %v10869_v51  ;;  %2291 = vmatprep.subr.bf16.mxu1 %v10871_v52  ;;  %v560_v50 = vld [vmem:[#allocation5 + $0x168] sm:$0xff]  ;;  %v10760_v51 = vcombine.low %v567_v39, %v575_v40  ;;  %v10762_v52 = vcombine.low %v568_v41, %v576_v42  ;;  %v10905_v39 = vcombine.high %v711_v33, %v719_v34  ;;  %v695_v41 = vld [vmem:[#allocation5 + $0x5a0] sm:$0xff] }
 0x10d   : > { %v10747_v55 = vcombine.high %v552_v49, %v560_v50  ;;  %v703_v42 = vld [vmem:[#allocation5 + $0x5e0] sm:$0xff] }
 0x10f   : > { %2251 = vmatpush2.bf16.msra.mxu0 %v10868_v59  ;;  %2292 = vmatpush2.bf16.msra.mxu1 %v10870_v60  ;;  %v536_v59 = vld [vmem:[#allocation5 + $0xa8] sm:$0xff] }
 0x110   : > { %2252 = vmatprep.subr.bf16.mxu0 %v10853_v61  ;;  %2293 = vmatprep.subr.bf16.mxu1 %v10855_v62  ;;  %v544_v60 = vld [vmem:[#allocation5 + $0xe8] sm:$0xff]  ;;  %v10744_v61 = vcombine.low %v551_v47, %v559_v48  ;;  %v10746_v62 = vcombine.low %v552_v49, %v560_v50  ;;  %v10889_v47 = vcombine.high %v695_v41, %v703_v42  ;;  %v679_v49 = vld [vmem:[#allocation5 + $0x520] sm:$0xff] }
 0x111   : > { %v10731_v0 = vcombine.high %v536_v59, %v544_v60  ;;  %v687_v50 = vld [vmem:[#allocation5 + $0x560] sm:$0xff] }
 0x113   : > { %2253 = vmatpush2.bf16.msra.mxu0 %v10852_v3  ;;  %2294 = vmatpush2.bf16.msra.mxu1 %v10854_v4  ;;  %v520_v3 = vld [vmem:[#allocation5 + $0x28] sm:$0xff] }
 0x114   : > { %2254 = vmatprep.subr.bf16.mxu0 %v10837_v5  ;;  %2295 = vmatprep.subr.bf16.mxu1 %v10839_v6  ;;  %v528_v4 = vld [vmem:[#allocation5 + $0x68] sm:$0xff]  ;;  %v10728_v5 = vcombine.low %v535_v56, %v543_v57  ;;  %v10730_v6 = vcombine.low %v536_v59, %v544_v60  ;;  %v10873_v56 = vcombine.high %v679_v49, %v687_v50  ;;  %v663_v59 = vld [vmem:[#allocation5 + $0x4a0] sm:$0xff] }
 0x115   : > { %v10715_v8 = vcombine.high %v520_v3, %v528_v4  ;;  %v671_v60 = vld [vmem:[#allocation5 + $0x4e0] sm:$0xff] }
 0x117   : > { %2255 = vmatpush2.bf16.msra.mxu0 %v10836_v11  ;;  %2296 = vmatpush2.bf16.msra.mxu1 %v10838_v12  ;;  %v760_v11 = vld [vmem:[#allocation5 + $0x7a8] sm:$0xff] }
 0x118   : > { %2306 = vmatprep.subr.bf16.mxu0 %v10825_v14  ;;  %2347 = vmatprep.subr.bf16.mxu1 %v10827_v15  ;;  %v768_v12 = vld [vmem:[#allocation5 + $0x7e8] sm:$0xff]  ;;  %v10712_v14 = vcombine.low %v519_v1, %v527_v2  ;;  %v10714_v15 = vcombine.low %v520_v3, %v528_v4  ;;  %v10857_v1 = vcombine.high %v663_v59, %v671_v60  ;;  %v647_v3 = vld [vmem:[#allocation5 + $0x420] sm:$0xff] }
 0x119   : > { %v10955_v17 = vcombine.high %v760_v11, %v768_v12  ;;  %v655_v4 = vld [vmem:[#allocation5 + $0x460] sm:$0xff] }
 0x11a   : > { %2257 = vmatmul.mubr.bf16.vlgmr.msra.gmra.mxu0 %v13452_v13  ;;  %2298 = vmatmul.mubr.bf16.vlgmr.msra.gmra.mxu1 %v13452_v13 }
 0x11b   : > { %2307 = vmatpush1.bf16.msra.mxu0 %v10824_v20  ;;  %2348 = vmatpush1.bf16.msra.mxu1 %v10826_v21  ;;  %v744_v20 = vld [vmem:[#allocation5 + $0x728] sm:$0xff] }
 0x11c   : > { %2308 = vmatprep.subr.bf16.mxu0 %v10809_v22  ;;  %2349 = vmatprep.subr.bf16.mxu1 %v10811_v23  ;;  %v752_v21 = vld [vmem:[#allocation5 + $0x768] sm:$0xff]  ;;  %v10952_v22 = vcombine.low %v759_v9, %v767_v10  ;;  %v10954_v23 = vcombine.low %v760_v11, %v768_v12  ;;  %v10841_v9 = vcombine.high %v647_v3, %v655_v4  ;;  %v633_v11 = vld [vmem:[#allocation5 + $0x3b0] sm:$0xff] }
 0x11d   : > { %2338 = vmatprep.mubr.bf16.mxu0 %v13446_v58  ;;  %2379 = vmatprep.mubr.bf16.mxu1 %v13446_v58  ;;  %v10939_v24 = vcombine.high %v744_v20, %v752_v21  ;;  %v641_v12 = vld [vmem:[#allocation5 + $0x3f0] sm:$0xff] }
 0x11f   : > { %2309 = vmatpush1.bf16.msra.mxu0 %v10808_v27  ;;  %2350 = vmatpush1.bf16.msra.mxu1 %v10810_v28  ;;  %v728_v27 = vld [vmem:[#allocation5 + $0x6a8] sm:$0xff] }
 0x120   : > { %2310 = vmatprep.subr.bf16.mxu0 %v10793_v29  ;;  %2351 = vmatprep.subr.bf16.mxu1 %v10795_v30  ;;  %v736_v28 = vld [vmem:[#allocation5 + $0x6e8] sm:$0xff]  ;;  %v10936_v29 = vcombine.low %v743_v18, %v751_v19  ;;  %v10938_v30 = vcombine.low %v744_v20, %v752_v21  ;;  %v10829_v18 = vcombine.high %v633_v11, %v641_v12  ;;  %v617_v20 = vld [vmem:[#allocation5 + $0x330] sm:$0xff] }
 0x121   : > { %v10923_v32 = vcombine.high %v728_v27, %v736_v28  ;;  %v625_v21 = vld [vmem:[#allocation5 + $0x370] sm:$0xff] }
 0x123   : > { %2311 = vmatpush1.bf16.msra.mxu0 %v10792_v35  ;;  %2352 = vmatpush1.bf16.msra.mxu1 %v10794_v36  ;;  %v712_v35 = vld [vmem:[#allocation5 + $0x628] sm:$0xff] }
 0x124   : > { %2312 = vmatprep.subr.bf16.mxu0 %v10777_v37  ;;  %2353 = vmatprep.subr.bf16.mxu1 %v10779_v38  ;;  %v720_v36 = vld [vmem:[#allocation5 + $0x668] sm:$0xff]  ;;  %v10920_v37 = vcombine.low %v727_v25, %v735_v26  ;;  %v10922_v38 = vcombine.low %v728_v27, %v736_v28  ;;  %v10813_v25 = vcombine.high %v617_v20, %v625_v21  ;;  %v601_v27 = vld [vmem:[#allocation5 + $0x2b0] sm:$0xff] }
 0x125   : > { %v10907_v40 = vcombine.high %v712_v35, %v720_v36  ;;  %v609_v28 = vld [vmem:[#allocation5 + $0x2f0] sm:$0xff] }
 0x127   : > { %2313 = vmatpush1.bf16.msra.mxu0 %v10776_v43  ;;  %2354 = vmatpush1.bf16.msra.mxu1 %v10778_v44  ;;  %v696_v43 = vld [vmem:[#allocation5 + $0x5a8] sm:$0xff] }
 0x128   : > { %2314 = vmatprep.subr.bf16.mxu0 %v10761_v45  ;;  %2355 = vmatprep.subr.bf16.mxu1 %v10763_v46  ;;  %v704_v44 = vld [vmem:[#allocation5 + $0x5e8] sm:$0xff]  ;;  %v10904_v45 = vcombine.low %v711_v33, %v719_v34  ;;  %v10906_v46 = vcombine.low %v712_v35, %v720_v36  ;;  %v10797_v33 = vcombine.high %v601_v27, %v609_v28  ;;  %v585_v35 = vld [vmem:[#allocation5 + $0x230] sm:$0xff] }
 0x129   : > { %v10891_v48 = vcombine.high %v696_v43, %v704_v44  ;;  %v593_v36 = vld [vmem:[#allocation5 + $0x270] sm:$0xff] }
 0x12b   : > { %2315 = vmatpush1.bf16.msra.mxu0 %v10760_v51  ;;  %2356 = vmatpush1.bf16.msra.mxu1 %v10762_v52  ;;  %v680_v51 = vld [vmem:[#allocation5 + $0x528] sm:$0xff] }
 0x12c   : > { %2316 = vmatprep.subr.bf16.mxu0 %v10745_v53  ;;  %2357 = vmatprep.subr.bf16.mxu1 %v10747_v55  ;;  %v688_v52 = vld [vmem:[#allocation5 + $0x568] sm:$0xff]  ;;  %v10888_v53 = vcombine.low %v695_v41, %v703_v42  ;;  %v10890_v55 = vcombine.low %v696_v43, %v704_v44  ;;  %v10781_v41 = vcombine.high %v585_v35, %v593_v36  ;;  %v569_v43 = vld [vmem:[#allocation5 + $0x1b0] sm:$0xff] }
 0x12d   : > { %v10875_v57 = vcombine.high %v680_v51, %v688_v52  ;;  %v577_v44 = vld [vmem:[#allocation5 + $0x1f0] sm:$0xff] }
 0x12f   : > { %2317 = vmatpush1.bf16.msra.mxu0 %v10744_v61  ;;  %2358 = vmatpush1.bf16.msra.mxu1 %v10746_v62  ;;  %v664_v61 = vld [vmem:[#allocation5 + $0x4a8] sm:$0xff] }
 0x130   : > { %2318 = vmatprep.subr.bf16.mxu0 %v10729_v63  ;;  %2359 = vmatprep.subr.bf16.mxu1 %v10731_v0  ;;  %v672_v62 = vld [vmem:[#allocation5 + $0x4e8] sm:$0xff]  ;;  %v10872_v63 = vcombine.low %v679_v49, %v687_v50  ;;  %v10874_v0 = vcombine.low %v680_v51, %v688_v52  ;;  %v10765_v49 = vcombine.high %v569_v43, %v577_v44  ;;  %v553_v50 = vld [vmem:[#allocation5 + $0x130] sm:$0xff]  ;;  %v554_v52 = vld [vmem:[#allocation5 + $0x138] sm:$0xff] }
 0x131   : > { %v10859_v2 = vcombine.high %v664_v61, %v672_v62  ;;  %v561_v51 = vld [vmem:[#allocation5 + $0x170] sm:$0xff] }
 0x133   : > { %2319 = vmatpush1.bf16.msra.mxu0 %v10728_v5  ;;  %2360 = vmatpush1.bf16.msra.mxu1 %v10730_v6  ;;  %v648_v5 = vld [vmem:[#allocation5 + $0x428] sm:$0xff] }
 0x134   : > { %2320 = vmatprep.subr.bf16.mxu0 %v10713_v7  ;;  %2361 = vmatprep.subr.bf16.mxu1 %v10715_v8  ;;  %v656_v6 = vld [vmem:[#allocation5 + $0x468] sm:$0xff]  ;;  %v10856_v7 = vcombine.low %v663_v59, %v671_v60  ;;  %v10858_v8 = vcombine.low %v664_v61, %v672_v62  ;;  %v537_v60 = vld [vmem:[#allocation5 + $0xb0] sm:$0xff]  ;;  %v538_v62 = vld [vmem:[#allocation5 + $0xb8] sm:$0xff] }
 0x135   : > { %v10843_v10 = vcombine.high %v648_v5, %v656_v6  ;;  %v545_v61 = vld [vmem:[#allocation5 + $0xf0] sm:$0xff] }
 0x137   : > { %2321 = vmatpush1.bf16.msra.mxu0 %v10712_v14  ;;  %2362 = vmatpush1.bf16.msra.mxu1 %v10714_v15  ;;  %v634_v14 = vld [vmem:[#allocation5 + $0x3b8] sm:$0xff] }
 0x138   : > { %2322 = vmatprep.subr.bf16.mxu0 %v10953_v16  ;;  %2363 = vmatprep.subr.bf16.mxu1 %v10955_v17  ;;  %v642_v15 = vld [vmem:[#allocation5 + $0x3f8] sm:$0xff]  ;;  %v10840_v16 = vcombine.low %v647_v3, %v655_v4  ;;  %v10842_v17 = vcombine.low %v648_v5, %v656_v6  ;;  %v521_v4 = vld [vmem:[#allocation5 + $0x30] sm:$0xff] }
 0x139   : > { %v10831_v19 = vcombine.high %v634_v14, %v642_v15  ;;  %v529_v5 = vld [vmem:[#allocation5 + $0x70] sm:$0xff]  ;;  %v522_v6 = vld [vmem:[#allocation5 + $0x38] sm:$0xff] }
 0x13b   : > { %2323 = vmatpush2.bf16.msra.mxu0 %v10952_v22  ;;  %2364 = vmatpush2.bf16.msra.mxu1 %v10954_v23  ;;  %v618_v22 = vld [vmem:[#allocation5 + $0x338] sm:$0xff] }
 0x13c   : > { %2324 = vmatprep.subr.bf16.mxu0 %v10937_v54  ;;  %2365 = vmatprep.subr.bf16.mxu1 %v10939_v24  ;;  %v626_v23 = vld [vmem:[#allocation5 + $0x378] sm:$0xff]  ;;  %v10828_v54 = vcombine.low %v633_v11, %v641_v12  ;;  %v10830_v24 = vcombine.low %v634_v14, %v642_v15  ;;  %v761_v12 = vld [vmem:[#allocation5 + $0x7b0] sm:$0xff] }
 0x13d   : > { %v10815_v26 = vcombine.high %v618_v22, %v626_v23  ;;  %v769_v14 = vld [vmem:[#allocation5 + $0x7f0] sm:$0xff]  ;;  %v762_v15 = vld [vmem:[#allocation5 + $0x7b8] sm:$0xff] }
 0x13f   : > { %2325 = vmatpush2.bf16.msra.mxu0 %v10936_v29  ;;  %2366 = vmatpush2.bf16.msra.mxu1 %v10938_v30  ;;  %v602_v29 = vld [vmem:[#allocation5 + $0x2b8] sm:$0xff] }
 0x140   : > { %2326 = vmatprep.subr.bf16.mxu0 %v10921_v31  ;;  %2367 = vmatprep.subr.bf16.mxu1 %v10923_v32  ;;  %v610_v30 = vld [vmem:[#allocation5 + $0x2f8] sm:$0xff]  ;;  %v10812_v31 = vcombine.low %v617_v20, %v625_v21  ;;  %v10814_v32 = vcombine.low %v618_v22, %v626_v23  ;;  %v745_v21 = vld [vmem:[#allocation5 + $0x730] sm:$0xff] }
 0x141   : > { %v10799_v34 = vcombine.high %v602_v29, %v610_v30  ;;  %v753_v22 = vld [vmem:[#allocation5 + $0x770] sm:$0xff]  ;;  %v746_v23 = vld [vmem:[#allocation5 + $0x738] sm:$0xff] }
 0x143   : > { %2327 = vmatpush2.bf16.msra.mxu0 %v10920_v37  ;;  %2368 = vmatpush2.bf16.msra.mxu1 %v10922_v38  ;;  %v586_v37 = vld [vmem:[#allocation5 + $0x238] sm:$0xff] }
 0x144   : > { %2328 = vmatprep.subr.bf16.mxu0 %v10905_v39  ;;  %2369 = vmatprep.subr.bf16.mxu1 %v10907_v40  ;;  %v594_v38 = vld [vmem:[#allocation5 + $0x278] sm:$0xff]  ;;  %v10796_v39 = vcombine.low %v601_v27, %v609_v28  ;;  %v10798_v40 = vcombine.low %v602_v29, %v610_v30  ;;  %v729_v28 = vld [vmem:[#allocation5 + $0x6b0] sm:$0xff] }
 0x145   : > { %v10783_v42 = vcombine.high %v586_v37, %v594_v38  ;;  %v737_v29 = vld [vmem:[#allocation5 + $0x6f0] sm:$0xff]  ;;  %v730_v30 = vld [vmem:[#allocation5 + $0x6b8] sm:$0xff] }
 0x147   : > { %2329 = vmatpush2.bf16.msra.mxu0 %v10904_v45  ;;  %2370 = vmatpush2.bf16.msra.mxu1 %v10906_v46  ;;  %v570_v45 = vld [vmem:[#allocation5 + $0x1b8] sm:$0xff] }
 0x148   : > { %2330 = vmatprep.subr.bf16.mxu0 %v10889_v47  ;;  %2371 = vmatprep.subr.bf16.mxu1 %v10891_v48  ;;  %v578_v46 = vld [vmem:[#allocation5 + $0x1f8] sm:$0xff]  ;;  %v10780_v47 = vcombine.low %v585_v35, %v593_v36  ;;  %v10782_v48 = vcombine.low %v586_v37, %v594_v38  ;;  %v713_v36 = vld [vmem:[#allocation5 + $0x630] sm:$0xff] }
 0x149   : > { %v721_v37 = vld [vmem:[#allocation5 + $0x670] sm:$0xff]  ;;  %v714_v38 = vld [vmem:[#allocation5 + $0x638] sm:$0xff] }
 0x14b   : > { %2331 = vmatpush2.bf16.msra.mxu0 %v10888_v53  ;;  %2372 = vmatpush2.bf16.msra.mxu1 %v10890_v55  ;;  %v562_v53 = vld [vmem:[#allocation5 + $0x178] sm:$0xff]  ;;  %v10764_v55 = vcombine.low %v569_v43, %v577_v44  ;;  %v697_v44 = vld [vmem:[#allocation5 + $0x5b0] sm:$0xff] }
 0x14c   : > { %2332 = vmatprep.subr.bf16.mxu0 %v10873_v56  ;;  %2373 = vmatprep.subr.bf16.mxu1 %v10875_v57  ;;  %v10766_v56 = vcombine.low %v570_v45, %v578_v46  ;;  %v10749_v57 = vcombine.high %v553_v50, %v561_v51  ;;  %v10751_v59 = vcombine.high %v554_v52, %v562_v53 }
 0x14f   : > { %2333 = vmatpush2.bf16.msra.mxu0 %v10872_v63  ;;  %2374 = vmatpush2.bf16.msra.mxu1 %v10874_v0  ;;  %v546_v63 = vld [vmem:[#allocation5 + $0xf8] sm:$0xff]  ;;  %v10748_v0 = vcombine.low %v553_v50, %v561_v51  ;;  %v681_v51 = vld [vmem:[#allocation5 + $0x530] sm:$0xff] }
 0x150   : > { %2334 = vmatprep.subr.bf16.mxu0 %v10857_v1  ;;  %2375 = vmatprep.subr.bf16.mxu1 %v10859_v2  ;;  %v10750_v1 = vcombine.low %v554_v52, %v562_v53  ;;  %v10733_v2 = vcombine.high %v537_v60, %v545_v61  ;;  %v10735_v3 = vcombine.high %v538_v62, %v546_v63  ;;  %v689_v52 = vld [vmem:[#allocation5 + $0x570] sm:$0xff]  ;;  %v682_v53 = vld [vmem:[#allocation5 + $0x538] sm:$0xff] }
 0x153   : > { %2335 = vmatpush2.bf16.msra.mxu0 %v10856_v7  ;;  %2376 = vmatpush2.bf16.msra.mxu1 %v10858_v8  ;;  %v530_v7 = vld [vmem:[#allocation5 + $0x78] sm:$0xff]  ;;  %v10732_v8 = vcombine.low %v537_v60, %v545_v61  ;;  %v665_v61 = vld [vmem:[#allocation5 + $0x4b0] sm:$0xff] }
 0x154   : > { %2336 = vmatprep.subr.bf16.mxu0 %v10841_v9  ;;  %2377 = vmatprep.subr.bf16.mxu1 %v10843_v10  ;;  %v10734_v9 = vcombine.low %v538_v62, %v546_v63  ;;  %v10717_v10 = vcombine.high %v521_v4, %v529_v5  ;;  %v10719_v11 = vcombine.high %v522_v6, %v530_v7  ;;  %v673_v62 = vld [vmem:[#allocation5 + $0x4f0] sm:$0xff]  ;;  %v666_v63 = vld [vmem:[#allocation5 + $0x4b8] sm:$0xff] }
 0x157   : > { %2337 = vmatpush2.bf16.msra.mxu0 %v10840_v16  ;;  %2378 = vmatpush2.bf16.msra.mxu1 %v10842_v17  ;;  %v770_v16 = vld [vmem:[#allocation5 + $0x7f8] sm:$0xff]  ;;  %v10716_v17 = vcombine.low %v521_v4, %v529_v5  ;;  %v10861_v4 = vcombine.high %v665_v61, %v673_v62 }
 0x158   : > { %2388 = vmatprep.subr.bf16.mxu0 %v10829_v18  ;;  %2429 = vmatprep.subr.bf16.mxu1 %v10831_v19  ;;  %v10718_v18 = vcombine.low %v522_v6, %v530_v7  ;;  %v10957_v19 = vcombine.high %v761_v12, %v769_v14  ;;  %v10959_v20 = vcombine.high %v762_v15, %v770_v16  ;;  %v649_v6 = vld [vmem:[#allocation5 + $0x430] sm:$0xff] }
 0x159   : > { %v657_v7 = vld [vmem:[#allocation5 + $0x470] sm:$0xff] }
 0x15a   : > { %2339 = vmatmul.mubr.bf16.vlgmr.msra.gmra.mxu0 %v13452_v13  ;;  %2380 = vmatmul.mubr.bf16.vlgmr.msra.gmra.mxu1 %v13452_v13 }
 0x15b   : > { %2389 = vmatpush1.bf16.msra.mxu0 %v10828_v54  ;;  %2430 = vmatpush1.bf16.msra.mxu1 %v10830_v24  ;;  %v754_v54 = vld [vmem:[#allocation5 + $0x778] sm:$0xff]  ;;  %v10956_v24 = vcombine.low %v761_v12, %v769_v14  ;;  %v10845_v14 = vcombine.high %v649_v6, %v657_v7 }
 0x15c   : > { %2390 = vmatprep.subr.bf16.mxu0 %v10813_v25  ;;  %2431 = vmatprep.subr.bf16.mxu1 %v10815_v26  ;;  %v10958_v25 = vcombine.low %v762_v15, %v770_v16  ;;  %v10941_v26 = vcombine.high %v745_v21, %v753_v22  ;;  %v10943_v27 = vcombine.high %v746_v23, %v754_v54 }
 0x15d   : > { %2420 = vmatprep.mubr.bf16.mxu0 %v13446_v58  ;;  %2461 = vmatprep.mubr.bf16.mxu1 %v13446_v58  ;;  %v10767_v58 = vcombine.high %v570_v45, %v578_v46  ;;  %v705_v45 = vld [vmem:[#allocation5 + $0x5f0] sm:$0xff]  ;;  %v698_v46 = vld [vmem:[#allocation5 + $0x5b8] sm:$0xff]  ;;  %v10844_v16 = vcombine.low %v649_v6, %v657_v7  ;;  %v772_v6 = vld [vmem:[#allocation7 + $0x8] sm:$0xff] }
 0x15f   : > { %2391 = vmatpush1.bf16.msra.mxu0 %v10812_v31  ;;  %2432 = vmatpush1.bf16.msra.mxu1 %v10814_v32  ;;  %v738_v31 = vld [vmem:[#allocation5 + $0x6f8] sm:$0xff]  ;;  %v10940_v32 = vcombine.low %v745_v21, %v753_v22 }
 0x160   : > { %2392 = vmatprep.subr.bf16.mxu0 %v10797_v33  ;;  %2433 = vmatprep.subr.bf16.mxu1 %v10799_v34  ;;  %v10942_v33 = vcombine.low %v746_v23, %v754_v54  ;;  %v10925_v34 = vcombine.high %v729_v28, %v737_v29  ;;  %v10927_v35 = vcombine.high %v730_v30, %v738_v31 }
 0x163   : > { %2393 = vmatpush1.bf16.msra.mxu0 %v10796_v39  ;;  %2434 = vmatpush1.bf16.msra.mxu1 %v10798_v40  ;;  %v722_v39 = vld [vmem:[#allocation5 + $0x678] sm:$0xff]  ;;  %v10924_v40 = vcombine.low %v729_v28, %v737_v29 }
 0x164   : > { %2394 = vmatprep.subr.bf16.mxu0 %v10781_v41  ;;  %2435 = vmatprep.subr.bf16.mxu1 %v10783_v42  ;;  %v10926_v41 = vcombine.low %v730_v30, %v738_v31  ;;  %v10909_v42 = vcombine.high %v713_v36, %v721_v37  ;;  %v10911_v43 = vcombine.high %v714_v38, %v722_v39 }
 0x167   : > { %2395 = vmatpush1.bf16.msra.mxu0 %v10780_v47  ;;  %2436 = vmatpush1.bf16.msra.mxu1 %v10782_v48  ;;  %v706_v47 = vld [vmem:[#allocation5 + $0x5f8] sm:$0xff]  ;;  %v10908_v48 = vcombine.low %v713_v36, %v721_v37 }
 0x168   : > { %2396 = vmatprep.subr.bf16.mxu0 %v10765_v49  ;;  %2437 = vmatprep.subr.bf16.mxu1 %v10767_v58  ;;  %v10910_v49 = vcombine.low %v714_v38, %v722_v39  ;;  %v10893_v58 = vcombine.high %v697_v44, %v705_v45  ;;  %v10895_v50 = vcombine.high %v698_v46, %v706_v47 }
 0x16b   : > { %2397 = vmatpush1.bf16.msra.mxu0 %v10764_v55  ;;  %2438 = vmatpush1.bf16.msra.mxu1 %v10766_v56  ;;  %v690_v55 = vld [vmem:[#allocation5 + $0x578] sm:$0xff]  ;;  %v10892_v56 = vcombine.low %v697_v44, %v705_v45 }
 0x16c   : > { %2398 = vmatprep.subr.bf16.mxu0 %v10749_v57  ;;  %2439 = vmatprep.subr.bf16.mxu1 %v10751_v59  ;;  %v10894_v57 = vcombine.low %v698_v46, %v706_v47  ;;  %v10877_v59 = vcombine.high %v681_v51, %v689_v52  ;;  %v10879_v60 = vcombine.high %v682_v53, %v690_v55 }
 0x16f   : > { %2399 = vmatpush1.bf16.msra.mxu0 %v10748_v0  ;;  %2440 = vmatpush1.bf16.msra.mxu1 %v10750_v1  ;;  %v674_v0 = vld [vmem:[#allocation5 + $0x4f8] sm:$0xff]  ;;  %v10876_v1 = vcombine.low %v681_v51, %v689_v52 }
 0x170   : > { %2400 = vmatprep.subr.bf16.mxu0 %v10733_v2  ;;  %2441 = vmatprep.subr.bf16.mxu1 %v10735_v3  ;;  %v775_v2 = vlaneseq  ;;  %v10878_v3 = vcombine.low %v682_v53, %v690_v55  ;;  %v10863_v5 = vcombine.high %v666_v63, %v674_v0  ;;  %v10862_v12 = vcombine.low %v666_v63, %v674_v0 }
 0x173   : > { %2401 = vmatpush1.bf16.msra.mxu0 %v10732_v8  ;;  %2442 = vmatpush1.bf16.msra.mxu1 %v10734_v9  ;;  %v650_v8 = vld [vmem:[#allocation5 + $0x438] sm:$0xff] }
 0x174   : > { %2402 = vmatprep.subr.bf16.mxu0 %v10717_v10  ;;  %2443 = vmatprep.subr.bf16.mxu1 %v10719_v11  ;;  %v658_v9 = vld [vmem:[#allocation5 + $0x478] sm:$0xff]  ;;  %v10860_v10 = vcombine.low %v665_v61, %v673_v62  ;;  %v13466_v11 = vshrl.u32 %v775_v2, 7 }
 0x175   : > { %v10847_v15 = vcombine.high %v650_v8, %v658_v9 }
 0x176   : > { %v781_v21 = vsub.s32 1, %v13466_v11  ;;  %v789_v22 = vsub.s32 3, %v13466_v11  ;;  %v793_v44 = vsub.s32 4, %v13466_v11  ;;  %v797_v45 = vsub.s32 5, %v13466_v11 }
 0x177   : > { %2403 = vmatpush1.bf16.msra.mxu0 %v10716_v17  ;;  %2444 = vmatpush1.bf16.msra.mxu1 %v10718_v18  ;;  %v777_v17 = vsub.s32 0, %v13466_v11  ;;  %v10846_v18 = vcombine.low %v650_v8, %v658_v9  ;;  %v805_v46 = vsub.s32 7, %v13466_v11 }
 0x178   : > { %2404 = vmatprep.subr.bf16.mxu0 %v10957_v19  ;;  %2445 = vmatprep.subr.bf16.mxu1 %v10959_v20  ;;  %v771_v19 = vld [vmem:[#allocation7] sm:$0xff]  ;;  %v785_v20 = vsub.s32 2, %v13466_v11  ;;  %v814_v9 = vrot.slane %v772_v6, %v781_v21 }
 0x179   : > { %v778_v23 = vrot.slane %v771_v19, %v777_v17  ;;  %v794_v47 = vrot.slane %v771_v19, %v793_v44  ;;  %v810_v7 = vrot.slane %v772_v6, %v777_v17 }
 0x17a   : > { %v786_v54 = vrot.slane %v771_v19, %v785_v20  ;;  %v818_v8 = vrot.slane %v772_v6, %v785_v20 }
 0x17b   : > { %2405 = vmatpush2.bf16.msra.mxu0 %v10956_v24  ;;  %2446 = vmatpush2.bf16.msra.mxu1 %v10958_v25  ;;  %v782_v24 = vrot.slane %v771_v19, %v781_v21  ;;  %v826_v21 = vrot.slane %v772_v6, %v793_v44 }
 0x17c   : > { %2406 = vmatprep.subr.bf16.mxu0 %v10941_v26  ;;  %2447 = vmatprep.subr.bf16.mxu1 %v10943_v27  ;;  %v790_v26 = vrot.slane %v771_v19, %v789_v22 }
 0x17f   : > { %2407 = vmatpush2.bf16.msra.mxu0 %v10940_v32  ;;  %2448 = vmatpush2.bf16.msra.mxu1 %v10942_v33 }
 0x180   : > { %2408 = vmatprep.subr.bf16.mxu0 %v10925_v34  ;;  %2449 = vmatprep.subr.bf16.mxu1 %v10927_v35 }
 0x183   : > { %2409 = vmatpush2.bf16.msra.mxu0 %v10924_v40  ;;  %2450 = vmatpush2.bf16.msra.mxu1 %v10926_v41 }
 0x184   : > { %2410 = vmatprep.subr.bf16.mxu0 %v10909_v42  ;;  %2451 = vmatprep.subr.bf16.mxu1 %v10911_v43 }
 0x187   : > { %2411 = vmatpush2.bf16.msra.mxu0 %v10908_v48  ;;  %2452 = vmatpush2.bf16.msra.mxu1 %v10910_v49  ;;  %v798_v49 = vrot.slane %v771_v19, %v797_v45 }
 0x188   : > { %2412 = vmatprep.subr.bf16.mxu0 %v10893_v58  ;;  %2453 = vmatprep.subr.bf16.mxu1 %v10895_v50  ;;  %v806_v50 = vrot.slane %v771_v19, %v805_v46 }
 0x18b   : > { %2413 = vmatpush2.bf16.msra.mxu0 %v10892_v56  ;;  %2454 = vmatpush2.bf16.msra.mxu1 %v10894_v57 }
 0x18c   : > { %2414 = vmatprep.subr.bf16.mxu0 %v10877_v59  ;;  %2455 = vmatprep.subr.bf16.mxu1 %v10879_v60 }
 0x18f   : > { %2415 = vmatpush2.bf16.msra.mxu0 %v10876_v1  ;;  %2456 = vmatpush2.bf16.msra.mxu1 %v10878_v3 }
 0x190   : > { %2416 = vmatprep.subr.bf16.mxu0 %v10861_v4  ;;  %2457 = vmatprep.subr.bf16.mxu1 %v10863_v5 }
 0x193   : > { %2417 = vmatpush2.bf16.msra.mxu0 %v10860_v10  ;;  %2458 = vmatpush2.bf16.msra.mxu1 %v10862_v12  ;;  %v822_v12 = vrot.slane %v772_v6, %v789_v22 }
 0x194   : > { %2418 = vmatprep.subr.bf16.mxu0 %v10845_v14  ;;  %2459 = vmatprep.subr.bf16.mxu1 %v10847_v15 }
 0x197   : > { %2419 = vmatpush2.bf16.msra.mxu0 %v10844_v16  ;;  %2460 = vmatpush2.bf16.msra.mxu1 %v10846_v18 }
 0x19a   : > { %v2176_v25 = vpop.f32.mrf.mxu0  ;;  %2421 = vmatmul.mubr.bf16.vlgmr.msra.gmra.mxu0 %v13452_v13  ;;  %v2217_v28 = vpop.f32.mrf.mxu1  ;;  %2462 = vmatmul.mubr.bf16.vlgmr.msra.gmra.mxu1 %v13452_v13  ;;  %v801_v13 = vsub.s32 6, %v13466_v11 }
 0x19b   : > { %v2177_v27 = vadd.f32 %v2176_v25, %v778_v23  ;;  %v2218_v29 = vadd.f32 %v2217_v28, %v786_v54 }
 0x19c   : > { %v2178_v30 = vpop.f32.mrf.mxu0  ;;  %v2219_v33 = vpop.f32.mrf.mxu1  ;;  %v802_v48 = vrot.slane %v771_v19, %v801_v13  ;;  %v834_v22 = vrot.slane %v772_v6, %v801_v13 }
 0x19d   : > { %v2470_v31 = vmax.f32 %v2177_v27, 0.0  ;;  %v2179_v32 = vadd.f32 %v2178_v30, %v782_v24  ;;  %v2472_v34 = vmax.f32 %v2218_v29, 0.0  ;;  %v2220_v35 = vadd.f32 %v2219_v33, %v790_v26 }
 0x19e   : > { %v2180_v36 = vpop.f32.mrf.mxu0  ;;  %v2221_v38 = vpop.f32.mrf.mxu1  ;;  %v838_v33 = vrot.slane %v772_v6, %v805_v46 }
 0x19f   : > { %v2471_v37 = vmax.f32 %v2179_v32, 0.0  ;;  %v2473_v39 = vmax.f32 %v2220_v35, 0.0 }
 0x1a0   : > { %v2181_v40 = vpop.f32.mrf.mxu0  ;;  %v2222_v42 = vpop.f32.mrf.mxu1 }
 0x1a1   : > { %v12019_v41 = vpack.c.bf16 %v2471_v37, %v2470_v31  ;;  %v12020_v43 = vpack.c.bf16 %v2473_v39, %v2472_v34  ;;  %v830_v31 = vrot.slane %v772_v6, %v797_v45 }
 0x1a3   : > { %2550 = vst [vmem:[#allocation2 + $0x30] sm:$0xff] %v12019_v41  ;;  %2551 = vst [vmem:[#allocation2] sm:$0xff] %v12020_v43 }
 0x1da   : > { %v2258_v58 = vpop.f32.mrf.mxu0  ;;  %v2299_v52 = vpop.f32.mrf.mxu1 }
 0x1db   : > { %v2259_v51 = vadd.f32 %v2258_v58, %v794_v47  ;;  %v2300_v53 = vadd.f32 %v2299_v52, %v802_v48 }
 0x1dc   : > { %v2260_v55 = vpop.f32.mrf.mxu0  ;;  %v2301_v59 = vpop.f32.mrf.mxu1 }
 0x1dd   : > { %v2474_v56 = vmax.f32 %v2259_v51, 0.0  ;;  %v2261_v57 = vadd.f32 %v2260_v55, %v798_v49  ;;  %v2476_v60 = vmax.f32 %v2300_v53, 0.0  ;;  %v2302_v61 = vadd.f32 %v2301_v59, %v806_v50 }
 0x1de   : > { %v2262_v62 = vpop.f32.mrf.mxu0  ;;  %v2303_v0 = vpop.f32.mrf.mxu1 }
 0x1df   : > { %v2475_v63 = vmax.f32 %v2261_v57, 0.0  ;;  %v2477_v1 = vmax.f32 %v2302_v61, 0.0 }
 0x1e0   : > { %v2263_v2 = vpop.f32.mrf.mxu0  ;;  %v2304_v4 = vpop.f32.mrf.mxu1 }
 0x1e1   : > { %v12021_v3 = vpack.c.bf16 %v2475_v63, %v2474_v56  ;;  %v12022_v5 = vpack.c.bf16 %v2477_v1, %v2476_v60 }
 0x1e3   : > { %2552 = vst [vmem:[#allocation2 + $0x18] sm:$0xff] %v12021_v3  ;;  %2553 = vst [vmem:[#allocation2 + $0x10] sm:$0xff] %v12022_v5 }
 0x21a   : > { %v2340_v10 = vpop.f32.mrf.mxu0  ;;  %v2381_v15 = vpop.f32.mrf.mxu1 }
 0x21b   : > { %v2341_v14 = vadd.f32 %v2340_v10, %v810_v7  ;;  %v2382_v16 = vadd.f32 %v2381_v15, %v818_v8 }
 0x21c   : > { %v2342_v18 = vpop.f32.mrf.mxu0  ;;  %v2383_v54 = vpop.f32.mrf.mxu1 }
 0x21d   : > { %v2478_v19 = vmax.f32 %v2341_v14, 0.0  ;;  %v2343_v23 = vadd.f32 %v2342_v18, %v814_v9  ;;  %v2480_v24 = vmax.f32 %v2382_v16, 0.0  ;;  %v2384_v25 = vadd.f32 %v2383_v54, %v822_v12 }
 0x21e   : > { %v2344_v26 = vpop.f32.mrf.mxu0  ;;  %v2385_v28 = vpop.f32.mrf.mxu1 }
 0x21f   : > { %v2479_v27 = vmax.f32 %v2343_v23, 0.0  ;;  %v2481_v29 = vmax.f32 %v2384_v25, 0.0 }
 0x220   : > { %v2345_v30 = vpop.f32.mrf.mxu0  ;;  %v2386_v17 = vpop.f32.mrf.mxu1 }
 0x221   : > { %v12023_v11 = vpack.c.bf16 %v2479_v27, %v2478_v19  ;;  %v12024_v20 = vpack.c.bf16 %v2481_v29, %v2480_v24 }
 0x223   : > { %2554 = vst [vmem:[#allocation2 + $0x8] sm:$0xff] %v12023_v11  ;;  %2555 = vst [vmem:[#allocation2 + $0x20] sm:$0xff] %v12024_v20 }
 0x25a   : > { %v2422_v32 = vpop.f32.mrf.mxu0  ;;  %v2463_v35 = vpop.f32.mrf.mxu1 }
 0x25b   : > { %v2423_v34 = vadd.f32 %v2422_v32, %v826_v21  ;;  %v2464_v36 = vadd.f32 %v2463_v35, %v834_v22 }
 0x25c   : > { %v2424_v37 = vpop.f32.mrf.mxu0  ;;  %v2465_v39 = vpop.f32.mrf.mxu1 }
 0x25d   : > { %v2425_v38 = vadd.f32 %v2424_v37, %v830_v31  ;;  %v2466_v40 = vadd.f32 %v2465_v39, %v838_v33  ;;  %v2482_v42 = vmax.f32 %v2423_v34, 0.0  ;;  %v2484_v48 = vmax.f32 %v2464_v36, 0.0 }
 0x25e   : > { %v2426_v41 = vpop.f32.mrf.mxu0  ;;  %v2467_v47 = vpop.f32.mrf.mxu1 }
 0x25f   : > { %v2483_v43 = vmax.f32 %v2425_v38, 0.0  ;;  %v2485_v49 = vmax.f32 %v2466_v40, 0.0 }
 0x260   : > { %v2427_v58 = vpop.f32.mrf.mxu0  ;;  %v2468_v44 = vpop.f32.mrf.mxu1 }
 0x261   : > { %v12025_v50 = vpack.c.bf16 %v2483_v43, %v2482_v42  ;;  %v12026_v13 = vpack.c.bf16 %v2485_v49, %v2484_v48 }
 0x263   : > { %2556 = vst [vmem:[#allocation2 + $0x28] sm:$0xff] %v12025_v50  ;;  %2557 = vst [vmem:[#allocation2 + $0x38] sm:$0xff] %v12026_v13 }
 0x264 PF: > { %v12139_v45 = vld [vmem:[%s13417_s30 + $0xe4] ss:$16 sps:$4 sm:$0xff]   ;;  %v12143_v51 = vld [vmem:[%s13417_s30 + $0xe0] ss:$16 sps:$4 sm:$0xff]  }
 0x265   : > { %v12141_v46 = vld [vmem:[%s13417_s30 + $0x2e4] ss:$16 sps:$4 sm:$0xff]   ;;  %5716 = vmatprep.subr.bf16.mxu0 %v12139_v45  ;;  %v12144_v52 = vld [vmem:[%s13417_s30 + $0x2e0] ss:$16 sps:$4 sm:$0xff]  }
 0x266   : > { %5757 = vmatprep.subr.bf16.mxu1 %v12141_v46  ;;  %v12145_v53 = vld [vmem:[%s13417_s30 + $0xc4] ss:$16 sps:$4 sm:$0xff]   ;;  %5717 = vmatpush1.bf16.msra.mxu0 %v12143_v51  ;;  %v12149_v56 = vld [vmem:[%s13417_s30 + $0xc0] ss:$16 sps:$4 sm:$0xff]  }
 0x267   : > { %5758 = vmatpush1.bf16.msra.mxu1 %v12144_v52  ;;  %v12147_v55 = vld [vmem:[%s13417_s30 + $0x2c4] ss:$16 sps:$4 sm:$0xff]   ;;  %5718 = vmatprep.subr.bf16.mxu0 %v12145_v53  ;;  %v12150_v57 = vld [vmem:[%s13417_s30 + $0x2c0] ss:$16 sps:$4 sm:$0xff]  }
 0x268   : > { %5759 = vmatprep.subr.bf16.mxu1 %v12147_v55  ;;  %v12151_v59 = vld [vmem:[%s13417_s30 + $0xa4] ss:$16 sps:$4 sm:$0xff]   ;;  %v12155_v61 = vld [vmem:[%s13417_s30 + $0xa0] ss:$16 sps:$4 sm:$0xff]  }
 0x269   : > { %v12153_v60 = vld [vmem:[%s13417_s30 + $0x2a4] ss:$16 sps:$4 sm:$0xff]   ;;  %v12156_v62 = vld [vmem:[%s13417_s30 + $0x2a0] ss:$16 sps:$4 sm:$0xff]  }
 0x26a   : > { %5719 = vmatpush1.bf16.msra.mxu0 %v12149_v56  ;;  %v12157_v63 = vld [vmem:[%s13417_s30 + $0x84] ss:$16 sps:$4 sm:$0xff]   ;;  %v12161_v1 = vld [vmem:[%s13417_s30 + $0x80] ss:$16 sps:$4 sm:$0xff]  }
 0x26b   : > { %5760 = vmatpush1.bf16.msra.mxu1 %v12150_v57  ;;  %5720 = vmatprep.subr.bf16.mxu0 %v12151_v59  ;;  %v12159_v0 = vld [vmem:[%s13417_s30 + $0x284] ss:$16 sps:$4 sm:$0xff]   ;;  %v12162_v2 = vld [vmem:[%s13417_s30 + $0x280] ss:$16 sps:$4 sm:$0xff]  }
 0x26c   : > { %5761 = vmatprep.subr.bf16.mxu1 %v12153_v60  ;;  %v12163_v3 = vld [vmem:[%s13417_s30 + $0x64] ss:$16 sps:$4 sm:$0xff]   ;;  %v12167_v5 = vld [vmem:[%s13417_s30 + $0x60] ss:$16 sps:$4 sm:$0xff]  }
 0x26d   : > { %v12165_v4 = vld [vmem:[%s13417_s30 + $0x264] ss:$16 sps:$4 sm:$0xff]   ;;  %v12168_v6 = vld [vmem:[%s13417_s30 + $0x260] ss:$16 sps:$4 sm:$0xff]  }
 0x26e   : > { %5721 = vmatpush1.bf16.msra.mxu0 %v12155_v61  ;;  %v12169_v7 = vld [vmem:[%s13417_s30 + $0x44] ss:$16 sps:$4 sm:$0xff]   ;;  %v12173_v9 = vld [vmem:[%s13417_s30 + $0x40] ss:$16 sps:$4 sm:$0xff]  }
 0x26f   : > { %5762 = vmatpush1.bf16.msra.mxu1 %v12156_v62  ;;  %5722 = vmatprep.subr.bf16.mxu0 %v12157_v63  ;;  %v12171_v8 = vld [vmem:[%s13417_s30 + $0x244] ss:$16 sps:$4 sm:$0xff]   ;;  %v12174_v10 = vld [vmem:[%s13417_s30 + $0x240] ss:$16 sps:$4 sm:$0xff]  }
 0x270   : > { %5763 = vmatprep.subr.bf16.mxu1 %v12159_v0  ;;  %v12175_v12 = vld [vmem:[%s13417_s30 + $0x24] ss:$16 sps:$4 sm:$0xff]   ;;  %v12179_v15 = vld [vmem:[%s13417_s30 + $0x20] ss:$16 sps:$4 sm:$0xff]  }
 0x271   : > { %v12177_v14 = vld [vmem:[%s13417_s30 + $0x224] ss:$16 sps:$4 sm:$0xff]   ;;  %v12180_v16 = vld [vmem:[%s13417_s30 + $0x220] ss:$16 sps:$4 sm:$0xff]  }
 0x272   : > { %5723 = vmatpush1.bf16.msra.mxu0 %v12161_v1  ;;  %v12181_v18 = vld [vmem:[%s13417_s30 + $0x4] ss:$16 sps:$4 sm:$0xff]   ;;  %v12185_v23 = vld [vmem:[%s13417_s30] ss:$16 sps:$4 sm:$0xff]  }
 0x273   : > { %5764 = vmatpush1.bf16.msra.mxu1 %v12162_v2  ;;  %5724 = vmatprep.subr.bf16.mxu0 %v12163_v3  ;;  %v12183_v19 = vld [vmem:[%s13417_s30 + $0x204] ss:$16 sps:$4 sm:$0xff]   ;;  %v12186_v54 = vld [vmem:[%s13417_s30 + $0x200] ss:$16 sps:$4 sm:$0xff]  }
 0x274   : > { %5765 = vmatprep.subr.bf16.mxu1 %v12165_v4  ;;  %v12187_v24 = vld [vmem:[%s13417_s30 + $0x1e4] ss:$16 sps:$4 sm:$0xff]   ;;  %v12191_v26 = vld [vmem:[%s13417_s30 + $0x1e0] ss:$16 sps:$4 sm:$0xff]  }
 0x275   : > { %v12189_v25 = vld [vmem:[%s13417_s30 + $0x3e4] ss:$16 sps:$4 sm:$0xff]   ;;  %v12192_v27 = vld [vmem:[%s13417_s30 + $0x3e0] ss:$16 sps:$4 sm:$0xff]  }
 0x276   : > { %5725 = vmatpush1.bf16.msra.mxu0 %v12167_v5  ;;  %v12193_v28 = vld [vmem:[%s13417_s30 + $0x1c4] ss:$16 sps:$4 sm:$0xff]   ;;  %v12197_v30 = vld [vmem:[%s13417_s30 + $0x1c0] ss:$16 sps:$4 sm:$0xff]  }
 0x277   : > { %5766 = vmatpush1.bf16.msra.mxu1 %v12168_v6  ;;  %5726 = vmatprep.subr.bf16.mxu0 %v12169_v7  ;;  %v12195_v29 = vld [vmem:[%s13417_s30 + $0x3c4] ss:$16 sps:$4 sm:$0xff]   ;;  %v12198_v11 = vld [vmem:[%s13417_s30 + $0x3c0] ss:$16 sps:$4 sm:$0xff]  }
 0x278   : > { %5767 = vmatprep.subr.bf16.mxu1 %v12171_v8  ;;  %v12199_v17 = vld [vmem:[%s13417_s30 + $0x1a4] ss:$16 sps:$4 sm:$0xff]   ;;  %v12203_v21 = vld [vmem:[%s13417_s30 + $0x1a0] ss:$16 sps:$4 sm:$0xff]  }
 0x279   : > { %v12201_v20 = vld [vmem:[%s13417_s30 + $0x3a4] ss:$16 sps:$4 sm:$0xff]   ;;  %v12204_v22 = vld [vmem:[%s13417_s30 + $0x3a0] ss:$16 sps:$4 sm:$0xff]  }
 0x27a   : > { %5727 = vmatpush1.bf16.msra.mxu0 %v12173_v9  ;;  %v12205_v31 = vld [vmem:[%s13417_s30 + $0x184] ss:$16 sps:$4 sm:$0xff]   ;;  %v12209_v36 = vld [vmem:[%s13417_s30 + $0x180] ss:$16 sps:$4 sm:$0xff]  }
 0x27b   : > { %5768 = vmatpush1.bf16.msra.mxu1 %v12174_v10  ;;  %5728 = vmatprep.subr.bf16.mxu0 %v12175_v12  ;;  %v12207_v32 = vld [vmem:[%s13417_s30 + $0x384] ss:$16 sps:$4 sm:$0xff]   ;;  %v12210_v37 = vld [vmem:[%s13417_s30 + $0x380] ss:$16 sps:$4 sm:$0xff]  }
 0x27c   : > { %5769 = vmatprep.subr.bf16.mxu1 %v12177_v14  ;;  %v2558_v33 = vld [vmem:[#allocation2 + $0x30] sm:$0xff]  ;;  %v2559_v35 = vld [vmem:[#allocation2] sm:$0xff] }
 0x27d   : > { %v13528_v34 = vcombine.high %v2558_v33, %v2558_v33  ;;  %v13532_v38 = vcombine.high %v2559_v35, %v2559_v35  ;;  %v12211_v39 = vld [vmem:[%s13417_s30 + $0x164] ss:$16 sps:$4 sm:$0xff]   ;;  %v12215_v41 = vld [vmem:[%s13417_s30 + $0x160] ss:$16 sps:$4 sm:$0xff]   ;;  %v13554_v56 = vcombine.low %v2558_v33, %v2558_v33  ;;  %v13556_v57 = vcombine.low %v2559_v35, %v2559_v35 }
 0x27e   : > { %5729 = vmatpush1.bf16.msra.mxu0 %v12179_v15  ;;  %v12213_v40 = vld [vmem:[%s13417_s30 + $0x364] ss:$16 sps:$4 sm:$0xff]   ;;  %v12216_v42 = vld [vmem:[%s13417_s30 + $0x360] ss:$16 sps:$4 sm:$0xff]  }
 0x27f   : > { %5770 = vmatpush1.bf16.msra.mxu1 %v12180_v16  ;;  %5730 = vmatprep.subr.bf16.mxu0 %v12181_v18  ;;  %v12217_v43 = vld [vmem:[%s13417_s30 + $0x144] ss:$16 sps:$4 sm:$0xff]   ;;  %v12221_v48 = vld [vmem:[%s13417_s30 + $0x140] ss:$16 sps:$4 sm:$0xff]  }
 0x280   : > { %5771 = vmatprep.subr.bf16.mxu1 %v12183_v19  ;;  %5748 = vmatprep.mubr.bf16.mxu0 %v13528_v34  ;;  %v12219_v47 = vld [vmem:[%s13417_s30 + $0x344] ss:$16 sps:$4 sm:$0xff]   ;;  %v12222_v49 = vld [vmem:[%s13417_s30 + $0x340] ss:$16 sps:$4 sm:$0xff]  }
 0x281   : > { %5789 = vmatprep.mubr.bf16.mxu1 %v13532_v38  ;;  %v12223_v58 = vld [vmem:[%s13417_s30 + $0x124] ss:$16 sps:$4 sm:$0xff]   ;;  %v12227_v44 = vld [vmem:[%s13417_s30 + $0x120] ss:$16 sps:$4 sm:$0xff]  }
 0x282   : > { %5731 = vmatpush1.bf16.msra.mxu0 %v12185_v23  ;;  %v12225_v50 = vld [vmem:[%s13417_s30 + $0x324] ss:$16 sps:$4 sm:$0xff]   ;;  %v12228_v13 = vld [vmem:[%s13417_s30 + $0x320] ss:$16 sps:$4 sm:$0xff]  }
 0x283   : > { %5772 = vmatpush1.bf16.msra.mxu1 %v12186_v54  ;;  %5732 = vmatprep.subr.bf16.mxu0 %v12187_v24  ;;  %v12229_v45 = vld [vmem:[%s13417_s30 + $0x104] ss:$16 sps:$4 sm:$0xff]   ;;  %v12233_v51 = vld [vmem:[%s13417_s30 + $0x100] ss:$16 sps:$4 sm:$0xff]  }
 0x284   : > { %5773 = vmatprep.subr.bf16.mxu1 %v12189_v25  ;;  %v12231_v46 = vld [vmem:[%s13417_s30 + $0x304] ss:$16 sps:$4 sm:$0xff]   ;;  %v12234_v52 = vld [vmem:[%s13417_s30 + $0x300] ss:$16 sps:$4 sm:$0xff]  }
 0x285   : > { %v12241_v53 = vld [vmem:[%s13417_s30 + $0x4e4] ss:$16 sps:$4 sm:$0xff]   ;;  %v12239_v59 = vld [vmem:[%s13417_s30 + $0x4e0] ss:$16 sps:$4 sm:$0xff]  }
 0x286   : > { %5733 = vmatpush2.bf16.msra.mxu0 %v12191_v26  ;;  %v12244_v55 = vld [vmem:[%s13417_s30 + $0x6e4] ss:$16 sps:$4 sm:$0xff]   ;;  %v12242_v60 = vld [vmem:[%s13417_s30 + $0x6e0] ss:$16 sps:$4 sm:$0xff]  }
 0x287   : > { %5774 = vmatpush2.bf16.msra.mxu1 %v12192_v27  ;;  %5734 = vmatprep.subr.bf16.mxu0 %v12193_v28  ;;  %v12247_v61 = vld [vmem:[%s13417_s30 + $0x4c4] ss:$16 sps:$4 sm:$0xff]   ;;  %v12245_v63 = vld [vmem:[%s13417_s30 + $0x4c0] ss:$16 sps:$4 sm:$0xff]  }
 0x288   : > { %5775 = vmatprep.subr.bf16.mxu1 %v12195_v29  ;;  %v12250_v62 = vld [vmem:[%s13417_s30 + $0x6c4] ss:$16 sps:$4 sm:$0xff]   ;;  %v12248_v0 = vld [vmem:[%s13417_s30 + $0x6c0] ss:$16 sps:$4 sm:$0xff]  }
 0x289   : > { %v12253_v1 = vld [vmem:[%s13417_s30 + $0x4a4] ss:$16 sps:$4 sm:$0xff]   ;;  %v12251_v3 = vld [vmem:[%s13417_s30 + $0x4a0] ss:$16 sps:$4 sm:$0xff]  }
 0x28a   : > { %5735 = vmatpush2.bf16.msra.mxu0 %v12197_v30  ;;  %v12256_v2 = vld [vmem:[%s13417_s30 + $0x6a4] ss:$16 sps:$4 sm:$0xff]   ;;  %v12254_v4 = vld [vmem:[%s13417_s30 + $0x6a0] ss:$16 sps:$4 sm:$0xff]  }
 0x28b   : > { %5776 = vmatpush2.bf16.msra.mxu1 %v12198_v11  ;;  %5736 = vmatprep.subr.bf16.mxu0 %v12199_v17  ;;  %v12259_v5 = vld [vmem:[%s13417_s30 + $0x484] ss:$16 sps:$4 sm:$0xff]   ;;  %v12257_v7 = vld [vmem:[%s13417_s30 + $0x480] ss:$16 sps:$4 sm:$0xff]  }
 0x28c   : > { %5777 = vmatprep.subr.bf16.mxu1 %v12201_v20  ;;  %v12262_v6 = vld [vmem:[%s13417_s30 + $0x684] ss:$16 sps:$4 sm:$0xff]   ;;  %v12260_v8 = vld [vmem:[%s13417_s30 + $0x680] ss:$16 sps:$4 sm:$0xff]  }
 0x28d   : > { %v12265_v9 = vld [vmem:[%s13417_s30 + $0x464] ss:$16 sps:$4 sm:$0xff]   ;;  %v12263_v12 = vld [vmem:[%s13417_s30 + $0x460] ss:$16 sps:$4 sm:$0xff]  }
 0x28e   : > { %5737 = vmatpush2.bf16.msra.mxu0 %v12203_v21  ;;  %v12268_v10 = vld [vmem:[%s13417_s30 + $0x664] ss:$16 sps:$4 sm:$0xff]   ;;  %v12266_v14 = vld [vmem:[%s13417_s30 + $0x660] ss:$16 sps:$4 sm:$0xff]  }
 0x28f   : > { %5778 = vmatpush2.bf16.msra.mxu1 %v12204_v22  ;;  %5738 = vmatprep.subr.bf16.mxu0 %v12205_v31  ;;  %v12271_v15 = vld [vmem:[%s13417_s30 + $0x444] ss:$16 sps:$4 sm:$0xff]   ;;  %v12269_v18 = vld [vmem:[%s13417_s30 + $0x440] ss:$16 sps:$4 sm:$0xff]  }
 0x290   : > { %5779 = vmatprep.subr.bf16.mxu1 %v12207_v32  ;;  %v12274_v16 = vld [vmem:[%s13417_s30 + $0x644] ss:$16 sps:$4 sm:$0xff]   ;;  %v12272_v19 = vld [vmem:[%s13417_s30 + $0x640] ss:$16 sps:$4 sm:$0xff]  }
 0x291   : > { %v12277_v23 = vld [vmem:[%s13417_s30 + $0x424] ss:$16 sps:$4 sm:$0xff]   ;;  %v12275_v26 = vld [vmem:[%s13417_s30 + $0x420] ss:$16 sps:$4 sm:$0xff]  }
 0x292   : > { %5739 = vmatpush2.bf16.msra.mxu0 %v12209_v36  ;;  %v12280_v54 = vld [vmem:[%s13417_s30 + $0x624] ss:$16 sps:$4 sm:$0xff]   ;;  %v12278_v27 = vld [vmem:[%s13417_s30 + $0x620] ss:$16 sps:$4 sm:$0xff]  }
 0x293   : > { %5780 = vmatpush2.bf16.msra.mxu1 %v12210_v37  ;;  %5740 = vmatprep.subr.bf16.mxu0 %v12211_v39  ;;  %v13584_v24 = vld [vmem:[#allocation2 + $0x18] sm:$0xff]  ;;  %v13586_v25 = vld [vmem:[#allocation2 + $0x10] sm:$0xff] }
 0x294   : > { %5781 = vmatprep.subr.bf16.mxu1 %v12213_v40  ;;  %v13592_v28 = vcombine.high %v13584_v24, %v13584_v24  ;;  %v13596_v29 = vcombine.high %v13586_v25, %v13586_v25  ;;  %v12283_v30 = vld [vmem:[%s13417_s30 + $0x404] ss:$16 sps:$4 sm:$0xff]   ;;  %v12281_v17 = vld [vmem:[%s13417_s30 + $0x400] ss:$16 sps:$4 sm:$0xff]  }
 0x295   : > { %v12286_v11 = vld [vmem:[%s13417_s30 + $0x604] ss:$16 sps:$4 sm:$0xff]   ;;  %v12284_v20 = vld [vmem:[%s13417_s30 + $0x600] ss:$16 sps:$4 sm:$0xff]  }
 0x296   : > { %5741 = vmatpush2.bf16.msra.mxu0 %v12215_v41  ;;  %v12289_v21 = vld [vmem:[%s13417_s30 + $0x5e4] ss:$16 sps:$4 sm:$0xff]   ;;  %v12287_v31 = vld [vmem:[%s13417_s30 + $0x5e0] ss:$16 sps:$4 sm:$0xff]  }
 0x297   : > { %5782 = vmatpush2.bf16.msra.mxu1 %v12216_v42  ;;  %5742 = vmatprep.subr.bf16.mxu0 %v12217_v43  ;;  %v12292_v22 = vld [vmem:[%s13417_s30 + $0x7e4] ss:$16 sps:$4 sm:$0xff]   ;;  %v12290_v32 = vld [vmem:[%s13417_s30 + $0x7e0] ss:$16 sps:$4 sm:$0xff]  }
 0x298   : > { %5783 = vmatprep.subr.bf16.mxu1 %v12219_v47  ;;  %v12295_v33 = vld [vmem:[%s13417_s30 + $0x5c4] ss:$16 sps:$4 sm:$0xff]   ;;  %v12293_v36 = vld [vmem:[%s13417_s30 + $0x5c0] ss:$16 sps:$4 sm:$0xff]  }
 0x299   : > { %v12298_v35 = vld [vmem:[%s13417_s30 + $0x7c4] ss:$16 sps:$4 sm:$0xff]   ;;  %v12296_v37 = vld [vmem:[%s13417_s30 + $0x7c0] ss:$16 sps:$4 sm:$0xff]  }
 0x29a   : > { %5743 = vmatpush2.bf16.msra.mxu0 %v12221_v48  ;;  %v12301_v39 = vld [vmem:[%s13417_s30 + $0x5a4] ss:$16 sps:$4 sm:$0xff]   ;;  %v12299_v41 = vld [vmem:[%s13417_s30 + $0x5a0] ss:$16 sps:$4 sm:$0xff]  }
 0x29b   : > { %5784 = vmatpush2.bf16.msra.mxu1 %v12222_v49  ;;  %5744 = vmatprep.subr.bf16.mxu0 %v12223_v58  ;;  %v12304_v40 = vld [vmem:[%s13417_s30 + $0x7a4] ss:$16 sps:$4 sm:$0xff]   ;;  %v12302_v42 = vld [vmem:[%s13417_s30 + $0x7a0] ss:$16 sps:$4 sm:$0xff]  }
 0x29c   : > { %5785 = vmatprep.subr.bf16.mxu1 %v12225_v50  ;;  %v12307_v43 = vld [vmem:[%s13417_s30 + $0x584] ss:$16 sps:$4 sm:$0xff]   ;;  %v12305_v48 = vld [vmem:[%s13417_s30 + $0x580] ss:$16 sps:$4 sm:$0xff]  }
 0x29d   : > { %v12310_v47 = vld [vmem:[%s13417_s30 + $0x784] ss:$16 sps:$4 sm:$0xff]   ;;  %v12308_v49 = vld [vmem:[%s13417_s30 + $0x780] ss:$16 sps:$4 sm:$0xff]  }
 0x29e   : > { %5745 = vmatpush2.bf16.msra.mxu0 %v12227_v44  ;;  %v12313_v58 = vld [vmem:[%s13417_s30 + $0x564] ss:$16 sps:$4 sm:$0xff]   ;;  %v12311_v44 = vld [vmem:[%s13417_s30 + $0x560] ss:$16 sps:$4 sm:$0xff]  }
 0x29f   : > { %5786 = vmatpush2.bf16.msra.mxu1 %v12228_v13  ;;  %5746 = vmatprep.subr.bf16.mxu0 %v12229_v45  ;;  %v12316_v50 = vld [vmem:[%s13417_s30 + $0x764] ss:$16 sps:$4 sm:$0xff]   ;;  %v12314_v13 = vld [vmem:[%s13417_s30 + $0x760] ss:$16 sps:$4 sm:$0xff]  }
 0x2a0   : > { %5787 = vmatprep.subr.bf16.mxu1 %v12231_v46  ;;  %v12319_v45 = vld [vmem:[%s13417_s30 + $0x544] ss:$16 sps:$4 sm:$0xff]  }
 0x2a1   : > { %v12322_v46 = vld [vmem:[%s13417_s30 + $0x744] ss:$16 sps:$4 sm:$0xff]  }
 0x2a2   : > { %5747 = vmatpush2.bf16.msra.mxu0 %v12233_v51  ;;  %v12317_v51 = vld [vmem:[%s13417_s30 + $0x540] ss:$16 sps:$4 sm:$0xff]  }
 0x2a3   : > { %5788 = vmatpush2.bf16.msra.mxu1 %v12234_v52  ;;  %5798 = vmatprep.subr.bf16.mxu0 %v12241_v53  ;;  %v12320_v52 = vld [vmem:[%s13417_s30 + $0x740] ss:$16 sps:$4 sm:$0xff]   ;;  %v12325_v53 = vld [vmem:[%s13417_s30 + $0x524] ss:$16 sps:$4 sm:$0xff]  }
 0x2a4   : > { %5839 = vmatprep.subr.bf16.mxu1 %v12244_v55  ;;  %v12328_v55 = vld [vmem:[%s13417_s30 + $0x724] ss:$16 sps:$4 sm:$0xff]  }
 0x2a5   : > { %5749 = vmatmul.mubr.bf16.vlgmr.msra.gmra.mxu0 %v13554_v56 }
 0x2a6   : > { %5790 = vmatmul.mubr.bf16.vlgmr.msra.gmra.mxu1 %v13556_v57  ;;  %5799 = vmatpush1.bf16.msra.mxu0 %v12239_v59  ;;  %v12323_v59 = vld [vmem:[%s13417_s30 + $0x520] ss:$16 sps:$4 sm:$0xff]  }
 0x2a7   : > { %5840 = vmatpush1.bf16.msra.mxu1 %v12242_v60  ;;  %5800 = vmatprep.subr.bf16.mxu0 %v12247_v61  ;;  %v12326_v60 = vld [vmem:[%s13417_s30 + $0x720] ss:$16 sps:$4 sm:$0xff]   ;;  %v12331_v61 = vld [vmem:[%s13417_s30 + $0x504] ss:$16 sps:$4 sm:$0xff]  }
 0x2a8   : > { %5841 = vmatprep.subr.bf16.mxu1 %v12250_v62  ;;  %5830 = vmatprep.mubr.bf16.mxu0 %v13592_v28  ;;  %v12334_v62 = vld [vmem:[%s13417_s30 + $0x704] ss:$16 sps:$4 sm:$0xff]  }
 0x2a9   : > { %5871 = vmatprep.mubr.bf16.mxu1 %v13596_v29 }
 0x2aa   : > { %5801 = vmatpush1.bf16.msra.mxu0 %v12245_v63  ;;  %v12329_v63 = vld [vmem:[%s13417_s30 + $0x500] ss:$16 sps:$4 sm:$0xff]  }
 0x2ab   : > { %5842 = vmatpush1.bf16.msra.mxu1 %v12248_v0  ;;  %5802 = vmatprep.subr.bf16.mxu0 %v12253_v1  ;;  %v12332_v0 = vld [vmem:[%s13417_s30 + $0x700] ss:$16 sps:$4 sm:$0xff]   ;;  %v12341_v1 = vld [vmem:[%s13417_s30 + $0x8e4] ss:$16 sps:$4 sm:$0xff]  }
 0x2ac   : > { %5843 = vmatprep.subr.bf16.mxu1 %v12256_v2  ;;  %v12344_v2 = vld [vmem:[%s13417_s30 + $0xae4] ss:$16 sps:$4 sm:$0xff]  }
 0x2ae   : > { %5803 = vmatpush1.bf16.msra.mxu0 %v12251_v3  ;;  %v13640_v3 = vcombine.low %v13584_v24, %v13584_v24  ;;  %v12359_v24 = vld [vmem:[%s13417_s30 + $0x884] ss:$16 sps:$4 sm:$0xff]  }
 0x2af   : > { %5844 = vmatpush1.bf16.msra.mxu1 %v12254_v4  ;;  %5804 = vmatprep.subr.bf16.mxu0 %v12259_v5  ;;  %v13644_v4 = vcombine.low %v13586_v25, %v13586_v25  ;;  %v12339_v5 = vld [vmem:[%s13417_s30 + $0x8e0] ss:$16 sps:$4 sm:$0xff]   ;;  %v12362_v25 = vld [vmem:[%s13417_s30 + $0xa84] ss:$16 sps:$4 sm:$0xff]  }
 0x2b0   : > { %5845 = vmatprep.subr.bf16.mxu1 %v12262_v6  ;;  %v12342_v6 = vld [vmem:[%s13417_s30 + $0xae0] ss:$16 sps:$4 sm:$0xff]  }
 0x2b2   : > { %5805 = vmatpush1.bf16.msra.mxu0 %v12257_v7  ;;  %v12347_v7 = vld [vmem:[%s13417_s30 + $0x8c4] ss:$16 sps:$4 sm:$0xff]  }
 0x2b3   : > { %5846 = vmatpush1.bf16.msra.mxu1 %v12260_v8  ;;  %5806 = vmatprep.subr.bf16.mxu0 %v12265_v9  ;;  %v12350_v8 = vld [vmem:[%s13417_s30 + $0xac4] ss:$16 sps:$4 sm:$0xff]  }
 0x2b4   : > { %5847 = vmatprep.subr.bf16.mxu1 %v12268_v10  ;;  %v13650_v9 = vld [vmem:[#allocation2 + $0x8] sm:$0xff]  ;;  %v13652_v10 = vld [vmem:[#allocation2 + $0x20] sm:$0xff] }
 0x2b6   : > { %5807 = vmatpush1.bf16.msra.mxu0 %v12263_v12  ;;  %v13656_v12 = vcombine.high %v13650_v9, %v13650_v9 }
 0x2b7   : > { %5848 = vmatpush1.bf16.msra.mxu1 %v12266_v14  ;;  %5808 = vmatprep.subr.bf16.mxu0 %v12271_v15  ;;  %v13660_v14 = vcombine.high %v13652_v10, %v13652_v10  ;;  %v12345_v15 = vld [vmem:[%s13417_s30 + $0x8c0] ss:$16 sps:$4 sm:$0xff]  }
 0x2b8   : > { %5849 = vmatprep.subr.bf16.mxu1 %v12274_v16  ;;  %v12348_v16 = vld [vmem:[%s13417_s30 + $0xac0] ss:$16 sps:$4 sm:$0xff]  }
 0x2ba   : > { %5809 = vmatpush1.bf16.msra.mxu0 %v12269_v18  ;;  %v12353_v18 = vld [vmem:[%s13417_s30 + $0x8a4] ss:$16 sps:$4 sm:$0xff]  }
 0x2bb   : > { %5850 = vmatpush1.bf16.msra.mxu1 %v12272_v19  ;;  %5810 = vmatprep.subr.bf16.mxu0 %v12277_v23  ;;  %v12356_v19 = vld [vmem:[%s13417_s30 + $0xaa4] ss:$16 sps:$4 sm:$0xff]   ;;  %v12351_v23 = vld [vmem:[%s13417_s30 + $0x8a0] ss:$16 sps:$4 sm:$0xff]  }
 0x2bc   : > { %5851 = vmatprep.subr.bf16.mxu1 %v12280_v54  ;;  %v12354_v54 = vld [vmem:[%s13417_s30 + $0xaa0] ss:$16 sps:$4 sm:$0xff]  }
 0x2be   : > { %5811 = vmatpush1.bf16.msra.mxu0 %v12275_v26  ;;  %v12357_v26 = vld [vmem:[%s13417_s30 + $0x880] ss:$16 sps:$4 sm:$0xff]  }
 0x2bf   : > { %5852 = vmatpush1.bf16.msra.mxu1 %v12278_v27  ;;  %5812 = vmatprep.subr.bf16.mxu0 %v12283_v30  ;;  %v12360_v27 = vld [vmem:[%s13417_s30 + $0xa80] ss:$16 sps:$4 sm:$0xff]   ;;  %v12365_v30 = vld [vmem:[%s13417_s30 + $0x864] ss:$16 sps:$4 sm:$0xff]  }
 0x2c0   : > { %5853 = vmatprep.subr.bf16.mxu1 %v12286_v11  ;;  %v12368_v11 = vld [vmem:[%s13417_s30 + $0xa64] ss:$16 sps:$4 sm:$0xff]  }
 0x2c2   : > { %5813 = vmatpush1.bf16.msra.mxu0 %v12281_v17  ;;  %v12363_v17 = vld [vmem:[%s13417_s30 + $0x860] ss:$16 sps:$4 sm:$0xff]  }
 0x2c3   : > { %5854 = vmatpush1.bf16.msra.mxu1 %v12284_v20  ;;  %5814 = vmatprep.subr.bf16.mxu0 %v12289_v21  ;;  %v12366_v20 = vld [vmem:[%s13417_s30 + $0xa60] ss:$16 sps:$4 sm:$0xff]   ;;  %v12371_v21 = vld [vmem:[%s13417_s30 + $0x844] ss:$16 sps:$4 sm:$0xff]  }
 0x2c4   : > { %5855 = vmatprep.subr.bf16.mxu1 %v12292_v22  ;;  %v12374_v22 = vld [vmem:[%s13417_s30 + $0xa44] ss:$16 sps:$4 sm:$0xff]  }
 0x2c6   : > { %5815 = vmatpush2.bf16.msra.mxu0 %v12287_v31  ;;  %v12369_v31 = vld [vmem:[%s13417_s30 + $0x840] ss:$16 sps:$4 sm:$0xff]  }
 0x2c7   : > { %5856 = vmatpush2.bf16.msra.mxu1 %v12290_v32  ;;  %5816 = vmatprep.subr.bf16.mxu0 %v12295_v33  ;;  %v12372_v32 = vld [vmem:[%s13417_s30 + $0xa40] ss:$16 sps:$4 sm:$0xff]   ;;  %v12377_v33 = vld [vmem:[%s13417_s30 + $0x824] ss:$16 sps:$4 sm:$0xff]  }
 0x2c8   : > { %5857 = vmatprep.subr.bf16.mxu1 %v12298_v35  ;;  %v12380_v35 = vld [vmem:[%s13417_s30 + $0xa24] ss:$16 sps:$4 sm:$0xff]  }
 0x2ca   : > { %5817 = vmatpush2.bf16.msra.mxu0 %v12293_v36  ;;  %v12375_v36 = vld [vmem:[%s13417_s30 + $0x820] ss:$16 sps:$4 sm:$0xff]  }
 0x2cb   : > { %5858 = vmatpush2.bf16.msra.mxu1 %v12296_v37  ;;  %5818 = vmatprep.subr.bf16.mxu0 %v12301_v39  ;;  %v12378_v37 = vld [vmem:[%s13417_s30 + $0xa20] ss:$16 sps:$4 sm:$0xff]   ;;  %v12383_v39 = vld [vmem:[%s13417_s30 + $0x804] ss:$16 sps:$4 sm:$0xff]  }
 0x2cc   : > { %5859 = vmatprep.subr.bf16.mxu1 %v12304_v40  ;;  %v12386_v40 = vld [vmem:[%s13417_s30 + $0xa04] ss:$16 sps:$4 sm:$0xff]  }
 0x2ce   : > { %5819 = vmatpush2.bf16.msra.mxu0 %v12299_v41  ;;  %v12381_v41 = vld [vmem:[%s13417_s30 + $0x800] ss:$16 sps:$4 sm:$0xff]  }
 0x2cf   : > { %5860 = vmatpush2.bf16.msra.mxu1 %v12302_v42  ;;  %5820 = vmatprep.subr.bf16.mxu0 %v12307_v43  ;;  %v12384_v42 = vld [vmem:[%s13417_s30 + $0xa00] ss:$16 sps:$4 sm:$0xff]   ;;  %v12389_v43 = vld [vmem:[%s13417_s30 + $0x9e4] ss:$16 sps:$4 sm:$0xff]  }
 0x2d0   : > { %5861 = vmatprep.subr.bf16.mxu1 %v12310_v47  ;;  %v12392_v47 = vld [vmem:[%s13417_s30 + $0xbe4] ss:$16 sps:$4 sm:$0xff]  }
 0x2d2   : > { %5821 = vmatpush2.bf16.msra.mxu0 %v12305_v48  ;;  %v12387_v48 = vld [vmem:[%s13417_s30 + $0x9e0] ss:$16 sps:$4 sm:$0xff]  }
 0x2d3   : > { %5862 = vmatpush2.bf16.msra.mxu1 %v12308_v49  ;;  %5822 = vmatprep.subr.bf16.mxu0 %v12313_v58  ;;  %v12390_v49 = vld [vmem:[%s13417_s30 + $0xbe0] ss:$16 sps:$4 sm:$0xff]   ;;  %v12395_v58 = vld [vmem:[%s13417_s30 + $0x9c4] ss:$16 sps:$4 sm:$0xff]  }
 0x2d4   : > { %5863 = vmatprep.subr.bf16.mxu1 %v12316_v50  ;;  %v12398_v50 = vld [vmem:[%s13417_s30 + $0xbc4] ss:$16 sps:$4 sm:$0xff]  }
 0x2d6   : > { %5823 = vmatpush2.bf16.msra.mxu0 %v12311_v44  ;;  %v12393_v44 = vld [vmem:[%s13417_s30 + $0x9c0] ss:$16 sps:$4 sm:$0xff]  }
 0x2d7   : > { %5864 = vmatpush2.bf16.msra.mxu1 %v12314_v13  ;;  %5824 = vmatprep.subr.bf16.mxu0 %v12319_v45  ;;  %v12396_v13 = vld [vmem:[%s13417_s30 + $0xbc0] ss:$16 sps:$4 sm:$0xff]   ;;  %v12401_v45 = vld [vmem:[%s13417_s30 + $0x9a4] ss:$16 sps:$4 sm:$0xff]  }
 0x2d8   : > { %5865 = vmatprep.subr.bf16.mxu1 %v12322_v46  ;;  %v12404_v46 = vld [vmem:[%s13417_s30 + $0xba4] ss:$16 sps:$4 sm:$0xff]  }
 0x2da   : > { %5825 = vmatpush2.bf16.msra.mxu0 %v12317_v51  ;;  %v12399_v51 = vld [vmem:[%s13417_s30 + $0x9a0] ss:$16 sps:$4 sm:$0xff]  }
 0x2db   : > { %5866 = vmatpush2.bf16.msra.mxu1 %v12320_v52  ;;  %5826 = vmatprep.subr.bf16.mxu0 %v12325_v53  ;;  %v12402_v52 = vld [vmem:[%s13417_s30 + $0xba0] ss:$16 sps:$4 sm:$0xff]   ;;  %v12407_v53 = vld [vmem:[%s13417_s30 + $0x984] ss:$16 sps:$4 sm:$0xff]  }
 0x2dc   : > { %5867 = vmatprep.subr.bf16.mxu1 %v12328_v55  ;;  %v12410_v55 = vld [vmem:[%s13417_s30 + $0xb84] ss:$16 sps:$4 sm:$0xff]  }
 0x2de   : > { %5827 = vmatpush2.bf16.msra.mxu0 %v12323_v59  ;;  %v12405_v59 = vld [vmem:[%s13417_s30 + $0x980] ss:$16 sps:$4 sm:$0xff]  }
 0x2df   : > { %5868 = vmatpush2.bf16.msra.mxu1 %v12326_v60  ;;  %5828 = vmatprep.subr.bf16.mxu0 %v12331_v61  ;;  %v12408_v60 = vld [vmem:[%s13417_s30 + $0xb80] ss:$16 sps:$4 sm:$0xff]   ;;  %v12413_v61 = vld [vmem:[%s13417_s30 + $0x964] ss:$16 sps:$4 sm:$0xff]  }
 0x2e0   : > { %5869 = vmatprep.subr.bf16.mxu1 %v12334_v62  ;;  %v12416_v62 = vld [vmem:[%s13417_s30 + $0xb64] ss:$16 sps:$4 sm:$0xff]  }
 0x2e2   : > { %5829 = vmatpush2.bf16.msra.mxu0 %v12329_v63  ;;  %v12411_v63 = vld [vmem:[%s13417_s30 + $0x960] ss:$16 sps:$4 sm:$0xff]  }
 0x2e3   : > { %5870 = vmatpush2.bf16.msra.mxu1 %v12332_v0  ;;  %5880 = vmatprep.subr.bf16.mxu0 %v12341_v1  ;;  %v12414_v0 = vld [vmem:[%s13417_s30 + $0xb60] ss:$16 sps:$4 sm:$0xff]   ;;  %v12419_v1 = vld [vmem:[%s13417_s30 + $0x944] ss:$16 sps:$4 sm:$0xff]  }
 0x2e4   : > { %5921 = vmatprep.subr.bf16.mxu1 %v12344_v2  ;;  %v12422_v2 = vld [vmem:[%s13417_s30 + $0xb44] ss:$16 sps:$4 sm:$0xff]  }
 0x2e5   : > { %5831 = vmatmul.mubr.bf16.vlgmr.msra.gmra.mxu0 %v13640_v3 }
 0x2e6   : > { %5872 = vmatmul.mubr.bf16.vlgmr.msra.gmra.mxu1 %v13644_v4  ;;  %5881 = vmatpush1.bf16.msra.mxu0 %v12339_v5  ;;  %v12417_v5 = vld [vmem:[%s13417_s30 + $0x940] ss:$16 sps:$4 sm:$0xff]  }
 0x2e7   : > { %5922 = vmatpush1.bf16.msra.mxu1 %v12342_v6  ;;  %5882 = vmatprep.subr.bf16.mxu0 %v12347_v7  ;;  %v12420_v6 = vld [vmem:[%s13417_s30 + $0xb40] ss:$16 sps:$4 sm:$0xff]   ;;  %v12425_v7 = vld [vmem:[%s13417_s30 + $0x924] ss:$16 sps:$4 sm:$0xff]  }
 0x2e8   : > { %5923 = vmatprep.subr.bf16.mxu1 %v12350_v8  ;;  %5912 = vmatprep.mubr.bf16.mxu0 %v13656_v12  ;;  %v12428_v8 = vld [vmem:[%s13417_s30 + $0xb24] ss:$16 sps:$4 sm:$0xff]  }
 0x2e9   : > { %5953 = vmatprep.mubr.bf16.mxu1 %v13660_v14 }
 0x2ea   : > { %5883 = vmatpush1.bf16.msra.mxu0 %v12345_v15  ;;  %v12423_v15 = vld [vmem:[%s13417_s30 + $0x920] ss:$16 sps:$4 sm:$0xff]  }
 0x2eb   : > { %5924 = vmatpush1.bf16.msra.mxu1 %v12348_v16  ;;  %5884 = vmatprep.subr.bf16.mxu0 %v12353_v18  ;;  %v12426_v16 = vld [vmem:[%s13417_s30 + $0xb20] ss:$16 sps:$4 sm:$0xff]   ;;  %v12431_v18 = vld [vmem:[%s13417_s30 + $0x904] ss:$16 sps:$4 sm:$0xff]  }
 0x2ec   : > { %5925 = vmatprep.subr.bf16.mxu1 %v12356_v19  ;;  %v12434_v19 = vld [vmem:[%s13417_s30 + $0xb04] ss:$16 sps:$4 sm:$0xff]  }
 0x2ee   : > { %5885 = vmatpush1.bf16.msra.mxu0 %v12351_v23  ;;  %v12429_v23 = vld [vmem:[%s13417_s30 + $0x900] ss:$16 sps:$4 sm:$0xff]  }
 0x2ef   : > { %5926 = vmatpush1.bf16.msra.mxu1 %v12354_v54  ;;  %5886 = vmatprep.subr.bf16.mxu0 %v12359_v24  ;;  %v12432_v54 = vld [vmem:[%s13417_s30 + $0xb00] ss:$16 sps:$4 sm:$0xff]   ;;  %v12441_v24 = vld [vmem:[%s13417_s30 + $0xce4] ss:$16 sps:$4 sm:$0xff]  }
 0x2f0   : > { %5927 = vmatprep.subr.bf16.mxu1 %v12362_v25  ;;  %v12444_v25 = vld [vmem:[%s13417_s30 + $0xee4] ss:$16 sps:$4 sm:$0xff]  }
 0x2f2   : > { %5887 = vmatpush1.bf16.msra.mxu0 %v12357_v26  ;;  %v12439_v26 = vld [vmem:[%s13417_s30 + $0xce0] ss:$16 sps:$4 sm:$0xff]  }
 0x2f3   : > { %5928 = vmatpush1.bf16.msra.mxu1 %v12360_v27  ;;  %5888 = vmatprep.subr.bf16.mxu0 %v12365_v30  ;;  %v13727_v27 = vld [vmem:[#allocation2 + $0x28] sm:$0xff]  ;;  %v13731_v30 = vcombine.low %v13650_v9, %v13650_v9 }
 0x2f4   : > { %5929 = vmatprep.subr.bf16.mxu1 %v12368_v11  ;;  %v13735_v11 = vcombine.low %v13652_v10, %v13652_v10  ;;  %v13744_v9 = vcombine.high %v13727_v27, %v13727_v27 }
 0x2f6   : > { %5889 = vmatpush1.bf16.msra.mxu0 %v12363_v17  ;;  %v13737_v17 = vld [vmem:[#allocation2 + $0x38] sm:$0xff] }
 0x2f7   : > { %5930 = vmatpush1.bf16.msra.mxu1 %v12366_v20  ;;  %5890 = vmatprep.subr.bf16.mxu0 %v12371_v21  ;;  %v12442_v20 = vld [vmem:[%s13417_s30 + $0xee0] ss:$16 sps:$4 sm:$0xff]   ;;  %v12447_v21 = vld [vmem:[%s13417_s30 + $0xcc4] ss:$16 sps:$4 sm:$0xff]   ;;  %v13748_v10 = vcombine.high %v13737_v17, %v13737_v17 }
 0x2f8   : > { %5931 = vmatprep.subr.bf16.mxu1 %v12374_v22  ;;  %v12450_v22 = vld [vmem:[%s13417_s30 + $0xec4] ss:$16 sps:$4 sm:$0xff]  }
 0x2fa   : > { %5891 = vmatpush1.bf16.msra.mxu0 %v12369_v31  ;;  %v12445_v31 = vld [vmem:[%s13417_s30 + $0xcc0] ss:$16 sps:$4 sm:$0xff]  }
 0x2fb   : > { %5932 = vmatpush1.bf16.msra.mxu1 %v12372_v32  ;;  %5892 = vmatprep.subr.bf16.mxu0 %v12377_v33  ;;  %v12448_v32 = vld [vmem:[%s13417_s30 + $0xec0] ss:$16 sps:$4 sm:$0xff]   ;;  %v12453_v33 = vld [vmem:[%s13417_s30 + $0xca4] ss:$16 sps:$4 sm:$0xff]  }
 0x2fc   : > { %5933 = vmatprep.subr.bf16.mxu1 %v12380_v35  ;;  %v12456_v35 = vld [vmem:[%s13417_s30 + $0xea4] ss:$16 sps:$4 sm:$0xff]  }
 0x2fe   : > { %5893 = vmatpush1.bf16.msra.mxu0 %v12375_v36  ;;  %v12451_v36 = vld [vmem:[%s13417_s30 + $0xca0] ss:$16 sps:$4 sm:$0xff]  }
 0x2ff   : > { %5934 = vmatpush1.bf16.msra.mxu1 %v12378_v37  ;;  %5894 = vmatprep.subr.bf16.mxu0 %v12383_v39  ;;  %v12454_v37 = vld [vmem:[%s13417_s30 + $0xea0] ss:$16 sps:$4 sm:$0xff]   ;;  %v12459_v39 = vld [vmem:[%s13417_s30 + $0xc84] ss:$16 sps:$4 sm:$0xff]  }
 0x300   : > { %5935 = vmatprep.subr.bf16.mxu1 %v12386_v40  ;;  %v12462_v40 = vld [vmem:[%s13417_s30 + $0xe84] ss:$16 sps:$4 sm:$0xff]  }
 0x302   : > { %5895 = vmatpush1.bf16.msra.mxu0 %v12381_v41  ;;  %v12457_v41 = vld [vmem:[%s13417_s30 + $0xc80] ss:$16 sps:$4 sm:$0xff]  }
 0x303   : > { %5936 = vmatpush1.bf16.msra.mxu1 %v12384_v42  ;;  %5896 = vmatprep.subr.bf16.mxu0 %v12389_v43  ;;  %v12460_v42 = vld [vmem:[%s13417_s30 + $0xe80] ss:$16 sps:$4 sm:$0xff]   ;;  %v12465_v43 = vld [vmem:[%s13417_s30 + $0xc64] ss:$16 sps:$4 sm:$0xff]  }
 0x304   : > { %5937 = vmatprep.subr.bf16.mxu1 %v12392_v47  ;;  %v12468_v47 = vld [vmem:[%s13417_s30 + $0xe64] ss:$16 sps:$4 sm:$0xff]  }
 0x306   : > { %5897 = vmatpush2.bf16.msra.mxu0 %v12387_v48  ;;  %v12463_v48 = vld [vmem:[%s13417_s30 + $0xc60] ss:$16 sps:$4 sm:$0xff]  }
 0x307   : > { %5938 = vmatpush2.bf16.msra.mxu1 %v12390_v49  ;;  %5898 = vmatprep.subr.bf16.mxu0 %v12395_v58  ;;  %v12466_v49 = vld [vmem:[%s13417_s30 + $0xe60] ss:$16 sps:$4 sm:$0xff]   ;;  %v12471_v58 = vld [vmem:[%s13417_s30 + $0xc44] ss:$16 sps:$4 sm:$0xff]  }
 0x308   : > { %5939 = vmatprep.subr.bf16.mxu1 %v12398_v50  ;;  %v12474_v50 = vld [vmem:[%s13417_s30 + $0xe44] ss:$16 sps:$4 sm:$0xff]  }
 0x30a   : > { %5899 = vmatpush2.bf16.msra.mxu0 %v12393_v44  ;;  %v12469_v44 = vld [vmem:[%s13417_s30 + $0xc40] ss:$16 sps:$4 sm:$0xff]  }
 0x30b   : > { %5940 = vmatpush2.bf16.msra.mxu1 %v12396_v13  ;;  %5900 = vmatprep.subr.bf16.mxu0 %v12401_v45  ;;  %v12472_v13 = vld [vmem:[%s13417_s30 + $0xe40] ss:$16 sps:$4 sm:$0xff]   ;;  %v12477_v45 = vld [vmem:[%s13417_s30 + $0xc24] ss:$16 sps:$4 sm:$0xff]  }
 0x30c   : > { %5941 = vmatprep.subr.bf16.mxu1 %v12404_v46  ;;  %v12480_v46 = vld [vmem:[%s13417_s30 + $0xe24] ss:$16 sps:$4 sm:$0xff]  }
 0x30e   : > { %5901 = vmatpush2.bf16.msra.mxu0 %v12399_v51  ;;  %v12475_v51 = vld [vmem:[%s13417_s30 + $0xc20] ss:$16 sps:$4 sm:$0xff]  }
 0x30f   : > { %5942 = vmatpush2.bf16.msra.mxu1 %v12402_v52  ;;  %5902 = vmatprep.subr.bf16.mxu0 %v12407_v53  ;;  %v12478_v52 = vld [vmem:[%s13417_s30 + $0xe20] ss:$16 sps:$4 sm:$0xff]   ;;  %v12483_v53 = vld [vmem:[%s13417_s30 + $0xc04] ss:$16 sps:$4 sm:$0xff]  }
 0x310   : > { %5943 = vmatprep.subr.bf16.mxu1 %v12410_v55  ;;  %v12486_v55 = vld [vmem:[%s13417_s30 + $0xe04] ss:$16 sps:$4 sm:$0xff]  }
 0x312   : > { %5903 = vmatpush2.bf16.msra.mxu0 %v12405_v59  ;;  %v12481_v59 = vld [vmem:[%s13417_s30 + $0xc00] ss:$16 sps:$4 sm:$0xff]  }
 0x313   : > { %5944 = vmatpush2.bf16.msra.mxu1 %v12408_v60  ;;  %5904 = vmatprep.subr.bf16.mxu0 %v12413_v61  ;;  %v12484_v60 = vld [vmem:[%s13417_s30 + $0xe00] ss:$16 sps:$4 sm:$0xff]   ;;  %v12489_v61 = vld [vmem:[%s13417_s30 + $0xde4] ss:$16 sps:$4 sm:$0xff]  }
 0x314   : > { %5945 = vmatprep.subr.bf16.mxu1 %v12416_v62  ;;  %v12492_v62 = vld [vmem:[%s13417_s30 + $0xfe4] ss:$16 sps:$4 sm:$0xff]  }
 0x316   : > { %5905 = vmatpush2.bf16.msra.mxu0 %v12411_v63  ;;  %v12487_v63 = vld [vmem:[%s13417_s30 + $0xde0] ss:$16 sps:$4 sm:$0xff]  }
 0x317   : > { %5946 = vmatpush2.bf16.msra.mxu1 %v12414_v0  ;;  %5906 = vmatprep.subr.bf16.mxu0 %v12419_v1  ;;  %v12490_v0 = vld [vmem:[%s13417_s30 + $0xfe0] ss:$16 sps:$4 sm:$0xff]   ;;  %v12495_v1 = vld [vmem:[%s13417_s30 + $0xdc4] ss:$16 sps:$4 sm:$0xff]  }
 0x318   : > { %5947 = vmatprep.subr.bf16.mxu1 %v12422_v2  ;;  %v12498_v2 = vld [vmem:[%s13417_s30 + $0xfc4] ss:$16 sps:$4 sm:$0xff]  }
 0x31a   : > { %5907 = vmatpush2.bf16.msra.mxu0 %v12417_v5  ;;  %v12493_v5 = vld [vmem:[%s13417_s30 + $0xdc0] ss:$16 sps:$4 sm:$0xff]  }
 0x31b   : > { %5948 = vmatpush2.bf16.msra.mxu1 %v12420_v6  ;;  %5908 = vmatprep.subr.bf16.mxu0 %v12425_v7  ;;  %v12496_v6 = vld [vmem:[%s13417_s30 + $0xfc0] ss:$16 sps:$4 sm:$0xff]   ;;  %v12501_v7 = vld [vmem:[%s13417_s30 + $0xda4] ss:$16 sps:$4 sm:$0xff]  }
 0x31c   : > { %5949 = vmatprep.subr.bf16.mxu1 %v12428_v8  ;;  %v12504_v8 = vld [vmem:[%s13417_s30 + $0xfa4] ss:$16 sps:$4 sm:$0xff]  }
 0x31e   : > { %5909 = vmatpush2.bf16.msra.mxu0 %v12423_v15  ;;  %v12499_v15 = vld [vmem:[%s13417_s30 + $0xda0] ss:$16 sps:$4 sm:$0xff]  }
 0x31f   : > { %5950 = vmatpush2.bf16.msra.mxu1 %v12426_v16  ;;  %5910 = vmatprep.subr.bf16.mxu0 %v12431_v18  ;;  %v12502_v16 = vld [vmem:[%s13417_s30 + $0xfa0] ss:$16 sps:$4 sm:$0xff]   ;;  %v12507_v18 = vld [vmem:[%s13417_s30 + $0xd84] ss:$16 sps:$4 sm:$0xff]  }
 0x320   : > { %5951 = vmatprep.subr.bf16.mxu1 %v12434_v19  ;;  %v12510_v19 = vld [vmem:[%s13417_s30 + $0xf84] ss:$16 sps:$4 sm:$0xff]  }
 0x322   : > { %5911 = vmatpush2.bf16.msra.mxu0 %v12429_v23  ;;  %v12505_v23 = vld [vmem:[%s13417_s30 + $0xd80] ss:$16 sps:$4 sm:$0xff]  }
 0x323   : > { %5952 = vmatpush2.bf16.msra.mxu1 %v12432_v54  ;;  %5962 = vmatprep.subr.bf16.mxu0 %v12441_v24  ;;  %v12508_v54 = vld [vmem:[%s13417_s30 + $0xf80] ss:$16 sps:$4 sm:$0xff]   ;;  %v12513_v24 = vld [vmem:[%s13417_s30 + $0xd64] ss:$16 sps:$4 sm:$0xff]  }
 0x324   : > { %6003 = vmatprep.subr.bf16.mxu1 %v12444_v25  ;;  %v12516_v25 = vld [vmem:[%s13417_s30 + $0xf64] ss:$16 sps:$4 sm:$0xff]  }
 0x325   : > { %5913 = vmatmul.mubr.bf16.vlgmr.msra.gmra.mxu0 %v13731_v30 }
 0x326   : > { %5954 = vmatmul.mubr.bf16.vlgmr.msra.gmra.mxu1 %v13735_v11  ;;  %5963 = vmatpush1.bf16.msra.mxu0 %v12439_v26  ;;  %v12511_v26 = vld [vmem:[%s13417_s30 + $0xd60] ss:$16 sps:$4 sm:$0xff]  }
 0x327   : > { %6004 = vmatpush1.bf16.msra.mxu1 %v12442_v20  ;;  %5964 = vmatprep.subr.bf16.mxu0 %v12447_v21  ;;  %v12514_v20 = vld [vmem:[%s13417_s30 + $0xf60] ss:$16 sps:$4 sm:$0xff]   ;;  %v12519_v21 = vld [vmem:[%s13417_s30 + $0xd44] ss:$16 sps:$4 sm:$0xff]  }
 0x328   : > { %6005 = vmatprep.subr.bf16.mxu1 %v12450_v22  ;;  %5994 = vmatprep.mubr.bf16.mxu0 %v13744_v9  ;;  %v12522_v22 = vld [vmem:[%s13417_s30 + $0xf44] ss:$16 sps:$4 sm:$0xff]  }
 0x329   : > { %6035 = vmatprep.mubr.bf16.mxu1 %v13748_v10 }
 0x32a   : > { %5965 = vmatpush1.bf16.msra.mxu0 %v12445_v31  ;;  %v12517_v31 = vld [vmem:[%s13417_s30 + $0xd40] ss:$16 sps:$4 sm:$0xff]  }
 0x32b   : > { %6006 = vmatpush1.bf16.msra.mxu1 %v12448_v32  ;;  %5966 = vmatprep.subr.bf16.mxu0 %v12453_v33  ;;  %v12520_v32 = vld [vmem:[%s13417_s30 + $0xf40] ss:$16 sps:$4 sm:$0xff]   ;;  %v3080_v33 = vlaneseq }
 0x32c   : > { %6007 = vmatprep.subr.bf16.mxu1 %v12456_v35  ;;  %v12525_v35 = vld [vmem:[%s13417_s30 + $0xd24] ss:$16 sps:$4 sm:$0xff]  }
 0x32e   : > { %5967 = vmatpush1.bf16.msra.mxu0 %v12451_v36  ;;  %v12528_v36 = vld [vmem:[%s13417_s30 + $0xf24] ss:$16 sps:$4 sm:$0xff]  }
 0x32f   : > { %6008 = vmatpush1.bf16.msra.mxu1 %v12454_v37  ;;  %5968 = vmatprep.subr.bf16.mxu0 %v12459_v39  ;;  %v12523_v37 = vld [vmem:[%s13417_s30 + $0xd20] ss:$16 sps:$4 sm:$0xff]  }
 0x330   : > { %6009 = vmatprep.subr.bf16.mxu1 %v12462_v40  ;;  %v12526_v39 = vld [vmem:[%s13417_s30 + $0xf20] ss:$16 sps:$4 sm:$0xff]   ;;  %v13808_v40 = vshrl.u32 %v3080_v33, 7  ;;  %v12572_v33 = vld [vmem:[%s13417_s30 + $0x248] ss:$16 sps:$4 sm:$0xff]  }
 0x332   : > { %5969 = vmatpush1.bf16.msra.mxu0 %v12457_v41  ;;  %v12531_v41 = vld [vmem:[%s13417_s30 + $0xd04] ss:$16 sps:$4 sm:$0xff]  }
 0x333   : > { %6010 = vmatpush1.bf16.msra.mxu1 %v12460_v42  ;;  %5970 = vmatprep.subr.bf16.mxu0 %v12465_v43  ;;  %v12534_v42 = vld [vmem:[%s13417_s30 + $0xf04] ss:$16 sps:$4 sm:$0xff]   ;;  %v12529_v43 = vld [vmem:[%s13417_s30 + $0xd00] ss:$16 sps:$4 sm:$0xff]  }
 0x334   : > { %6011 = vmatprep.subr.bf16.mxu1 %v12468_v47  ;;  %v12532_v47 = vld [vmem:[%s13417_s30 + $0xf00] ss:$16 sps:$4 sm:$0xff]  }
 0x336   : > { %5971 = vmatpush1.bf16.msra.mxu0 %v12463_v48  ;;  %v3078_v48 = vld [vmem:[%s433_s21] sm:$0xf] }
 0x337   : > { %6012 = vmatpush1.bf16.msra.mxu1 %v12466_v49  ;;  %5972 = vmatprep.subr.bf16.mxu0 %v12471_v58  ;;  %v13817_v49 = vsub.s32 0, %v13808_v40  ;;  %v12541_v58 = vld [vmem:[%s13417_s30 + $0xec] ss:$16 sps:$4 sm:$0xff]  }
 0x338   : > { %6013 = vmatprep.subr.bf16.mxu1 %v12474_v50  ;;  %v12544_v50 = vld [vmem:[%s13417_s30 + $0x2ec] ss:$16 sps:$4 sm:$0xff]  }
 0x33a   : > { %5973 = vmatpush1.bf16.msra.mxu0 %v12469_v44  ;;  %v13822_v44 = vsub.s32 1, %v13808_v40 }
 0x33b   : > { %6014 = vmatpush1.bf16.msra.mxu1 %v12472_v13  ;;  %5974 = vmatprep.subr.bf16.mxu0 %v12477_v45  ;;  %v13826_v13 = vcombine.low %v13727_v27, %v13727_v27  ;;  %v13830_v45 = vcombine.low %v13737_v17, %v13737_v17  ;;  %v12545_v17 = vld [vmem:[%s13417_s30 + $0xc8] ss:$16 sps:$4 sm:$0xff]  }
 0x33c   : > { %6015 = vmatprep.subr.bf16.mxu1 %v12480_v46  ;;  %v12539_v46 = vld [vmem:[%s13417_s30 + $0xe8] ss:$16 sps:$4 sm:$0xff]   ;;  %v3087_v27 = vrot.slane %v3078_v48, %v13822_v44 }
 0x33e   : > { %5975 = vmatpush1.bf16.msra.mxu0 %v12475_v51  ;;  %v3083_v51 = vrot.slane %v3078_v48, %v13817_v49  ;;  %v12589_v48 = vld [vmem:[%s13417_s30 + $0x1ec] ss:$16 sps:$4 sm:$0xff]  }
 0x33f   : > { %6016 = vmatpush1.bf16.msra.mxu1 %v12478_v52  ;;  %5976 = vmatprep.subr.bf16.mxu0 %v12483_v53  ;;  %v12542_v52 = vld [vmem:[%s13417_s30 + $0x2e8] ss:$16 sps:$4 sm:$0xff]   ;;  %v12547_v53 = vld [vmem:[%s13417_s30 + $0xcc] ss:$16 sps:$4 sm:$0xff]  }
 0x340   : > { %6017 = vmatprep.subr.bf16.mxu1 %v12486_v55  ;;  %v12550_v55 = vld [vmem:[%s13417_s30 + $0x2cc] ss:$16 sps:$4 sm:$0xff]  }
 0x342   : > { %5977 = vmatpush1.bf16.msra.mxu0 %v12481_v59 }
 0x343   : > { %6018 = vmatpush1.bf16.msra.mxu1 %v12484_v60  ;;  %5978 = vmatprep.subr.bf16.mxu0 %v12489_v61 }
 0x344   : > { %6019 = vmatprep.subr.bf16.mxu1 %v12492_v62  ;;  %v12548_v62 = vld [vmem:[%s13417_s30 + $0x2c8] ss:$16 sps:$4 sm:$0xff]  }
 0x346   : > { %5979 = vmatpush2.bf16.msra.mxu0 %v12487_v63 }
 0x347   : > { %6020 = vmatpush2.bf16.msra.mxu1 %v12490_v0  ;;  %5980 = vmatprep.subr.bf16.mxu0 %v12495_v1  ;;  %v12553_v1 = vld [vmem:[%s13417_s30 + $0xac] ss:$16 sps:$4 sm:$0xff]  }
 0x348   : > { %6021 = vmatprep.subr.bf16.mxu1 %v12498_v2  ;;  %v12556_v2 = vld [vmem:[%s13417_s30 + $0x2ac] ss:$16 sps:$4 sm:$0xff]  }
 0x34a   : > { %5981 = vmatpush2.bf16.msra.mxu0 %v12493_v5 }
 0x34b   : > { %6022 = vmatpush2.bf16.msra.mxu1 %v12496_v6  ;;  %5982 = vmatprep.subr.bf16.mxu0 %v12501_v7 }
 0x34c   : > { %6023 = vmatprep.subr.bf16.mxu1 %v12504_v8 }
 0x34e   : > { %5983 = vmatpush2.bf16.msra.mxu0 %v12499_v15  ;;  %v12551_v15 = vld [vmem:[%s13417_s30 + $0xa8] ss:$16 sps:$4 sm:$0xff]  }
 0x34f   : > { %6024 = vmatpush2.bf16.msra.mxu1 %v12502_v16  ;;  %5984 = vmatprep.subr.bf16.mxu0 %v12507_v18  ;;  %v12554_v18 = vld [vmem:[%s13417_s30 + $0x2a8] ss:$16 sps:$4 sm:$0xff]  }
 0x350   : > { %6025 = vmatprep.subr.bf16.mxu1 %v12510_v19 }
 0x352   : > { %5985 = vmatpush2.bf16.msra.mxu0 %v12505_v23 }
 0x353   : > { %6026 = vmatpush2.bf16.msra.mxu1 %v12508_v54  ;;  %5986 = vmatprep.subr.bf16.mxu0 %v12513_v24  ;;  %v12557_v54 = vld [vmem:[%s13417_s30 + $0x88] ss:$16 sps:$4 sm:$0xff]  }
 0x354   : > { %6027 = vmatprep.subr.bf16.mxu1 %v12516_v25  ;;  %v12560_v24 = vld [vmem:[%s13417_s30 + $0x288] ss:$16 sps:$4 sm:$0xff]   ;;  %v12565_v25 = vld [vmem:[%s13417_s30 + $0x6c] ss:$16 sps:$4 sm:$0xff]  }
 0x356   : > { %5987 = vmatpush2.bf16.msra.mxu0 %v12511_v26  ;;  %v12568_v26 = vld [vmem:[%s13417_s30 + $0x26c] ss:$16 sps:$4 sm:$0xff]  }
 0x357   : > { %6028 = vmatpush2.bf16.msra.mxu1 %v12514_v20  ;;  %5988 = vmatprep.subr.bf16.mxu0 %v12519_v21  ;;  %v12563_v20 = vld [vmem:[%s13417_s30 + $0x68] ss:$16 sps:$4 sm:$0xff]  }
 0x358   : > { %6029 = vmatprep.subr.bf16.mxu1 %v12522_v22  ;;  %v12566_v21 = vld [vmem:[%s13417_s30 + $0x268] ss:$16 sps:$4 sm:$0xff]   ;;  %v12571_v22 = vld [vmem:[%s13417_s30 + $0x4c] ss:$16 sps:$4 sm:$0xff]  }
 0x35a   : > { %5989 = vmatpush2.bf16.msra.mxu0 %v12517_v31  ;;  %v12574_v31 = vld [vmem:[%s13417_s30 + $0x24c] ss:$16 sps:$4 sm:$0xff]  }
 0x35b   : > { %6030 = vmatpush2.bf16.msra.mxu1 %v12520_v32  ;;  %5990 = vmatprep.subr.bf16.mxu0 %v12525_v35  ;;  %v12569_v32 = vld [vmem:[%s13417_s30 + $0x48] ss:$16 sps:$4 sm:$0xff]   ;;  %v12577_v35 = vld [vmem:[%s13417_s30 + $0x2c] ss:$16 sps:$4 sm:$0xff]  }
 0x35c   : > { %6031 = vmatprep.subr.bf16.mxu1 %v12528_v36  ;;  %v12580_v36 = vld [vmem:[%s13417_s30 + $0x22c] ss:$16 sps:$4 sm:$0xff]  }
 0x35e   : > { %5991 = vmatpush2.bf16.msra.mxu0 %v12523_v37  ;;  %v12575_v37 = vld [vmem:[%s13417_s30 + $0x28] ss:$16 sps:$4 sm:$0xff]  }
 0x35f   : > { %6032 = vmatpush2.bf16.msra.mxu1 %v12526_v39  ;;  %5992 = vmatprep.subr.bf16.mxu0 %v12531_v41  ;;  %v12578_v39 = vld [vmem:[%s13417_s30 + $0x228] ss:$16 sps:$4 sm:$0xff]   ;;  %v12583_v41 = vld [vmem:[%s13417_s30 + $0xc] ss:$16 sps:$4 sm:$0xff]  }
 0x360   : > { %6033 = vmatprep.subr.bf16.mxu1 %v12534_v42  ;;  %v12586_v42 = vld [vmem:[%s13417_s30 + $0x20c] ss:$16 sps:$4 sm:$0xff]  }
 0x362   : > { %5993 = vmatpush2.bf16.msra.mxu0 %v12529_v43  ;;  %v12581_v43 = vld [vmem:[%s13417_s30 + $0x8] ss:$16 sps:$4 sm:$0xff]  }
 0x363   : > { %6034 = vmatpush2.bf16.msra.mxu1 %v12532_v47  ;;  %6044 = vmatprep.subr.bf16.mxu0 %v12541_v58  ;;  %v12584_v47 = vld [vmem:[%s13417_s30 + $0x208] ss:$16 sps:$4 sm:$0xff]   ;;  %v12592_v58 = vld [vmem:[%s13417_s30 + $0x3ec] ss:$16 sps:$4 sm:$0xff]  }
 0x364   : > { %6085 = vmatprep.subr.bf16.mxu1 %v12544_v50  ;;  %v12587_v50 = vld [vmem:[%s13417_s30 + $0x1e8] ss:$16 sps:$4 sm:$0xff]  }
 0x365   : > { %v5750_v59 = vpop.f32.mrf.mxu0  ;;  %5995 = vmatmul.mubr.bf16.vlgmr.msra.gmra.mxu0 %v13826_v13 }
 0x366   : > { %v5791_v60 = vpop.f32.mrf.mxu1  ;;  %6036 = vmatmul.mubr.bf16.vlgmr.msra.gmra.mxu1 %v13830_v45  ;;  %v5751_v61 = vadd.f32 %v5750_v59, %v3083_v51  ;;  %6045 = vmatpush1.bf16.msra.mxu0 %v12539_v46  ;;  %v12590_v46 = vld [vmem:[%s13417_s30 + $0x3e8] ss:$16 sps:$4 sm:$0xff]   ;;  %v12595_v51 = vld [vmem:[%s13417_s30 + $0x1cc] ss:$16 sps:$4 sm:$0xff]  }
 0x367   : > { %6086 = vmatpush1.bf16.msra.mxu1 %v12542_v52  ;;  %v5752_v63 = vpop.f32.mrf.mxu0  ;;  %6046 = vmatprep.subr.bf16.mxu0 %v12547_v53  ;;  %v12598_v52 = vld [vmem:[%s13417_s30 + $0x3cc] ss:$16 sps:$4 sm:$0xff]   ;;  %v12593_v53 = vld [vmem:[%s13417_s30 + $0x1c8] ss:$16 sps:$4 sm:$0xff]  }
 0x368   : > { %v5793_v0 = vpop.f32.mrf.mxu1  ;;  %6087 = vmatprep.subr.bf16.mxu1 %v12550_v55  ;;  %v13844_v5 = vadd.f32 %v5791_v60, %v5751_v61  ;;  %v5753_v6 = vadd.f32 %v5752_v63, %v3087_v27  ;;  %6076 = vmatprep.mubr.bf16.mxu0 %v13528_v34  ;;  %v12559_v34 = vld [vmem:[%s13417_s30 + $0x8c] ss:$16 sps:$4 sm:$0xff]   ;;  %v12596_v55 = vld [vmem:[%s13417_s30 + $0x3c8] ss:$16 sps:$4 sm:$0xff]  }
 0x369   : > { %6117 = vmatprep.mubr.bf16.mxu1 %v13532_v38  ;;  %v5754_v7 = vpop.f32.mrf.mxu0  ;;  %v12562_v38 = vld [vmem:[%s13417_s30 + $0x28c] ss:$16 sps:$4 sm:$0xff]   ;;  %v12599_v60 = vld [vmem:[%s13417_s30 + $0x1a8] ss:$16 sps:$4 sm:$0xff]  }
 0x36a   : > { %v5795_v8 = vpop.f32.mrf.mxu1  ;;  %v13849_v16 = vadd.f32 %v5793_v0, %v5753_v6  ;;  %6047 = vmatpush1.bf16.msra.mxu0 %v12545_v17  ;;  %v12601_v27 = vld [vmem:[%s13417_s30 + $0x1ac] ss:$16 sps:$4 sm:$0xff]   ;;  %v12602_v17 = vld [vmem:[%s13417_s30 + $0x3a8] ss:$16 sps:$4 sm:$0xff]  }
 0x36b   : > { %6088 = vmatpush1.bf16.msra.mxu1 %v12548_v62  ;;  %v5755_v19 = vpop.f32.mrf.mxu0  ;;  %6048 = vmatprep.subr.bf16.mxu0 %v12553_v1  ;;  %v12604_v59 = vld [vmem:[%s13417_s30 + $0x3ac] ss:$16 sps:$4 sm:$0xff]   ;;  %v12605_v63 = vld [vmem:[%s13417_s30 + $0x188] ss:$16 sps:$4 sm:$0xff]  }
 0x36c   : > { %v5796_v23 = vpop.f32.mrf.mxu1  ;;  %6089 = vmatprep.subr.bf16.mxu1 %v12556_v2  ;;  %v12607_v61 = vld [vmem:[%s13417_s30 + $0x18c] ss:$16 sps:$4 sm:$0xff]   ;;  %v12608_v0 = vld [vmem:[%s13417_s30 + $0x388] ss:$16 sps:$4 sm:$0xff]  }
 0x36d   : > { %v12610_v62 = vld [vmem:[%s13417_s30 + $0x38c] ss:$16 sps:$4 sm:$0xff]   ;;  %v12611_v6 = vld [vmem:[%s13417_s30 + $0x168] ss:$16 sps:$4 sm:$0xff]  }
 0x36e   : > { %6049 = vmatpush1.bf16.msra.mxu0 %v12551_v15  ;;  %v12613_v1 = vld [vmem:[%s13417_s30 + $0x16c] ss:$16 sps:$4 sm:$0xff]   ;;  %v12614_v7 = vld [vmem:[%s13417_s30 + $0x368] ss:$16 sps:$4 sm:$0xff]  }
 0x36f   : > { %6090 = vmatpush1.bf16.msra.mxu1 %v12554_v18  ;;  %6050 = vmatprep.subr.bf16.mxu0 %v12559_v34  ;;  %v12616_v2 = vld [vmem:[%s13417_s30 + $0x36c] ss:$16 sps:$4 sm:$0xff]   ;;  %v12617_v18 = vld [vmem:[%s13417_s30 + $0x148] ss:$16 sps:$4 sm:$0xff]  }
 0x370   : > { %6091 = vmatprep.subr.bf16.mxu1 %v12562_v38  ;;  %v12619_v8 = vld [vmem:[%s13417_s30 + $0x14c] ss:$16 sps:$4 sm:$0xff]   ;;  %v12620_v19 = vld [vmem:[%s13417_s30 + $0x348] ss:$16 sps:$4 sm:$0xff]  }
 0x371   : > { %v12622_v15 = vld [vmem:[%s13417_s30 + $0x34c] ss:$16 sps:$4 sm:$0xff]   ;;  %v12623_v38 = vld [vmem:[%s13417_s30 + $0x128] ss:$16 sps:$4 sm:$0xff]  }
 0x372   : > { %6051 = vmatpush1.bf16.msra.mxu0 %v12557_v54  ;;  %v12625_v23 = vld [vmem:[%s13417_s30 + $0x12c] ss:$16 sps:$4 sm:$0xff]   ;;  %v12626_v54 = vld [vmem:[%s13417_s30 + $0x328] ss:$16 sps:$4 sm:$0xff]  }
 0x373   : > { %6092 = vmatpush1.bf16.msra.mxu1 %v12560_v24  ;;  %6052 = vmatprep.subr.bf16.mxu0 %v12565_v25  ;;  %v12628_v34 = vld [vmem:[%s13417_s30 + $0x32c] ss:$16 sps:$4 sm:$0xff]  }
 0x374   : > { %6093 = vmatprep.subr.bf16.mxu1 %v12568_v26  ;;  %v12631_v24 = vld [vmem:[%s13417_s30 + $0x10c] ss:$16 sps:$4 sm:$0xff]   ;;  %v12629_v26 = vld [vmem:[%s13417_s30 + $0x108] ss:$16 sps:$4 sm:$0xff]  }
 0x375   : > { %v12634_v25 = vld [vmem:[%s13417_s30 + $0x30c] ss:$16 sps:$4 sm:$0xff]  }
 0x376   : > { %6053 = vmatpush1.bf16.msra.mxu0 %v12563_v20  ;;  %v12632_v20 = vld [vmem:[%s13417_s30 + $0x308] ss:$16 sps:$4 sm:$0xff]  }
 0x377   : > { %6094 = vmatpush1.bf16.msra.mxu1 %v12566_v21  ;;  %6054 = vmatprep.subr.bf16.mxu0 %v12571_v22  ;;  %v12637_v21 = vld [vmem:[%s13417_s30 + $0x4ec] ss:$16 sps:$4 sm:$0xff]  }
 0x378   : > { %6095 = vmatprep.subr.bf16.mxu1 %v12574_v31  ;;  %v12640_v22 = vld [vmem:[%s13417_s30 + $0x6ec] ss:$16 sps:$4 sm:$0xff]   ;;  %v12635_v31 = vld [vmem:[%s13417_s30 + $0x4e8] ss:$16 sps:$4 sm:$0xff]  }
 0x37a   : > { %6055 = vmatpush1.bf16.msra.mxu0 %v12569_v32  ;;  %v12638_v32 = vld [vmem:[%s13417_s30 + $0x6e8] ss:$16 sps:$4 sm:$0xff]  }
 0x37b   : > { %6096 = vmatpush1.bf16.msra.mxu1 %v12572_v33  ;;  %6056 = vmatprep.subr.bf16.mxu0 %v12577_v35  ;;  %v12643_v33 = vld [vmem:[%s13417_s30 + $0x4cc] ss:$16 sps:$4 sm:$0xff]  }
 0x37c   : > { %6097 = vmatprep.subr.bf16.mxu1 %v12580_v36  ;;  %v12646_v35 = vld [vmem:[%s13417_s30 + $0x6cc] ss:$16 sps:$4 sm:$0xff]  }
 0x37e   : > { %6057 = vmatpush1.bf16.msra.mxu0 %v12575_v37 }
 0x37f   : > { %6098 = vmatpush1.bf16.msra.mxu1 %v12578_v39  ;;  %6058 = vmatprep.subr.bf16.mxu0 %v12583_v41  ;;  %v12641_v41 = vld [vmem:[%s13417_s30 + $0x4c8] ss:$16 sps:$4 sm:$0xff]  }
 0x380   : > { %6099 = vmatprep.subr.bf16.mxu1 %v12586_v42  ;;  %v12644_v42 = vld [vmem:[%s13417_s30 + $0x6c8] ss:$16 sps:$4 sm:$0xff]  }
 0x382   : > { %6059 = vmatpush1.bf16.msra.mxu0 %v12581_v43 }
 0x383   : > { %6100 = vmatpush1.bf16.msra.mxu1 %v12584_v47  ;;  %6060 = vmatprep.subr.bf16.mxu0 %v12589_v48  ;;  %v12649_v48 = vld [vmem:[%s13417_s30 + $0x4ac] ss:$16 sps:$4 sm:$0xff]  }
 0x384   : > { %6101 = vmatprep.subr.bf16.mxu1 %v12592_v58  ;;  %v12652_v58 = vld [vmem:[%s13417_s30 + $0x6ac] ss:$16 sps:$4 sm:$0xff]  }
 0x386   : > { %6061 = vmatpush2.bf16.msra.mxu0 %v12587_v50 }
 0x387   : > { %6102 = vmatpush2.bf16.msra.mxu1 %v12590_v46  ;;  %6062 = vmatprep.subr.bf16.mxu0 %v12595_v51  ;;  %v12647_v51 = vld [vmem:[%s13417_s30 + $0x4a8] ss:$16 sps:$4 sm:$0xff]  }
 0x388   : > { %6103 = vmatprep.subr.bf16.mxu1 %v12598_v52  ;;  %v12650_v52 = vld [vmem:[%s13417_s30 + $0x6a8] ss:$16 sps:$4 sm:$0xff]  }
 0x38a   : > { %6063 = vmatpush2.bf16.msra.mxu0 %v12593_v53 }
 0x38b   : > { %6104 = vmatpush2.bf16.msra.mxu1 %v12596_v55  ;;  %6064 = vmatprep.subr.bf16.mxu0 %v12601_v27  ;;  %v12656_v27 = vld [vmem:[%s13417_s30 + $0x688] ss:$16 sps:$4 sm:$0xff]  }
 0x38c   : > { %6105 = vmatprep.subr.bf16.mxu1 %v12604_v59  ;;  %v12661_v59 = vld [vmem:[%s13417_s30 + $0x46c] ss:$16 sps:$4 sm:$0xff]  }
 0x38e   : > { %6065 = vmatpush2.bf16.msra.mxu0 %v12599_v60  ;;  %v12664_v60 = vld [vmem:[%s13417_s30 + $0x66c] ss:$16 sps:$4 sm:$0xff]  }
 0x38f   : > { %6106 = vmatpush2.bf16.msra.mxu1 %v12602_v17  ;;  %6066 = vmatprep.subr.bf16.mxu0 %v12607_v61  ;;  %v12659_v17 = vld [vmem:[%s13417_s30 + $0x468] ss:$16 sps:$4 sm:$0xff]  }
 0x390   : > { %6107 = vmatprep.subr.bf16.mxu1 %v12610_v62  ;;  %v12662_v61 = vld [vmem:[%s13417_s30 + $0x668] ss:$16 sps:$4 sm:$0xff]   ;;  %v12667_v62 = vld [vmem:[%s13417_s30 + $0x44c] ss:$16 sps:$4 sm:$0xff]  }
 0x392   : > { %6067 = vmatpush2.bf16.msra.mxu0 %v12605_v63  ;;  %v12670_v63 = vld [vmem:[%s13417_s30 + $0x64c] ss:$16 sps:$4 sm:$0xff]  }
 0x393   : > { %6108 = vmatpush2.bf16.msra.mxu1 %v12608_v0  ;;  %6068 = vmatprep.subr.bf16.mxu0 %v12613_v1  ;;  %v12665_v0 = vld [vmem:[%s13417_s30 + $0x448] ss:$16 sps:$4 sm:$0xff]  }
 0x394   : > { %6109 = vmatprep.subr.bf16.mxu1 %v12616_v2  ;;  %v12668_v1 = vld [vmem:[%s13417_s30 + $0x648] ss:$16 sps:$4 sm:$0xff]   ;;  %v12673_v2 = vld [vmem:[%s13417_s30 + $0x42c] ss:$16 sps:$4 sm:$0xff]  }
 0x396   : > { %6069 = vmatpush2.bf16.msra.mxu0 %v12611_v6  ;;  %v12676_v6 = vld [vmem:[%s13417_s30 + $0x62c] ss:$16 sps:$4 sm:$0xff]  }
 0x397   : > { %6110 = vmatpush2.bf16.msra.mxu1 %v12614_v7  ;;  %6070 = vmatprep.subr.bf16.mxu0 %v12619_v8  ;;  %v12671_v7 = vld [vmem:[%s13417_s30 + $0x428] ss:$16 sps:$4 sm:$0xff]  }
 0x398   : > { %6111 = vmatprep.subr.bf16.mxu1 %v12622_v15  ;;  %v12674_v8 = vld [vmem:[%s13417_s30 + $0x628] ss:$16 sps:$4 sm:$0xff]   ;;  %v12679_v15 = vld [vmem:[%s13417_s30 + $0x40c] ss:$16 sps:$4 sm:$0xff]  }
 0x39a   : > { %6071 = vmatpush2.bf16.msra.mxu0 %v12617_v18  ;;  %v12682_v18 = vld [vmem:[%s13417_s30 + $0x60c] ss:$16 sps:$4 sm:$0xff]  }
 0x39b   : > { %6112 = vmatpush2.bf16.msra.mxu1 %v12620_v19  ;;  %6072 = vmatprep.subr.bf16.mxu0 %v12625_v23  ;;  %v12677_v19 = vld [vmem:[%s13417_s30 + $0x408] ss:$16 sps:$4 sm:$0xff]  }
 0x39c   : > { %6113 = vmatprep.subr.bf16.mxu1 %v12628_v34  ;;  %v12680_v23 = vld [vmem:[%s13417_s30 + $0x608] ss:$16 sps:$4 sm:$0xff]   ;;  %v12685_v34 = vld [vmem:[%s13417_s30 + $0x5ec] ss:$16 sps:$4 sm:$0xff]  }
 0x39e   : > { %6073 = vmatpush2.bf16.msra.mxu0 %v12623_v38  ;;  %v12688_v38 = vld [vmem:[%s13417_s30 + $0x7ec] ss:$16 sps:$4 sm:$0xff]  }
 0x39f   : > { %6114 = vmatpush2.bf16.msra.mxu1 %v12626_v54  ;;  %6074 = vmatprep.subr.bf16.mxu0 %v12631_v24  ;;  %v12683_v54 = vld [vmem:[%s13417_s30 + $0x5e8] ss:$16 sps:$4 sm:$0xff]  }
 0x3a0   : > { %6115 = vmatprep.subr.bf16.mxu1 %v12634_v25  ;;  %v12686_v24 = vld [vmem:[%s13417_s30 + $0x7e8] ss:$16 sps:$4 sm:$0xff]   ;;  %v12691_v25 = vld [vmem:[%s13417_s30 + $0x5cc] ss:$16 sps:$4 sm:$0xff]  }
 0x3a2   : > { %6075 = vmatpush2.bf16.msra.mxu0 %v12629_v26  ;;  %v12694_v26 = vld [vmem:[%s13417_s30 + $0x7cc] ss:$16 sps:$4 sm:$0xff]  }
 0x3a3   : > { %6116 = vmatpush2.bf16.msra.mxu1 %v12632_v20  ;;  %6126 = vmatprep.subr.bf16.mxu0 %v12637_v21  ;;  %v12689_v20 = vld [vmem:[%s13417_s30 + $0x5c8] ss:$16 sps:$4 sm:$0xff]  }
 0x3a4   : > { %6167 = vmatprep.subr.bf16.mxu1 %v12640_v22  ;;  %v12692_v21 = vld [vmem:[%s13417_s30 + $0x7c8] ss:$16 sps:$4 sm:$0xff]   ;;  %v12697_v22 = vld [vmem:[%s13417_s30 + $0x5ac] ss:$16 sps:$4 sm:$0xff]  }
 0x3a5   : > { %v5832_v36 = vpop.f32.mrf.mxu0  ;;  %6077 = vmatmul.mubr.bf16.vlgmr.msra.gmra.mxu0 %v13554_v56 }
 0x3a6   : > { %v5873_v37 = vpop.f32.mrf.mxu1  ;;  %6118 = vmatmul.mubr.bf16.vlgmr.msra.gmra.mxu1 %v13556_v57  ;;  %v5833_v39 = vadd.f32 %v5832_v36, %v13844_v5  ;;  %6127 = vmatpush1.bf16.msra.mxu0 %v12635_v31  ;;  %v12700_v31 = vld [vmem:[%s13417_s30 + $0x7ac] ss:$16 sps:$4 sm:$0xff]  }
 0x3a7   : > { %6168 = vmatpush1.bf16.msra.mxu1 %v12638_v32  ;;  %v5834_v43 = vpop.f32.mrf.mxu0  ;;  %6128 = vmatprep.subr.bf16.mxu0 %v12643_v33  ;;  %v12695_v32 = vld [vmem:[%s13417_s30 + $0x5a8] ss:$16 sps:$4 sm:$0xff]   ;;  %v12706_v36 = vld [vmem:[%s13417_s30 + $0x78c] ss:$16 sps:$4 sm:$0xff]  }
 0x3a8   : > { %v5875_v47 = vpop.f32.mrf.mxu1  ;;  %6169 = vmatprep.subr.bf16.mxu1 %v12646_v35  ;;  %v13917_v50 = vadd.f32 %v5873_v37, %v5833_v39  ;;  %v5835_v56 = vadd.f32 %v5834_v43, %v13849_v16  ;;  %6158 = vmatprep.mubr.bf16.mxu0 %v13592_v28  ;;  %v12655_v28 = vld [vmem:[%s13417_s30 + $0x48c] ss:$16 sps:$4 sm:$0xff]   ;;  %v12653_v16 = vld [vmem:[%s13417_s30 + $0x488] ss:$16 sps:$4 sm:$0xff]  }
 0x3a9   : > { %6199 = vmatprep.mubr.bf16.mxu1 %v13596_v29  ;;  %v5836_v57 = vpop.f32.mrf.mxu0  ;;  %v12658_v29 = vld [vmem:[%s13417_s30 + $0x68c] ss:$16 sps:$4 sm:$0xff]   ;;  %v12698_v33 = vld [vmem:[%s13417_s30 + $0x7a8] ss:$16 sps:$4 sm:$0xff]  }
 0x3aa   : > { %v5877_v5 = vpop.f32.mrf.mxu1  ;;  %v13922_v46 = vadd.f32 %v5875_v47, %v5835_v56  ;;  %6129 = vmatpush1.bf16.msra.mxu0 %v12641_v41  ;;  %v12703_v35 = vld [vmem:[%s13417_s30 + $0x58c] ss:$16 sps:$4 sm:$0xff]   ;;  %v12701_v37 = vld [vmem:[%s13417_s30 + $0x588] ss:$16 sps:$4 sm:$0xff]  }
 0x3ab   : > { %6170 = vmatpush1.bf16.msra.mxu1 %v12644_v42  ;;  %v5837_v53 = vpop.f32.mrf.mxu0  ;;  %6130 = vmatprep.subr.bf16.mxu0 %v12649_v48  ;;  %v12704_v39 = vld [vmem:[%s13417_s30 + $0x788] ss:$16 sps:$4 sm:$0xff]   ;;  %v12709_v41 = vld [vmem:[%s13417_s30 + $0x56c] ss:$16 sps:$4 sm:$0xff]  }
 0x3ac   : > { %v5878_v55 = vpop.f32.mrf.mxu1  ;;  %6171 = vmatprep.subr.bf16.mxu1 %v12652_v58  ;;  %v12712_v42 = vld [vmem:[%s13417_s30 + $0x76c] ss:$16 sps:$4 sm:$0xff]   ;;  %v12707_v43 = vld [vmem:[%s13417_s30 + $0x568] ss:$16 sps:$4 sm:$0xff]  }
 0x3ad   : > { %v12710_v47 = vld [vmem:[%s13417_s30 + $0x768] ss:$16 sps:$4 sm:$0xff]   ;;  %v12715_v48 = vld [vmem:[%s13417_s30 + $0x54c] ss:$16 sps:$4 sm:$0xff]  }
 0x3ae   : > { %6131 = vmatpush1.bf16.msra.mxu0 %v12647_v51  ;;  %v12718_v58 = vld [vmem:[%s13417_s30 + $0x74c] ss:$16 sps:$4 sm:$0xff]   ;;  %v12713_v56 = vld [vmem:[%s13417_s30 + $0x548] ss:$16 sps:$4 sm:$0xff]  }
 0x3af   : > { %6172 = vmatpush1.bf16.msra.mxu1 %v12650_v52  ;;  %6132 = vmatprep.subr.bf16.mxu0 %v12655_v28  ;;  %v12716_v57 = vld [vmem:[%s13417_s30 + $0x748] ss:$16 sps:$4 sm:$0xff]   ;;  %v12721_v5 = vld [vmem:[%s13417_s30 + $0x52c] ss:$16 sps:$4 sm:$0xff]  }
 0x3b0   : > { %6173 = vmatprep.subr.bf16.mxu1 %v12658_v29  ;;  %v12724_v51 = vld [vmem:[%s13417_s30 + $0x72c] ss:$16 sps:$4 sm:$0xff]   ;;  %v12719_v52 = vld [vmem:[%s13417_s30 + $0x528] ss:$16 sps:$4 sm:$0xff]  }
 0x3b1   : > { %v12722_v53 = vld [vmem:[%s13417_s30 + $0x728] ss:$16 sps:$4 sm:$0xff]   ;;  %v12727_v55 = vld [vmem:[%s13417_s30 + $0x50c] ss:$16 sps:$4 sm:$0xff]  }
 0x3b2   : > { %6133 = vmatpush1.bf16.msra.mxu0 %v12653_v16  ;;  %v12730_v28 = vld [vmem:[%s13417_s30 + $0x70c] ss:$16 sps:$4 sm:$0xff]   ;;  %v12725_v29 = vld [vmem:[%s13417_s30 + $0x508] ss:$16 sps:$4 sm:$0xff]  }
 0x3b3   : > { %6174 = vmatpush1.bf16.msra.mxu1 %v12656_v27  ;;  %6134 = vmatprep.subr.bf16.mxu0 %v12661_v59  ;;  %v12728_v16 = vld [vmem:[%s13417_s30 + $0x708] ss:$16 sps:$4 sm:$0xff]   ;;  %v12733_v27 = vld [vmem:[%s13417_s30 + $0x8ec] ss:$16 sps:$4 sm:$0xff]  }
 0x3b4   : > { %6175 = vmatprep.subr.bf16.mxu1 %v12664_v60  ;;  %v12736_v59 = vld [vmem:[%s13417_s30 + $0xaec] ss:$16 sps:$4 sm:$0xff]   ;;  %v12731_v60 = vld [vmem:[%s13417_s30 + $0x8e8] ss:$16 sps:$4 sm:$0xff]  }
 0x3b6   : > { %6135 = vmatpush1.bf16.msra.mxu0 %v12659_v17  ;;  %v12734_v17 = vld [vmem:[%s13417_s30 + $0xae8] ss:$16 sps:$4 sm:$0xff]  }
 0x3b7   : > { %6176 = vmatpush1.bf16.msra.mxu1 %v12662_v61  ;;  %6136 = vmatprep.subr.bf16.mxu0 %v12667_v62  ;;  %v12739_v61 = vld [vmem:[%s13417_s30 + $0x8cc] ss:$16 sps:$4 sm:$0xff]  }
 0x3b8   : > { %6177 = vmatprep.subr.bf16.mxu1 %v12670_v63  ;;  %v12742_v62 = vld [vmem:[%s13417_s30 + $0xacc] ss:$16 sps:$4 sm:$0xff]  }
 0x3ba   : > { %6137 = vmatpush1.bf16.msra.mxu0 %v12665_v0 }
 0x3bb   : > { %6178 = vmatpush1.bf16.msra.mxu1 %v12668_v1  ;;  %6138 = vmatprep.subr.bf16.mxu0 %v12673_v2  ;;  %v12737_v2 = vld [vmem:[%s13417_s30 + $0x8c8] ss:$16 sps:$4 sm:$0xff]  }
 0x3bc   : > { %6179 = vmatprep.subr.bf16.mxu1 %v12676_v6  ;;  %v12740_v6 = vld [vmem:[%s13417_s30 + $0xac8] ss:$16 sps:$4 sm:$0xff]  }
 0x3be   : > { %6139 = vmatpush1.bf16.msra.mxu0 %v12671_v7 }
 0x3bf   : > { %6180 = vmatpush1.bf16.msra.mxu1 %v12674_v8  ;;  %6140 = vmatprep.subr.bf16.mxu0 %v12679_v15  ;;  %v12745_v15 = vld [vmem:[%s13417_s30 + $0x8ac] ss:$16 sps:$4 sm:$0xff]  }
 0x3c0   : > { %6181 = vmatprep.subr.bf16.mxu1 %v12682_v18  ;;  %v12748_v18 = vld [vmem:[%s13417_s30 + $0xaac] ss:$16 sps:$4 sm:$0xff]  }
 0x3c2   : > { %6141 = vmatpush1.bf16.msra.mxu0 %v12677_v19 }
 0x3c3   : > { %6182 = vmatpush1.bf16.msra.mxu1 %v12680_v23  ;;  %6142 = vmatprep.subr.bf16.mxu0 %v12685_v34  ;;  %v12743_v34 = vld [vmem:[%s13417_s30 + $0x8a8] ss:$16 sps:$4 sm:$0xff]  }
 0x3c4   : > { %6183 = vmatprep.subr.bf16.mxu1 %v12688_v38  ;;  %v12746_v38 = vld [vmem:[%s13417_s30 + $0xaa8] ss:$16 sps:$4 sm:$0xff]  }
 0x3c6   : > { %6143 = vmatpush2.bf16.msra.mxu0 %v12683_v54 }
 0x3c7   : > { %6184 = vmatpush2.bf16.msra.mxu1 %v12686_v24  ;;  %6144 = vmatprep.subr.bf16.mxu0 %v12691_v25  ;;  %v12752_v25 = vld [vmem:[%s13417_s30 + $0xa88] ss:$16 sps:$4 sm:$0xff]  }
 0x3c8   : > { %6185 = vmatprep.subr.bf16.mxu1 %v12694_v26  ;;  %v12757_v26 = vld [vmem:[%s13417_s30 + $0x86c] ss:$16 sps:$4 sm:$0xff]  }
 0x3ca   : > { %6145 = vmatpush2.bf16.msra.mxu0 %v12689_v20  ;;  %v12760_v20 = vld [vmem:[%s13417_s30 + $0xa6c] ss:$16 sps:$4 sm:$0xff]  }
 0x3cb   : > { %6186 = vmatpush2.bf16.msra.mxu1 %v12692_v21  ;;  %6146 = vmatprep.subr.bf16.mxu0 %v12697_v22  ;;  %v12755_v21 = vld [vmem:[%s13417_s30 + $0x868] ss:$16 sps:$4 sm:$0xff]  }
 0x3cc   : > { %6187 = vmatprep.subr.bf16.mxu1 %v12700_v31  ;;  %v12758_v22 = vld [vmem:[%s13417_s30 + $0xa68] ss:$16 sps:$4 sm:$0xff]   ;;  %v12763_v31 = vld [vmem:[%s13417_s30 + $0x84c] ss:$16 sps:$4 sm:$0xff]  }
 0x3ce   : > { %6147 = vmatpush2.bf16.msra.mxu0 %v12695_v32  ;;  %v12766_v32 = vld [vmem:[%s13417_s30 + $0xa4c] ss:$16 sps:$4 sm:$0xff]  }
 0x3cf   : > { %6188 = vmatpush2.bf16.msra.mxu1 %v12698_v33  ;;  %6148 = vmatprep.subr.bf16.mxu0 %v12703_v35  ;;  %v12761_v33 = vld [vmem:[%s13417_s30 + $0x848] ss:$16 sps:$4 sm:$0xff]  }
 0x3d0   : > { %6189 = vmatprep.subr.bf16.mxu1 %v12706_v36  ;;  %v12764_v35 = vld [vmem:[%s13417_s30 + $0xa48] ss:$16 sps:$4 sm:$0xff]   ;;  %v12769_v36 = vld [vmem:[%s13417_s30 + $0x82c] ss:$16 sps:$4 sm:$0xff]  }
 0x3d2   : > { %6149 = vmatpush2.bf16.msra.mxu0 %v12701_v37  ;;  %v12772_v37 = vld [vmem:[%s13417_s30 + $0xa2c] ss:$16 sps:$4 sm:$0xff]  }
 0x3d3   : > { %6190 = vmatpush2.bf16.msra.mxu1 %v12704_v39  ;;  %6150 = vmatprep.subr.bf16.mxu0 %v12709_v41  ;;  %v12767_v39 = vld [vmem:[%s13417_s30 + $0x828] ss:$16 sps:$4 sm:$0xff]  }
 0x3d4   : > { %6191 = vmatprep.subr.bf16.mxu1 %v12712_v42  ;;  %v12770_v41 = vld [vmem:[%s13417_s30 + $0xa28] ss:$16 sps:$4 sm:$0xff]   ;;  %v12775_v42 = vld [vmem:[%s13417_s30 + $0x80c] ss:$16 sps:$4 sm:$0xff]  }
 0x3d6   : > { %6151 = vmatpush2.bf16.msra.mxu0 %v12707_v43  ;;  %v12778_v43 = vld [vmem:[%s13417_s30 + $0xa0c] ss:$16 sps:$4 sm:$0xff]  }
 0x3d7   : > { %6192 = vmatpush2.bf16.msra.mxu1 %v12710_v47  ;;  %6152 = vmatprep.subr.bf16.mxu0 %v12715_v48  ;;  %v12773_v47 = vld [vmem:[%s13417_s30 + $0x808] ss:$16 sps:$4 sm:$0xff]  }
 0x3d8   : > { %6193 = vmatprep.subr.bf16.mxu1 %v12718_v58  ;;  %v12776_v48 = vld [vmem:[%s13417_s30 + $0xa08] ss:$16 sps:$4 sm:$0xff]   ;;  %v12781_v58 = vld [vmem:[%s13417_s30 + $0x9ec] ss:$16 sps:$4 sm:$0xff]  }
 0x3da   : > { %6153 = vmatpush2.bf16.msra.mxu0 %v12713_v56  ;;  %v12784_v56 = vld [vmem:[%s13417_s30 + $0xbec] ss:$16 sps:$4 sm:$0xff]  }
 0x3db   : > { %6194 = vmatpush2.bf16.msra.mxu1 %v12716_v57  ;;  %6154 = vmatprep.subr.bf16.mxu0 %v12721_v5  ;;  %v12779_v57 = vld [vmem:[%s13417_s30 + $0x9e8] ss:$16 sps:$4 sm:$0xff]  }
 0x3dc   : > { %6195 = vmatprep.subr.bf16.mxu1 %v12724_v51  ;;  %v12782_v5 = vld [vmem:[%s13417_s30 + $0xbe8] ss:$16 sps:$4 sm:$0xff]   ;;  %v12787_v51 = vld [vmem:[%s13417_s30 + $0x9cc] ss:$16 sps:$4 sm:$0xff]  }
 0x3de   : > { %6155 = vmatpush2.bf16.msra.mxu0 %v12719_v52  ;;  %v12790_v52 = vld [vmem:[%s13417_s30 + $0xbcc] ss:$16 sps:$4 sm:$0xff]  }
 0x3df   : > { %6196 = vmatpush2.bf16.msra.mxu1 %v12722_v53  ;;  %6156 = vmatprep.subr.bf16.mxu0 %v12727_v55  ;;  %v12785_v53 = vld [vmem:[%s13417_s30 + $0x9c8] ss:$16 sps:$4 sm:$0xff]  }
 0x3e0   : > { %6197 = vmatprep.subr.bf16.mxu1 %v12730_v28  ;;  %v12788_v55 = vld [vmem:[%s13417_s30 + $0xbc8] ss:$16 sps:$4 sm:$0xff]   ;;  %v12793_v28 = vld [vmem:[%s13417_s30 + $0x9ac] ss:$16 sps:$4 sm:$0xff]  }
 0x3e2   : > { %6157 = vmatpush2.bf16.msra.mxu0 %v12725_v29  ;;  %v12796_v29 = vld [vmem:[%s13417_s30 + $0xbac] ss:$16 sps:$4 sm:$0xff]  }
 0x3e3   : > { %6198 = vmatpush2.bf16.msra.mxu1 %v12728_v16  ;;  %6208 = vmatprep.subr.bf16.mxu0 %v12733_v27  ;;  %v12791_v16 = vld [vmem:[%s13417_s30 + $0x9a8] ss:$16 sps:$4 sm:$0xff]  }
 0x3e4   : > { %6249 = vmatprep.subr.bf16.mxu1 %v12736_v59  ;;  %v12794_v27 = vld [vmem:[%s13417_s30 + $0xba8] ss:$16 sps:$4 sm:$0xff]   ;;  %v12799_v59 = vld [vmem:[%s13417_s30 + $0x98c] ss:$16 sps:$4 sm:$0xff]  }
 0x3e5   : > { %v5914_v63 = vpop.f32.mrf.mxu0  ;;  %6159 = vmatmul.mubr.bf16.vlgmr.msra.gmra.mxu0 %v13640_v3 }
 0x3e6   : > { %v5955_v0 = vpop.f32.mrf.mxu1  ;;  %6200 = vmatmul.mubr.bf16.vlgmr.msra.gmra.mxu1 %v13644_v4  ;;  %v5915_v1 = vadd.f32 %v5914_v63, %v13917_v50  ;;  %6209 = vmatpush1.bf16.msra.mxu0 %v12731_v60  ;;  %v12802_v60 = vld [vmem:[%s13417_s30 + $0xb8c] ss:$16 sps:$4 sm:$0xff]  }
 0x3e7   : > { %6250 = vmatpush1.bf16.msra.mxu1 %v12734_v17  ;;  %v5916_v7 = vpop.f32.mrf.mxu0  ;;  %6210 = vmatprep.subr.bf16.mxu0 %v12739_v61  ;;  %v12797_v17 = vld [vmem:[%s13417_s30 + $0x988] ss:$16 sps:$4 sm:$0xff]   ;;  %v12808_v63 = vld [vmem:[%s13417_s30 + $0xb6c] ss:$16 sps:$4 sm:$0xff]  }
 0x3e8   : > { %v5957_v8 = vpop.f32.mrf.mxu1  ;;  %6251 = vmatprep.subr.bf16.mxu1 %v12742_v62  ;;  %v13991_v19 = vadd.f32 %v5955_v0, %v5915_v1  ;;  %v5917_v3 = vadd.f32 %v5916_v7, %v13922_v46  ;;  %6240 = vmatprep.mubr.bf16.mxu0 %v13656_v12  ;;  %v12751_v12 = vld [vmem:[%s13417_s30 + $0x88c] ss:$16 sps:$4 sm:$0xff]   ;;  %v12749_v46 = vld [vmem:[%s13417_s30 + $0x888] ss:$16 sps:$4 sm:$0xff]  }
 0x3e9   : > { %6281 = vmatprep.mubr.bf16.mxu1 %v13660_v14  ;;  %v5918_v4 = vpop.f32.mrf.mxu0  ;;  %v12754_v14 = vld [vmem:[%s13417_s30 + $0xa8c] ss:$16 sps:$4 sm:$0xff]   ;;  %v12800_v61 = vld [vmem:[%s13417_s30 + $0xb88] ss:$16 sps:$4 sm:$0xff]  }
 0x3ea   : > { %v5959_v50 = vpop.f32.mrf.mxu1  ;;  %v13996_v23 = vadd.f32 %v5957_v8, %v5917_v3  ;;  %6211 = vmatpush1.bf16.msra.mxu0 %v12737_v2  ;;  %v12805_v62 = vld [vmem:[%s13417_s30 + $0x96c] ss:$16 sps:$4 sm:$0xff]   ;;  %v12803_v0 = vld [vmem:[%s13417_s30 + $0x968] ss:$16 sps:$4 sm:$0xff]  }
 0x3eb   : > { %6252 = vmatpush1.bf16.msra.mxu1 %v12740_v6  ;;  %v5919_v54 = vpop.f32.mrf.mxu0  ;;  %6212 = vmatprep.subr.bf16.mxu0 %v12745_v15  ;;  %v12806_v1 = vld [vmem:[%s13417_s30 + $0xb68] ss:$16 sps:$4 sm:$0xff]   ;;  %v12811_v2 = vld [vmem:[%s13417_s30 + $0x94c] ss:$16 sps:$4 sm:$0xff]  }
 0x3ec   : > { %v5960_v24 = vpop.f32.mrf.mxu1  ;;  %6253 = vmatprep.subr.bf16.mxu1 %v12748_v18  ;;  %v12814_v6 = vld [vmem:[%s13417_s30 + $0xb4c] ss:$16 sps:$4 sm:$0xff]   ;;  %v12809_v7 = vld [vmem:[%s13417_s30 + $0x948] ss:$16 sps:$4 sm:$0xff]  }
 0x3ed   : > { %v12812_v8 = vld [vmem:[%s13417_s30 + $0xb48] ss:$16 sps:$4 sm:$0xff]   ;;  %v12817_v15 = vld [vmem:[%s13417_s30 + $0x92c] ss:$16 sps:$4 sm:$0xff]  }
 0x3ee   : > { %6213 = vmatpush1.bf16.msra.mxu0 %v12743_v34  ;;  %v12820_v18 = vld [vmem:[%s13417_s30 + $0xb2c] ss:$16 sps:$4 sm:$0xff]   ;;  %v12815_v3 = vld [vmem:[%s13417_s30 + $0x928] ss:$16 sps:$4 sm:$0xff]  }
 0x3ef   : > { %6254 = vmatpush1.bf16.msra.mxu1 %v12746_v38  ;;  %6214 = vmatprep.subr.bf16.mxu0 %v12751_v12  ;;  %v12818_v4 = vld [vmem:[%s13417_s30 + $0xb28] ss:$16 sps:$4 sm:$0xff]   ;;  %v12823_v50 = vld [vmem:[%s13417_s30 + $0x90c] ss:$16 sps:$4 sm:$0xff]  }
 0x3f0   : > { %6255 = vmatprep.subr.bf16.mxu1 %v12754_v14  ;;  %v12826_v34 = vld [vmem:[%s13417_s30 + $0xb0c] ss:$16 sps:$4 sm:$0xff]   ;;  %v12821_v38 = vld [vmem:[%s13417_s30 + $0x908] ss:$16 sps:$4 sm:$0xff]  }
 0x3f1   : > { %v12824_v54 = vld [vmem:[%s13417_s30 + $0xb08] ss:$16 sps:$4 sm:$0xff]   ;;  %v12829_v24 = vld [vmem:[%s13417_s30 + $0xcec] ss:$16 sps:$4 sm:$0xff]  }
 0x3f2   : > { %6215 = vmatpush1.bf16.msra.mxu0 %v12749_v46  ;;  %v12832_v12 = vld [vmem:[%s13417_s30 + $0xeec] ss:$16 sps:$4 sm:$0xff]   ;;  %v12827_v14 = vld [vmem:[%s13417_s30 + $0xce8] ss:$16 sps:$4 sm:$0xff]  }
 0x3f3   : > { %6256 = vmatpush1.bf16.msra.mxu1 %v12752_v25  ;;  %6216 = vmatprep.subr.bf16.mxu0 %v12757_v26  ;;  %v12830_v46 = vld [vmem:[%s13417_s30 + $0xee8] ss:$16 sps:$4 sm:$0xff]   ;;  %v12835_v25 = vld [vmem:[%s13417_s30 + $0xccc] ss:$16 sps:$4 sm:$0xff]  }
 0x3f4   : > { %6257 = vmatprep.subr.bf16.mxu1 %v12760_v20  ;;  %v12838_v26 = vld [vmem:[%s13417_s30 + $0xecc] ss:$16 sps:$4 sm:$0xff]  }
 0x3f6   : > { %6217 = vmatpush1.bf16.msra.mxu0 %v12755_v21 }
 0x3f7   : > { %6258 = vmatpush1.bf16.msra.mxu1 %v12758_v22  ;;  %6218 = vmatprep.subr.bf16.mxu0 %v12763_v31  ;;  %v12833_v31 = vld [vmem:[%s13417_s30 + $0xcc8] ss:$16 sps:$4 sm:$0xff]  }
 0x3f8   : > { %6259 = vmatprep.subr.bf16.mxu1 %v12766_v32  ;;  %v12836_v32 = vld [vmem:[%s13417_s30 + $0xec8] ss:$16 sps:$4 sm:$0xff]  }
 0x3fa   : > { %6219 = vmatpush1.bf16.msra.mxu0 %v12761_v33 }
 0x3fb   : > { %6260 = vmatpush1.bf16.msra.mxu1 %v12764_v35  ;;  %6220 = vmatprep.subr.bf16.mxu0 %v12769_v36  ;;  %v12841_v36 = vld [vmem:[%s13417_s30 + $0xcac] ss:$16 sps:$4 sm:$0xff]  }
 0x3fc   : > { %6261 = vmatprep.subr.bf16.mxu1 %v12772_v37 }
 0x3fe   : > { %6221 = vmatpush1.bf16.msra.mxu0 %v12767_v39  ;;  %v12839_v39 = vld [vmem:[%s13417_s30 + $0xca8] ss:$16 sps:$4 sm:$0xff]  }
 0x3ff   : > { %6262 = vmatpush1.bf16.msra.mxu1 %v12770_v41  ;;  %6222 = vmatprep.subr.bf16.mxu0 %v12775_v42  ;;  %v12842_v41 = vld [vmem:[%s13417_s30 + $0xea8] ss:$16 sps:$4 sm:$0xff]  }
 0x400   : > { %6263 = vmatprep.subr.bf16.mxu1 %v12778_v43 }
 0x402   : > { %6223 = vmatpush1.bf16.msra.mxu0 %v12773_v47  ;;  %v12847_v47 = vld [vmem:[%s13417_s30 + $0xc8c] ss:$16 sps:$4 sm:$0xff]  }
 0x403   : > { %6264 = vmatpush1.bf16.msra.mxu1 %v12776_v48  ;;  %6224 = vmatprep.subr.bf16.mxu0 %v12781_v58  ;;  %v12848_v48 = vld [vmem:[%s13417_s30 + $0xe88] ss:$16 sps:$4 sm:$0xff]   ;;  %v12853_v58 = vld [vmem:[%s13417_s30 + $0xc6c] ss:$16 sps:$4 sm:$0xff]  }
 0x404   : > { %6265 = vmatprep.subr.bf16.mxu1 %v12784_v56  ;;  %v12856_v56 = vld [vmem:[%s13417_s30 + $0xe6c] ss:$16 sps:$4 sm:$0xff]  }
 0x406   : > { %6225 = vmatpush2.bf16.msra.mxu0 %v12779_v57  ;;  %v12851_v57 = vld [vmem:[%s13417_s30 + $0xc68] ss:$16 sps:$4 sm:$0xff]  }
 0x407   : > { %6266 = vmatpush2.bf16.msra.mxu1 %v12782_v5  ;;  %6226 = vmatprep.subr.bf16.mxu0 %v12787_v51  ;;  %v12854_v5 = vld [vmem:[%s13417_s30 + $0xe68] ss:$16 sps:$4 sm:$0xff]   ;;  %v12859_v51 = vld [vmem:[%s13417_s30 + $0xc4c] ss:$16 sps:$4 sm:$0xff]  }
 0x408   : > { %6267 = vmatprep.subr.bf16.mxu1 %v12790_v52  ;;  %v12862_v52 = vld [vmem:[%s13417_s30 + $0xe4c] ss:$16 sps:$4 sm:$0xff]  }
 0x40a   : > { %6227 = vmatpush2.bf16.msra.mxu0 %v12785_v53  ;;  %v12857_v53 = vld [vmem:[%s13417_s30 + $0xc48] ss:$16 sps:$4 sm:$0xff]  }
 0x40b   : > { %6268 = vmatpush2.bf16.msra.mxu1 %v12788_v55  ;;  %6228 = vmatprep.subr.bf16.mxu0 %v12793_v28  ;;  %v12860_v55 = vld [vmem:[%s13417_s30 + $0xe48] ss:$16 sps:$4 sm:$0xff]   ;;  %v12865_v28 = vld [vmem:[%s13417_s30 + $0xc2c] ss:$16 sps:$4 sm:$0xff]  }
 0x40c   : > { %6269 = vmatprep.subr.bf16.mxu1 %v12796_v29  ;;  %v12868_v29 = vld [vmem:[%s13417_s30 + $0xe2c] ss:$16 sps:$4 sm:$0xff]  }
 0x40e   : > { %6229 = vmatpush2.bf16.msra.mxu0 %v12791_v16  ;;  %v12863_v16 = vld [vmem:[%s13417_s30 + $0xc28] ss:$16 sps:$4 sm:$0xff]  }
 0x40f   : > { %6270 = vmatpush2.bf16.msra.mxu1 %v12794_v27  ;;  %6230 = vmatprep.subr.bf16.mxu0 %v12799_v59  ;;  %v12866_v27 = vld [vmem:[%s13417_s30 + $0xe28] ss:$16 sps:$4 sm:$0xff]   ;;  %v12871_v59 = vld [vmem:[%s13417_s30 + $0xc0c] ss:$16 sps:$4 sm:$0xff]  }
 0x410   : > { %6271 = vmatprep.subr.bf16.mxu1 %v12802_v60  ;;  %v12874_v60 = vld [vmem:[%s13417_s30 + $0xe0c] ss:$16 sps:$4 sm:$0xff]  }
 0x412   : > { %6231 = vmatpush2.bf16.msra.mxu0 %v12797_v17  ;;  %v12869_v17 = vld [vmem:[%s13417_s30 + $0xc08] ss:$16 sps:$4 sm:$0xff]  }
 0x413   : > { %6272 = vmatpush2.bf16.msra.mxu1 %v12800_v61  ;;  %6232 = vmatprep.subr.bf16.mxu0 %v12805_v62  ;;  %v12872_v61 = vld [vmem:[%s13417_s30 + $0xe08] ss:$16 sps:$4 sm:$0xff]   ;;  %v12877_v62 = vld [vmem:[%s13417_s30 + $0xdec] ss:$16 sps:$4 sm:$0xff]  }
 0x414   : > { %6273 = vmatprep.subr.bf16.mxu1 %v12808_v63  ;;  %v12880_v63 = vld [vmem:[%s13417_s30 + $0xfec] ss:$16 sps:$4 sm:$0xff]  }
 0x416   : > { %6233 = vmatpush2.bf16.msra.mxu0 %v12803_v0  ;;  %v12875_v0 = vld [vmem:[%s13417_s30 + $0xde8] ss:$16 sps:$4 sm:$0xff]  }
 0x417   : > { %6274 = vmatpush2.bf16.msra.mxu1 %v12806_v1  ;;  %6234 = vmatprep.subr.bf16.mxu0 %v12811_v2  ;;  %v12878_v1 = vld [vmem:[%s13417_s30 + $0xfe8] ss:$16 sps:$4 sm:$0xff]   ;;  %v12883_v2 = vld [vmem:[%s13417_s30 + $0xdcc] ss:$16 sps:$4 sm:$0xff]  }
 0x418   : > { %6275 = vmatprep.subr.bf16.mxu1 %v12814_v6  ;;  %v12886_v6 = vld [vmem:[%s13417_s30 + $0xfcc] ss:$16 sps:$4 sm:$0xff]  }
 0x41a   : > { %6235 = vmatpush2.bf16.msra.mxu0 %v12809_v7  ;;  %v12881_v7 = vld [vmem:[%s13417_s30 + $0xdc8] ss:$16 sps:$4 sm:$0xff]  }
 0x41b   : > { %6276 = vmatpush2.bf16.msra.mxu1 %v12812_v8  ;;  %6236 = vmatprep.subr.bf16.mxu0 %v12817_v15  ;;  %v12884_v8 = vld [vmem:[%s13417_s30 + $0xfc8] ss:$16 sps:$4 sm:$0xff]   ;;  %v12889_v15 = vld [vmem:[%s13417_s30 + $0xdac] ss:$16 sps:$4 sm:$0xff]  }
 0x41c   : > { %6277 = vmatprep.subr.bf16.mxu1 %v12820_v18  ;;  %v12892_v18 = vld [vmem:[%s13417_s30 + $0xfac] ss:$16 sps:$4 sm:$0xff]  }
 0x41e   : > { %6237 = vmatpush2.bf16.msra.mxu0 %v12815_v3  ;;  %v12887_v3 = vld [vmem:[%s13417_s30 + $0xda8] ss:$16 sps:$4 sm:$0xff]  }
 0x41f   : > { %6278 = vmatpush2.bf16.msra.mxu1 %v12818_v4  ;;  %6238 = vmatprep.subr.bf16.mxu0 %v12823_v50  ;;  %v12890_v4 = vld [vmem:[%s13417_s30 + $0xfa8] ss:$16 sps:$4 sm:$0xff]   ;;  %v12895_v50 = vld [vmem:[%s13417_s30 + $0xd8c] ss:$16 sps:$4 sm:$0xff]  }
 0x420   : > { %6279 = vmatprep.subr.bf16.mxu1 %v12826_v34  ;;  %v12898_v34 = vld [vmem:[%s13417_s30 + $0xf8c] ss:$16 sps:$4 sm:$0xff]  }
 0x422   : > { %6239 = vmatpush2.bf16.msra.mxu0 %v12821_v38  ;;  %v12893_v38 = vld [vmem:[%s13417_s30 + $0xd88] ss:$16 sps:$4 sm:$0xff]  }
 0x423   : > { %6280 = vmatpush2.bf16.msra.mxu1 %v12824_v54  ;;  %6290 = vmatprep.subr.bf16.mxu0 %v12829_v24  ;;  %v12896_v54 = vld [vmem:[%s13417_s30 + $0xf88] ss:$16 sps:$4 sm:$0xff]   ;;  %v12901_v24 = vld [vmem:[%s13417_s30 + $0xd6c] ss:$16 sps:$4 sm:$0xff]  }
 0x424   : > { %6331 = vmatprep.subr.bf16.mxu1 %v12832_v12  ;;  %v12904_v12 = vld [vmem:[%s13417_s30 + $0xf6c] ss:$16 sps:$4 sm:$0xff]  }
 0x425   : > { %v5996_v20 = vpop.f32.mrf.mxu0  ;;  %6241 = vmatmul.mubr.bf16.vlgmr.msra.gmra.mxu0 %v13731_v30  ;;  %v12844_v30 = vld [vmem:[%s13417_s30 + $0xeac] ss:$16 sps:$4 sm:$0xff]  }
 0x426   : > { %v6037_v21 = vpop.f32.mrf.mxu1  ;;  %6282 = vmatmul.mubr.bf16.vlgmr.msra.gmra.mxu1 %v13735_v11  ;;  %v5997_v22 = vadd.f32 %v5996_v20, %v13991_v19  ;;  %6291 = vmatpush1.bf16.msra.mxu0 %v12827_v14  ;;  %v12899_v14 = vld [vmem:[%s13417_s30 + $0xd68] ss:$16 sps:$4 sm:$0xff]  }
 0x427   : > { %6332 = vmatpush1.bf16.msra.mxu1 %v12830_v46  ;;  %v14063_v33 = vpop.f32.mrf.mxu0  ;;  %6292 = vmatprep.subr.bf16.mxu0 %v12835_v25  ;;  %v12902_v46 = vld [vmem:[%s13417_s30 + $0xf68] ss:$16 sps:$4 sm:$0xff]   ;;  %v12907_v25 = vld [vmem:[%s13417_s30 + $0xd4c] ss:$16 sps:$4 sm:$0xff]  }
 0x428   : > { %v14065_v35 = vpop.f32.mrf.mxu1  ;;  %6333 = vmatprep.subr.bf16.mxu1 %v12838_v26  ;;  %v14069_v37 = vadd.f32 %v6037_v21, %v5997_v22  ;;  %6322 = vmatprep.mubr.bf16.mxu0 %v13744_v9  ;;  %v12850_v9 = vld [vmem:[%s13417_s30 + $0xe8c] ss:$16 sps:$4 sm:$0xff]   ;;  %v12905_v20 = vld [vmem:[%s13417_s30 + $0xd48] ss:$16 sps:$4 sm:$0xff]  }
 0x429   : > { %6363 = vmatprep.mubr.bf16.mxu1 %v13748_v10  ;;  %v6000_v11 = vpop.f32.mrf.mxu0  ;;  %v12845_v10 = vld [vmem:[%s13417_s30 + $0xc88] ss:$16 sps:$4 sm:$0xff]   ;;  %v12910_v26 = vld [vmem:[%s13417_s30 + $0xf4c] ss:$16 sps:$4 sm:$0xff]  }
 0x42a   : > { %v6041_v19 = vpop.f32.mrf.mxu1  ;;  %6293 = vmatpush1.bf16.msra.mxu0 %v12833_v31  ;;  %v12908_v21 = vld [vmem:[%s13417_s30 + $0xf48] ss:$16 sps:$4 sm:$0xff]   ;;  %v12913_v22 = vld [vmem:[%s13417_s30 + $0xd2c] ss:$16 sps:$4 sm:$0xff]  }
 0x42b   : > { %6334 = vmatpush1.bf16.msra.mxu1 %v12836_v32  ;;  %v6001_v42 = vpop.f32.mrf.mxu0  ;;  %6294 = vmatprep.subr.bf16.mxu0 %v12841_v36  ;;  %v12916_v31 = vld [vmem:[%s13417_s30 + $0xf2c] ss:$16 sps:$4 sm:$0xff]   ;;  %v5999_v32 = vadd.f32 %v14063_v33, %v13996_v23  ;;  %v12911_v36 = vld [vmem:[%s13417_s30 + $0xd28] ss:$16 sps:$4 sm:$0xff]   ;;  %v14133_v23 = vsub.s32 2, %v13808_v40 }
 0x42c   : > { %v6042_v43 = vpop.f32.mrf.mxu1  ;;  %6335 = vmatprep.subr.bf16.mxu1 %v12844_v30  ;;  %v12914_v30 = vld [vmem:[%s13417_s30 + $0xf28] ss:$16 sps:$4 sm:$0xff]   ;;  %v12919_v11 = vld [vmem:[%s13417_s30 + $0xd0c] ss:$16 sps:$4 sm:$0xff]  }
 0x42d   : > { %v12922_v19 = vld [vmem:[%s13417_s30 + $0xf0c] ss:$16 sps:$4 sm:$0xff]   ;;  %v12917_v43 = vld [vmem:[%s13417_s30 + $0xd08] ss:$16 sps:$4 sm:$0xff]  }
 0x42e   : > { %6295 = vmatpush1.bf16.msra.mxu0 %v12839_v39  ;;  %v6040_v39 = vadd.f32 %v14065_v35, %v5999_v32  ;;  %v6500_v42 = vld [vmem:[%s13426_s11 + $0x3c0] sm:$0xff] }
 0x42f   : > { %6336 = vmatpush1.bf16.msra.mxu1 %v12842_v41  ;;  %6296 = vmatprep.subr.bf16.mxu0 %v12847_v47  ;;  %v6492_v41 = vld [vmem:[%s13426_s11 + $0x380] sm:$0xff] }
 0x430   : > { %6337 = vmatprep.subr.bf16.mxu1 %v12850_v9  ;;  %v12920_v47 = vld [vmem:[%s13417_s30 + $0xf08] ss:$16 sps:$4 sm:$0xff]   ;;  %v11609_v33 = vcombine.high %v6492_v41, %v6500_v42  ;;  %v6373_v9 = vmax.f32 %v6040_v39, 0.0 }
 0x431   : > { %v6476_v35 = vld [vmem:[%s13426_s11 + $0x300] sm:$0xff] }
 0x432   : > { %6297 = vmatpush1.bf16.msra.mxu0 %v12845_v10  ;;  %v14136_v10 = vsub.s32 3, %v13808_v40  ;;  %v6716_v32 = vld [vmem:[%s13426_s11 + $0xa80] sm:$0xff] }
 0x433   : > { %6338 = vmatpush1.bf16.msra.mxu1 %v12848_v48  ;;  %6298 = vmatprep.subr.bf16.mxu0 %v12853_v58  ;;  %v6484_v48 = vld [vmem:[%s13426_s11 + $0x340] sm:$0xff]  ;;  %v12923_v58 = vld [vmem:[%s433_s21] sm:$0xf] }
 0x434   : > { %6339 = vmatprep.subr.bf16.mxu1 %v12856_v56  ;;  %v3091_v56 = vrot.slane %v12923_v58, %v14133_v23 }
 0x436   : > { %6299 = vmatpush1.bf16.msra.mxu0 %v12851_v57  ;;  %v11608_v57 = vcombine.low %v6492_v41, %v6500_v42  ;;  %v6380_v41 = vld [vmem:[%s13426_s11] sm:$0xff] }
 0x437   : > { %6340 = vmatpush1.bf16.msra.mxu1 %v12854_v5  ;;  %6300 = vmatprep.subr.bf16.mxu0 %v12859_v51  ;;  %v11593_v5 = vcombine.high %v6476_v35, %v6484_v48  ;;  %v14143_v51 = vpack.c.bf16 %v6373_v9, %v6373_v9  ;;  %v6388_v42 = vld [vmem:[%s13426_s11 + $0x40] sm:$0xff] }
 0x438   : > { %6341 = vmatprep.subr.bf16.mxu1 %v12862_v52  ;;  %v3095_v52 = vrot.slane %v12923_v58, %v14136_v10  ;;  %v6620_v58 = vld [vmem:[%s13426_s11 + $0x780] sm:$0xff] }
 0x43a   : > { %6301 = vmatpush1.bf16.msra.mxu0 %v12857_v53  ;;  %v6460_v53 = vld [vmem:[%s13426_s11 + $0x280] sm:$0xff] }
 0x43b   : > { %6342 = vmatpush1.bf16.msra.mxu1 %v12860_v55  ;;  %6302 = vmatprep.subr.bf16.mxu0 %v12865_v28  ;;  %v6468_v55 = vld [vmem:[%s13426_s11 + $0x2c0] sm:$0xff] }
 0x43c   : > { %6343 = vmatprep.subr.bf16.mxu1 %v12868_v29 }
 0x43e   : > { %6303 = vmatpush1.bf16.msra.mxu0 %v12863_v16 }
 0x43f   : > { %6344 = vmatpush1.bf16.msra.mxu1 %v12866_v27  ;;  %6304 = vmatprep.subr.bf16.mxu0 %v12871_v59  ;;  %v11592_v27 = vcombine.low %v6476_v35, %v6484_v48  ;;  %v11497_v48 = vcombine.high %v6380_v41, %v6388_v42 }
 0x440   : > { %6345 = vmatprep.subr.bf16.mxu1 %v12874_v60 }
 0x442   : > { %6305 = vmatpush1.bf16.msra.mxu0 %v12869_v17  ;;  %v11577_v17 = vcombine.high %v6460_v53, %v6468_v55 }
 0x443   : > { %6346 = vmatpush1.bf16.msra.mxu1 %v12872_v61  ;;  %6306 = vmatprep.subr.bf16.mxu0 %v12877_v62 }
 0x444   : > { %6347 = vmatprep.subr.bf16.mxu1 %v12880_v63  ;;  %v6444_v63 = vld [vmem:[%s13426_s11 + $0x200] sm:$0xff] }
 0x446   : > { %6307 = vmatpush2.bf16.msra.mxu0 %v12875_v0 }
 0x447   : > { %6348 = vmatpush2.bf16.msra.mxu1 %v12878_v1  ;;  %6308 = vmatprep.subr.bf16.mxu0 %v12883_v2  ;;  %v11576_v2 = vcombine.low %v6460_v53, %v6468_v55 }
 0x448   : > { %6349 = vmatprep.subr.bf16.mxu1 %v12886_v6 }
 0x44a   : > { %6309 = vmatpush2.bf16.msra.mxu0 %v12881_v7 }
 0x44b   : > { %6350 = vmatpush2.bf16.msra.mxu1 %v12884_v8  ;;  %6310 = vmatprep.subr.bf16.mxu0 %v12889_v15  ;;  %v6428_v15 = vld [vmem:[%s13426_s11 + $0x180] sm:$0xff] }
 0x44c   : > { %6351 = vmatprep.subr.bf16.mxu1 %v12892_v18  ;;  %v6436_v18 = vld [vmem:[%s13426_s11 + $0x1c0] sm:$0xff] }
 0x44e   : > { %6311 = vmatpush2.bf16.msra.mxu0 %v12887_v3  ;;  %v6748_v3 = vld [vmem:[%s13426_s11 + $0xb80] sm:$0xff] }
 0x44f   : > { %6352 = vmatpush2.bf16.msra.mxu1 %v12890_v4  ;;  %6312 = vmatprep.subr.bf16.mxu0 %v12895_v50  ;;  %v6756_v4 = vld [vmem:[%s13426_s11 + $0xbc0] sm:$0xff] }
 0x450   : > { %6353 = vmatprep.subr.bf16.mxu1 %v12898_v34  ;;  %v11864_v34 = vcombine.low %v6748_v3, %v6756_v4 }
 0x452   : > { %6313 = vmatpush2.bf16.msra.mxu0 %v12893_v38  ;;  %v11865_v38 = vcombine.high %v6748_v3, %v6756_v4  ;;  %v6580_v3 = vld [vmem:[%s13426_s11 + $0x640] sm:$0xff] }
 0x453   : > { %6354 = vmatpush2.bf16.msra.mxu1 %v12896_v54  ;;  %6314 = vmatprep.subr.bf16.mxu0 %v12901_v24  ;;  %v11545_v54 = vcombine.high %v6428_v15, %v6436_v18  ;;  %v6412_v24 = vld [vmem:[%s13426_s11 + $0x100] sm:$0xff] }
 0x454   : > { %6355 = vmatprep.subr.bf16.mxu1 %v12904_v12  ;;  %v6420_v12 = vld [vmem:[%s13426_s11 + $0x140] sm:$0xff] }
 0x455   : > { %v6636_v4 = vld [vmem:[%s13426_s11 + $0x800] sm:$0xff] }
 0x456   : > { %6315 = vmatpush2.bf16.msra.mxu0 %v12899_v14  ;;  %v6732_v14 = vld [vmem:[%s13426_s11 + $0xb00] sm:$0xff] }
 0x457   : > { %6356 = vmatpush2.bf16.msra.mxu1 %v12902_v46  ;;  %6316 = vmatprep.subr.bf16.mxu0 %v12907_v25  ;;  %v6740_v46 = vld [vmem:[%s13426_s11 + $0xb40] sm:$0xff]  ;;  %v11544_v25 = vcombine.low %v6428_v15, %v6436_v18 }
 0x458   : > { %6357 = vmatprep.subr.bf16.mxu1 %v12910_v26  ;;  %v11848_v26 = vcombine.low %v6732_v14, %v6740_v46  ;;  %v6572_v18 = vld [vmem:[%s13426_s11 + $0x600] sm:$0xff] }
 0x45a   : > { %6317 = vmatpush2.bf16.msra.mxu0 %v12905_v20  ;;  %v11849_v20 = vcombine.high %v6732_v14, %v6740_v46  ;;  %v6564_v14 = vld [vmem:[%s13426_s11 + $0x5c0] sm:$0xff] }
 0x45b   : > { %6358 = vmatpush2.bf16.msra.mxu1 %v12908_v21  ;;  %6318 = vmatprep.subr.bf16.mxu0 %v12913_v22  ;;  %v11529_v21 = vcombine.high %v6412_v24, %v6420_v12  ;;  %v6396_v22 = vld [vmem:[%s13426_s11 + $0x80] sm:$0xff] }
 0x45c   : > { %6359 = vmatprep.subr.bf16.mxu1 %v12916_v31  ;;  %v6404_v31 = vld [vmem:[%s13426_s11 + $0xc0] sm:$0xff] }
 0x45d   : > { %v11513_v39 = vcombine.high %v6396_v22, %v6404_v31  ;;  %v6876_v46 = vld [vmem:[%s13426_s11 + $0xf80] sm:$0xff] }
 0x45e   : > { %6319 = vmatpush2.bf16.msra.mxu0 %v12911_v36  ;;  %v6724_v36 = vld [vmem:[%s13426_s11 + $0xac0] sm:$0xff] }
 0x45f   : > { %6360 = vmatpush2.bf16.msra.mxu1 %v12914_v30  ;;  %6320 = vmatprep.subr.bf16.mxu0 %v12919_v11  ;;  %v11528_v30 = vcombine.low %v6412_v24, %v6420_v12  ;;  %v11832_v11 = vcombine.low %v6716_v32, %v6724_v36  ;;  %v11689_v24 = vcombine.high %v6572_v18, %v6580_v3  ;;  %v6556_v12 = vld [vmem:[%s13426_s11 + $0x580] sm:$0xff] }
 0x460   : > { %6361 = vmatprep.subr.bf16.mxu1 %v12922_v19  ;;  %v11833_v19 = vcombine.high %v6716_v32, %v6724_v36  ;;  %v6548_v32 = vld [vmem:[%s13426_s11 + $0x540] sm:$0xff] }
 0x461   : > { %v6860_v36 = vld [vmem:[%s13426_s11 + $0xf00] sm:$0xff] }
 0x462   : > { %6321 = vmatpush2.bf16.msra.mxu0 %v12917_v43  ;;  %v6700_v43 = vld [vmem:[%s13426_s11 + $0xa00] sm:$0xff] }
 0x463   : > { %6362 = vmatpush2.bf16.msra.mxu1 %v12920_v47  ;;  %9452 = vmatprep.subr.bf16.mxu0 %v11609_v33  ;;  %v6708_v47 = vld [vmem:[%s13426_s11 + $0xa40] sm:$0xff]  ;;  %v11512_v33 = vcombine.low %v6396_v22, %v6404_v31  ;;  %v11673_v22 = vcombine.high %v6556_v12, %v6564_v14 }
 0x464   : > { %9493 = vmatprep.subr.bf16.mxu1 %v11865_v38  ;;  %v11816_v9 = vcombine.low %v6700_v43, %v6708_v47  ;;  %v11817_v35 = vcombine.high %v6700_v43, %v6708_v47  ;;  %v6540_v31 = vld [vmem:[%s13426_s11 + $0x500] sm:$0xff] }
 0x465   : > { %v6078_v28 = vpop.f32.mrf.mxu0  ;;  %6323 = vmatmul.mubr.bf16.vlgmr.msra.gmra.mxu0 %v13826_v13  ;;  %v6452_v13 = vld [vmem:[%s13426_s11 + $0x240] sm:$0xff] }
 0x466   : > { %v6119_v29 = vpop.f32.mrf.mxu1  ;;  %6364 = vmatmul.mubr.bf16.vlgmr.msra.gmra.mxu1 %v13830_v45  ;;  %v6079_v16 = vadd.f32 %v6078_v28, %v3091_v56  ;;  %9453 = vmatpush1.bf16.msra.mxu0 %v11608_v57  ;;  %v11561_v8 = vcombine.high %v6444_v63, %v6452_v13  ;;  %v11560_v50 = vcombine.low %v6444_v63, %v6452_v13  ;;  %v6628_v56 = vld [vmem:[%s13426_s11 + $0x7c0] sm:$0xff] }
 0x467   : > { %9484 = vmatprep.mubr.bf16.mxu0 %v14143_v51  ;;  %v6080_v59 = vpop.f32.mrf.mxu0  ;;  %9454 = vmatprep.subr.bf16.mxu0 %v11593_v5  ;;  %v6684_v57 = vld [vmem:[%s13426_s11 + $0x980] sm:$0xff]  ;;  %v11737_v28 = vcombine.high %v6620_v58, %v6628_v56 }
 0x468   : > { %v6121_v60 = vpop.f32.mrf.mxu1  ;;  %v14151_v61 = vadd.f32 %v6119_v29, %v6079_v16  ;;  %v6081_v62 = vadd.f32 %v6080_v59, %v3095_v52  ;;  %9494 = vmatpush1.bf16.msra.mxu1 %v11864_v34  ;;  %v6692_v5 = vld [vmem:[%s13426_s11 + $0x9c0] sm:$0xff]  ;;  %v11496_v52 = vcombine.low %v6380_v41, %v6388_v42  ;;  %v11657_v41 = vcombine.high %v6540_v31, %v6548_v32 }
 0x469   : > { %v6082_v0 = vpop.f32.mrf.mxu0  ;;  %9495 = vmatprep.subr.bf16.mxu1 %v11849_v20  ;;  %v11800_v53 = vcombine.low %v6684_v57, %v6692_v5  ;;  %v11801_v55 = vcombine.high %v6684_v57, %v6692_v5  ;;  %v6604_v29 = vld [vmem:[%s13426_s11 + $0x700] sm:$0xff] }
 0x46a   : > { %v6123_v45 = vpop.f32.mrf.mxu1  ;;  %v14155_v1 = vadd.f32 %v6121_v60, %v6081_v62  ;;  %9455 = vmatpush1.bf16.msra.mxu0 %v11592_v27  ;;  %v6612_v16 = vld [vmem:[%s13426_s11 + $0x740] sm:$0xff]  ;;  %v11736_v60 = vcombine.low %v6620_v58, %v6628_v56 }
 0x46b   : > { %v6083_v6 = vpop.f32.mrf.mxu0  ;;  %9456 = vmatprep.subr.bf16.mxu0 %v11577_v17  ;;  %v6668_v27 = vld [vmem:[%s13426_s11 + $0x900] sm:$0xff]  ;;  %v11721_v63 = vcombine.high %v6604_v29, %v6612_v16 }
 0x46c   : > { %v6124_v7 = vpop.f32.mrf.mxu1  ;;  %9496 = vmatpush1.bf16.msra.mxu1 %v11848_v26  ;;  %v6676_v59 = vld [vmem:[%s13426_s11 + $0x940] sm:$0xff]  ;;  %v11720_v6 = vcombine.low %v6604_v29, %v6612_v16  ;;  %v11688_v26 = vcombine.low %v6572_v18, %v6580_v3  ;;  %v6493_v16 = vld [vmem:[%s13426_s11 + $0x388] sm:$0xff] }
 0x46d   : > { %9497 = vmatprep.subr.bf16.mxu1 %v11833_v19  ;;  %v11784_v17 = vcombine.low %v6668_v27, %v6676_v59  ;;  %v11785_v62 = vcombine.high %v6668_v27, %v6676_v59  ;;  %v6588_v13 = vld [vmem:[%s13426_s11 + $0x680] sm:$0xff]  ;;  %v6501_v27 = vld [vmem:[%s13426_s11 + $0x3c8] sm:$0xff] }
 0x46e   : > { %9457 = vmatpush1.bf16.msra.mxu0 %v11576_v2  ;;  %v6596_v0 = vld [vmem:[%s13426_s11 + $0x6c0] sm:$0xff] }
 0x46f   : > { %9458 = vmatprep.subr.bf16.mxu0 %v11561_v8  ;;  %v6652_v45 = vld [vmem:[%s13426_s11 + $0x880] sm:$0xff]  ;;  %v11705_v15 = vcombine.high %v6588_v13, %v6596_v0  ;;  %v11704_v34 = vcombine.low %v6588_v13, %v6596_v0  ;;  %v6372_v13 = vmax.f32 %v14069_v37, 0.0  ;;  %v11611_v0 = vcombine.high %v6493_v16, %v6501_v27 }
 0x470   : > { %9498 = vmatpush1.bf16.msra.mxu1 %v11832_v11  ;;  %v6660_v2 = vld [vmem:[%s13426_s11 + $0x8c0] sm:$0xff]  ;;  %v11672_v11 = vcombine.low %v6556_v12, %v6564_v14 }
 0x471   : > { %9499 = vmatprep.subr.bf16.mxu1 %v11817_v35  ;;  %v11768_v7 = vcombine.low %v6652_v45, %v6660_v2  ;;  %v11769_v8 = vcombine.high %v6652_v45, %v6660_v2  ;;  %v6524_v42 = vld [vmem:[%s13426_s11 + $0x480] sm:$0xff]  ;;  %v6477_v45 = vld [vmem:[%s13426_s11 + $0x308] sm:$0xff]  ;;  %v14214_v3 = vpack.c.bf16 %v6372_v13, %v6372_v13 }
 0x472   : > { %9459 = vmatpush1.bf16.msra.mxu0 %v11560_v50  ;;  %v6644_v50 = vld [vmem:[%s13426_s11 + $0x840] sm:$0xff]  ;;  %v6485_v2 = vld [vmem:[%s13426_s11 + $0x348] sm:$0xff] }
 0x473   : > { %9460 = vmatprep.subr.bf16.mxu0 %v11545_v54  ;;  %v11752_v38 = vcombine.low %v6636_v4, %v6644_v50  ;;  %v11753_v54 = vcombine.high %v6636_v4, %v6644_v50  ;;  %v6532_v43 = vld [vmem:[%s13426_s11 + $0x4c0] sm:$0xff]  ;;  %v11595_v37 = vcombine.high %v6477_v45, %v6485_v2  ;;  %v6461_v4 = vld [vmem:[%s13426_s11 + $0x288] sm:$0xff]  ;;  %v11594_v14 = vcombine.low %v6477_v45, %v6485_v2 }
 0x474   : > { %9500 = vmatpush1.bf16.msra.mxu1 %v11816_v9  ;;  %v6844_v47 = vld [vmem:[%s13426_s11 + $0xe80] sm:$0xff]  ;;  %v11656_v9 = vcombine.low %v6540_v31, %v6548_v32  ;;  %v11641_v58 = vcombine.high %v6524_v42, %v6532_v43  ;;  %v6469_v50 = vld [vmem:[%s13426_s11 + $0x2c8] sm:$0xff] }
 0x475   : > { %9501 = vmatprep.subr.bf16.mxu1 %v11801_v55  ;;  %v6508_v56 = vld [vmem:[%s13426_s11 + $0x400] sm:$0xff]  ;;  %v6445_v32 = vld [vmem:[%s13426_s11 + $0x208] sm:$0xff] }
 0x476   : > { %9461 = vmatpush1.bf16.msra.mxu0 %v11544_v25  ;;  %v6884_v25 = vld [vmem:[%s13426_s11 + $0xfc0] sm:$0xff]  ;;  %v6629_v45 = vld [vmem:[%s13426_s11 + $0x7c8] sm:$0xff] }
 0x477   : > { %9462 = vmatprep.subr.bf16.mxu0 %v11529_v21  ;;  %v11992_v20 = vcombine.low %v6876_v46, %v6884_v25  ;;  %v11993_v21 = vcombine.high %v6876_v46, %v6884_v25  ;;  %v6516_v57 = vld [vmem:[%s13426_s11 + $0x440] sm:$0xff] }
 0x478   : > { %9502 = vmatpush1.bf16.msra.mxu1 %v11800_v53  ;;  %v6828_v5 = vld [vmem:[%s13426_s11 + $0xe00] sm:$0xff]  ;;  %v11640_v53 = vcombine.low %v6524_v42, %v6532_v43  ;;  %v11625_v29 = vcombine.high %v6508_v56, %v6516_v57 }
 0x479   : > { %9503 = vmatprep.subr.bf16.mxu1 %v11785_v62  ;;  %v6812_v59 = vld [vmem:[%s13426_s11 + $0xd80] sm:$0xff] }
 0x47a   : > { %9463 = vmatpush1.bf16.msra.mxu0 %v11528_v30  ;;  %v6868_v30 = vld [vmem:[%s13426_s11 + $0xf40] sm:$0xff] }
 0x47b   : > { %9464 = vmatprep.subr.bf16.mxu0 %v11513_v39  ;;  %v11976_v19 = vcombine.low %v6860_v36, %v6868_v30  ;;  %v11977_v39 = vcombine.high %v6860_v36, %v6868_v30  ;;  %v6453_v36 = vld [vmem:[%s13426_s11 + $0x248] sm:$0xff] }
 0x47c   : > { %9504 = vmatpush1.bf16.msra.mxu1 %v11784_v17  ;;  %v11624_v17 = vcombine.low %v6508_v56, %v6516_v57  ;;  %v11562_v56 = vcombine.low %v6445_v32, %v6453_v36 }
 0x47d   : > { %9505 = vmatprep.subr.bf16.mxu1 %v11769_v8  ;;  %v11610_v8 = vcombine.low %v6493_v16, %v6501_v27  ;;  %v6397_v16 = vld [vmem:[%s13426_s11 + $0x88] sm:$0xff] }
 0x47e   : > { %9465 = vmatpush1.bf16.msra.mxu0 %v11512_v33  ;;  %v6852_v33 = vld [vmem:[%s13426_s11 + $0xec0] sm:$0xff]  ;;  %v6405_v27 = vld [vmem:[%s13426_s11 + $0xc8] sm:$0xff] }
 0x47f   : > { %9466 = vmatprep.subr.bf16.mxu0 %v11497_v48  ;;  %v11960_v35 = vcombine.low %v6844_v47, %v6852_v33  ;;  %v11961_v48 = vcombine.high %v6844_v47, %v6852_v33 }
 0x480   : > { %9506 = vmatpush1.bf16.msra.mxu1 %v11768_v7  ;;  %v6804_v7 = vld [vmem:[%s13426_s11 + $0xd40] sm:$0xff] }
 0x481   : > { %9507 = vmatprep.subr.bf16.mxu1 %v11753_v54  ;;  %v6780_v54 = vld [vmem:[%s13426_s11 + $0xc80] sm:$0xff] }
 0x482   : > { %9467 = vmatpush1.bf16.msra.mxu0 %v11496_v52  ;;  %v6836_v52 = vld [vmem:[%s13426_s11 + $0xe40] sm:$0xff] }
 0x483   : > { %9468 = vmatprep.subr.bf16.mxu0 %v11737_v28  ;;  %v11944_v55 = vcombine.low %v6828_v5, %v6836_v52  ;;  %v11945_v28 = vcombine.high %v6828_v5, %v6836_v52 }
 0x484   : > { %9508 = vmatpush1.bf16.msra.mxu1 %v11752_v38 }
 0x485   : > { %9509 = vmatprep.subr.bf16.mxu1 %v11993_v21 }
 0x486   : > { %9469 = vmatpush2.bf16.msra.mxu0 %v11736_v60  ;;  %v6820_v60 = vld [vmem:[%s13426_s11 + $0xdc0] sm:$0xff] }
 0x487   : > { %9470 = vmatprep.subr.bf16.mxu0 %v11721_v63  ;;  %v11928_v62 = vcombine.low %v6812_v59, %v6820_v60  ;;  %v11929_v63 = vcombine.high %v6812_v59, %v6820_v60  ;;  %v11515_v60 = vcombine.high %v6397_v16, %v6405_v27 }
 0x488   : > { %9510 = vmatpush2.bf16.msra.mxu1 %v11992_v20  ;;  %v11579_v20 = vcombine.high %v6461_v4, %v6469_v50 }
 0x489   : > { %9511 = vmatprep.subr.bf16.mxu1 %v11977_v39 }
 0x48a   : > { %9471 = vmatpush2.bf16.msra.mxu0 %v11720_v6  ;;  %v6796_v6 = vld [vmem:[%s13426_s11 + $0xd00] sm:$0xff] }
 0x48b   : > { %9472 = vmatprep.subr.bf16.mxu0 %v11705_v15  ;;  %v11912_v15 = vcombine.low %v6796_v6, %v6804_v7  ;;  %v11913_v18 = vcombine.high %v6796_v6, %v6804_v7  ;;  %v6605_v7 = vld [vmem:[%s13426_s11 + $0x708] sm:$0xff] }
 0x48c   : > { %9512 = vmatpush2.bf16.msra.mxu1 %v11976_v19  ;;  %v6772_v19 = vld [vmem:[%s13426_s11 + $0xc40] sm:$0xff] }
 0x48d   : > { %9513 = vmatprep.subr.bf16.mxu1 %v11961_v48  ;;  %v14235_v48 = vld [vmem:[%s13426_s11 + $0xb88] sm:$0xff] }
 0x48e   : > { %9473 = vmatpush2.bf16.msra.mxu0 %v11704_v34 }
 0x48f   : > { %9474 = vmatprep.subr.bf16.mxu0 %v11689_v24  ;;  %v6788_v24 = vld [vmem:[%s13426_s11 + $0xcc0] sm:$0xff] }
 0x490   : > { %9514 = vmatpush2.bf16.msra.mxu1 %v11960_v35  ;;  %v11897_v46 = vcombine.high %v6780_v54, %v6788_v24  ;;  %v11896_v21 = vcombine.low %v6780_v54, %v6788_v24  ;;  %v6437_v35 = vld [vmem:[%s13426_s11 + $0x1c8] sm:$0xff] }
 0x491   : > { %9515 = vmatprep.subr.bf16.mxu1 %v11945_v28  ;;  %v6581_v54 = vld [vmem:[%s13426_s11 + $0x648] sm:$0xff] }
 0x492   : > { %9475 = vmatpush2.bf16.msra.mxu0 %v11688_v26 }
 0x493   : > { %9476 = vmatprep.subr.bf16.mxu0 %v11673_v22 }
 0x494   : > { %9516 = vmatpush2.bf16.msra.mxu1 %v11944_v55  ;;  %v6421_v55 = vld [vmem:[%s13426_s11 + $0x148] sm:$0xff] }
 0x495   : > { %9517 = vmatprep.subr.bf16.mxu1 %v11929_v63  ;;  %v11514_v63 = vcombine.low %v6397_v16, %v6405_v27 }
 0x496   : > { %9477 = vmatpush2.bf16.msra.mxu0 %v11672_v11  ;;  %v6764_v11 = vld [vmem:[%s13426_s11 + $0xc00] sm:$0xff] }
 0x497   : > { %9478 = vmatprep.subr.bf16.mxu0 %v11657_v41  ;;  %v11578_v41 = vcombine.low %v6461_v4, %v6469_v50  ;;  %v11881_v42 = vcombine.high %v6764_v11, %v6772_v19  ;;  %v11880_v33 = vcombine.low %v6764_v11, %v6772_v19  ;;  %v6597_v4 = vld [vmem:[%s13426_s11 + $0x6c8] sm:$0xff] }
 0x498   : > { %9518 = vmatpush2.bf16.msra.mxu1 %v11928_v62  ;;  %v6389_v62 = vld [vmem:[%s13426_s11 + $0x48] sm:$0xff] }
 0x499   : > { %9519 = vmatprep.subr.bf16.mxu1 %v11913_v18  ;;  %v6509_v19 = vld [vmem:[%s13426_s11 + $0x408] sm:$0xff] }
 0x49a   : > { %9479 = vmatpush2.bf16.msra.mxu0 %v11656_v9  ;;  %v6429_v9 = vld [vmem:[%s13426_s11 + $0x188] sm:$0xff] }
 0x49b   : > { %9480 = vmatprep.subr.bf16.mxu0 %v11641_v58  ;;  %v14238_v58 = vld [vmem:[%s13426_s11 + $0xbc8] sm:$0xff]  ;;  %v11547_v5 = vcombine.high %v6429_v9, %v6437_v35  ;;  %v11546_v28 = vcombine.low %v6429_v9, %v6437_v35  ;;  %v6478_v35 = vld [vmem:[%s13426_s11 + $0x310] sm:$0xff] }
 0x49c   : > { %9520 = vmatpush2.bf16.msra.mxu1 %v11912_v15  ;;  %v11867_v57 = vcombine.high %v14235_v48, %v14238_v58  ;;  %v11866_v52 = vcombine.low %v14235_v48, %v14238_v58 }
 0x49d   : > { %9521 = vmatprep.subr.bf16.mxu1 %v11897_v46  ;;  %v6565_v46 = vld [vmem:[%s13426_s11 + $0x5c8] sm:$0xff] }
 0x49e   : > { %9481 = vmatpush2.bf16.msra.mxu0 %v11640_v53  ;;  %v6413_v53 = vld [vmem:[%s13426_s11 + $0x108] sm:$0xff] }
 0x49f   : > { %9482 = vmatprep.subr.bf16.mxu0 %v11625_v29  ;;  %v11531_v29 = vcombine.high %v6413_v53, %v6421_v55  ;;  %v11530_v59 = vcombine.low %v6413_v53, %v6421_v55  ;;  %v6462_v53 = vld [vmem:[%s13426_s11 + $0x290] sm:$0xff] }
 0x4a0   : > { %9522 = vmatpush2.bf16.msra.mxu1 %v11896_v21  ;;  %v6549_v21 = vld [vmem:[%s13426_s11 + $0x548] sm:$0xff]  ;;  %v6470_v55 = vld [vmem:[%s13426_s11 + $0x2d0] sm:$0xff] }
 0x4a1   : > { %9523 = vmatprep.subr.bf16.mxu1 %v11881_v42 }
 0x4a2   : > { %9483 = vmatpush2.bf16.msra.mxu0 %v11624_v17  ;;  %v6381_v17 = vld [vmem:[%s13426_s11 + $0x8] sm:$0xff] }
 0x4a3   : > { %9534 = vmatprep.subr.bf16.mxu0 %v11611_v0  ;;  %v11499_v13 = vcombine.high %v6381_v17, %v6389_v62  ;;  %v6621_v0 = vld [vmem:[%s13426_s11 + $0x788] sm:$0xff]  ;;  %v11498_v2 = vcombine.low %v6381_v17, %v6389_v62  ;;  %v11581_v17 = vcombine.high %v6462_v53, %v6470_v55 }
 0x4a4   : > { %9524 = vmatpush2.bf16.msra.mxu1 %v11880_v33  ;;  %v11739_v6 = vcombine.high %v6621_v0, %v6629_v45  ;;  %v11738_v15 = vcombine.low %v6621_v0, %v6629_v45  ;;  %v11580_v45 = vcombine.low %v6462_v53, %v6470_v55  ;;  %v6542_v55 = vld [vmem:[%s13426_s11 + $0x510] sm:$0xff] }
 0x4a5   : > { %v6160_v34 = vpop.f32.mrf.mxu0  ;;  %9485 = vmatmul.mubr.bf16.vlgmr.msra.gmra.mxu0 %v14214_v3  ;;  %9575 = vmatprep.subr.bf16.mxu1 %v11867_v57 }
 0x4a6   : > { %v6201_v38 = vpop.f32.mrf.mxu1  ;;  %v6161_v12 = vadd.f32 %v6160_v34, %v14151_v61  ;;  %9535 = vmatpush1.bf16.msra.mxu0 %v11610_v8  ;;  %9566 = vmatprep.mubr.bf16.mxu0 %v14143_v51  ;;  %v6613_v8 = vld [vmem:[%s13426_s11 + $0x748] sm:$0xff] }
 0x4a7   : > { %v6162_v25 = vpop.f32.mrf.mxu0  ;;  %9536 = vmatprep.subr.bf16.mxu0 %v11595_v37  ;;  %v11723_v18 = vcombine.high %v6605_v7, %v6613_v8  ;;  %v6589_v37 = vld [vmem:[%s13426_s11 + $0x688] sm:$0xff]  ;;  %v11722_v50 = vcombine.low %v6605_v7, %v6613_v8  ;;  %v6430_v8 = vld [vmem:[%s13426_s11 + $0x190] sm:$0xff] }
 0x4a8   : > { %v6203_v26 = vpop.f32.mrf.mxu1  ;;  %v14223_v22 = vadd.f32 %v6201_v38, %v6161_v12  ;;  %v6163_v31 = vadd.f32 %v6162_v25, %v14155_v1  ;;  %v11563_v1 = vcombine.high %v6445_v32, %v6453_v36  ;;  %v11707_v34 = vcombine.high %v6589_v37, %v6597_v4  ;;  %v6573_v38 = vld [vmem:[%s13426_s11 + $0x608] sm:$0xff] }
 0x4a9   : > { %v6164_v61 = vpop.f32.mrf.mxu0  ;;  %v11706_v24 = vcombine.low %v6589_v37, %v6597_v4  ;;  %v11691_v12 = vcombine.high %v6573_v38, %v6581_v54  ;;  %v11690_v25 = vcombine.low %v6573_v38, %v6581_v54  ;;  %v6525_v36 = vld [vmem:[%s13426_s11 + $0x488] sm:$0xff]  ;;  %v6414_v4 = vld [vmem:[%s13426_s11 + $0x110] sm:$0xff] }
 0x4aa   : > { %v6205_v30 = vpop.f32.mrf.mxu1  ;;  %v14230_v39 = vadd.f32 %v6203_v26, %v6163_v31  ;;  %9537 = vmatpush1.bf16.msra.mxu0 %v11594_v14  ;;  %v6557_v14 = vld [vmem:[%s13426_s11 + $0x588] sm:$0xff]  ;;  %v6398_v54 = vld [vmem:[%s13426_s11 + $0x90] sm:$0xff] }
 0x4ab   : > { %v6165_v43 = vpop.f32.mrf.mxu0  ;;  %9538 = vmatprep.subr.bf16.mxu0 %v11579_v20  ;;  %v11675_v26 = vcombine.high %v6557_v14, %v6565_v46  ;;  %v6541_v20 = vld [vmem:[%s13426_s11 + $0x508] sm:$0xff]  ;;  %v11674_v31 = vcombine.low %v6557_v14, %v6565_v46  ;;  %v6382_v46 = vld [vmem:[%s13426_s11 + $0x10] sm:$0xff] }
 0x4ac   : > { %v6206_v47 = vpop.f32.mrf.mxu1  ;;  %v11659_v32 = vcombine.high %v6541_v20, %v6549_v21  ;;  %v6533_v61 = vld [vmem:[%s13426_s11 + $0x4c8] sm:$0xff]  ;;  %v11658_v30 = vcombine.low %v6541_v20, %v6549_v21  ;;  %v6622_v21 = vld [vmem:[%s13426_s11 + $0x790] sm:$0xff] }
 0x4ad   : > { %v11643_v11 = vcombine.high %v6525_v36, %v6533_v61  ;;  %v11642_v42 = vcombine.low %v6525_v36, %v6533_v61  ;;  %v6494_v47 = vld [vmem:[%s13426_s11 + $0x390] sm:$0xff] }
 0x4ae   : > { %9539 = vmatpush1.bf16.msra.mxu0 %v11578_v41  ;;  %v6517_v41 = vld [vmem:[%s13426_s11 + $0x448] sm:$0xff]  ;;  %v6606_v61 = vld [vmem:[%s13426_s11 + $0x710] sm:$0xff] }
 0x4af   : > { %9540 = vmatprep.subr.bf16.mxu0 %v11563_v1  ;;  %v11627_v43 = vcombine.high %v6509_v19, %v6517_v41  ;;  %v6502_v1 = vld [vmem:[%s13426_s11 + $0x3d0] sm:$0xff]  ;;  %v11626_v33 = vcombine.low %v6509_v19, %v6517_v41 }
 0x4b0   : > { %v11613_v9 = vcombine.high %v6494_v47, %v6502_v1  ;;  %v11612_v57 = vcombine.low %v6494_v47, %v6502_v1  ;;  %v6590_v41 = vld [vmem:[%s13426_s11 + $0x690] sm:$0xff] }
 0x4b1   : > { %v6574_v1 = vld [vmem:[%s13426_s11 + $0x610] sm:$0xff] }
 0x4b2   : > { %9541 = vmatpush1.bf16.msra.mxu0 %v11562_v56  ;;  %v6486_v56 = vld [vmem:[%s13426_s11 + $0x350] sm:$0xff] }
 0x4b3   : > { %9542 = vmatprep.subr.bf16.mxu0 %v11547_v5  ;;  %v11597_v5 = vcombine.high %v6478_v35, %v6486_v56  ;;  %v11596_v27 = vcombine.low %v6478_v35, %v6486_v56  ;;  %v6558_v56 = vld [vmem:[%s13426_s11 + $0x590] sm:$0xff] }
 0x4b6   : > { %9543 = vmatpush1.bf16.msra.mxu0 %v11546_v28 }
 0x4b7   : > { %9544 = vmatprep.subr.bf16.mxu0 %v11531_v29 }
 0x4ba   : > { %9545 = vmatpush1.bf16.msra.mxu0 %v11530_v59 }
 0x4bb   : > { %9546 = vmatprep.subr.bf16.mxu0 %v11515_v60 }
 0x4be   : > { %9547 = vmatpush1.bf16.msra.mxu0 %v11514_v63  ;;  %v6446_v63 = vld [vmem:[%s13426_s11 + $0x210] sm:$0xff] }
 0x4bf   : > { %9548 = vmatprep.subr.bf16.mxu0 %v11499_v13  ;;  %v6454_v13 = vld [vmem:[%s13426_s11 + $0x250] sm:$0xff] }
 0x4c0   : > { %v11565_v7 = vcombine.high %v6446_v63, %v6454_v13 }
 0x4c2   : > { %9549 = vmatpush1.bf16.msra.mxu0 %v11498_v2 }
 0x4c3   : > { %9550 = vmatprep.subr.bf16.mxu0 %v11739_v6 }
 0x4c6   : > { %9551 = vmatpush2.bf16.msra.mxu0 %v11738_v15  ;;  %v6438_v15 = vld [vmem:[%s13426_s11 + $0x1d0] sm:$0xff] }
 0x4c7   : > { %9552 = vmatprep.subr.bf16.mxu0 %v11723_v18  ;;  %v11564_v18 = vcombine.low %v6446_v63, %v6454_v13  ;;  %v11549_v37 = vcombine.high %v6430_v8, %v6438_v15 }
 0x4ca   : > { %9553 = vmatpush2.bf16.msra.mxu0 %v11722_v50  ;;  %v6422_v50 = vld [vmem:[%s13426_s11 + $0x150] sm:$0xff] }
 0x4cb   : > { %9554 = vmatprep.subr.bf16.mxu0 %v11707_v34  ;;  %v11548_v34 = vcombine.low %v6430_v8, %v6438_v15  ;;  %v11533_v38 = vcombine.high %v6414_v4, %v6422_v50 }
 0x4ce   : > { %9555 = vmatpush2.bf16.msra.mxu0 %v11706_v24  ;;  %v6406_v24 = vld [vmem:[%s13426_s11 + $0xd0] sm:$0xff] }
 0x4cf   : > { %9556 = vmatprep.subr.bf16.mxu0 %v11691_v12  ;;  %v11532_v12 = vcombine.low %v6414_v4, %v6422_v50  ;;  %v11517_v14 = vcombine.high %v6398_v54, %v6406_v24 }
 0x4d2   : > { %9557 = vmatpush2.bf16.msra.mxu0 %v11690_v25  ;;  %v6390_v25 = vld [vmem:[%s13426_s11 + $0x50] sm:$0xff] }
 0x4d3   : > { %9558 = vmatprep.subr.bf16.mxu0 %v11675_v26  ;;  %v11516_v26 = vcombine.low %v6398_v54, %v6406_v24  ;;  %v11501_v20 = vcombine.high %v6382_v46, %v6390_v25  ;;  %v6471_v54 = vld [vmem:[%s13426_s11 + $0x2d8] sm:$0xff] }
 0x4d6   : > { %9559 = vmatpush2.bf16.msra.mxu0 %v11674_v31  ;;  %v6630_v31 = vld [vmem:[%s13426_s11 + $0x7d0] sm:$0xff] }
 0x4d7   : > { %9560 = vmatprep.subr.bf16.mxu0 %v11659_v32  ;;  %v11500_v32 = vcombine.low %v6382_v46, %v6390_v25  ;;  %v11741_v36 = vcombine.high %v6622_v21, %v6630_v31 }
 0x4da   : > { %9561 = vmatpush2.bf16.msra.mxu0 %v11658_v30  ;;  %v6614_v30 = vld [vmem:[%s13426_s11 + $0x750] sm:$0xff] }
 0x4db   : > { %9562 = vmatprep.subr.bf16.mxu0 %v11643_v11  ;;  %v11740_v11 = vcombine.low %v6622_v21, %v6630_v31  ;;  %v11725_v19 = vcombine.high %v6606_v61, %v6614_v30  ;;  %v6447_v31 = vld [vmem:[%s13426_s11 + $0x218] sm:$0xff] }
 0x4de   : > { %9563 = vmatpush2.bf16.msra.mxu0 %v11642_v42  ;;  %v6598_v42 = vld [vmem:[%s13426_s11 + $0x6d0] sm:$0xff] }
 0x4df   : > { %9564 = vmatprep.subr.bf16.mxu0 %v11627_v43  ;;  %v11724_v43 = vcombine.low %v6606_v61, %v6614_v30  ;;  %v11709_v47 = vcombine.high %v6590_v41, %v6598_v42 }
 0x4e2   : > { %9565 = vmatpush2.bf16.msra.mxu0 %v11626_v33  ;;  %v6582_v33 = vld [vmem:[%s13426_s11 + $0x650] sm:$0xff] }
 0x4e3   : > { %9616 = vmatprep.subr.bf16.mxu0 %v11613_v9  ;;  %v11708_v9 = vcombine.low %v6590_v41, %v6598_v42  ;;  %v11693_v35 = vcombine.high %v6574_v1, %v6582_v33 }
 0x4e5   : > { %v6242_v28 = vpop.f32.mrf.mxu0  ;;  %9567 = vmatmul.mubr.bf16.vlgmr.msra.gmra.mxu0 %v14214_v3 }
 0x4e6   : > { %v6283_v29 = vpop.f32.mrf.mxu1  ;;  %v6243_v16 = vadd.f32 %v6242_v28, %v14223_v22  ;;  %9617 = vmatpush1.bf16.msra.mxu0 %v11612_v57  ;;  %9648 = vmatprep.mubr.bf16.mxu0 %v14143_v51  ;;  %v6566_v57 = vld [vmem:[%s13426_s11 + $0x5d0] sm:$0xff] }
 0x4e7   : > { %v14275_v59 = vpop.f32.mrf.mxu0  ;;  %9618 = vmatprep.subr.bf16.mxu0 %v11597_v5  ;;  %v11692_v5 = vcombine.low %v6574_v1, %v6582_v33  ;;  %v11677_v53 = vcombine.high %v6558_v56, %v6566_v57  ;;  %v6550_v28 = vld [vmem:[%s13426_s11 + $0x550] sm:$0xff]  ;;  %v6431_v1 = vld [vmem:[%s13426_s11 + $0x198] sm:$0xff] }
 0x4e8   : > { %v14277_v60 = vpop.f32.mrf.mxu1  ;;  %v14279_v62 = vadd.f32 %v6283_v29, %v6243_v16  ;;  %v11676_v29 = vcombine.low %v6558_v56, %v6566_v57  ;;  %v11661_v16 = vcombine.high %v6542_v55, %v6550_v28  ;;  %v11660_v63 = vcombine.low %v6542_v55, %v6550_v28  ;;  %v6439_v33 = vld [vmem:[%s13426_s11 + $0x1d8] sm:$0xff]  ;;  %v6725_v55 = vld [vmem:[%s13426_s11 + $0xac8] sm:$0xff] }
 0x4e9   : > { %v6246_v0 = vpop.f32.mrf.mxu0  ;;  %v6245_v4 = vadd.f32 %v14275_v59, %v14230_v39  ;;  %v6415_v28 = vld [vmem:[%s13426_s11 + $0x118] sm:$0xff] }
 0x4ea   : > { %v6287_v22 = vpop.f32.mrf.mxu1  ;;  %9619 = vmatpush1.bf16.msra.mxu0 %v11596_v27  ;;  %v6526_v27 = vld [vmem:[%s13426_s11 + $0x490] sm:$0xff] }
 0x4eb   : > { %v6247_v2 = vpop.f32.mrf.mxu0  ;;  %9620 = vmatprep.subr.bf16.mxu0 %v11581_v17  ;;  %v6534_v17 = vld [vmem:[%s13426_s11 + $0x4d0] sm:$0xff] }
 0x4ec   : > { %v6288_v6 = vpop.f32.mrf.mxu1  ;;  %v11645_v13 = vcombine.high %v6526_v27, %v6534_v17  ;;  %v6510_v0 = vld [vmem:[%s13426_s11 + $0x410] sm:$0xff] }
 0x4ed   : > { %v6518_v22 = vld [vmem:[%s13426_s11 + $0x450] sm:$0xff]  ;;  %v6495_v6 = vld [vmem:[%s13426_s11 + $0x398] sm:$0xff] }
 0x4ee   : > { %9621 = vmatpush1.bf16.msra.mxu0 %v11580_v45  ;;  %v11644_v45 = vcombine.low %v6526_v27, %v6534_v17  ;;  %v11629_v2 = vcombine.high %v6510_v0, %v6518_v22  ;;  %v11628_v8 = vcombine.low %v6510_v0, %v6518_v22  ;;  %v11550_v27 = vcombine.low %v6431_v1, %v6439_v33  ;;  %v6709_v0 = vld [vmem:[%s13426_s11 + $0xa48] sm:$0xff]  ;;  %v6399_v22 = vld [vmem:[%s13426_s11 + $0x98] sm:$0xff] }
 0x4ef   : > { %9622 = vmatprep.subr.bf16.mxu0 %v11565_v7  ;;  %v6503_v7 = vld [vmem:[%s13426_s11 + $0x3d8] sm:$0xff] }
 0x4f0   : > { %v11615_v15 = vcombine.high %v6495_v6, %v6503_v7  ;;  %v11614_v50 = vcombine.low %v6495_v6, %v6503_v7  ;;  %v6685_v6 = vld [vmem:[%s13426_s11 + $0x988] sm:$0xff] }
 0x4f1   : > { %v6693_v7 = vld [vmem:[%s13426_s11 + $0x9c8] sm:$0xff] }
 0x4f2   : > { %9623 = vmatpush1.bf16.msra.mxu0 %v11564_v18  ;;  %v6479_v18 = vld [vmem:[%s13426_s11 + $0x318] sm:$0xff] }
 0x4f3   : > { %9624 = vmatprep.subr.bf16.mxu0 %v11549_v37  ;;  %v6487_v37 = vld [vmem:[%s13426_s11 + $0x358] sm:$0xff] }
 0x4f4   : > { %v11598_v39 = vcombine.low %v6479_v18, %v6487_v37 }
 0x4f6   : > { %9625 = vmatpush1.bf16.msra.mxu0 %v11548_v34  ;;  %v11599_v34 = vcombine.high %v6479_v18, %v6487_v37 }
 0x4f7   : > { %9626 = vmatprep.subr.bf16.mxu0 %v11533_v38  ;;  %v6463_v38 = vld [vmem:[%s13426_s11 + $0x298] sm:$0xff] }
 0x4fa   : > { %9627 = vmatpush1.bf16.msra.mxu0 %v11532_v12 }
 0x4fb   : > { %9628 = vmatprep.subr.bf16.mxu0 %v11517_v14  ;;  %v6286_v14 = vadd.f32 %v14277_v60, %v6245_v4  ;;  %v11803_v4 = vcombine.high %v6685_v6, %v6693_v7 }
 0x4fe   : > { %9629 = vmatpush1.bf16.msra.mxu0 %v11516_v26  ;;  %v11583_v26 = vcombine.high %v6463_v38, %v6471_v54 }
 0x4ff   : > { %9630 = vmatprep.subr.bf16.mxu0 %v11501_v20 }
 0x502   : > { %9631 = vmatpush1.bf16.msra.mxu0 %v11500_v32  ;;  %v6455_v32 = vld [vmem:[%s13426_s11 + $0x258] sm:$0xff] }
 0x503   : > { %9632 = vmatprep.subr.bf16.mxu0 %v11741_v36  ;;  %v11567_v41 = vcombine.high %v6447_v31, %v6455_v32  ;;  %v11566_v56 = vcombine.low %v6447_v31, %v6455_v32 }
 0x506   : > { %9633 = vmatpush2.bf16.msra.mxu0 %v11740_v11 }
 0x507   : > { %9634 = vmatprep.subr.bf16.mxu0 %v11725_v19 }
 0x50a   : > { %9635 = vmatpush2.bf16.msra.mxu0 %v11724_v43  ;;  %v6733_v43 = vld [vmem:[%s13426_s11 + $0xb08] sm:$0xff] }
 0x50b   : > { %9636 = vmatprep.subr.bf16.mxu0 %v11709_v47  ;;  %v6741_v47 = vld [vmem:[%s13426_s11 + $0xb48] sm:$0xff] }
 0x50c   : > { %v11851_v57 = vcombine.high %v6733_v43, %v6741_v47 }
 0x50e   : > { %9637 = vmatpush2.bf16.msra.mxu0 %v11708_v9 }
 0x50f   : > { %9638 = vmatprep.subr.bf16.mxu0 %v11693_v35 }
 0x512   : > { %9639 = vmatpush2.bf16.msra.mxu0 %v11692_v5  ;;  %v11551_v5 = vcombine.high %v6431_v1, %v6439_v33  ;;  %v6575_v1 = vld [vmem:[%s13426_s11 + $0x618] sm:$0xff] }
 0x513   : > { %9640 = vmatprep.subr.bf16.mxu0 %v11677_v53  ;;  %v6717_v53 = vld [vmem:[%s13426_s11 + $0xa88] sm:$0xff]  ;;  %v6583_v33 = vld [vmem:[%s13426_s11 + $0x658] sm:$0xff] }
 0x514   : > { %v11835_v17 = vcombine.high %v6717_v53, %v6725_v55  ;;  %v11834_v48 = vcombine.low %v6717_v53, %v6725_v55  ;;  %v11695_v53 = vcombine.high %v6575_v1, %v6583_v33  ;;  %v6861_v55 = vld [vmem:[%s13426_s11 + $0xf08] sm:$0xff] }
 0x516   : > { %9641 = vmatpush2.bf16.msra.mxu0 %v11676_v29  ;;  %v6423_v29 = vld [vmem:[%s13426_s11 + $0x158] sm:$0xff] }
 0x517   : > { %9642 = vmatprep.subr.bf16.mxu0 %v11661_v16  ;;  %v11850_v16 = vcombine.low %v6733_v43, %v6741_v47  ;;  %v11534_v58 = vcombine.low %v6415_v28, %v6423_v29  ;;  %v6877_v43 = vld [vmem:[%s13426_s11 + $0xf88] sm:$0xff] }
 0x518   : > { %v6885_v47 = vld [vmem:[%s13426_s11 + $0xfc8] sm:$0xff] }
 0x51a   : > { %9643 = vmatpush2.bf16.msra.mxu0 %v11660_v63  ;;  %v11535_v63 = vcombine.high %v6415_v28, %v6423_v29  ;;  %v6869_v28 = vld [vmem:[%s13426_s11 + $0xf48] sm:$0xff]  ;;  %v6559_v29 = vld [vmem:[%s13426_s11 + $0x598] sm:$0xff] }
 0x51b   : > { %9644 = vmatprep.subr.bf16.mxu0 %v11645_v13  ;;  %v6701_v13 = vld [vmem:[%s13426_s11 + $0xa08] sm:$0xff] }
 0x51c   : > { %v11818_v18 = vcombine.low %v6701_v13, %v6709_v0 }
 0x51e   : > { %9645 = vmatpush2.bf16.msra.mxu0 %v11644_v45  ;;  %v6407_v45 = vld [vmem:[%s13426_s11 + $0xd8] sm:$0xff] }
 0x51f   : > { %9646 = vmatprep.subr.bf16.mxu0 %v11629_v2  ;;  %v11519_v2 = vcombine.high %v6399_v22, %v6407_v45  ;;  %v11518_v37 = vcombine.low %v6399_v22, %v6407_v45  ;;  %v6853_v22 = vld [vmem:[%s13426_s11 + $0xec8] sm:$0xff]  ;;  %v6543_v45 = vld [vmem:[%s13426_s11 + $0x518] sm:$0xff] }
 0x522   : > { %9647 = vmatpush2.bf16.msra.mxu0 %v11628_v8  ;;  %v6383_v8 = vld [vmem:[%s13426_s11 + $0x18] sm:$0xff] }
 0x523   : > { %9698 = vmatprep.subr.bf16.mxu0 %v11615_v15  ;;  %v6391_v15 = vld [vmem:[%s13426_s11 + $0x58] sm:$0xff] }
 0x525   : > { %v6324_v24 = vpop.f32.mrf.mxu0  ;;  %9649 = vmatmul.mubr.bf16.vlgmr.msra.gmra.mxu0 %v14214_v3 }
 0x526   : > { %v6365_v12 = vpop.f32.mrf.mxu1  ;;  %v6325_v46 = vadd.f32 %v6324_v24, %v14279_v62  ;;  %9699 = vmatpush1.bf16.msra.mxu0 %v11614_v50  ;;  %9730 = vmatprep.mubr.bf16.mxu0 %v14143_v51  ;;  %v11582_v62 = vcombine.low %v6463_v38, %v6471_v54  ;;  %v11503_v50 = vcombine.high %v6383_v8, %v6391_v15  ;;  %v6677_v38 = vld [vmem:[%s13426_s11 + $0x948] sm:$0xff]  ;;  %v6623_v54 = vld [vmem:[%s13426_s11 + $0x798] sm:$0xff] }
 0x527   : > { %v6326_v59 = vpop.f32.mrf.mxu0  ;;  %9700 = vmatprep.subr.bf16.mxu0 %v11599_v34  ;;  %v6669_v34 = vld [vmem:[%s13426_s11 + $0x908] sm:$0xff]  ;;  %v6631_v24 = vld [vmem:[%s13426_s11 + $0x7d8] sm:$0xff] }
 0x528   : > { %v6367_v25 = vpop.f32.mrf.mxu1  ;;  %v6366_v20 = vadd.f32 %v6365_v12, %v6325_v46  ;;  %v6327_v21 = vadd.f32 %v6326_v59, %v6286_v14  ;;  %v11802_v12 = vcombine.low %v6685_v6, %v6693_v7  ;;  %v11502_v14 = vcombine.low %v6383_v8, %v6391_v15  ;;  %v6653_v59 = vld [vmem:[%s13426_s11 + $0x888] sm:$0xff]  ;;  %v6527_v15 = vld [vmem:[%s13426_s11 + $0x498] sm:$0xff] }
 0x529   : > { %v6328_v36 = vpop.f32.mrf.mxu0  ;;  %v11787_v46 = vcombine.high %v6669_v34, %v6677_v38  ;;  %v11742_v31 = vcombine.low %v6623_v54, %v6631_v24  ;;  %v6829_v7 = vld [vmem:[%s13426_s11 + $0xe08] sm:$0xff] }
 0x52a   : > { %v6369_v60 = vpop.f32.mrf.mxu1  ;;  %v6368_v61 = vadd.f32 %v6367_v25, %v6327_v21  ;;  %9701 = vmatpush1.bf16.msra.mxu0 %v11598_v39  ;;  %v6374_v30 = vmax.f32 %v6366_v20, 0.0  ;;  %v11743_v39 = vcombine.high %v6623_v54, %v6631_v24  ;;  %v6661_v25 = vld [vmem:[%s13426_s11 + $0x8c8] sm:$0xff]  ;;  %v6615_v20 = vld [vmem:[%s13426_s11 + $0x758] sm:$0xff]  ;;  %v11786_v21 = vcombine.low %v6669_v34, %v6677_v38 }
 0x52b   : > { %v6329_v11 = vpop.f32.mrf.mxu0  ;;  %9702 = vmatprep.subr.bf16.mxu0 %v11583_v26  ;;  %v6607_v26 = vld [vmem:[%s13426_s11 + $0x718] sm:$0xff]  ;;  %v11771_v32 = vcombine.high %v6653_v59, %v6661_v25  ;;  %v6637_v60 = vld [vmem:[%s13426_s11 + $0x808] sm:$0xff] }
 0x52c   : > { %v6370_v19 = vpop.f32.mrf.mxu1  ;;  %v6375_v42 = vmax.f32 %v6368_v61, 0.0  ;;  %v14327_v35 = vpack.c.bf16 %v6374_v30, %v6374_v30  ;;  %v11727_v36 = vcombine.high %v6607_v26, %v6615_v20  ;;  %v6645_v61 = vld [vmem:[%s13426_s11 + $0x848] sm:$0xff]  ;;  %v6599_v30 = vld [vmem:[%s13426_s11 + $0x6d8] sm:$0xff]  ;;  %v11770_v11 = vcombine.low %v6653_v59, %v6661_v25 }
 0x52d   : > { %v11726_v19 = vcombine.low %v6607_v26, %v6615_v20  ;;  %v6837_v8 = vld [vmem:[%s13426_s11 + $0xe48] sm:$0xff]  ;;  %v6511_v24 = vld [vmem:[%s13426_s11 + $0x418] sm:$0xff]  ;;  %v6496_v20 = vld [vmem:[%s13426_s11 + $0x3a0] sm:$0xff] }
 0x52e   : > { %v14325_v9 = vpack.c.bf16 %v6375_v42, %v6375_v42  ;;  %9703 = vmatpush1.bf16.msra.mxu0 %v11582_v62  ;;  %v6591_v62 = vld [vmem:[%s13426_s11 + $0x698] sm:$0xff]  ;;  %v6813_v38 = vld [vmem:[%s13426_s11 + $0xd88] sm:$0xff] }
 0x52f   : > { %9704 = vmatprep.subr.bf16.mxu0 %v11567_v41  ;;  %v11755_v41 = vcombine.high %v6637_v60, %v6645_v61  ;;  %v11711_v42 = vcombine.high %v6591_v62, %v6599_v30  ;;  %v6821_v54 = vld [vmem:[%s13426_s11 + $0xdc8] sm:$0xff] }
 0x530   : > { %9525 = vmatprep.mubr.bf16.mxu1 %v14325_v9  ;;  %v6797_v25 = vld [vmem:[%s13426_s11 + $0xd08] sm:$0xff] }
 0x531   : > { %9526 = vmatmul.mubr.bf16.vlgmr.msra.gmra.mxu1 %v14327_v35  ;;  %v6805_v26 = vld [vmem:[%s13426_s11 + $0xd48] sm:$0xff] }
 0x532   : > { %9576 = vmatpush1.bf16.msra.mxu1 %v11866_v52  ;;  %9607 = vmatprep.mubr.bf16.mxu1 %v14325_v9  ;;  %v11819_v52 = vcombine.high %v6701_v13, %v6709_v0  ;;  %v6845_v0 = vld [vmem:[%s13426_s11 + $0xe88] sm:$0xff] }
 0x533   : > { %9705 = vmatpush1.bf16.msra.mxu0 %v11566_v56  ;;  %9577 = vmatprep.subr.bf16.mxu1 %v11851_v57  ;;  %v11754_v56 = vcombine.low %v6637_v60, %v6645_v61  ;;  %v11710_v57 = vcombine.low %v6591_v62, %v6599_v30  ;;  %v6781_v61 = vld [vmem:[%s13426_s11 + $0xc88] sm:$0xff]  ;;  %v6480_v30 = vld [vmem:[%s13426_s11 + $0x320] sm:$0xff] }
 0x534   : > { %9706 = vmatprep.subr.bf16.mxu0 %v11551_v5  ;;  %v11995_v5 = vcombine.high %v6877_v43, %v6885_v47  ;;  %v6789_v62 = vld [vmem:[%s13426_s11 + $0xcc8] sm:$0xff] }
 0x536   : > { %9578 = vmatpush1.bf16.msra.mxu1 %v11850_v16  ;;  %v6567_v16 = vld [vmem:[%s13426_s11 + $0x5d8] sm:$0xff] }
 0x537   : > { %9707 = vmatpush1.bf16.msra.mxu0 %v11550_v27  ;;  %9579 = vmatprep.subr.bf16.mxu1 %v11835_v17  ;;  %v11994_v27 = vcombine.low %v6877_v43, %v6885_v47  ;;  %v11694_v17 = vcombine.low %v6575_v1, %v6583_v33  ;;  %v11679_v13 = vcombine.high %v6559_v29, %v6567_v16  ;;  %v6765_v47 = vld [vmem:[%s13426_s11 + $0xc08] sm:$0xff] }
 0x538   : > { %9708 = vmatprep.subr.bf16.mxu0 %v11535_v63  ;;  %v11979_v63 = vcombine.high %v6861_v55, %v6869_v28  ;;  %v6773_v1 = vld [vmem:[%s13426_s11 + $0xc48] sm:$0xff] }
 0x53a   : > { %9580 = vmatpush1.bf16.msra.mxu1 %v11834_v48  ;;  %v6551_v48 = vld [vmem:[%s13426_s11 + $0x558] sm:$0xff] }
 0x53b   : > { %9709 = vmatpush1.bf16.msra.mxu0 %v11534_v58  ;;  %9581 = vmatprep.subr.bf16.mxu1 %v11819_v52  ;;  %v11978_v58 = vcombine.low %v6861_v55, %v6869_v28  ;;  %v11678_v52 = vcombine.low %v6559_v29, %v6567_v16  ;;  %v11663_v6 = vcombine.high %v6543_v45, %v6551_v48  ;;  %v6750_v16 = vld [vmem:[%s13426_s11 + $0xb90] sm:$0xff] }
 0x53c   : > { %9710 = vmatprep.subr.bf16.mxu0 %v11519_v2  ;;  %v11963_v2 = vcombine.high %v6845_v0, %v6853_v22  ;;  %v11883_v28 = vcombine.high %v6765_v47, %v6773_v1 }
 0x53e   : > { %9582 = vmatpush1.bf16.msra.mxu1 %v11818_v18  ;;  %v6535_v18 = vld [vmem:[%s13426_s11 + $0x4d8] sm:$0xff] }
 0x53f   : > { %9711 = vmatpush1.bf16.msra.mxu0 %v11518_v37  ;;  %9583 = vmatprep.subr.bf16.mxu1 %v11803_v4  ;;  %v11962_v37 = vcombine.low %v6845_v0, %v6853_v22  ;;  %v11662_v4 = vcombine.low %v6543_v45, %v6551_v48  ;;  %v11647_v34 = vcombine.high %v6527_v15, %v6535_v18 }
 0x540   : > { %9712 = vmatprep.subr.bf16.mxu0 %v11503_v50  ;;  %v11947_v50 = vcombine.high %v6829_v7, %v6837_v8  ;;  %v11882_v0 = vcombine.low %v6765_v47, %v6773_v1  ;;  %v6632_v47 = vld [vmem:[%s13426_s11 + $0x7e0] sm:$0xff] }
 0x542   : > { %9584 = vmatpush1.bf16.msra.mxu1 %v11802_v12  ;;  %v6519_v12 = vld [vmem:[%s13426_s11 + $0x458] sm:$0xff] }
 0x543   : > { %9713 = vmatpush1.bf16.msra.mxu0 %v11502_v14  ;;  %9585 = vmatprep.subr.bf16.mxu1 %v11787_v46  ;;  %v11946_v14 = vcombine.low %v6829_v7, %v6837_v8  ;;  %v11646_v46 = vcombine.low %v6527_v15, %v6535_v18  ;;  %v11631_v59 = vcombine.high %v6511_v24, %v6519_v12  ;;  %v6440_v7 = vld [vmem:[%s13426_s11 + $0x1e0] sm:$0xff] }
 0x544   : > { %9714 = vmatprep.subr.bf16.mxu0 %v11743_v39  ;;  %v11931_v39 = vcombine.high %v6813_v38, %v6821_v54 }
 0x546   : > { %9586 = vmatpush1.bf16.msra.mxu1 %v11786_v21  ;;  %v6504_v21 = vld [vmem:[%s13426_s11 + $0x3e0] sm:$0xff] }
 0x547   : > { %9715 = vmatpush2.bf16.msra.mxu0 %v11742_v31  ;;  %9587 = vmatprep.subr.bf16.mxu1 %v11771_v32  ;;  %v11930_v31 = vcombine.low %v6813_v38, %v6821_v54  ;;  %v11630_v32 = vcombine.low %v6511_v24, %v6519_v12  ;;  %v11617_v60 = vcombine.high %v6496_v20, %v6504_v21  ;;  %v6424_v38 = vld [vmem:[%s13426_s11 + $0x160] sm:$0xff] }
 0x548   : > { %9716 = vmatprep.subr.bf16.mxu0 %v11727_v36  ;;  %v11915_v36 = vcombine.high %v6797_v25, %v6805_v26 }
 0x54a   : > { %9588 = vmatpush1.bf16.msra.mxu1 %v11770_v11  ;;  %v6488_v11 = vld [vmem:[%s13426_s11 + $0x360] sm:$0xff] }
 0x54b   : > { %9717 = vmatpush2.bf16.msra.mxu0 %v11726_v19  ;;  %9589 = vmatprep.subr.bf16.mxu1 %v11755_v41  ;;  %v11914_v19 = vcombine.low %v6797_v25, %v6805_v26  ;;  %v11616_v41 = vcombine.low %v6496_v20, %v6504_v21  ;;  %v11601_v43 = vcombine.high %v6480_v30, %v6488_v11  ;;  %v6408_v25 = vld [vmem:[%s13426_s11 + $0xe0] sm:$0xff] }
 0x54c   : > { %9718 = vmatprep.subr.bf16.mxu0 %v11711_v42  ;;  %v11899_v42 = vcombine.high %v6781_v61, %v6789_v62  ;;  %v11600_v55 = vcombine.low %v6480_v30, %v6488_v11 }
 0x54e   : > { %9590 = vmatpush1.bf16.msra.mxu1 %v11754_v56  ;;  %v6464_v56 = vld [vmem:[%s13426_s11 + $0x2a0] sm:$0xff] }
 0x54f   : > { %9719 = vmatpush2.bf16.msra.mxu0 %v11710_v57  ;;  %9591 = vmatprep.subr.bf16.mxu1 %v11995_v5  ;;  %v6472_v57 = vld [vmem:[%s13426_s11 + $0x2e0] sm:$0xff]  ;;  %v11898_v5 = vcombine.low %v6781_v61, %v6789_v62 }
 0x550   : > { %9720 = vmatprep.subr.bf16.mxu0 %v11695_v53  ;;  %v11585_v29 = vcombine.high %v6464_v56, %v6472_v57  ;;  %v11584_v45 = vcombine.low %v6464_v56, %v6472_v57  ;;  %v6392_v61 = vld [vmem:[%s13426_s11 + $0x60] sm:$0xff] }
 0x552   : > { %9592 = vmatpush2.bf16.msra.mxu1 %v11994_v27  ;;  %v6758_v27 = vld [vmem:[%s13426_s11 + $0xbd0] sm:$0xff] }
 0x553   : > { %9721 = vmatpush2.bf16.msra.mxu0 %v11694_v17  ;;  %9593 = vmatprep.subr.bf16.mxu1 %v11979_v63  ;;  %v6448_v63 = vld [vmem:[%s13426_s11 + $0x220] sm:$0xff]  ;;  %v11869_v48 = vcombine.high %v6750_v16, %v6758_v27  ;;  %v11868_v8 = vcombine.low %v6750_v16, %v6758_v27 }
 0x554   : > { %9722 = vmatprep.subr.bf16.mxu0 %v11679_v13  ;;  %v6456_v13 = vld [vmem:[%s13426_s11 + $0x260] sm:$0xff] }
 0x555   : > { %v11568_v15 = vcombine.low %v6448_v63, %v6456_v13  ;;  %v6616_v16 = vld [vmem:[%s13426_s11 + $0x760] sm:$0xff] }
 0x556   : > { %9594 = vmatpush2.bf16.msra.mxu1 %v11978_v58  ;;  %v11569_v58 = vcombine.high %v6448_v63, %v6456_v13 }
 0x557   : > { %9723 = vmatpush2.bf16.msra.mxu0 %v11678_v52  ;;  %9595 = vmatprep.subr.bf16.mxu1 %v11963_v2  ;;  %v6734_v52 = vld [vmem:[%s13426_s11 + $0xb10] sm:$0xff] }
 0x558   : > { %9724 = vmatprep.subr.bf16.mxu0 %v11663_v6  ;;  %v6742_v2 = vld [vmem:[%s13426_s11 + $0xb50] sm:$0xff]  ;;  %v6432_v6 = vld [vmem:[%s13426_s11 + $0x1a0] sm:$0xff] }
 0x559   : > { %v11853_v18 = vcombine.high %v6734_v52, %v6742_v2  ;;  %v11852_v54 = vcombine.low %v6734_v52, %v6742_v2  ;;  %v11552_v24 = vcombine.low %v6432_v6, %v6440_v7 }
 0x55a   : > { %9596 = vmatpush2.bf16.msra.mxu1 %v11962_v37  ;;  %v11553_v37 = vcombine.high %v6432_v6, %v6440_v7  ;;  %v6878_v7 = vld [vmem:[%s13426_s11 + $0xf90] sm:$0xff] }
 0x55b   : > { %9725 = vmatpush2.bf16.msra.mxu0 %v11662_v4  ;;  %9597 = vmatprep.subr.bf16.mxu1 %v11947_v50  ;;  %v6718_v4 = vld [vmem:[%s13426_s11 + $0xa90] sm:$0xff] }
 0x55c   : > { %9726 = vmatprep.subr.bf16.mxu0 %v11647_v34  ;;  %v6726_v50 = vld [vmem:[%s13426_s11 + $0xad0] sm:$0xff]  ;;  %v6416_v34 = vld [vmem:[%s13426_s11 + $0x120] sm:$0xff] }
 0x55d   : > { %v11837_v12 = vcombine.high %v6718_v4, %v6726_v50  ;;  %v11836_v26 = vcombine.low %v6718_v4, %v6726_v50  ;;  %v11536_v20 = vcombine.low %v6416_v34, %v6424_v38 }
 0x55e   : > { %9598 = vmatpush2.bf16.msra.mxu1 %v11946_v14  ;;  %v11537_v14 = vcombine.high %v6416_v34, %v6424_v38  ;;  %v6862_v38 = vld [vmem:[%s13426_s11 + $0xf10] sm:$0xff] }
 0x55f   : > { %9727 = vmatpush2.bf16.msra.mxu0 %v11646_v46  ;;  %9599 = vmatprep.subr.bf16.mxu1 %v11931_v39  ;;  %v6702_v46 = vld [vmem:[%s13426_s11 + $0xa10] sm:$0xff] }
 0x560   : > { %9728 = vmatprep.subr.bf16.mxu0 %v11631_v59  ;;  %v6710_v39 = vld [vmem:[%s13426_s11 + $0xa50] sm:$0xff]  ;;  %v6400_v59 = vld [vmem:[%s13426_s11 + $0xa0] sm:$0xff] }
 0x561   : > { %v11821_v21 = vcombine.high %v6702_v46, %v6710_v39  ;;  %v11820_v62 = vcombine.low %v6702_v46, %v6710_v39  ;;  %v11520_v30 = vcombine.low %v6400_v59, %v6408_v25 }
 0x562   : > { %9600 = vmatpush2.bf16.msra.mxu1 %v11930_v31  ;;  %v11521_v31 = vcombine.high %v6400_v59, %v6408_v25  ;;  %v6846_v25 = vld [vmem:[%s13426_s11 + $0xe90] sm:$0xff] }
 0x563   : > { %9729 = vmatpush2.bf16.msra.mxu0 %v11630_v32  ;;  %9601 = vmatprep.subr.bf16.mxu1 %v11915_v36  ;;  %v6686_v32 = vld [vmem:[%s13426_s11 + $0x990] sm:$0xff] }
 0x564   : > { %9780 = vmatprep.subr.bf16.mxu0 %v11617_v60  ;;  %v6694_v36 = vld [vmem:[%s13426_s11 + $0x9d0] sm:$0xff]  ;;  %v6384_v60 = vld [vmem:[%s13426_s11 + $0x20] sm:$0xff] }
 0x565   : > { %v14389_v33 = vpop.f32.mrf.mxu0  ;;  %v11805_v11 = vcombine.high %v6686_v32, %v6694_v36  ;;  %v11804_v1 = vcombine.low %v6686_v32, %v6694_v36  ;;  %v11504_v56 = vcombine.low %v6384_v60, %v6392_v61 }
 0x566   : > { %9602 = vmatpush2.bf16.msra.mxu1 %v11914_v19  ;;  %9731 = vmatmul.mubr.bf16.vlgmr.msra.gmra.mxu0 %v14214_v3  ;;  %v11505_v19 = vcombine.high %v6384_v60, %v6392_v61  ;;  %v6830_v61 = vld [vmem:[%s13426_s11 + $0xe10] sm:$0xff] }
 0x567   : > { %9781 = vmatpush1.bf16.msra.mxu0 %v11616_v41  ;;  %9812 = vmatprep.mubr.bf16.mxu0 %v14143_v51  ;;  %v14395_v53 = vpop.f32.mrf.mxu0  ;;  %v6670_v41 = vld [vmem:[%s13426_s11 + $0x910] sm:$0xff] }
 0x568   : > { %9603 = vmatprep.subr.bf16.mxu1 %v11899_v42  ;;  %9782 = vmatprep.subr.bf16.mxu0 %v11601_v43  ;;  %v6678_v42 = vld [vmem:[%s13426_s11 + $0x950] sm:$0xff]  ;;  %v6624_v43 = vld [vmem:[%s13426_s11 + $0x7a0] sm:$0xff] }
 0x569   : > { %v9490_v17 = vpop.f32.mrf.mxu0  ;;  %v11789_v57 = vcombine.high %v6670_v41, %v6678_v42  ;;  %v11788_v27 = vcombine.low %v6670_v41, %v6678_v42 }
 0x56a   : > { %9604 = vmatpush2.bf16.msra.mxu1 %v11898_v5  ;;  %v11745_v5 = vcombine.high %v6624_v43, %v6632_v47  ;;  %v11744_v17 = vcombine.low %v6624_v43, %v6632_v47  ;;  %v6814_v47 = vld [vmem:[%s13426_s11 + $0xd90] sm:$0xff] }
 0x56b   : > { %9783 = vmatpush1.bf16.msra.mxu0 %v11600_v55  ;;  %v9491_v22 = vpop.f32.mrf.mxu0  ;;  %9605 = vmatprep.subr.bf16.mxu1 %v11883_v28  ;;  %v6654_v55 = vld [vmem:[%s13426_s11 + $0x890] sm:$0xff] }
 0x56c   : > { %9784 = vmatprep.subr.bf16.mxu0 %v11585_v29  ;;  %v6662_v28 = vld [vmem:[%s13426_s11 + $0x8d0] sm:$0xff]  ;;  %v6608_v29 = vld [vmem:[%s13426_s11 + $0x720] sm:$0xff] }
 0x56d   : > { %v11773_v63 = vcombine.high %v6654_v55, %v6662_v28  ;;  %v11729_v13 = vcombine.high %v6608_v29, %v6616_v16  ;;  %v6646_v22 = vld [vmem:[%s13426_s11 + $0x850] sm:$0xff]  ;;  %v11728_v52 = vcombine.low %v6608_v29, %v6616_v16 }
 0x56e   : > { %9606 = vmatpush2.bf16.msra.mxu1 %v11882_v0  ;;  %v6638_v0 = vld [vmem:[%s13426_s11 + $0x810] sm:$0xff] }
 0x56f   : > { %9785 = vmatpush1.bf16.msra.mxu0 %v11584_v45  ;;  %9657 = vmatprep.subr.bf16.mxu1 %v11869_v48  ;;  %v6592_v45 = vld [vmem:[%s13426_s11 + $0x6a0] sm:$0xff]  ;;  %v11757_v2 = vcombine.high %v6638_v0, %v6646_v22  ;;  %v6798_v16 = vld [vmem:[%s13426_s11 + $0xd10] sm:$0xff] }
 0x570   : > { %9786 = vmatprep.subr.bf16.mxu0 %v11569_v58  ;;  %v6600_v48 = vld [vmem:[%s13426_s11 + $0x6e0] sm:$0xff]  ;;  %v11772_v58 = vcombine.low %v6654_v55, %v6662_v28 }
 0x571   : > { %9608 = vmatmul.mubr.bf16.vlgmr.msra.gmra.mxu1 %v14327_v35  ;;  %v11713_v6 = vcombine.high %v6592_v45, %v6600_v48  ;;  %v11712_v4 = vcombine.low %v6592_v45, %v6600_v48  ;;  %v6782_v48 = vld [vmem:[%s13426_s11 + $0xc90] sm:$0xff] }
 0x572   : > { %9658 = vmatpush1.bf16.msra.mxu1 %v11868_v8  ;;  %9689 = vmatprep.mubr.bf16.mxu1 %v14325_v9  ;;  %v6886_v8 = vld [vmem:[%s13426_s11 + $0xfd0] sm:$0xff] }
 0x573   : > { %9787 = vmatpush1.bf16.msra.mxu0 %v11568_v15  ;;  %9659 = vmatprep.subr.bf16.mxu1 %v11853_v18  ;;  %v6576_v15 = vld [vmem:[%s13426_s11 + $0x620] sm:$0xff]  ;;  %v11997_v50 = vcombine.high %v6878_v7, %v6886_v8 }
 0x574   : > { %9788 = vmatprep.subr.bf16.mxu0 %v11553_v37  ;;  %v6584_v18 = vld [vmem:[%s13426_s11 + $0x660] sm:$0xff]  ;;  %v11756_v37 = vcombine.low %v6638_v0, %v6646_v22 }
 0x575   : > { %v11697_v34 = vcombine.high %v6576_v15, %v6584_v18  ;;  %v11696_v46 = vcombine.low %v6576_v15, %v6584_v18  ;;  %v6766_v18 = vld [vmem:[%s13426_s11 + $0xc10] sm:$0xff] }
 0x576   : > { %9660 = vmatpush1.bf16.msra.mxu1 %v11852_v54  ;;  %v6870_v54 = vld [vmem:[%s13426_s11 + $0xf50] sm:$0xff] }
 0x577   : > { %9789 = vmatpush1.bf16.msra.mxu0 %v11552_v24  ;;  %9661 = vmatprep.subr.bf16.mxu1 %v11837_v12  ;;  %v6560_v24 = vld [vmem:[%s13426_s11 + $0x5a0] sm:$0xff]  ;;  %v11981_v39 = vcombine.high %v6862_v38, %v6870_v54 }
 0x578   : > { %9790 = vmatprep.subr.bf16.mxu0 %v11537_v14  ;;  %v6568_v12 = vld [vmem:[%s13426_s11 + $0x5e0] sm:$0xff]  ;;  %v11996_v14 = vcombine.low %v6878_v7, %v6886_v8 }
 0x579   : > { %v11681_v59 = vcombine.high %v6560_v24, %v6568_v12  ;;  %v11680_v32 = vcombine.low %v6560_v24, %v6568_v12 }
 0x57a   : > { %9662 = vmatpush1.bf16.msra.mxu1 %v11836_v26  ;;  %v6854_v26 = vld [vmem:[%s13426_s11 + $0xed0] sm:$0xff] }
 0x57b   : > { %9791 = vmatpush1.bf16.msra.mxu0 %v11536_v20  ;;  %9663 = vmatprep.subr.bf16.mxu1 %v11821_v21  ;;  %v6544_v20 = vld [vmem:[%s13426_s11 + $0x520] sm:$0xff]  ;;  %v11965_v36 = vcombine.high %v6846_v25, %v6854_v26 }
 0x57c   : > { %9792 = vmatprep.subr.bf16.mxu0 %v11521_v31  ;;  %v6552_v21 = vld [vmem:[%s13426_s11 + $0x560] sm:$0xff]  ;;  %v11980_v31 = vcombine.low %v6862_v38, %v6870_v54 }
 0x57d   : > { %v11665_v60 = vcombine.high %v6544_v20, %v6552_v21  ;;  %v11664_v41 = vcombine.low %v6544_v20, %v6552_v21 }
 0x57e   : > { %9664 = vmatpush1.bf16.msra.mxu1 %v11820_v62  ;;  %v6838_v62 = vld [vmem:[%s13426_s11 + $0xe50] sm:$0xff] }
 0x57f   : > { %9793 = vmatpush1.bf16.msra.mxu0 %v11520_v30  ;;  %9665 = vmatprep.subr.bf16.mxu1 %v11805_v11  ;;  %v6528_v30 = vld [vmem:[%s13426_s11 + $0x4a0] sm:$0xff]  ;;  %v11949_v42 = vcombine.high %v6830_v61, %v6838_v62 }
 0x580   : > { %9794 = vmatprep.subr.bf16.mxu0 %v11505_v19  ;;  %v6536_v11 = vld [vmem:[%s13426_s11 + $0x4e0] sm:$0xff]  ;;  %v11964_v19 = vcombine.low %v6846_v25, %v6854_v26  ;;  %v6449_v25 = vld [vmem:[%s13426_s11 + $0x228] sm:$0xff] }
 0x581   : > { %v11649_v43 = vcombine.high %v6528_v30, %v6536_v11  ;;  %v11648_v55 = vcombine.low %v6528_v30, %v6536_v11  ;;  %v6457_v26 = vld [vmem:[%s13426_s11 + $0x268] sm:$0xff] }
 0x582   : > { %9666 = vmatpush1.bf16.msra.mxu1 %v11804_v1  ;;  %v6822_v1 = vld [vmem:[%s13426_s11 + $0xdd0] sm:$0xff]  ;;  %v6441_v30 = vld [vmem:[%s13426_s11 + $0x1e8] sm:$0xff] }
 0x583   : > { %9795 = vmatpush1.bf16.msra.mxu0 %v11504_v56  ;;  %9667 = vmatprep.subr.bf16.mxu1 %v11789_v57  ;;  %v6512_v56 = vld [vmem:[%s13426_s11 + $0x420] sm:$0xff]  ;;  %v11933_v28 = vcombine.high %v6814_v47, %v6822_v1 }
 0x584   : > { %9796 = vmatprep.subr.bf16.mxu0 %v11745_v5  ;;  %v6520_v57 = vld [vmem:[%s13426_s11 + $0x460] sm:$0xff]  ;;  %v11948_v5 = vcombine.low %v6830_v61, %v6838_v62  ;;  %v6743_v61 = vld [vmem:[%s13426_s11 + $0xb58] sm:$0xff]  ;;  %v6433_v62 = vld [vmem:[%s13426_s11 + $0x1a8] sm:$0xff] }
 0x585   : > { %v11633_v29 = vcombine.high %v6512_v56, %v6520_v57  ;;  %v11632_v0 = vcombine.low %v6512_v56, %v6520_v57  ;;  %v6425_v56 = vld [vmem:[%s13426_s11 + $0x168] sm:$0xff] }
 0x586   : > { %9668 = vmatpush1.bf16.msra.mxu1 %v11788_v27  ;;  %v6806_v27 = vld [vmem:[%s13426_s11 + $0xd50] sm:$0xff] }
 0x587   : > { %9797 = vmatpush2.bf16.msra.mxu0 %v11744_v17  ;;  %9669 = vmatprep.subr.bf16.mxu1 %v11773_v63  ;;  %v6497_v17 = vld [vmem:[%s13426_s11 + $0x3a8] sm:$0xff]  ;;  %v11917_v22 = vcombine.high %v6798_v16, %v6806_v27 }
 0x588   : > { %9798 = vmatprep.subr.bf16.mxu0 %v11729_v13  ;;  %v6505_v63 = vld [vmem:[%s13426_s11 + $0x3e8] sm:$0xff]  ;;  %v11932_v13 = vcombine.low %v6814_v47, %v6822_v1  ;;  %v6727_v47 = vld [vmem:[%s13426_s11 + $0xad8] sm:$0xff] }
 0x589   : > { %v11619_v45 = vcombine.high %v6497_v17, %v6505_v63  ;;  %v11618_v7 = vcombine.low %v6497_v17, %v6505_v63  ;;  %v6417_v1 = vld [vmem:[%s13426_s11 + $0x128] sm:$0xff] }
 0x58a   : > { %9670 = vmatpush1.bf16.msra.mxu1 %v11772_v58  ;;  %v6790_v58 = vld [vmem:[%s13426_s11 + $0xcd0] sm:$0xff]  ;;  %v6409_v17 = vld [vmem:[%s13426_s11 + $0xe8] sm:$0xff] }
 0x58b   : > { %9799 = vmatpush2.bf16.msra.mxu0 %v11728_v52  ;;  %9671 = vmatprep.subr.bf16.mxu1 %v11757_v2  ;;  %v6481_v52 = vld [vmem:[%s13426_s11 + $0x328] sm:$0xff]  ;;  %v11901_v8 = vcombine.high %v6782_v48, %v6790_v58  ;;  %v11900_v38 = vcombine.low %v6782_v48, %v6790_v58  ;;  %v6695_v48 = vld [vmem:[%s13426_s11 + $0x9d8] sm:$0xff] }
 0x58c   : > { %9800 = vmatprep.subr.bf16.mxu0 %v11713_v6  ;;  %v6489_v2 = vld [vmem:[%s13426_s11 + $0x368] sm:$0xff]  ;;  %v11916_v6 = vcombine.low %v6798_v16, %v6806_v27  ;;  %v6711_v16 = vld [vmem:[%s13426_s11 + $0xa58] sm:$0xff] }
 0x58d   : > { %v11603_v15 = vcombine.high %v6481_v52, %v6489_v2  ;;  %v11602_v24 = vcombine.low %v6481_v52, %v6489_v2  ;;  %v6401_v27 = vld [vmem:[%s13426_s11 + $0xa8] sm:$0xff] }
 0x58e   : > { %9672 = vmatpush1.bf16.msra.mxu1 %v11756_v37  ;;  %v6774_v37 = vld [vmem:[%s13426_s11 + $0xc50] sm:$0xff]  ;;  %v6385_v58 = vld [vmem:[%s13426_s11 + $0x28] sm:$0xff] }
 0x58f   : > { %9801 = vmatpush2.bf16.msra.mxu0 %v11712_v4  ;;  %9673 = vmatprep.subr.bf16.mxu1 %v11997_v50  ;;  %v6465_v50 = vld [vmem:[%s13426_s11 + $0x2a8] sm:$0xff]  ;;  %v11885_v12 = vcombine.high %v6766_v18, %v6774_v37  ;;  %v11884_v20 = vcombine.low %v6766_v18, %v6774_v37  ;;  %v6679_v18 = vld [vmem:[%s13426_s11 + $0x958] sm:$0xff] }
 0x590   : > { %9802 = vmatprep.subr.bf16.mxu0 %v11697_v34  ;;  %v6473_v34 = vld [vmem:[%s13426_s11 + $0x2e8] sm:$0xff] }
 0x591   : > { %v6393_v52 = vld [vmem:[%s13426_s11 + $0x68] sm:$0xff] }
 0x592   : > { %9674 = vmatpush2.bf16.msra.mxu1 %v11996_v14  ;;  %v11587_v14 = vcombine.high %v6465_v50, %v6473_v34  ;;  %v6625_v37 = vld [vmem:[%s13426_s11 + $0x7a8] sm:$0xff] }
 0x593   : > { %9803 = vmatpush2.bf16.msra.mxu0 %v11696_v46  ;;  %9675 = vmatprep.subr.bf16.mxu1 %v11981_v39  ;;  %v6751_v46 = vld [vmem:[%s13426_s11 + $0xb98] sm:$0xff] }
 0x594   : > { %9804 = vmatprep.subr.bf16.mxu0 %v11681_v59  ;;  %v6759_v39 = vld [vmem:[%s13426_s11 + $0xbd8] sm:$0xff] }
 0x595   : > { %v11870_v11 = vcombine.low %v6751_v46, %v6759_v39 }
 0x596   : > { %9676 = vmatpush2.bf16.msra.mxu1 %v11980_v31  ;;  %v11586_v31 = vcombine.low %v6465_v50, %v6473_v34  ;;  %v6633_v50 = vld [vmem:[%s13426_s11 + $0x7e8] sm:$0xff] }
 0x597   : > { %9805 = vmatpush2.bf16.msra.mxu0 %v11680_v32  ;;  %9677 = vmatprep.subr.bf16.mxu1 %v11965_v36  ;;  %v11871_v32 = vcombine.high %v6751_v46, %v6759_v39  ;;  %v11571_v36 = vcombine.high %v6449_v25, %v6457_v26  ;;  %v6663_v46 = vld [vmem:[%s13426_s11 + $0x8d8] sm:$0xff]  ;;  %v6609_v39 = vld [vmem:[%s13426_s11 + $0x728] sm:$0xff] }
 0x598   : > { %9806 = vmatprep.subr.bf16.mxu0 %v11665_v60  ;;  %v6735_v60 = vld [vmem:[%s13426_s11 + $0xb18] sm:$0xff] }
 0x599   : > { %v11854_v57 = vcombine.low %v6735_v60, %v6743_v61 }
 0x59a   : > { %9678 = vmatpush2.bf16.msra.mxu1 %v11964_v19  ;;  %v11570_v19 = vcombine.low %v6449_v25, %v6457_v26  ;;  %v11746_v26 = vcombine.low %v6625_v37, %v6633_v50 }
 0x59b   : > { %9807 = vmatpush2.bf16.msra.mxu0 %v11664_v41  ;;  %9679 = vmatprep.subr.bf16.mxu1 %v11949_v42  ;;  %v11855_v41 = vcombine.high %v6735_v60, %v6743_v61  ;;  %v11555_v42 = vcombine.high %v6433_v62, %v6441_v30  ;;  %v6601_v60 = vld [vmem:[%s13426_s11 + $0x6e8] sm:$0xff] }
 0x59c   : > { %9808 = vmatprep.subr.bf16.mxu0 %v11649_v43  ;;  %v6719_v43 = vld [vmem:[%s13426_s11 + $0xa98] sm:$0xff] }
 0x59d   : > { %v11838_v63 = vcombine.low %v6719_v43, %v6727_v47 }
 0x59e   : > { %9680 = vmatpush2.bf16.msra.mxu1 %v11948_v5  ;;  %v11554_v5 = vcombine.low %v6433_v62, %v6441_v30 }
 0x59f   : > { %9809 = vmatpush2.bf16.msra.mxu0 %v11648_v55  ;;  %9681 = vmatprep.subr.bf16.mxu1 %v11933_v28  ;;  %v11839_v55 = vcombine.high %v6719_v43, %v6727_v47  ;;  %v11539_v28 = vcombine.high %v6417_v1, %v6425_v56  ;;  %v6585_v43 = vld [vmem:[%s13426_s11 + $0x668] sm:$0xff] }
 0x5a0   : > { %9810 = vmatprep.subr.bf16.mxu0 %v11633_v29  ;;  %v6703_v29 = vld [vmem:[%s13426_s11 + $0xa18] sm:$0xff] }
 0x5a1   : > { %v11822_v2 = vcombine.low %v6703_v29, %v6711_v16 }
 0x5a2   : > { %9682 = vmatpush2.bf16.msra.mxu1 %v11932_v13  ;;  %v11538_v13 = vcombine.low %v6417_v1, %v6425_v56 }
 0x5a3   : > { %9811 = vmatpush2.bf16.msra.mxu0 %v11632_v0  ;;  %9683 = vmatprep.subr.bf16.mxu1 %v11917_v22  ;;  %v11823_v0 = vcombine.high %v6703_v29, %v6711_v16  ;;  %v11523_v22 = vcombine.high %v6401_v27, %v6409_v17  ;;  %v6569_v29 = vld [vmem:[%s13426_s11 + $0x5e8] sm:$0xff] }
 0x5a4   : > { %9862 = vmatprep.subr.bf16.mxu0 %v11619_v45  ;;  %v6687_v45 = vld [vmem:[%s13426_s11 + $0x998] sm:$0xff] }
 0x5a5   : > { %v14461_v4 = vpop.f32.mrf.mxu0  ;;  %v11806_v34 = vcombine.low %v6687_v45, %v6695_v48 }
 0x5a6   : > { %9684 = vmatpush2.bf16.msra.mxu1 %v11916_v6  ;;  %9813 = vmatmul.mubr.bf16.vlgmr.msra.gmra.mxu0 %v14214_v3  ;;  %v11522_v6 = vcombine.low %v6401_v27, %v6409_v17 }
 0x5a7   : > { %9863 = vmatpush1.bf16.msra.mxu0 %v11618_v7  ;;  %9894 = vmatprep.mubr.bf16.mxu0 %v14143_v51  ;;  %v14467_v54 = vpop.f32.mrf.mxu0  ;;  %v11807_v7 = vcombine.high %v6687_v45, %v6695_v48  ;;  %v6553_v45 = vld [vmem:[%s13426_s11 + $0x568] sm:$0xff] }
 0x5a8   : > { %9685 = vmatprep.subr.bf16.mxu1 %v11901_v8  ;;  %9864 = vmatprep.subr.bf16.mxu0 %v11603_v15  ;;  %v11507_v8 = vcombine.high %v6385_v58, %v6393_v52  ;;  %v6671_v15 = vld [vmem:[%s13426_s11 + $0x918] sm:$0xff] }
 0x5a9   : > { %v9572_v59 = vpop.f32.mrf.mxu0  ;;  %v11790_v25 = vcombine.low %v6671_v15, %v6679_v18 }
 0x5aa   : > { %9686 = vmatpush2.bf16.msra.mxu1 %v11900_v38  ;;  %v11506_v38 = vcombine.low %v6385_v58, %v6393_v52  ;;  %v6617_v59 = vld [vmem:[%s13426_s11 + $0x768] sm:$0xff] }
 0x5ab   : > { %9865 = vmatpush1.bf16.msra.mxu0 %v11602_v24  ;;  %v9573_v21 = vpop.f32.mrf.mxu0  ;;  %9687 = vmatprep.subr.bf16.mxu1 %v11885_v12  ;;  %v11791_v24 = vcombine.high %v6671_v15, %v6679_v18  ;;  %v11747_v12 = vcombine.high %v6625_v37, %v6633_v50  ;;  %v11730_v62 = vcombine.low %v6609_v39, %v6617_v59  ;;  %v6537_v15 = vld [vmem:[%s13426_s11 + $0x4e8] sm:$0xff] }
 0x5ac   : > { %9866 = vmatprep.subr.bf16.mxu0 %v11587_v14  ;;  %v6655_v14 = vld [vmem:[%s13426_s11 + $0x898] sm:$0xff]  ;;  %v11731_v21 = vcombine.high %v6609_v39, %v6617_v59 }
 0x5ad   : > { %v11774_v61 = vcombine.low %v6655_v14, %v6663_v46 }
 0x5ae   : > { %9688 = vmatpush2.bf16.msra.mxu1 %v11884_v20  ;;  %v11775_v20 = vcombine.high %v6655_v14, %v6663_v46  ;;  %v6521_v14 = vld [vmem:[%s13426_s11 + $0x468] sm:$0xff] }
 0x5af   : > { %9867 = vmatpush1.bf16.msra.mxu0 %v11586_v31  ;;  %9739 = vmatprep.subr.bf16.mxu1 %v11871_v32  ;;  %v6639_v31 = vld [vmem:[%s13426_s11 + $0x818] sm:$0xff] }
 0x5b0   : > { %9868 = vmatprep.subr.bf16.mxu0 %v11571_v36  ;;  %v6647_v32 = vld [vmem:[%s13426_s11 + $0x858] sm:$0xff]  ;;  %v6593_v36 = vld [vmem:[%s13426_s11 + $0x6a8] sm:$0xff] }
 0x5b1   : > { %9690 = vmatmul.mubr.bf16.vlgmr.msra.gmra.mxu1 %v14327_v35  ;;  %v11759_v30 = vcombine.high %v6639_v31, %v6647_v32  ;;  %v11758_v47 = vcombine.low %v6639_v31, %v6647_v32  ;;  %v11714_v1 = vcombine.low %v6593_v36, %v6601_v60  ;;  %v6506_v31 = vld [vmem:[%s13426_s11 + $0x3f0] sm:$0xff] }
 0x5b2   : > { %9740 = vmatpush1.bf16.msra.mxu1 %v11870_v11  ;;  %9771 = vmatprep.mubr.bf16.mxu1 %v14325_v9  ;;  %v11715_v11 = vcombine.high %v6593_v36, %v6601_v60 }
 0x5b3   : > { %9869 = vmatpush1.bf16.msra.mxu0 %v11570_v19  ;;  %9741 = vmatprep.subr.bf16.mxu1 %v11855_v41  ;;  %v6879_v19 = vld [vmem:[%s13426_s11 + $0xf98] sm:$0xff] }
 0x5b4   : > { %9870 = vmatprep.subr.bf16.mxu0 %v11555_v42  ;;  %v6887_v41 = vld [vmem:[%s13426_s11 + $0xfd8] sm:$0xff]  ;;  %v6577_v42 = vld [vmem:[%s13426_s11 + $0x628] sm:$0xff] }
 0x5b5   : > { %v11999_v56 = vcombine.high %v6879_v19, %v6887_v41  ;;  %v11998_v16 = vcombine.low %v6879_v19, %v6887_v41  ;;  %v11698_v27 = vcombine.low %v6577_v42, %v6585_v43  ;;  %v6490_v19 = vld [vmem:[%s13426_s11 + $0x370] sm:$0xff] }
 0x5b6   : > { %9742 = vmatpush1.bf16.msra.mxu1 %v11854_v57  ;;  %v11699_v57 = vcombine.high %v6577_v42, %v6585_v43 }
 0x5b7   : > { %9871 = vmatpush1.bf16.msra.mxu0 %v11554_v5  ;;  %9743 = vmatprep.subr.bf16.mxu1 %v11839_v55  ;;  %v6863_v5 = vld [vmem:[%s13426_s11 + $0xf18] sm:$0xff] }
 0x5b8   : > { %9872 = vmatprep.subr.bf16.mxu0 %v11539_v28  ;;  %v6871_v55 = vld [vmem:[%s13426_s11 + $0xf58] sm:$0xff]  ;;  %v6561_v28 = vld [vmem:[%s13426_s11 + $0x5a8] sm:$0xff] }
 0x5b9   : > { %v11983_v17 = vcombine.high %v6863_v5, %v6871_v55  ;;  %v11982_v48 = vcombine.low %v6863_v5, %v6871_v55  ;;  %v11682_v58 = vcombine.low %v6561_v28, %v6569_v29  ;;  %v6466_v5 = vld [vmem:[%s13426_s11 + $0x2b0] sm:$0xff] }
 0x5ba   : > { %9744 = vmatpush1.bf16.msra.mxu1 %v11838_v63  ;;  %v11683_v63 = vcombine.high %v6561_v28, %v6569_v29  ;;  %v6474_v55 = vld [vmem:[%s13426_s11 + $0x2f0] sm:$0xff] }
 0x5bb   : > { %9873 = vmatpush1.bf16.msra.mxu0 %v11538_v13  ;;  %9745 = vmatprep.subr.bf16.mxu1 %v11823_v0  ;;  %v6847_v13 = vld [vmem:[%s13426_s11 + $0xe98] sm:$0xff] }
 0x5bc   : > { %9874 = vmatprep.subr.bf16.mxu0 %v11523_v22  ;;  %v6855_v0 = vld [vmem:[%s13426_s11 + $0xed8] sm:$0xff]  ;;  %v6545_v22 = vld [vmem:[%s13426_s11 + $0x528] sm:$0xff] }
 0x5bd   : > { %v11967_v52 = vcombine.high %v6847_v13, %v6855_v0  ;;  %v11966_v18 = vcombine.low %v6847_v13, %v6855_v0  ;;  %v11666_v37 = vcombine.low %v6545_v22, %v6553_v45  ;;  %v6760_v13 = vld [vmem:[%s13426_s11 + $0xbe0] sm:$0xff] }
 0x5be   : > { %9746 = vmatpush1.bf16.msra.mxu1 %v11822_v2  ;;  %v11667_v2 = vcombine.high %v6545_v22, %v6553_v45  ;;  %v6450_v22 = vld [vmem:[%s13426_s11 + $0x230] sm:$0xff] }
 0x5bf   : > { %9875 = vmatpush1.bf16.msra.mxu0 %v11522_v6  ;;  %9747 = vmatprep.subr.bf16.mxu1 %v11807_v7  ;;  %v6831_v6 = vld [vmem:[%s13426_s11 + $0xe18] sm:$0xff]  ;;  %v6458_v45 = vld [vmem:[%s13426_s11 + $0x270] sm:$0xff] }
 0x5c0   : > { %9876 = vmatprep.subr.bf16.mxu0 %v11507_v8  ;;  %v6839_v7 = vld [vmem:[%s13426_s11 + $0xe58] sm:$0xff]  ;;  %v6529_v8 = vld [vmem:[%s13426_s11 + $0x4a8] sm:$0xff] }
 0x5c1   : > { %v11951_v50 = vcombine.high %v6831_v6, %v6839_v7  ;;  %v11950_v46 = vcombine.low %v6831_v6, %v6839_v7  ;;  %v11650_v39 = vcombine.low %v6529_v8, %v6537_v15  ;;  %v11573_v6 = vcombine.high %v6450_v22, %v6458_v45  ;;  %v6736_v7 = vld [vmem:[%s13426_s11 + $0xb20] sm:$0xff] }
 0x5c2   : > { %9748 = vmatpush1.bf16.msra.mxu1 %v11806_v34  ;;  %v11651_v34 = vcombine.high %v6529_v8, %v6537_v15  ;;  %v6744_v8 = vld [vmem:[%s13426_s11 + $0xb60] sm:$0xff]  ;;  %v6434_v15 = vld [vmem:[%s13426_s11 + $0x1b0] sm:$0xff] }
 0x5c3   : > { %9877 = vmatpush1.bf16.msra.mxu0 %v11506_v38  ;;  %9749 = vmatprep.subr.bf16.mxu1 %v11791_v24  ;;  %v6815_v38 = vld [vmem:[%s13426_s11 + $0xd98] sm:$0xff] }
 0x5c4   : > { %9878 = vmatprep.subr.bf16.mxu0 %v11747_v12  ;;  %v6823_v24 = vld [vmem:[%s13426_s11 + $0xdd8] sm:$0xff]  ;;  %v6513_v12 = vld [vmem:[%s13426_s11 + $0x428] sm:$0xff] }
 0x5c5   : > { %v11935_v59 = vcombine.high %v6815_v38, %v6823_v24  ;;  %v11934_v32 = vcombine.low %v6815_v38, %v6823_v24  ;;  %v11634_v36 = vcombine.low %v6513_v12, %v6521_v14  ;;  %v6720_v24 = vld [vmem:[%s13426_s11 + $0xaa0] sm:$0xff] }
 0x5c6   : > { %9750 = vmatpush1.bf16.msra.mxu1 %v11790_v25  ;;  %v11635_v25 = vcombine.high %v6513_v12, %v6521_v14  ;;  %v6728_v12 = vld [vmem:[%s13426_s11 + $0xae0] sm:$0xff] }
 0x5c7   : > { %9879 = vmatpush2.bf16.msra.mxu0 %v11746_v26  ;;  %9751 = vmatprep.subr.bf16.mxu1 %v11775_v20  ;;  %v6799_v26 = vld [vmem:[%s13426_s11 + $0xd18] sm:$0xff] }
 0x5c8   : > { %9880 = vmatprep.subr.bf16.mxu0 %v11731_v21  ;;  %v6807_v20 = vld [vmem:[%s13426_s11 + $0xd58] sm:$0xff]  ;;  %v6498_v21 = vld [vmem:[%s13426_s11 + $0x3b0] sm:$0xff] }
 0x5c9   : > { %v11919_v60 = vcombine.high %v6799_v26, %v6807_v20  ;;  %v11918_v41 = vcombine.low %v6799_v26, %v6807_v20  ;;  %v11620_v42 = vcombine.low %v6498_v21, %v6506_v31 }
 0x5ca   : > { %9752 = vmatpush1.bf16.msra.mxu1 %v11774_v61  ;;  %v11621_v61 = vcombine.high %v6498_v21, %v6506_v31  ;;  %v11841_v21 = vcombine.high %v6720_v24, %v6728_v12 }
 0x5cb   : > { %9881 = vmatpush2.bf16.msra.mxu0 %v11730_v62  ;;  %9753 = vmatprep.subr.bf16.mxu1 %v11759_v30  ;;  %v6783_v62 = vld [vmem:[%s13426_s11 + $0xc98] sm:$0xff] }
 0x5cc   : > { %9882 = vmatprep.subr.bf16.mxu0 %v11715_v11  ;;  %v6791_v30 = vld [vmem:[%s13426_s11 + $0xcd8] sm:$0xff]  ;;  %v6482_v11 = vld [vmem:[%s13426_s11 + $0x330] sm:$0xff] }
 0x5cd   : > { %v11903_v43 = vcombine.high %v6783_v62, %v6791_v30  ;;  %v11902_v28 = vcombine.low %v6783_v62, %v6791_v30  ;;  %v6410_v62 = vld [vmem:[%s13426_s11 + $0xf0] sm:$0xff]  ;;  %v11840_v30 = vcombine.low %v6720_v24, %v6728_v12 }
 0x5ce   : > { %9754 = vmatpush1.bf16.msra.mxu1 %v11758_v47  ;;  %v11605_v47 = vcombine.high %v6482_v11, %v6490_v19 }
 0x5cf   : > { %9883 = vmatpush2.bf16.msra.mxu0 %v11714_v1  ;;  %9755 = vmatprep.subr.bf16.mxu1 %v11999_v56  ;;  %v6767_v1 = vld [vmem:[%s13426_s11 + $0xc18] sm:$0xff] }
 0x5d0   : > { %9884 = vmatprep.subr.bf16.mxu0 %v11699_v57  ;;  %v6775_v56 = vld [vmem:[%s13426_s11 + $0xc58] sm:$0xff] }
 0x5d2   : > { %9756 = vmatpush2.bf16.msra.mxu1 %v11998_v16  ;;  %v11604_v16 = vcombine.low %v6482_v11, %v6490_v19 }
 0x5d3   : > { %9885 = vmatpush2.bf16.msra.mxu0 %v11698_v27  ;;  %9757 = vmatprep.subr.bf16.mxu1 %v11983_v17  ;;  %v11887_v27 = vcombine.high %v6767_v1, %v6775_v56  ;;  %v11589_v17 = vcombine.high %v6466_v5, %v6474_v55 }
 0x5d4   : > { %9886 = vmatprep.subr.bf16.mxu0 %v11683_v63  ;;  %v6752_v63 = vld [vmem:[%s13426_s11 + $0xba0] sm:$0xff] }
 0x5d6   : > { %9758 = vmatpush2.bf16.msra.mxu1 %v11982_v48  ;;  %v11886_v48 = vcombine.low %v6767_v1, %v6775_v56  ;;  %v6394_v1 = vld [vmem:[%s13426_s11 + $0x70] sm:$0xff] }
 0x5d7   : > { %9887 = vmatpush2.bf16.msra.mxu0 %v11682_v58  ;;  %9759 = vmatprep.subr.bf16.mxu1 %v11967_v52  ;;  %v11588_v52 = vcombine.low %v6466_v5, %v6474_v55 }
 0x5d8   : > { %9888 = vmatprep.subr.bf16.mxu0 %v11667_v2  ;;  %v11873_v2 = vcombine.high %v6752_v63, %v6760_v13 }
 0x5da   : > { %9760 = vmatpush2.bf16.msra.mxu1 %v11966_v18  ;;  %v6442_v18 = vld [vmem:[%s13426_s11 + $0x1f0] sm:$0xff] }
 0x5db   : > { %9889 = vmatpush2.bf16.msra.mxu0 %v11666_v37  ;;  %9761 = vmatprep.subr.bf16.mxu1 %v11951_v50  ;;  %v11872_v37 = vcombine.low %v6752_v63, %v6760_v13  ;;  %v11572_v50 = vcombine.low %v6450_v22, %v6458_v45  ;;  %v11557_v38 = vcombine.high %v6434_v15, %v6442_v18  ;;  %v6634_v63 = vld [vmem:[%s13426_s11 + $0x7f0] sm:$0xff] }
 0x5dc   : > { %9890 = vmatprep.subr.bf16.mxu0 %v11651_v34  ;;  %v11857_v34 = vcombine.high %v6736_v7, %v6744_v8  ;;  %v11556_v20 = vcombine.low %v6434_v15, %v6442_v18  ;;  %v6640_v18 = vld [vmem:[%s13426_s11 + $0x820] sm:$0xff] }
 0x5de   : > { %9762 = vmatpush2.bf16.msra.mxu1 %v11950_v46  ;;  %v6418_v46 = vld [vmem:[%s13426_s11 + $0x130] sm:$0xff] }
 0x5df   : > { %9891 = vmatpush2.bf16.msra.mxu0 %v11650_v39  ;;  %9763 = vmatprep.subr.bf16.mxu1 %v11935_v59  ;;  %v6426_v39 = vld [vmem:[%s13426_s11 + $0x170] sm:$0xff] }
 0x5e0   : > { %9892 = vmatprep.subr.bf16.mxu0 %v11635_v25  ;;  %v11856_v25 = vcombine.low %v6736_v7, %v6744_v8  ;;  %v11540_v19 = vcombine.low %v6418_v46, %v6426_v39 }
 0x5e2   : > { %9764 = vmatpush2.bf16.msra.mxu1 %v11934_v32  ;;  %v11541_v32 = vcombine.high %v6418_v46, %v6426_v39  ;;  %v6880_v46 = vld [vmem:[%s13426_s11 + $0xfa0] sm:$0xff] }
 0x5e3   : > { %9893 = vmatpush2.bf16.msra.mxu0 %v11634_v36  ;;  %9765 = vmatprep.subr.bf16.mxu1 %v11919_v60  ;;  %v6704_v36 = vld [vmem:[%s13426_s11 + $0xa20] sm:$0xff] }
 0x5e4   : > { %9944 = vmatprep.subr.bf16.mxu0 %v11621_v61  ;;  %v6402_v61 = vld [vmem:[%s13426_s11 + $0xb0] sm:$0xff]  ;;  %v6888_v39 = vld [vmem:[%s13426_s11 + $0xfe0] sm:$0xff] }
 0x5e5   : > { %v14533_v57 = vpop.f32.mrf.mxu0  ;;  %v11524_v5 = vcombine.low %v6402_v61, %v6410_v62 }
 0x5e6   : > { %9766 = vmatpush2.bf16.msra.mxu1 %v11918_v41  ;;  %9895 = vmatmul.mubr.bf16.vlgmr.msra.gmra.mxu0 %v14214_v3  ;;  %v11525_v41 = vcombine.high %v6402_v61, %v6410_v62  ;;  %v6562_v61 = vld [vmem:[%s13426_s11 + $0x5b0] sm:$0xff] }
 0x5e7   : > { %9945 = vmatpush1.bf16.msra.mxu0 %v11620_v42  ;;  %9976 = vmatprep.mubr.bf16.mxu0 %v14143_v51  ;;  %v14539_v29 = vpop.f32.mrf.mxu0  ;;  %v6688_v42 = vld [vmem:[%s13426_s11 + $0x9a0] sm:$0xff]  ;;  %v6570_v62 = vld [vmem:[%s13426_s11 + $0x5f0] sm:$0xff] }
 0x5e8   : > { %9767 = vmatprep.subr.bf16.mxu1 %v11903_v43  ;;  %9946 = vmatprep.subr.bf16.mxu0 %v11605_v47  ;;  %v6696_v43 = vld [vmem:[%s13426_s11 + $0x9e0] sm:$0xff]  ;;  %v6386_v47 = vld [vmem:[%s13426_s11 + $0x30] sm:$0xff] }
 0x5e9   : > { %v9654_v0 = vpop.f32.mrf.mxu0  ;;  %v11809_v55 = vcombine.high %v6688_v42, %v6696_v43  ;;  %v11808_v13 = vcombine.low %v6688_v42, %v6696_v43  ;;  %v6856_v42 = vld [vmem:[%s13426_s11 + $0xee0] sm:$0xff]  ;;  %v6546_v43 = vld [vmem:[%s13426_s11 + $0x530] sm:$0xff] }
 0x5ea   : > { %9768 = vmatpush2.bf16.msra.mxu1 %v11902_v28  ;;  %v11509_v28 = vcombine.high %v6386_v47, %v6394_v1  ;;  %v11508_v0 = vcombine.low %v6386_v47, %v6394_v1  ;;  %v6554_v47 = vld [vmem:[%s13426_s11 + $0x570] sm:$0xff] }
 0x5eb   : > { %9947 = vmatpush1.bf16.msra.mxu0 %v11604_v16  ;;  %v9655_v58 = vpop.f32.mrf.mxu0  ;;  %9769 = vmatprep.subr.bf16.mxu1 %v11887_v27  ;;  %v6672_v16 = vld [vmem:[%s13426_s11 + $0x920] sm:$0xff] }
 0x5ec   : > { %9948 = vmatprep.subr.bf16.mxu0 %v11589_v17  ;;  %v6680_v27 = vld [vmem:[%s13426_s11 + $0x960] sm:$0xff]  ;;  %v6626_v17 = vld [vmem:[%s13426_s11 + $0x7b0] sm:$0xff] }
 0x5ed   : > { %v11793_v22 = vcombine.high %v6672_v16, %v6680_v27  ;;  %v11749_v45 = vcombine.high %v6626_v17, %v6634_v63  ;;  %v6664_v58 = vld [vmem:[%s13426_s11 + $0x8e0] sm:$0xff]  ;;  %v11748_v7 = vcombine.low %v6626_v17, %v6634_v63  ;;  %v6538_v17 = vld [vmem:[%s13426_s11 + $0x4f0] sm:$0xff] }
 0x5ee   : > { %9770 = vmatpush2.bf16.msra.mxu1 %v11886_v48  ;;  %v6656_v48 = vld [vmem:[%s13426_s11 + $0x8a0] sm:$0xff] }
 0x5ef   : > { %9949 = vmatpush1.bf16.msra.mxu0 %v11588_v52  ;;  %9821 = vmatprep.subr.bf16.mxu1 %v11873_v2  ;;  %v6610_v52 = vld [vmem:[%s13426_s11 + $0x730] sm:$0xff]  ;;  %v11777_v8 = vcombine.high %v6656_v48, %v6664_v58 }
 0x5f0   : > { %9950 = vmatprep.subr.bf16.mxu0 %v11573_v6  ;;  %v6618_v2 = vld [vmem:[%s13426_s11 + $0x770] sm:$0xff]  ;;  %v11792_v6 = vcombine.low %v6672_v16, %v6680_v27  ;;  %v6840_v16 = vld [vmem:[%s13426_s11 + $0xe60] sm:$0xff] }
 0x5f1   : > { %9772 = vmatmul.mubr.bf16.vlgmr.msra.gmra.mxu1 %v14327_v35  ;;  %v9527_v14 = vpop.f32.mrf.mxu1  ;;  %v11733_v15 = vcombine.high %v6610_v52, %v6618_v2  ;;  %v11732_v24 = vcombine.low %v6610_v52, %v6618_v2  ;;  %v6530_v27 = vld [vmem:[%s13426_s11 + $0x4b0] sm:$0xff] }
 0x5f2   : > { %v14555_v59 = vadd.f32 %v9527_v14, %v14389_v33  ;;  %9822 = vmatpush1.bf16.msra.mxu1 %v11872_v37  ;;  %9853 = vmatprep.mubr.bf16.mxu1 %v14325_v9  ;;  %v6712_v33 = vld [vmem:[%s13426_s11 + $0xa60] sm:$0xff]  ;;  %v6522_v52 = vld [vmem:[%s13426_s11 + $0x470] sm:$0xff] }
 0x5f3   : > { %9951 = vmatpush1.bf16.msra.mxu0 %v11572_v50  ;;  %v9529_v26 = vpop.f32.mrf.mxu1  ;;  %9823 = vmatprep.subr.bf16.mxu1 %v11857_v34  ;;  %v11824_v56 = vcombine.low %v6704_v36, %v6712_v33  ;;  %v6648_v37 = vld [vmem:[%s13426_s11 + $0x860] sm:$0xff]  ;;  %v6594_v50 = vld [vmem:[%s13426_s11 + $0x6b0] sm:$0xff] }
 0x5f4   : > { %v14559_v31 = vadd.f32 %v9529_v26, %v14395_v53  ;;  %9952 = vmatprep.subr.bf16.mxu0 %v11557_v38  ;;  %v11825_v53 = vcombine.high %v6704_v36, %v6712_v33  ;;  %v6602_v34 = vld [vmem:[%s13426_s11 + $0x6f0] sm:$0xff]  ;;  %v11776_v38 = vcombine.low %v6656_v48, %v6664_v58  ;;  %v11761_v12 = vcombine.high %v6640_v18, %v6648_v37  ;;  %v6864_v33 = vld [vmem:[%s13426_s11 + $0xf20] sm:$0xff] }
 0x5f5   : > { %v9531_v60 = vpop.f32.mrf.mxu1  ;;  %v11717_v14 = vcombine.high %v6594_v50, %v6602_v34  ;;  %v6586_v26 = vld [vmem:[%s13426_s11 + $0x670] sm:$0xff]  ;;  %v6824_v48 = vld [vmem:[%s13426_s11 + $0xde0] sm:$0xff] }
 0x5f6   : > { %9824 = vmatpush1.bf16.msra.mxu1 %v11856_v25  ;;  %v6578_v25 = vld [vmem:[%s13426_s11 + $0x630] sm:$0xff]  ;;  %v6872_v60 = vld [vmem:[%s13426_s11 + $0xf60] sm:$0xff] }
 0x5f7   : > { %9953 = vmatpush1.bf16.msra.mxu0 %v11556_v20  ;;  %v9532_v11 = vpop.f32.mrf.mxu1  ;;  %9825 = vmatprep.subr.bf16.mxu1 %v11841_v21  ;;  %v11760_v20 = vcombine.low %v6640_v18, %v6648_v37  ;;  %v11716_v21 = vcombine.low %v6594_v50, %v6602_v34  ;;  %v11701_v36 = vcombine.high %v6578_v25, %v6586_v26  ;;  %v6514_v58 = vld [vmem:[%s13426_s11 + $0x430] sm:$0xff]  ;;  %v6808_v18 = vld [vmem:[%s13426_s11 + $0xd60] sm:$0xff]  ;;  %v6499_v37 = vld [vmem:[%s13426_s11 + $0x3b8] sm:$0xff] }
 0x5f8   : > { %9954 = vmatprep.subr.bf16.mxu0 %v11541_v32  ;;  %v12001_v32 = vcombine.high %v6880_v46, %v6888_v39  ;;  %v11700_v11 = vcombine.low %v6578_v25, %v6586_v26  ;;  %v11984_v1 = vcombine.low %v6864_v33, %v6872_v60  ;;  %v6507_v50 = vld [vmem:[%s13426_s11 + $0x3f8] sm:$0xff] }
 0x5f9   : > { %v6491_v25 = vld [vmem:[%s13426_s11 + $0x378] sm:$0xff] }
 0x5fa   : > { %9826 = vmatpush1.bf16.msra.mxu1 %v11840_v30  ;;  %v12000_v30 = vcombine.low %v6880_v46, %v6888_v39  ;;  %v6792_v46 = vld [vmem:[%s13426_s11 + $0xce0] sm:$0xff]  ;;  %v6483_v39 = vld [vmem:[%s13426_s11 + $0x338] sm:$0xff] }
 0x5fb   : > { %9955 = vmatpush1.bf16.msra.mxu0 %v11540_v19  ;;  %9827 = vmatprep.subr.bf16.mxu1 %v11825_v53  ;;  %v11985_v19 = vcombine.high %v6864_v33, %v6872_v60  ;;  %v11685_v53 = vcombine.high %v6562_v61, %v6570_v62  ;;  %v6776_v33 = vld [vmem:[%s13426_s11 + $0xc60] sm:$0xff]  ;;  %v6467_v60 = vld [vmem:[%s13426_s11 + $0x2b8] sm:$0xff] }
 0x5fc   : > { %9956 = vmatprep.subr.bf16.mxu0 %v11525_v41  ;;  %v6848_v41 = vld [vmem:[%s13426_s11 + $0xea0] sm:$0xff] }
 0x5fd   : > { %v11968_v63 = vcombine.low %v6848_v41, %v6856_v42 }
 0x5fe   : > { %9828 = vmatpush1.bf16.msra.mxu1 %v11824_v56  ;;  %v11684_v56 = vcombine.low %v6562_v61, %v6570_v62  ;;  %v6475_v61 = vld [vmem:[%s13426_s11 + $0x2f8] sm:$0xff] }
 0x5ff   : > { %9957 = vmatpush1.bf16.msra.mxu0 %v11524_v5  ;;  %9829 = vmatprep.subr.bf16.mxu1 %v11809_v55  ;;  %v11969_v5 = vcombine.high %v6848_v41, %v6856_v42  ;;  %v11669_v55 = vcombine.high %v6546_v43, %v6554_v47  ;;  %v11591_v41 = vcombine.high %v6467_v60, %v6475_v61  ;;  %v6753_v42 = vld [vmem:[%s13426_s11 + $0xba8] sm:$0xff] }
 0x600   : > { %9958 = vmatprep.subr.bf16.mxu0 %v11509_v28  ;;  %v6832_v28 = vld [vmem:[%s13426_s11 + $0xe20] sm:$0xff] }
 0x601   : > { %v11952_v2 = vcombine.low %v6832_v28, %v6840_v16 }
 0x602   : > { %9830 = vmatpush1.bf16.msra.mxu1 %v11808_v13  ;;  %v11668_v13 = vcombine.low %v6546_v43, %v6554_v47  ;;  %v6761_v43 = vld [vmem:[%s13426_s11 + $0xbe8] sm:$0xff]  ;;  %v6451_v47 = vld [vmem:[%s13426_s11 + $0x238] sm:$0xff] }
 0x603   : > { %9959 = vmatpush1.bf16.msra.mxu0 %v11508_v0  ;;  %9831 = vmatprep.subr.bf16.mxu1 %v11793_v22  ;;  %v11953_v0 = vcombine.high %v6832_v28, %v6840_v16  ;;  %v11653_v22 = vcombine.high %v6530_v27, %v6538_v17 }
 0x604   : > { %9960 = vmatprep.subr.bf16.mxu0 %v11749_v45  ;;  %v6816_v45 = vld [vmem:[%s13426_s11 + $0xda0] sm:$0xff] }
 0x605   : > { %v11936_v34 = vcombine.low %v6816_v45, %v6824_v48 }
 0x606   : > { %9832 = vmatpush1.bf16.msra.mxu1 %v11792_v6  ;;  %v11652_v6 = vcombine.low %v6530_v27, %v6538_v17  ;;  %v6737_v27 = vld [vmem:[%s13426_s11 + $0xb28] sm:$0xff] }
 0x607   : > { %9961 = vmatpush2.bf16.msra.mxu0 %v11748_v7  ;;  %9833 = vmatprep.subr.bf16.mxu1 %v11777_v8  ;;  %v11937_v7 = vcombine.high %v6816_v45, %v6824_v48  ;;  %v11637_v8 = vcombine.high %v6514_v58, %v6522_v52  ;;  %v6745_v17 = vld [vmem:[%s13426_s11 + $0xb68] sm:$0xff] }
 0x608   : > { %9962 = vmatprep.subr.bf16.mxu0 %v11733_v15  ;;  %v6800_v15 = vld [vmem:[%s13426_s11 + $0xd20] sm:$0xff]  ;;  %v11859_v45 = vcombine.high %v6737_v27, %v6745_v17 }
 0x609   : > { %v11920_v26 = vcombine.low %v6800_v15, %v6808_v18 }
 0x60a   : > { %9834 = vmatpush1.bf16.msra.mxu1 %v11776_v38  ;;  %v11636_v38 = vcombine.low %v6514_v58, %v6522_v52  ;;  %v6721_v58 = vld [vmem:[%s13426_s11 + $0xaa8] sm:$0xff] }
 0x60b   : > { %9963 = vmatpush2.bf16.msra.mxu0 %v11732_v24  ;;  %9835 = vmatprep.subr.bf16.mxu1 %v11761_v12  ;;  %v11921_v24 = vcombine.high %v6800_v15, %v6808_v18  ;;  %v11623_v12 = vcombine.high %v6499_v37, %v6507_v50  ;;  %v6729_v52 = vld [vmem:[%s13426_s11 + $0xae8] sm:$0xff]  ;;  %v11858_v15 = vcombine.low %v6737_v27, %v6745_v17 }
 0x60c   : > { %9964 = vmatprep.subr.bf16.mxu0 %v11717_v14  ;;  %v6784_v14 = vld [vmem:[%s13426_s11 + $0xca0] sm:$0xff] }
 0x60e   : > { %9836 = vmatpush1.bf16.msra.mxu1 %v11760_v20  ;;  %v11622_v20 = vcombine.low %v6499_v37, %v6507_v50  ;;  %v11843_v50 = vcombine.high %v6721_v58, %v6729_v52 }
 0x60f   : > { %9965 = vmatpush2.bf16.msra.mxu0 %v11716_v21  ;;  %9837 = vmatprep.subr.bf16.mxu1 %v12001_v32  ;;  %v11905_v21 = vcombine.high %v6784_v14, %v6792_v46  ;;  %v11607_v32 = vcombine.high %v6483_v39, %v6491_v25 }
 0x610   : > { %9966 = vmatprep.subr.bf16.mxu0 %v11701_v36  ;;  %v6768_v36 = vld [vmem:[%s13426_s11 + $0xc20] sm:$0xff] }
 0x612   : > { %9838 = vmatpush2.bf16.msra.mxu1 %v12000_v30  ;;  %v11904_v30 = vcombine.low %v6784_v14, %v6792_v46  ;;  %v6403_v14 = vld [vmem:[%s13426_s11 + $0xb8] sm:$0xff] }
 0x613   : > { %9967 = vmatpush2.bf16.msra.mxu0 %v11700_v11  ;;  %9839 = vmatprep.subr.bf16.mxu1 %v11985_v19  ;;  %v11606_v11 = vcombine.low %v6483_v39, %v6491_v25  ;;  %v11889_v19 = vcombine.high %v6768_v36, %v6776_v33  ;;  %v6411_v46 = vld [vmem:[%s13426_s11 + $0xf8] sm:$0xff]  ;;  %v11842_v39 = vcombine.low %v6721_v58, %v6729_v52 }
 0x614   : > { %9968 = vmatprep.subr.bf16.mxu0 %v11685_v53 }
 0x616   : > { %9840 = vmatpush2.bf16.msra.mxu1 %v11984_v1  ;;  %v6459_v1 = vld [vmem:[%s13426_s11 + $0x278] sm:$0xff] }
 0x617   : > { %9969 = vmatpush2.bf16.msra.mxu0 %v11684_v56  ;;  %9841 = vmatprep.subr.bf16.mxu1 %v11969_v5  ;;  %v11888_v5 = vcombine.low %v6768_v36, %v6776_v33  ;;  %v11575_v16 = vcombine.high %v6451_v47, %v6459_v1  ;;  %v6387_v36 = vld [vmem:[%s13426_s11 + $0x38] sm:$0xff] }
 0x618   : > { %9970 = vmatprep.subr.bf16.mxu0 %v11669_v55  ;;  %v11875_v55 = vcombine.high %v6753_v42, %v6761_v43  ;;  %v6395_v33 = vld [vmem:[%s13426_s11 + $0x78] sm:$0xff] }
 0x61a   : > { %9842 = vmatpush2.bf16.msra.mxu1 %v11968_v63  ;;  %v6435_v63 = vld [vmem:[%s13426_s11 + $0x1b8] sm:$0xff] }
 0x61b   : > { %9971 = vmatpush2.bf16.msra.mxu0 %v11668_v13  ;;  %9843 = vmatprep.subr.bf16.mxu1 %v11953_v0  ;;  %v6443_v13 = vld [vmem:[%s13426_s11 + $0x1f8] sm:$0xff]  ;;  %v11874_v0 = vcombine.low %v6753_v42, %v6761_v43 }
 0x61c   : > { %9972 = vmatprep.subr.bf16.mxu0 %v11653_v22  ;;  %v11574_v22 = vcombine.low %v6451_v47, %v6459_v1  ;;  %v11559_v48 = vcombine.high %v6435_v63, %v6443_v13  ;;  %v11558_v37 = vcombine.low %v6435_v63, %v6443_v13  ;;  %v6627_v42 = vld [vmem:[%s13426_s11 + $0x7b8] sm:$0xff]  ;;  %v11510_v1 = vcombine.low %v6387_v36, %v6395_v33 }
 0x61d   : > { %v6635_v43 = vld [vmem:[%s13426_s11 + $0x7f8] sm:$0xff] }
 0x61e   : > { %9844 = vmatpush2.bf16.msra.mxu1 %v11952_v2  ;;  %v11750_v17 = vcombine.low %v6627_v42, %v6635_v43 }
 0x61f   : > { %9973 = vmatpush2.bf16.msra.mxu0 %v11652_v6  ;;  %9845 = vmatprep.subr.bf16.mxu1 %v11937_v7  ;;  %v6419_v6 = vld [vmem:[%s13426_s11 + $0x138] sm:$0xff] }
 0x620   : > { %9974 = vmatprep.subr.bf16.mxu0 %v11637_v8  ;;  %v6427_v7 = vld [vmem:[%s13426_s11 + $0x178] sm:$0xff] }
 0x622   : > { %9846 = vmatpush2.bf16.msra.mxu1 %v11936_v34 }
 0x623   : > { %9975 = vmatpush2.bf16.msra.mxu0 %v11636_v38  ;;  %9847 = vmatprep.subr.bf16.mxu1 %v11921_v24  ;;  %v11543_v38 = vcombine.high %v6419_v6, %v6427_v7  ;;  %v6705_v24 = vld [vmem:[%s13426_s11 + $0xa28] sm:$0xff] }
 0x624   : > { %10026 = vmatprep.subr.bf16.mxu0 %v11623_v12 }
 0x626   : > { %v14613_v62 = vpop.f32.mrf.mxu0  ;;  %9848 = vmatpush2.bf16.msra.mxu1 %v11920_v26  ;;  %9977 = vmatmul.mubr.bf16.vlgmr.msra.gmra.mxu0 %v14214_v3  ;;  %v11542_v26 = vcombine.low %v6419_v6, %v6427_v7  ;;  %v6881_v7 = vld [vmem:[%s13426_s11 + $0xfa8] sm:$0xff] }
 0x627   : > { %10027 = vmatpush1.bf16.msra.mxu0 %v11622_v20  ;;  %10058 = vmatprep.mubr.bf16.mxu0 %v14143_v51  ;;  %v11590_v51 = vcombine.low %v6467_v60, %v6475_v61  ;;  %v11527_v20 = vcombine.high %v6403_v14, %v6411_v46  ;;  %v11526_v61 = vcombine.low %v6403_v14, %v6411_v46  ;;  %v6873_v14 = vld [vmem:[%s13426_s11 + $0xf68] sm:$0xff]  ;;  %v6563_v46 = vld [vmem:[%s13426_s11 + $0x5b8] sm:$0xff] }
 0x628   : > { %v14617_v53 = vpop.f32.mrf.mxu0  ;;  %9849 = vmatprep.subr.bf16.mxu1 %v11905_v21  ;;  %10028 = vmatprep.subr.bf16.mxu0 %v11607_v32  ;;  %v6689_v21 = vld [vmem:[%s13426_s11 + $0x9a8] sm:$0xff] }
 0x629   : > { %v6697_v32 = vld [vmem:[%s13426_s11 + $0x9e8] sm:$0xff] }
 0x62a   : > { %v9736_v56 = vpop.f32.mrf.mxu0  ;;  %9850 = vmatpush2.bf16.msra.mxu1 %v11904_v30  ;;  %v11811_v30 = vcombine.high %v6689_v21, %v6697_v32  ;;  %v11810_v47 = vcombine.low %v6689_v21, %v6697_v32  ;;  %v6849_v21 = vld [vmem:[%s13426_s11 + $0xea8] sm:$0xff] }
 0x62b   : > { %10029 = vmatpush1.bf16.msra.mxu0 %v11606_v11  ;;  %9851 = vmatprep.subr.bf16.mxu1 %v11889_v19  ;;  %v11511_v11 = vcombine.high %v6387_v36, %v6395_v33  ;;  %v6673_v19 = vld [vmem:[%s13426_s11 + $0x928] sm:$0xff]  ;;  %v6547_v36 = vld [vmem:[%s13426_s11 + $0x538] sm:$0xff] }
 0x62c   : > { %v9737_v28 = vpop.f32.mrf.mxu0  ;;  %10030 = vmatprep.subr.bf16.mxu0 %v11591_v41  ;;  %v6681_v41 = vld [vmem:[%s13426_s11 + $0x968] sm:$0xff]  ;;  %v6555_v33 = vld [vmem:[%s13426_s11 + $0x578] sm:$0xff] }
 0x62d   : > { %v11795_v56 = vcombine.high %v6673_v19, %v6681_v41  ;;  %v6611_v28 = vld [vmem:[%s13426_s11 + $0x738] sm:$0xff]  ;;  %v11794_v27 = vcombine.low %v6673_v19, %v6681_v41  ;;  %v6857_v32 = vld [vmem:[%s13426_s11 + $0xee8] sm:$0xff] }
 0x62e   : > { %9852 = vmatpush2.bf16.msra.mxu1 %v11888_v5  ;;  %v11751_v5 = vcombine.high %v6627_v42, %v6635_v43  ;;  %v6833_v19 = vld [vmem:[%s13426_s11 + $0xe28] sm:$0xff]  ;;  %v6531_v42 = vld [vmem:[%s13426_s11 + $0x4b8] sm:$0xff] }
 0x62f   : > { %10031 = vmatpush1.bf16.msra.mxu0 %v11590_v51  ;;  %9903 = vmatprep.subr.bf16.mxu1 %v11875_v55  ;;  %v6657_v51 = vld [vmem:[%s13426_s11 + $0x8a8] sm:$0xff]  ;;  %v6539_v43 = vld [vmem:[%s13426_s11 + $0x4f8] sm:$0xff] }
 0x630   : > { %10032 = vmatprep.subr.bf16.mxu0 %v11575_v16  ;;  %v6665_v55 = vld [vmem:[%s13426_s11 + $0x8e8] sm:$0xff]  ;;  %v6619_v16 = vld [vmem:[%s13426_s11 + $0x778] sm:$0xff] }
 0x631   : > { %v9609_v2 = vpop.f32.mrf.mxu1  ;;  %9854 = vmatmul.mubr.bf16.vlgmr.msra.gmra.mxu1 %v14327_v35  ;;  %v11779_v63 = vcombine.high %v6657_v51, %v6665_v55  ;;  %v11735_v13 = vcombine.high %v6611_v28, %v6619_v16  ;;  %v11778_v58 = vcombine.low %v6657_v51, %v6665_v55  ;;  %v11734_v52 = vcombine.low %v6611_v28, %v6619_v16  ;;  %v6841_v41 = vld [vmem:[%s13426_s11 + $0xe68] sm:$0xff]  ;;  %v6515_v28 = vld [vmem:[%s13426_s11 + $0x438] sm:$0xff] }
 0x632   : > { %v14633_v8 = vadd.f32 %v9609_v2, %v14461_v4  ;;  %9904 = vmatpush1.bf16.msra.mxu1 %v11874_v0  ;;  %9935 = vmatprep.mubr.bf16.mxu1 %v14325_v9  ;;  %v6713_v4 = vld [vmem:[%s13426_s11 + $0xa68] sm:$0xff]  ;;  %v6523_v16 = vld [vmem:[%s13426_s11 + $0x478] sm:$0xff] }
 0x633   : > { %v9611_v18 = vpop.f32.mrf.mxu1  ;;  %10033 = vmatpush1.bf16.msra.mxu0 %v11574_v22  ;;  %9905 = vmatprep.subr.bf16.mxu1 %v11859_v45  ;;  %v11826_v60 = vcombine.low %v6705_v24, %v6713_v4  ;;  %v6641_v0 = vld [vmem:[%s13426_s11 + $0x828] sm:$0xff]  ;;  %v6595_v45 = vld [vmem:[%s13426_s11 + $0x6b8] sm:$0xff] }
 0x634   : > { %v14637_v34 = vadd.f32 %v9611_v18, %v14467_v54  ;;  %10034 = vmatprep.subr.bf16.mxu0 %v11559_v48  ;;  %v11827_v54 = vcombine.high %v6705_v24, %v6713_v4  ;;  %v6649_v22 = vld [vmem:[%s13426_s11 + $0x868] sm:$0xff]  ;;  %v6603_v48 = vld [vmem:[%s13426_s11 + $0x6f8] sm:$0xff] }
 0x635   : > { %v9613_v12 = vpop.f32.mrf.mxu1  ;;  %v11763_v2 = vcombine.high %v6641_v0, %v6649_v22  ;;  %v11719_v6 = vcombine.high %v6595_v45, %v6603_v48  ;;  %v6579_v18 = vld [vmem:[%s13426_s11 + $0x638] sm:$0xff]  ;;  %v6817_v51 = vld [vmem:[%s13426_s11 + $0xda8] sm:$0xff] }
 0x636   : > { %9906 = vmatpush1.bf16.msra.mxu1 %v11858_v15  ;;  %v6889_v15 = vld [vmem:[%s13426_s11 + $0xfe8] sm:$0xff] }
 0x637   : > { %v9614_v25 = vpop.f32.mrf.mxu1  ;;  %10035 = vmatpush1.bf16.msra.mxu0 %v11558_v37  ;;  %9907 = vmatprep.subr.bf16.mxu1 %v11843_v50  ;;  %v6587_v37 = vld [vmem:[%s13426_s11 + $0x678] sm:$0xff]  ;;  %v11762_v50 = vcombine.low %v6641_v0, %v6649_v22  ;;  %v12003_v24 = vcombine.high %v6881_v7, %v6889_v15  ;;  %v6865_v12 = vld [vmem:[%s13426_s11 + $0xf28] sm:$0xff] }
 0x638   : > { %10036 = vmatprep.subr.bf16.mxu0 %v11543_v38  ;;  %v11718_v38 = vcombine.low %v6595_v45, %v6603_v48  ;;  %v11703_v4 = vcombine.high %v6579_v18, %v6587_v37  ;;  %v12002_v25 = vcombine.low %v6881_v7, %v6889_v15  ;;  %v6825_v55 = vld [vmem:[%s13426_s11 + $0xde8] sm:$0xff]  ;;  %v11638_v48 = vcombine.low %v6515_v28, %v6523_v16 }
 0x639   : > { %v6801_v0 = vld [vmem:[%s13426_s11 + $0xd28] sm:$0xff]  ;;  %v11938_v45 = vcombine.low %v6817_v51, %v6825_v55 }
 0x63a   : > { %9908 = vmatpush1.bf16.msra.mxu1 %v11842_v39  ;;  %v6571_v39 = vld [vmem:[%s13426_s11 + $0x5f8] sm:$0xff]  ;;  %v6809_v22 = vld [vmem:[%s13426_s11 + $0xd68] sm:$0xff] }
 0x63b   : > { %10037 = vmatpush1.bf16.msra.mxu0 %v11542_v26  ;;  %9909 = vmatprep.subr.bf16.mxu1 %v11827_v54  ;;  %v11702_v26 = vcombine.low %v6579_v18, %v6587_v37  ;;  %v11987_v54 = vcombine.high %v6865_v12, %v6873_v14  ;;  %v6769_v15 = vld [vmem:[%s13426_s11 + $0xc28] sm:$0xff] }
 0x63c   : > { %10038 = vmatprep.subr.bf16.mxu0 %v11527_v20  ;;  %v11687_v20 = vcombine.high %v6563_v46, %v6571_v39  ;;  %v6777_v18 = vld [vmem:[%s13426_s11 + $0xc68] sm:$0xff] }
 0x63e   : > { %9910 = vmatpush1.bf16.msra.mxu1 %v11826_v60  ;;  %v11986_v60 = vcombine.low %v6865_v12, %v6873_v14  ;;  %v6762_v12 = vld [vmem:[%s13426_s11 + $0xbf0] sm:$0xff] }
 0x63f   : > { %10039 = vmatpush1.bf16.msra.mxu0 %v11526_v61  ;;  %9911 = vmatprep.subr.bf16.mxu1 %v11811_v30  ;;  %v11686_v61 = vcombine.low %v6563_v46, %v6571_v39  ;;  %v11971_v30 = vcombine.high %v6849_v21, %v6857_v32  ;;  %v11890_v46 = vcombine.low %v6769_v15, %v6777_v18 }
 0x640   : > { %10040 = vmatprep.subr.bf16.mxu0 %v11511_v11  ;;  %v11671_v11 = vcombine.high %v6547_v36, %v6555_v33 }
 0x642   : > { %9912 = vmatpush1.bf16.msra.mxu1 %v11810_v47  ;;  %v11970_v47 = vcombine.low %v6849_v21, %v6857_v32  ;;  %v6722_v21 = vld [vmem:[%s13426_s11 + $0xab0] sm:$0xff] }
 0x643   : > { %10041 = vmatpush1.bf16.msra.mxu0 %v11510_v1  ;;  %9913 = vmatprep.subr.bf16.mxu1 %v11795_v56  ;;  %v11670_v1 = vcombine.low %v6547_v36, %v6555_v33  ;;  %v11955_v56 = vcombine.high %v6833_v19, %v6841_v41  ;;  %v6730_v32 = vld [vmem:[%s13426_s11 + $0xaf0] sm:$0xff] }
 0x644   : > { %10042 = vmatprep.subr.bf16.mxu0 %v11751_v5  ;;  %v11655_v5 = vcombine.high %v6531_v42, %v6539_v43 }
 0x646   : > { %9914 = vmatpush1.bf16.msra.mxu1 %v11794_v27  ;;  %v11954_v27 = vcombine.low %v6833_v19, %v6841_v41  ;;  %v6706_v19 = vld [vmem:[%s13426_s11 + $0xa30] sm:$0xff] }
 0x647   : > { %10043 = vmatpush2.bf16.msra.mxu0 %v11750_v17  ;;  %9915 = vmatprep.subr.bf16.mxu1 %v11779_v63  ;;  %v11654_v17 = vcombine.low %v6531_v42, %v6539_v43  ;;  %v11939_v63 = vcombine.high %v6817_v51, %v6825_v55  ;;  %v6714_v41 = vld [vmem:[%s13426_s11 + $0xa70] sm:$0xff] }
 0x648   : > { %10044 = vmatprep.subr.bf16.mxu0 %v11735_v13  ;;  %v11639_v13 = vcombine.high %v6515_v28, %v6523_v16  ;;  %v6674_v51 = vld [vmem:[%s13426_s11 + $0x930] sm:$0xff] }
 0x649   : > { %v6682_v55 = vld [vmem:[%s13426_s11 + $0x970] sm:$0xff] }
 0x64a   : > { %9916 = vmatpush1.bf16.msra.mxu1 %v11778_v58  ;;  %v11923_v58 = vcombine.high %v6801_v0, %v6809_v22  ;;  %v11797_v16 = vcombine.high %v6674_v51, %v6682_v55 }
 0x64b   : > { %10045 = vmatpush2.bf16.msra.mxu0 %v11734_v52  ;;  %9917 = vmatprep.subr.bf16.mxu1 %v11763_v2  ;;  %v6785_v52 = vld [vmem:[%s13426_s11 + $0xca8] sm:$0xff] }
 0x64c   : > { %10046 = vmatprep.subr.bf16.mxu0 %v11719_v6  ;;  %v6793_v2 = vld [vmem:[%s13426_s11 + $0xce8] sm:$0xff]  ;;  %v11922_v6 = vcombine.low %v6801_v0, %v6809_v22  ;;  %v6642_v0 = vld [vmem:[%s13426_s11 + $0x830] sm:$0xff] }
 0x64d   : > { %v11907_v7 = vcombine.high %v6785_v52, %v6793_v2  ;;  %v6650_v22 = vld [vmem:[%s13426_s11 + $0x870] sm:$0xff] }
 0x64e   : > { %9918 = vmatpush1.bf16.msra.mxu1 %v11762_v50  ;;  %v11906_v50 = vcombine.low %v6785_v52, %v6793_v2  ;;  %v6890_v52 = vld [vmem:[%s13426_s11 + $0xff0] sm:$0xff]  ;;  %v11764_v2 = vcombine.low %v6642_v0, %v6650_v22 }
 0x64f   : > { %10047 = vmatpush2.bf16.msra.mxu0 %v11718_v38  ;;  %9919 = vmatprep.subr.bf16.mxu1 %v12003_v24  ;;  %v11891_v38 = vcombine.high %v6769_v15, %v6777_v18  ;;  %v6874_v15 = vld [vmem:[%s13426_s11 + $0xf70] sm:$0xff] }
 0x650   : > { %10048 = vmatprep.subr.bf16.mxu0 %v11703_v4  ;;  %v6754_v4 = vld [vmem:[%s13426_s11 + $0xbb0] sm:$0xff] }
 0x651   : > { %v11877_v39 = vcombine.high %v6754_v4, %v6762_v12 }
 0x652   : > { %9920 = vmatpush2.bf16.msra.mxu1 %v12002_v25 }
 0x653   : > { %10049 = vmatpush2.bf16.msra.mxu0 %v11702_v26  ;;  %9921 = vmatprep.subr.bf16.mxu1 %v11987_v54  ;;  %v6738_v26 = vld [vmem:[%s13426_s11 + $0xb30] sm:$0xff] }
 0x654   : > { %10050 = vmatprep.subr.bf16.mxu0 %v11687_v20  ;;  %v6746_v54 = vld [vmem:[%s13426_s11 + $0xb70] sm:$0xff] }
 0x655   : > { %v11861_v20 = vcombine.high %v6738_v26, %v6746_v54 }
 0x656   : > { %9922 = vmatpush2.bf16.msra.mxu1 %v11986_v60  ;;  %v11860_v60 = vcombine.low %v6738_v26, %v6746_v54  ;;  %v6818_v54 = vld [vmem:[%s13426_s11 + $0xdb0] sm:$0xff] }
 0x657   : > { %10051 = vmatpush2.bf16.msra.mxu0 %v11686_v61  ;;  %9923 = vmatprep.subr.bf16.mxu1 %v11971_v30  ;;  %v11845_v30 = vcombine.high %v6722_v21, %v6730_v32 }
 0x658   : > { %10052 = vmatprep.subr.bf16.mxu0 %v11671_v11 }
 0x65a   : > { %9924 = vmatpush2.bf16.msra.mxu1 %v11970_v47  ;;  %v11829_v47 = vcombine.high %v6706_v19, %v6714_v41 }
 0x65b   : > { %10053 = vmatpush2.bf16.msra.mxu0 %v11670_v1  ;;  %9925 = vmatprep.subr.bf16.mxu1 %v11955_v56  ;;  %v6690_v1 = vld [vmem:[%s13426_s11 + $0x9b0] sm:$0xff] }
 0x65c   : > { %10054 = vmatprep.subr.bf16.mxu0 %v11655_v5  ;;  %v6698_v56 = vld [vmem:[%s13426_s11 + $0x9f0] sm:$0xff]  ;;  %v11828_v5 = vcombine.low %v6706_v19, %v6714_v41 }
 0x65d   : > { %v11812_v28 = vcombine.low %v6690_v1, %v6698_v56  ;;  %v6794_v19 = vld [vmem:[%s13426_s11 + $0xcf0] sm:$0xff] }
 0x65e   : > { %9926 = vmatpush2.bf16.msra.mxu1 %v11954_v27  ;;  %v6658_v27 = vld [vmem:[%s13426_s11 + $0x8b0] sm:$0xff] }
 0x65f   : > { %10055 = vmatpush2.bf16.msra.mxu0 %v11654_v17  ;;  %9927 = vmatprep.subr.bf16.mxu1 %v11939_v63  ;;  %v6666_v17 = vld [vmem:[%s13426_s11 + $0x8f0] sm:$0xff]  ;;  %v11796_v63 = vcombine.low %v6674_v51, %v6682_v55  ;;  %v6763_v51 = vld [vmem:[%s13426_s11 + $0xbf8] sm:$0xff] }
 0x660   : > { %10056 = vmatprep.subr.bf16.mxu0 %v11639_v13  ;;  %v11781_v13 = vcombine.high %v6658_v27, %v6666_v17 }
 0x662   : > { %9928 = vmatpush2.bf16.msra.mxu1 %v11938_v45  ;;  %v11780_v45 = vcombine.low %v6658_v27, %v6666_v17  ;;  %v6739_v17 = vld [vmem:[%s13426_s11 + $0xb38] sm:$0xff] }
 0x663   : > { %10057 = vmatpush2.bf16.msra.mxu0 %v11638_v48  ;;  %9929 = vmatprep.subr.bf16.mxu1 %v11923_v58  ;;  %v11765_v48 = vcombine.high %v6642_v0, %v6650_v22  ;;  %v6882_v58 = vld [vmem:[%s13426_s11 + $0xfb0] sm:$0xff]  ;;  %v6723_v22 = vld [vmem:[%s13426_s11 + $0xab8] sm:$0xff] }
 0x664   : > { %v12004_v18 = vcombine.low %v6882_v58, %v6890_v52 }
 0x666   : > { %v14685_v37 = vpop.f32.mrf.mxu0  ;;  %9930 = vmatpush2.bf16.msra.mxu1 %v11922_v6  ;;  %10059 = vmatmul.mubr.bf16.vlgmr.msra.gmra.mxu0 %v14214_v3  ;;  %v11876_v3 = vcombine.low %v6754_v4, %v6762_v12  ;;  %v12005_v6 = vcombine.high %v6882_v58, %v6890_v52  ;;  %v6858_v4 = vld [vmem:[%s13426_s11 + $0xef0] sm:$0xff] }
 0x667   : > { %9931 = vmatprep.subr.bf16.mxu1 %v11907_v7  ;;  %v6866_v7 = vld [vmem:[%s13426_s11 + $0xf30] sm:$0xff] }
 0x668   : > { %v14688_v24 = vpop.f32.mrf.mxu0  ;;  %v11988_v12 = vcombine.low %v6866_v7, %v6874_v15 }
 0x66a   : > { %v9818_v14 = vpop.f32.mrf.mxu0  ;;  %9932 = vmatpush2.bf16.msra.mxu1 %v11906_v50  ;;  %v11989_v50 = vcombine.high %v6866_v7, %v6874_v15  ;;  %v6707_v15 = vld [vmem:[%s13426_s11 + $0xa38] sm:$0xff] }
 0x66b   : > { %9933 = vmatprep.subr.bf16.mxu1 %v11891_v38  ;;  %v6850_v38 = vld [vmem:[%s13426_s11 + $0xeb0] sm:$0xff] }
 0x66c   : > { %v9819_v25 = vpop.f32.mrf.mxu0  ;;  %v11973_v14 = vcombine.high %v6850_v38, %v6858_v4 }
 0x66d   : > { %v11972_v25 = vcombine.low %v6850_v38, %v6858_v4 }
 0x66e   : > { %9934 = vmatpush2.bf16.msra.mxu1 %v11890_v46  ;;  %v6834_v46 = vld [vmem:[%s13426_s11 + $0xe30] sm:$0xff] }
 0x66f   : > { %9985 = vmatprep.subr.bf16.mxu1 %v11877_v39  ;;  %v6842_v39 = vld [vmem:[%s13426_s11 + $0xe70] sm:$0xff] }
 0x670   : > { %v11957_v26 = vcombine.high %v6834_v46, %v6842_v39 }
 0x671   : > { %v9691_v36 = vpop.f32.mrf.mxu1  ;;  %9936 = vmatmul.mubr.bf16.vlgmr.msra.gmra.mxu1 %v14327_v35 }
 0x672   : > { %v14698_v33 = vadd.f32 %v9691_v36, %v14533_v57  ;;  %9986 = vmatpush1.bf16.msra.mxu1 %v11876_v3  ;;  %10017 = vmatprep.mubr.bf16.mxu1 %v14325_v9  ;;  %v11844_v57 = vcombine.low %v6722_v21, %v6730_v32  ;;  %v6826_v3 = vld [vmem:[%s13426_s11 + $0xdf0] sm:$0xff] }
 0x673   : > { %v9693_v61 = vpop.f32.mrf.mxu1  ;;  %9987 = vmatprep.subr.bf16.mxu1 %v11861_v20  ;;  %v11956_v20 = vcombine.low %v6834_v46, %v6842_v39  ;;  %v11941_v21 = vcombine.high %v6818_v54, %v6826_v3  ;;  %v6802_v32 = vld [vmem:[%s13426_s11 + $0xd30] sm:$0xff]  ;;  %v6675_v46 = vld [vmem:[%s13426_s11 + $0x938] sm:$0xff] }
 0x674   : > { %v14702_v11 = vadd.f32 %v9693_v61, %v14539_v29  ;;  %v11813_v29 = vcombine.high %v6690_v1, %v6698_v56  ;;  %v6810_v36 = vld [vmem:[%s13426_s11 + $0xd70] sm:$0xff]  ;;  %v6683_v39 = vld [vmem:[%s13426_s11 + $0x978] sm:$0xff] }
 0x675   : > { %v9695_v42 = vpop.f32.mrf.mxu1  ;;  %v11925_v61 = vcombine.high %v6802_v32, %v6810_v36  ;;  %v11924_v41 = vcombine.low %v6802_v32, %v6810_v36  ;;  %v6643_v32 = vld [vmem:[%s13426_s11 + $0x838] sm:$0xff] }
 0x676   : > { %9988 = vmatpush1.bf16.msra.mxu1 %v11860_v60  ;;  %v11940_v60 = vcombine.low %v6818_v54, %v6826_v3  ;;  %v6659_v54 = vld [vmem:[%s13426_s11 + $0x8b8] sm:$0xff] }
 0x677   : > { %v9696_v43 = vpop.f32.mrf.mxu1  ;;  %9989 = vmatprep.subr.bf16.mxu1 %v11845_v30  ;;  %v6786_v30 = vld [vmem:[%s13426_s11 + $0xcb0] sm:$0xff]  ;;  %v6667_v3 = vld [vmem:[%s13426_s11 + $0x8f8] sm:$0xff] }
 0x678   : > { %v11909_v42 = vcombine.high %v6786_v30, %v6794_v19  ;;  %v6778_v43 = vld [vmem:[%s13426_s11 + $0xc70] sm:$0xff]  ;;  %v11908_v1 = vcombine.low %v6786_v30, %v6794_v19  ;;  %v6651_v36 = vld [vmem:[%s13426_s11 + $0x878] sm:$0xff] }
 0x679   : > { %v6883_v30 = vld [vmem:[%s13426_s11 + $0xfb8] sm:$0xff] }
 0x67a   : > { %9990 = vmatpush1.bf16.msra.mxu1 %v11844_v57  ;;  %v6770_v57 = vld [vmem:[%s13426_s11 + $0xc30] sm:$0xff]  ;;  %v6891_v19 = vld [vmem:[%s13426_s11 + $0xff8] sm:$0xff] }
 0x67b   : > { %9991 = vmatprep.subr.bf16.mxu1 %v11829_v47  ;;  %v11893_v56 = vcombine.high %v6770_v57, %v6778_v43 }
 0x67e   : > { %9992 = vmatpush1.bf16.msra.mxu1 %v11828_v5 }
 0x67f   : > { %9993 = vmatprep.subr.bf16.mxu1 %v11813_v29  ;;  %v6755_v29 = vld [vmem:[%s13426_s11 + $0xbb8] sm:$0xff] }
 0x682   : > { %9994 = vmatpush1.bf16.msra.mxu1 %v11812_v28  ;;  %v11892_v28 = vcombine.low %v6770_v57, %v6778_v43  ;;  %v6867_v57 = vld [vmem:[%s13426_s11 + $0xf38] sm:$0xff] }
 0x683   : > { %9995 = vmatprep.subr.bf16.mxu1 %v11797_v16  ;;  %v11879_v16 = vcombine.high %v6755_v29, %v6763_v51  ;;  %v6875_v43 = vld [vmem:[%s13426_s11 + $0xf78] sm:$0xff] }
 0x686   : > { %9996 = vmatpush1.bf16.msra.mxu1 %v11796_v63  ;;  %v6747_v63 = vld [vmem:[%s13426_s11 + $0xb78] sm:$0xff] }
 0x687   : > { %9997 = vmatprep.subr.bf16.mxu1 %v11781_v13  ;;  %v11878_v13 = vcombine.low %v6755_v29, %v6763_v51  ;;  %v11863_v0 = vcombine.high %v6739_v17, %v6747_v63  ;;  %v11862_v52 = vcombine.low %v6739_v17, %v6747_v63  ;;  %v6851_v29 = vld [vmem:[%s13426_s11 + $0xeb8] sm:$0xff] }
 0x688   : > { %v6859_v51 = vld [vmem:[%s13426_s11 + $0xef8] sm:$0xff] }
 0x689   : > { %v11974_v17 = vcombine.low %v6851_v29, %v6859_v51 }
 0x68a   : > { %9998 = vmatpush1.bf16.msra.mxu1 %v11780_v45  ;;  %v6731_v45 = vld [vmem:[%s13426_s11 + $0xaf8] sm:$0xff] }
 0x68b   : > { %9999 = vmatprep.subr.bf16.mxu1 %v11765_v48 }
 0x68e   : > { %10000 = vmatpush1.bf16.msra.mxu1 %v11764_v2 }
 0x68f   : > { %10001 = vmatprep.subr.bf16.mxu1 %v12005_v6  ;;  %v11847_v6 = vcombine.high %v6723_v22, %v6731_v45 }
 0x692   : > { %10002 = vmatpush2.bf16.msra.mxu1 %v12004_v18  ;;  %v6715_v18 = vld [vmem:[%s13426_s11 + $0xa78] sm:$0xff] }
 0x693   : > { %10003 = vmatprep.subr.bf16.mxu1 %v11989_v50  ;;  %v11831_v4 = vcombine.high %v6707_v15, %v6715_v18 }
 0x696   : > { %10004 = vmatpush2.bf16.msra.mxu1 %v11988_v12  ;;  %v6699_v12 = vld [vmem:[%s13426_s11 + $0x9f8] sm:$0xff] }
 0x697   : > { %10005 = vmatprep.subr.bf16.mxu1 %v11973_v14  ;;  %v11830_v14 = vcombine.low %v6707_v15, %v6715_v18  ;;  %v6787_v15 = vld [vmem:[%s13426_s11 + $0xcb8] sm:$0xff] }
 0x698   : > { %v6795_v18 = vld [vmem:[%s13426_s11 + $0xcf8] sm:$0xff] }
 0x69a   : > { %10006 = vmatpush2.bf16.msra.mxu1 %v11972_v25 }
 0x69b   : > { %10007 = vmatprep.subr.bf16.mxu1 %v11957_v26  ;;  %v11799_v26 = vcombine.high %v6675_v46, %v6683_v39 }
 0x69e   : > { %10008 = vmatpush2.bf16.msra.mxu1 %v11956_v20  ;;  %v11798_v20 = vcombine.low %v6675_v46, %v6683_v39 }
 0x69f   : > { %10009 = vmatprep.subr.bf16.mxu1 %v11941_v21  ;;  %v11783_v21 = vcombine.high %v6659_v54, %v6667_v3 }
 0x6a2   : > { %10010 = vmatpush2.bf16.msra.mxu1 %v11940_v60  ;;  %v11782_v60 = vcombine.low %v6659_v54, %v6667_v3 }
 0x6a3   : > { %10011 = vmatprep.subr.bf16.mxu1 %v11925_v61  ;;  %v11767_v61 = vcombine.high %v6643_v32, %v6651_v36 }
 0x6a6   : > { %v14730_v47 = vpop.f32.mrf.mxu0  ;;  %10012 = vmatpush2.bf16.msra.mxu1 %v11924_v41  ;;  %v11766_v41 = vcombine.low %v6643_v32, %v6651_v36 }
 0x6a7   : > { %10013 = vmatprep.subr.bf16.mxu1 %v11909_v42  ;;  %v12007_v42 = vcombine.high %v6883_v30, %v6891_v19 }
 0x6a8   : > { %v14732_v5 = vpop.f32.mrf.mxu0 }
 0x6aa   : > { %v9900_v55 = vpop.f32.mrf.mxu0  ;;  %10014 = vmatpush2.bf16.msra.mxu1 %v11908_v1  ;;  %v12006_v1 = vcombine.low %v6883_v30, %v6891_v19 }
 0x6ab   : > { %10015 = vmatprep.subr.bf16.mxu1 %v11893_v56  ;;  %v11991_v56 = vcombine.high %v6867_v57, %v6875_v43  ;;  %v11990_v55 = vcombine.low %v6867_v57, %v6875_v43 }
 0x6ac   : > { %v9901_v27 = vpop.f32.mrf.mxu0 }
 0x6ad   : > { %v6843_v27 = vld [vmem:[%s13426_s11 + $0xe78] sm:$0xff] }
 0x6ae   : > { %10016 = vmatpush2.bf16.msra.mxu1 %v11892_v28  ;;  %v11975_v28 = vcombine.high %v6851_v29, %v6859_v51 }
 0x6af   : > { %10067 = vmatprep.subr.bf16.mxu1 %v11879_v16  ;;  %v6835_v16 = vld [vmem:[%s13426_s11 + $0xe38] sm:$0xff] }
 0x6b0   : > { %v11959_v63 = vcombine.high %v6835_v16, %v6843_v27 }
 0x6b1   : > { %v9773_v48 = vpop.f32.mrf.mxu1  ;;  %10018 = vmatmul.mubr.bf16.vlgmr.msra.gmra.mxu1 %v14327_v35 }
 0x6b2   : > { %v14742_v58 = vadd.f32 %v9773_v48, %v14613_v62  ;;  %10068 = vmatpush1.bf16.msra.mxu1 %v11878_v13  ;;  %10099 = vmatprep.mubr.bf16.mxu1 %v14325_v9  ;;  %v11846_v62 = vcombine.low %v6723_v22, %v6731_v45  ;;  %v6691_v9 = vld [vmem:[%s13426_s11 + $0x9b8] sm:$0xff]  ;;  %v11958_v22 = vcombine.low %v6835_v16, %v6843_v27 }
 0x6b3   : > { %v9775_v2 = vpop.f32.mrf.mxu1  ;;  %10069 = vmatprep.subr.bf16.mxu1 %v11863_v0  ;;  %v11814_v25 = vcombine.low %v6691_v9, %v6699_v12  ;;  %v6819_v13 = vld [vmem:[%s13426_s11 + $0xdb8] sm:$0xff] }
 0x6b4   : > { %v14746_v7 = vadd.f32 %v9775_v2, %v14617_v53  ;;  %v11815_v53 = vcombine.high %v6691_v9, %v6699_v12  ;;  %v6827_v0 = vld [vmem:[%s13426_s11 + $0xdf8] sm:$0xff]  ;;  %v11910_v12 = vcombine.low %v6787_v15, %v6795_v18 }
 0x6b5   : > { %v9777_v50 = vpop.f32.mrf.mxu1  ;;  %v11943_v45 = vcombine.high %v6819_v13, %v6827_v0  ;;  %v6803_v48 = vld [vmem:[%s13426_s11 + $0xd38] sm:$0xff]  ;;  %v11942_v2 = vcombine.low %v6819_v13, %v6827_v0 }
 0x6b6   : > { %10070 = vmatpush1.bf16.msra.mxu1 %v11862_v52  ;;  %v6811_v52 = vld [vmem:[%s13426_s11 + $0xd78] sm:$0xff] }
 0x6b7   : > { %v9778_v38 = vpop.f32.mrf.mxu1  ;;  %10071 = vmatprep.subr.bf16.mxu1 %v11847_v6  ;;  %v11927_v6 = vcombine.high %v6803_v48, %v6811_v52  ;;  %v11926_v50 = vcombine.low %v6803_v48, %v6811_v52 }
 0x6b8   : > { %v6771_v38 = vld [vmem:[%s13426_s11 + $0xc38] sm:$0xff] }
 0x6ba   : > { %10072 = vmatpush1.bf16.msra.mxu1 %v11846_v62  ;;  %v11911_v62 = vcombine.high %v6787_v15, %v6795_v18 }
 0x6bb   : > { %10073 = vmatprep.subr.bf16.mxu1 %v11831_v4  ;;  %v6779_v4 = vld [vmem:[%s13426_s11 + $0xc78] sm:$0xff] }
 0x6bc   : > { %v11894_v39 = vcombine.low %v6771_v38, %v6779_v4 }
 0x6be   : > { %10074 = vmatpush1.bf16.msra.mxu1 %v11830_v14  ;;  %v11895_v14 = vcombine.high %v6771_v38, %v6779_v4 }
 0x6bf   : > { %10075 = vmatprep.subr.bf16.mxu1 %v11815_v53 }
 0x6c2   : > { %10076 = vmatpush1.bf16.msra.mxu1 %v11814_v25 }
 0x6c3   : > { %10077 = vmatprep.subr.bf16.mxu1 %v11799_v26 }
 0x6c6   : > { %10078 = vmatpush1.bf16.msra.mxu1 %v11798_v20 }
 0x6c7   : > { %10079 = vmatprep.subr.bf16.mxu1 %v11783_v21 }
 0x6ca   : > { %10080 = vmatpush1.bf16.msra.mxu1 %v11782_v60 }
 0x6cb   : > { %10081 = vmatprep.subr.bf16.mxu1 %v11767_v61 }
 0x6ce   : > { %10082 = vmatpush1.bf16.msra.mxu1 %v11766_v41 }
 0x6cf   : > { %10083 = vmatprep.subr.bf16.mxu1 %v12007_v42 }
 0x6d2   : > { %10084 = vmatpush2.bf16.msra.mxu1 %v12006_v1 }
 0x6d3   : > { %10085 = vmatprep.subr.bf16.mxu1 %v11991_v56 }
 0x6d6   : > { %10086 = vmatpush2.bf16.msra.mxu1 %v11990_v55 }
 0x6d7   : > { %10087 = vmatprep.subr.bf16.mxu1 %v11975_v28 }
 0x6da   : > { %10088 = vmatpush2.bf16.msra.mxu1 %v11974_v17 }
 0x6db   : > { %10089 = vmatprep.subr.bf16.mxu1 %v11959_v63 }
 0x6de   : > { %10090 = vmatpush2.bf16.msra.mxu1 %v11958_v22 }
 0x6df   : > { %10091 = vmatprep.subr.bf16.mxu1 %v11943_v45 }
 0x6e2   : > { %10092 = vmatpush2.bf16.msra.mxu1 %v11942_v2 }
 0x6e3   : > { %10093 = vmatprep.subr.bf16.mxu1 %v11927_v6 }
 0x6e6   : > { %v9978_v9 = vpop.f32.mrf.mxu0  ;;  %10094 = vmatpush2.bf16.msra.mxu1 %v11926_v50 }
 0x6e7   : > { %10095 = vmatprep.subr.bf16.mxu1 %v11911_v62 }
 0x6e8   : > { %v9980_v53 = vpop.f32.mrf.mxu0 }
 0x6ea   : > { %v9982_v46 = vpop.f32.mrf.mxu0  ;;  %10096 = vmatpush2.bf16.msra.mxu1 %v11910_v12 }
 0x6eb   : > { %10097 = vmatprep.subr.bf16.mxu1 %v11895_v14 }
 0x6ec   : > { %v9983_v25 = vpop.f32.mrf.mxu0 }
 0x6ee   : > { %10098 = vmatpush2.bf16.msra.mxu1 %v11894_v39 }
 0x6f1   : > { %v9855_v26 = vpop.f32.mrf.mxu1  ;;  %10100 = vmatmul.mubr.bf16.vlgmr.msra.gmra.mxu1 %v14327_v35 }
 0x6f2   : > { %v14776_v54 = vadd.f32 %v9855_v26, %v14685_v37 }
 0x6f3   : > { %v9857_v3 = vpop.f32.mrf.mxu1 }
 0x6f4   : > { %v14779_v20 = vadd.f32 %v9857_v3, %v14688_v24 }
 0x6f5   : > { %v9859_v21 = vpop.f32.mrf.mxu1 }
 0x6f7   : > { %v9860_v32 = vpop.f32.mrf.mxu1 }
 0x726   : > { %v10060_v36 = vpop.f32.mrf.mxu0 }
 0x728   : > { %v10062_v60 = vpop.f32.mrf.mxu0 }
 0x72a   : > { %v10064_v61 = vpop.f32.mrf.mxu0 }
 0x72c   : > { %v10065_v30 = vpop.f32.mrf.mxu0 }
 0x731   : > { %v9937_v19 = vpop.f32.mrf.mxu1 }
 0x732   : > { %v14782_v41 = vadd.f32 %v9937_v19, %v14730_v47 }
 0x733   : > { %v9939_v42 = vpop.f32.mrf.mxu1 }
 0x734   : > { %v14785_v35 = vadd.f32 %v9939_v42, %v14732_v5 }
 0x735   : > { %v9941_v37 = vpop.f32.mrf.mxu1 }
 0x737   : > { %v9942_v57 = vpop.f32.mrf.mxu1 }
 0x771   : > { %v10019_v43 = vpop.f32.mrf.mxu1 }
 0x772   : > { %v14787_v1 = vadd.f32 %v10019_v43, %v9978_v9 }
 0x773   : > { %v10021_v24 = vpop.f32.mrf.mxu1 }
 0x774   : > { %v14789_v56 = vadd.f32 %v10021_v24, %v9980_v53 }
 0x775   : > { %v10023_v29 = vpop.f32.mrf.mxu1 }
 0x777   : > { %v10024_v51 = vpop.f32.mrf.mxu1 }
 0x7b1   : > { %v10101_v55 = vpop.f32.mrf.mxu1 }
 0x7b2   : > { %v14791_v28 = vadd.f32 %v10101_v55, %v10060_v36 }
 0x7b3   : > { %v10103_v16 = vpop.f32.mrf.mxu1  ;;  %10110 = sbr.rel (%p10701_p2) target bundleno = 1984 (0x7c0), region = 92 }
 0x7b4   : > { %v14793_v47 = vadd.f32 %v10103_v16, %v10062_v60 }
 0x7b5   : > { %v10105_v27 = vpop.f32.mrf.mxu1 }
 0x7b7   : > { %v10106_v17 = vpop.f32.mrf.mxu1 }
 0x7b8   : > { %10111 = vst [vmem:[#allocation3] sm:$0xff] %v14555_v59  ;;  %10112 = vst [vmem:[#allocation3 + $0x18] sm:$0xff] %v14559_v31 }
 0x7b9   : > { %10113 = vst [vmem:[#allocation3 + $0x50] sm:$0xff] %v14633_v8  ;;  %10114 = vst [vmem:[#allocation3 + $0x60] sm:$0xff] %v14637_v34 }
 0x7ba   : > { %10115 = vst [vmem:[#allocation3 + $0x68] sm:$0xff] %v14698_v33  ;;  %10116 = vst [vmem:[#allocation3 + $0x20] sm:$0xff] %v14702_v11 }
 0x7bb   : > { %10117 = vst [vmem:[#allocation3 + $0x70] sm:$0xff] %v14742_v58  ;;  %10118 = vst [vmem:[#allocation3 + $0x10] sm:$0xff] %v14746_v7 }
 0x7bc   : > { %10119 = vst [vmem:[#allocation3 + $0x28] sm:$0xff] %v14776_v54  ;;  %10120 = vst [vmem:[#allocation3 + $0x40] sm:$0xff] %v14779_v20 }
 0x7bd   : > { %10121 = vst [vmem:[#allocation3 + $0x38] sm:$0xff] %v14782_v41  ;;  %10122 = vst [vmem:[#allocation3 + $0x8] sm:$0xff] %v14785_v35 }
 0x7be   : > { %10123 = vst [vmem:[#allocation3 + $0x58] sm:$0xff] %v14787_v1  ;;  %10124 = vst [vmem:[#allocation3 + $0x48] sm:$0xff] %v14789_v56 }
 0x7bf   : > { %10125 = vst [vmem:[#allocation3 + $0x78] sm:$0xff] %v14791_v28  ;;  %10126 = vst [vmem:[#allocation3 + $0x30] sm:$0xff] %v14793_v47 }
 0x7c0 PF: > { %p12009_p3 = scmp.le.s32.totalorder %s13170_s14, 0 }
 0x7c2   : > { %10130 = sbr.rel (%p12009_p3) target bundleno = 2002 (0x7d2), region = 96 }
 0x7c7   : > { %v10131_v5 = vld [vmem:[#allocation3] sm:$0xff]  ;;  %v10132_v63 = vld [vmem:[#allocation3 + $0x18] sm:$0xff]  ;;  %v10133_v13 = vld [vmem:[#allocation3 + $0x50] sm:$0xff] }
 0x7c8   : > { %v10147_v0 = vadd.f32 %v10131_v5, %v14555_v59  ;;  %v10148_v22 = vadd.f32 %v10132_v63, %v14559_v31  ;;  %v10149_v45 = vadd.f32 %v10133_v13, %v14633_v8  ;;  %v10134_v48 = vld [vmem:[#allocation3 + $0x60] sm:$0xff]  ;;  %v10135_v52 = vld [vmem:[#allocation3 + $0x68] sm:$0xff]  ;;  %v10137_v50 = vld [vmem:[#allocation3 + $0x70] sm:$0xff] }
 0x7c9   : > { %v10136_v2 = vld [vmem:[#allocation3 + $0x20] sm:$0xff]  ;;  %v10150_v6 = vadd.f32 %v10134_v48, %v14637_v34  ;;  %v10151_v15 = vadd.f32 %v10135_v52, %v14698_v33  ;;  %v10138_v62 = vld [vmem:[#allocation3 + $0x10] sm:$0xff]  ;;  %v10139_v38 = vld [vmem:[#allocation3 + $0x28] sm:$0xff]  ;;  %v10153_v59 = vadd.f32 %v10137_v50, %v14742_v58 }
 0x7ca   : > { %v10152_v18 = vadd.f32 %v10136_v2, %v14702_v11  ;;  %10163 = vst [vmem:[#allocation3] sm:$0xff] %v10147_v0  ;;  %10164 = vst [vmem:[#allocation3 + $0x18] sm:$0xff] %v10148_v22  ;;  %v10154_v31 = vadd.f32 %v10138_v62, %v14746_v7  ;;  %v10155_v8 = vadd.f32 %v10139_v38, %v14776_v54  ;;  %v10140_v4 = vld [vmem:[#allocation3 + $0x40] sm:$0xff]  ;;  %v10141_v9 = vld [vmem:[#allocation3 + $0x38] sm:$0xff] }
 0x7cb   : > { %10165 = vst [vmem:[#allocation3 + $0x50] sm:$0xff] %v10149_v45  ;;  %v10142_v12 = vld [vmem:[#allocation3 + $0x8] sm:$0xff]  ;;  %10166 = vst [vmem:[#allocation3 + $0x60] sm:$0xff] %v10150_v6  ;;  %v10156_v34 = vadd.f32 %v10140_v4, %v14779_v20  ;;  %v10157_v33 = vadd.f32 %v10141_v9, %v14782_v41  ;;  %v10143_v14 = vld [vmem:[#allocation3 + $0x58] sm:$0xff] }
 0x7cc   : > { %10167 = vst [vmem:[#allocation3 + $0x68] sm:$0xff] %v10151_v15  ;;  %10168 = vst [vmem:[#allocation3 + $0x20] sm:$0xff] %v10152_v18  ;;  %v10158_v11 = vadd.f32 %v10142_v12, %v14785_v35  ;;  %v10144_v53 = vld [vmem:[#allocation3 + $0x48] sm:$0xff]  ;;  %v10145_v46 = vld [vmem:[#allocation3 + $0x78] sm:$0xff]  ;;  %v10159_v58 = vadd.f32 %v10143_v14, %v14787_v1 }
 0x7cd   : > { %10169 = vst [vmem:[#allocation3 + $0x70] sm:$0xff] %v10153_v59  ;;  %10170 = vst [vmem:[#allocation3 + $0x10] sm:$0xff] %v10154_v31  ;;  %v10160_v7 = vadd.f32 %v10144_v53, %v14789_v56  ;;  %v10161_v39 = vadd.f32 %v10145_v46, %v14791_v28  ;;  %v10146_v25 = vld [vmem:[#allocation3 + $0x30] sm:$0xff] }
 0x7ce   : > { %10171 = vst [vmem:[#allocation3 + $0x28] sm:$0xff] %v10155_v8  ;;  %10172 = vst [vmem:[#allocation3 + $0x40] sm:$0xff] %v10156_v34  ;;  %v10162_v26 = vadd.f32 %v10146_v25, %v14793_v47 }
 0x7cf   : > { %10173 = vst [vmem:[#allocation3 + $0x38] sm:$0xff] %v10157_v33  ;;  %10174 = vst [vmem:[#allocation3 + $0x8] sm:$0xff] %v10158_v11 }
 0x7d0   : > { %10175 = vst [vmem:[#allocation3 + $0x58] sm:$0xff] %v10159_v58  ;;  %10176 = vst [vmem:[#allocation3 + $0x48] sm:$0xff] %v10160_v7 }
 0x7d1   : > { %10177 = vst [vmem:[#allocation3 + $0x78] sm:$0xff] %v10161_v39  ;;  %10178 = vst [vmem:[#allocation3 + $0x30] sm:$0xff] %v10162_v26 }
 0x7d2 PF: > { %p12010_p1 = scmp.ne.s32.totalorder %s13170_s14, 3 }
 0x7d4   : > { %10182 = sbr.rel (%p12010_p1) target bundleno = 2192 (0x890), region = 100 }
 0x7d9   : > { %v10199_v54 = vld [vmem:[#allocation12] sm:$0xff]  ;;  %v10315_v20 = vld [vmem:[#allocation13] sm:$0xff]  ;;  %v14835_v61 = vsub.s32 4, %v13808_v40  ;;  %v10225_v42 = vsub.s32 5, %v13808_v40  ;;  %v14840_v57 = vsub.s32 6, %v13808_v40  ;;  %v10233_v47 = vsub.s32 7, %v13808_v40 }
 0x7da   : > { %v10206_v3 = vrot.slane %v10199_v54, %v13817_v49  ;;  %v10183_v21 = vld [vmem:[#allocation3] sm:$0xff]  ;;  %v10210_v32 = vrot.slane %v10199_v54, %v13822_v44  ;;  %v10184_v36 = vld [vmem:[#allocation3 + $0x18] sm:$0xff]  ;;  %v10214_v60 = vrot.slane %v10199_v54, %v14133_v23  ;;  %v10317_v30 = vunpack.c.l.bf16 %v10315_v20  ;;  %v10185_v19 = vld [vmem:[#allocation3 + $0x50] sm:$0xff] }
 0x7db   : > { %v10218_v41 = vrot.slane %v10199_v54, %v14136_v10  ;;  %v10186_v37 = vld [vmem:[#allocation3 + $0x60] sm:$0xff]  ;;  %v10222_v56 = vrot.slane %v10199_v54, %v14835_v61  ;;  %v10187_v29 = vld [vmem:[#allocation3 + $0x68] sm:$0xff]  ;;  %v10318_v55 = vunpack.c.h.bf16 %v10315_v20  ;;  %v10226_v16 = vrot.slane %v10199_v54, %v10225_v42  ;;  %v10189_v52 = vld [vmem:[#allocation3 + $0x70] sm:$0xff] }
 0x7dc   : > { %v10283_v35 = vadd.f32 %v10206_v3, %v10183_v21  ;;  %v10284_v43 = vadd.f32 %v10210_v32, %v10184_v36  ;;  %v10328_v1 = vrot.slane %v10317_v30, %v13817_v49  ;;  %v10332_v24 = vrot.slane %v10317_v30, %v14133_v23  ;;  %v10188_v5 = vld [vmem:[#allocation3 + $0x20] sm:$0xff]  ;;  %v10316_v59 = vld [vmem:[#allocation13 + $0x8] sm:$0xff]  ;;  %v10191_v14 = vld [vmem:[#allocation3 + $0x28] sm:$0xff] }
 0x7dd   : > { %v10285_v51 = vadd.f32 %v10214_v60, %v10185_v19  ;;  %v10336_v28 = vrot.slane %v10317_v30, %v14835_v61  ;;  %v10286_v27 = vadd.f32 %v10218_v41, %v10186_v37  ;;  %v10340_v13 = vrot.slane %v10317_v30, %v14840_v57  ;;  %v14853_v2 = vld [vmem:[#allocation12 + $0x8] sm:$0xff]  ;;  %v10190_v31 = vld [vmem:[#allocation3 + $0x10] sm:$0xff]  ;;  %v10193_v19 = vld [vmem:[#allocation3 + $0x38] sm:$0xff] }
 0x7de   : > { %v10299_v17 = vmax.f32 %v10283_v35, 0.0  ;;  %v10300_v63 = vmax.f32 %v10284_v43, 0.0  ;;  %v10408_v0 = vrot.slane %v10328_v1, %v13817_v49  ;;  %v10412_v22 = vrot.slane %v10332_v24, %v13817_v49 }
 0x7df   : > { %v10230_v45 = vrot.slane %v10199_v54, %v14840_v57  ;;  %v10287_v48 = vadd.f32 %v10222_v56, %v10187_v29  ;;  %v10301_v6 = vmax.f32 %v10285_v51, 0.0  ;;  %v10344_v15 = vrot.slane %v10318_v55, %v13817_v49  ;;  %v10194_v56 = vld [vmem:[#allocation3 + $0x8] sm:$0xff] }
 0x7e0   : > { %v10416_v18 = vrot.slane %v10336_v28, %v13817_v49  ;;  %v10234_v50 = vrot.slane %v10199_v54, %v10233_v47  ;;  %v10288_v62 = vadd.f32 %v10226_v16, %v10188_v5  ;;  %v10302_v38 = vmax.f32 %v10286_v27, 0.0  ;;  %v10192_v54 = vld [vmem:[#allocation3 + $0x40] sm:$0xff] }
 0x7e1   : > { %v10348_v8 = vrot.slane %v10318_v55, %v14133_v23  ;;  %v10420_v4 = vrot.slane %v10340_v13, %v13817_v49  ;;  %v10469_v9 = vmul.f32 %v10408_v0, %v10299_v17  ;;  %v10470_v12 = vmul.f32 %v10412_v22, %v10300_v63  ;;  %v10195_v63 = vld [vmem:[#allocation3 + $0x58] sm:$0xff] }
 0x7e2   : > { %v10238_v34 = vrot.slane %v14853_v2, %v13817_v49  ;;  %v10289_v33 = vadd.f32 %v10230_v45, %v10189_v52  ;;  %v10303_v11 = vmax.f32 %v10287_v48, 0.0  ;;  %v10319_v53 = vunpack.c.l.bf16 %v10316_v59 }
 0x7e3   : > { %v10352_v46 = vrot.slane %v10318_v55, %v14835_v61  ;;  %v10424_v58 = vrot.slane %v10344_v15, %v13817_v49  ;;  %v10471_v7 = vmul.f32 %v10416_v18, %v10301_v6  ;;  %v10242_v39 = vrot.slane %v14853_v2, %v13822_v44  ;;  %v10196_v6 = vld [vmem:[#allocation3 + $0x48] sm:$0xff] }
 0x7e4   : > { %v10290_v25 = vadd.f32 %v10234_v50, %v10190_v31  ;;  %v10304_v26 = vmax.f32 %v10288_v62, 0.0  ;;  %v10356_v3 = vrot.slane %v10318_v55, %v14840_v57  ;;  %v10428_v20 = vrot.slane %v10348_v8, %v13817_v49  ;;  %v10197_v8 = vld [vmem:[#allocation3 + $0x78] sm:$0xff] }
 0x7e5   : > { %v10472_v21 = vmul.f32 %v10420_v4, %v10302_v38  ;;  %v10485_v32 = vadd.f32 %v10470_v12, %v10469_v9  ;;  %v10246_v36 = vrot.slane %v14853_v2, %v14133_v23  ;;  %v10291_v60 = vadd.f32 %v10238_v34, %v10191_v14  ;;  %v10198_v14 = vld [vmem:[#allocation3 + $0x30] sm:$0xff] }
 0x7e6   : > { %v10305_v30 = vmax.f32 %v10289_v33, 0.0  ;;  %v10360_v41 = vrot.slane %v10319_v53, %v13817_v49  ;;  %v10432_v35 = vrot.slane %v10352_v46, %v13817_v49  ;;  %v10473_v44 = vmul.f32 %v10424_v58, %v10303_v11 }
 0x7e7   : > { %v10486_v37 = vadd.f32 %v10485_v32, %v10471_v7  ;;  %v10250_v43 = vrot.slane %v14853_v2, %v14136_v10  ;;  %v10292_v1 = vadd.f32 %v10242_v39, %v10192_v54  ;;  %v10306_v24 = vmax.f32 %v10290_v25, 0.0 }
 0x7e8   : > { %v10364_v29 = vrot.slane %v10319_v53, %v14133_v23  ;;  %v10436_v51 = vrot.slane %v10356_v3, %v13817_v49  ;;  %v10474_v55 = vmul.f32 %v10428_v20, %v10304_v26  ;;  %v10254_v16 = vrot.slane %v14853_v2, %v14835_v61 }
 0x7e9   : > { %v10487_v28 = vadd.f32 %v10486_v37, %v10472_v21  ;;  %v10293_v27 = vadd.f32 %v10246_v36, %v10193_v19  ;;  %v10307_v17 = vmax.f32 %v10291_v60, 0.0  ;;  %v10320_v5 = vunpack.c.h.bf16 %v10316_v59 }
 0x7ea   : > { %v10368_v13 = vrot.slane %v10319_v53, %v14835_v61  ;;  %v10440_v10 = vrot.slane %v10360_v41, %v13817_v49  ;;  %v10475_v0 = vmul.f32 %v10432_v35, %v10305_v30  ;;  %v10258_v45 = vrot.slane %v14853_v2, %v10225_v42 }
 0x7eb   : > { %v10488_v22 = vadd.f32 %v10487_v28, %v10473_v44  ;;  %v10294_v48 = vadd.f32 %v10250_v43, %v10194_v56  ;;  %v10308_v52 = vmax.f32 %v10292_v1, 0.0  ;;  %v10372_v15 = vrot.slane %v10319_v53, %v14840_v57 }
 0x7ec   : > { %v10444_v18 = vrot.slane %v10364_v29, %v13817_v49  ;;  %v10476_v50 = vmul.f32 %v10436_v51, %v10306_v24  ;;  %v10262_v38 = vrot.slane %v14853_v2, %v14840_v57  ;;  %v10295_v59 = vadd.f32 %v10254_v16, %v10195_v63  ;;  %v12011_v29 = vld [vmem:[#allocation4] ss:$0 sm:$0xff] }
 0x7ed   : > { %v10489_v62 = vadd.f32 %v10488_v22, %v10474_v55  ;;  %v10309_v31 = vmax.f32 %v10293_v27, 0.0  ;;  %v10376_v4 = vrot.slane %v10320_v5, %v13817_v49  ;;  %v10448_v9 = vrot.slane %v10368_v13, %v13817_v49 }
 0x7ee   : > { %v10477_v42 = vmul.f32 %v10440_v10, %v10307_v17  ;;  %v10266_v34 = vrot.slane %v14853_v2, %v10233_v47  ;;  %v10296_v33 = vadd.f32 %v10258_v45, %v10196_v6  ;;  %v10310_v11 = vmax.f32 %v10294_v48, 0.0 }
 0x7ef   : > { %v10490_v12 = vadd.f32 %v10489_v62, %v10475_v0  ;;  %v10380_v53 = vrot.slane %v10320_v5, %v14133_v23  ;;  %v10452_v46 = vrot.slane %v10372_v15, %v13817_v49  ;;  %v10478_v58 = vmul.f32 %v10444_v18, %v10308_v52 }
 0x7f0   : > { %v10297_v39 = vadd.f32 %v10262_v38, %v10197_v8  ;;  %v10311_v25 = vmax.f32 %v10295_v59, 0.0  ;;  %v10384_v26 = vrot.slane %v10320_v5, %v14835_v61  ;;  %v10456_v54 = vrot.slane %v10376_v4, %v13817_v49 }
 0x7f1   : > { %v10491_v7 = vadd.f32 %v10490_v12, %v10476_v50  ;;  %v10479_v3 = vmul.f32 %v10448_v9, %v10309_v31  ;;  %v10298_v40 = vadd.f32 %v10266_v34, %v10198_v14  ;;  %v10312_v21 = vmax.f32 %v10296_v33, 0.0 }
 0x7f2   : > { %v10388_v47 = vrot.slane %v10320_v5, %v14840_v57  ;;  %v10460_v2 = vrot.slane %v10380_v53, %v13817_v49  ;;  %v10480_v32 = vmul.f32 %v10452_v46, %v10310_v11  ;;  %v10313_v36 = vmax.f32 %v10297_v39, 0.0 }
 0x7f3   : > { %v10492_v20 = vadd.f32 %v10491_v7, %v10477_v42  ;;  %v10464_v60 = vrot.slane %v10384_v26, %v13817_v49  ;;  %v10481_v30 = vmul.f32 %v10456_v54, %v10311_v25  ;;  %v10314_v41 = vmax.f32 %v10298_v40, 0.0 }
 0x7f4   : > { %v10468_v61 = vrot.slane %v10388_v47, %v13817_v49  ;;  %v10482_v35 = vmul.f32 %v10460_v2, %v10312_v21  ;;  %vm10510_vm0 = vcmask 7168  }
 0x7f5   : > { %v10493_v23 = vadd.f32 %v10492_v20, %v10478_v58  ;;  %v10483_v37 = vmul.f32 %v10464_v60, %v10313_v36 }
 0x7f6   : > { %v10484_v1 = vmul.f32 %v10468_v61, %v10314_v41 }
 0x7f7   : > { %v10494_v19 = vadd.f32 %v10493_v23, %v10479_v3 }
 0x7f9   : > { %v10495_v44 = vadd.f32 %v10494_v19, %v10480_v32 }
 0x7fb   : > { %v10496_v43 = vadd.f32 %v10495_v44, %v10481_v30 }
 0x7fd   : > { %v10497_v24 = vadd.f32 %v10496_v43, %v10482_v35 }
 0x7ff   : > { %v10498_v56 = vadd.f32 %v10497_v24, %v10483_v37 }
 0x801   : > { %v10499_v57 = vadd.f32 %v10498_v56, %v10484_v1 }
 0x803   : > { %10500 = vadd.xlane.f32.xlu0 %v10499_v57 }
 0x88c   : > { %v10501_v51 = vpop.xlane.xlu0 %10500 }
 0x88d   : > { %v10509_v55 = vadd.f32 %v12011_v29, %v10501_v51 }
 0x88f   : > { %10511 = vst.msk [vmem:[%s14931_s9] sm:$0xff] %vm10510_vm0, %v10509_v55 }
 0x890 PF: > { %s24_s16 = sadd.s32 1, %s13178_s16   ;;  %s14968_s24 = sld [smem:[#allocation20_spill]] }
 0x891   : > { %p21_p4 = scmp.ge.s32.totalorder %s24_s16, 6   ;;  %s14969_s13 = sld [smem:[#allocation22_spill]] }
 0x892   : > { %s14970_s8 = sld [smem:[#allocation21_spill]]  ;;  %s14971_s11 = smov %s13162_s12 }
 0x893   : > { %s14973_s14 = smov %s13174_s15 }
 0x894   :  { %23 = sbr.rel (!%p21_p4) target bundleno = 8 (0x8), region = 152 }
 0x896   : > { %s14972_s12 = smov %s14968_s24 }
 0x898   : > { %s14974_s15 = smov %s14970_s8 }
 0x899   :  { %10531 = vsyncpa [#allocation6], 1 }
 0x89a   :  { %10533 = vsyncpa [#allocation6 + $0x1], 1 }
 0x89b   :  { %10534 = vsyncpa [#allocation8], 1 }
 0x89c   :  { %10535 = vsyncpa [#allocation14], 1 }

</bundles_post_ra>
